<compile_context>
chip_gen: v5e
topology: v5e:2x2
jax: 0.10.0
libtpu: 0.0.40
codegen_flags: <defaults>
</compile_context>

<pallas_src>
import jax
import jax.numpy as jnp
from jax.experimental import pallas as pl
from jax.experimental.pallas import tpu as pltpu

BN_EPS = 1e-3          # matches nn.BatchNorm1d(eps=0.001)
NEG_INF = -1e30        # padded-logit bias (underflows to 0 after exp)


def _rup(n, m=128):
    return (n + m - 1) // m * m


# ----------------------------- fused kernel ---------------------------------

def _sherlock_fused_kernel(
    x_ref, y_ref, z_ref, w_ref,
    w1a_ref, b1a_ref, w2a_ref, b2a_ref,      # branch 1 (960 -> 300 -> 300)
    w1b_ref, b1b_ref, w2b_ref, b2b_ref,      # branch 2 (201 -> 200 -> 200)
    w1c_ref, b1c_ref, w2c_ref, b2c_ref,      # branch 3 (400 -> 400 -> 400)
    wh1a_ref, wh1b_ref, wh1c_ref, wh1d_ref, bh1_ref,   # head dense1 row-blocks
    wh2_ref, bh2_ref,                         # head dense2
    wh3_ref, bh3_ref,                         # head dense3 (+ softmax)
    o_ref,
):
    def dot(a_bf16, w_ref_):
        # bf16 x bf16 MXU matmul with f32 accumulation
        return jnp.dot(a_bf16, w_ref_[...], preferred_element_type=jnp.float32)

    def relu_bf16(v_f32):
        # single cast per layer: ReLU in f32, store/carry activation as bf16
        return jnp.maximum(v_f32, 0.0).astype(jnp.bfloat16)

    # --- branch 1 : bn (folded) -> dense1 -> relu -> dropout(id) -> dense2 -> relu
    h = relu_bf16(dot(x_ref[...], w1a_ref) + b1a_ref[...])
    # TODO(synk): F.dropout(p=0.35) implemented as identity (inference semantics).
    d1 = relu_bf16(dot(h, w2a_ref) + b2a_ref[...])

    # --- branch 2
    h = relu_bf16(dot(y_ref[...], w1b_ref) + b1b_ref[...])
    d2 = relu_bf16(dot(h, w2b_ref) + b2b_ref[...])

    # --- branch 3
    h = relu_bf16(dot(z_ref[...], w1c_ref) + b1c_ref[...])
    d3 = relu_bf16(dot(h, w2c_ref) + b2c_ref[...])

    # --- head: torch.cat replaced by block-row partial matmuls.
    #     bn1 (on w) and bn2 (on the concat) are folded into the W blocks / bias.
    u = (dot(d1, wh1a_ref) + dot(d2, wh1b_ref) + dot(d3, wh1c_ref)
         + dot(w_ref[...], wh1d_ref) + bh1_ref[...])
    h = relu_bf16(u)
    # TODO(synk): F.dropout(p=0.35) implemented as identity (inference semantics).
    h = relu_bf16(dot(h, wh2_ref) + bh2_ref[...])

    logits = dot(h, wh3_ref) + bh3_ref[...]          # padded cols biased to -1e30
    m = jnp.max(logits, axis=1, keepdims=True)       # softmax(dim=1)
    e = jnp.exp(logits - m)
    o_ref[...] = e / jnp.sum(e, axis=1, keepdims=True)


# ----------------------------- parameter construction -----------------------

def _bn_affine(feat, eps=BN_EPS):
    """Inference BN with fresh running stats: gamma=1, beta=0, mean=0, var=1."""
    gamma = jnp.ones((feat,), jnp.float32)
    beta = jnp.zeros((feat,), jnp.float32)
    mean = jnp.zeros((feat,), jnp.float32)
    var = jnp.ones((feat,), jnp.float32)
    scale = gamma / jnp.sqrt(var + eps)
    shift = beta - mean * scale
    return scale, shift


def _linear(key, fan_in, fan_out):
    """PyTorch nn.Linear default init: U(-1/sqrt(fan_in), 1/sqrt(fan_in))."""
    kw, kb = jax.random.split(key)
    bound = 1.0 / (fan_in ** 0.5)
    w = jax.random.uniform(kw, (fan_in, fan_out), jnp.float32, -bound, bound)
    b = jax.random.uniform(kb, (fan_out,), jnp.float32, -bound, bound)
    return w, b


def _fold_bn(scale, shift, w, b):
    """(x*scale + shift) @ W + b  ==  x @ (scale[:,None]*W) + (shift@W + b)."""
    return w * scale[:, None], shift @ w + b


def _pad_w(w, in_pad, out_pad):
    fi, fo = w.shape
    return jnp.pad(w, ((0, in_pad - fi), (0, out_pad - fo))).astype(jnp.bfloat16)


def _pad_b(b, out_pad, pad_value=0.0):
    fo = b.shape[0]
    return jnp.pad(b, (0, out_pad - fo),
                   constant_values=pad_value).reshape(1, out_pad).astype(jnp.float32)


def make_sherlock_params(key, label_categories=78):
    ks = jax.random.split(key, 6)
    p = {}

    def thin_slice(k, cin, cout):
        k1, k2 = jax.random.split(k)
        s, t = _bn_affine(cin)
        w1, b1 = _linear(k1, cin, cout)
        w2, b2 = _linear(k2, cout, cout)
        w1, b1 = _fold_bn(s, t, w1, b1)           # fold BN into dense1 (f32)
        cin_p, cout_p = _rup(cin), _rup(cout)
        return (_pad_w(w1, cin_p, cout_p), _pad_b(b1, cout_p),
                _pad_w(w2, cout_p, cout_p), _pad_b(b2, cout_p))

    p["slice1"] = thin_slice(ks[0], 960, 300)     # (1024,384) / (384,384)
    p["slice2"] = thin_slice(ks[1], 201, 200)     # (256,256)  / (256,256)
    p["slice3"] = thin_slice(ks[2], 400, 400)     # (512,512)  / (512,512)

    # ----- head: bn2 -> dense1 -> dense2 -> dense3 -> softmax
    s1, t1 = _bn_affine(27)       # bn1 on input w
    s2, t2 = _bn_affine(927)      # bn2 on the concat
    wh1, bh1 = _linear(ks[3], 927, 500)
    wh2, bh2 = _linear(ks[4], 500, 500)
    wh3, bh3 = _linear(ks[5], 500, label_categories)

    # fold bn2 into dense1 (f32)
    wh1_s = wh1 * s2[:, None]
    bh1_f = t2 @ wh1 + bh1

    # split dense1 rows to match concat order (d1|d2|d3|d4) and fold bn1 into
    # the d4 block so the raw `w` input feeds the head directly.
    blk1 = wh1_s[0:300]
    blk2 = wh1_s[300:500]
    blk3 = wh1_s[500:900]
    blk4 = wh1_s[900:927] * s1[:, None]
    bh1_f = bh1_f + t1 @ wh1_s[900:927]

    H = _rup(500)                  # 512
    C = _rup(label_categories)     # 128
    p["head"] = (
        _pad_w(blk1, _rup(300), H), _pad_w(blk2, _rup(200), H),
        _pad_w(blk3, _rup(400), H), _pad_w(blk4, _rup(27), H),
        _pad_b(bh1_f, H),
        _pad_w(wh2, H, H), _pad_b(bh2, H),
        _pad_w(wh3, H, C), _pad_b(bh3, C, pad_value=NEG_INF),
    )
    return p


# ----------------------------- full forward ---------------------------------

def sherlock_forward(params, x, y, z, w, *, label_categories=78):
    B = x.shape[0]
    nc = label_categories
    C = _rup(nc)

    # batch tile: multiple of 8 sublanes, up to 256 rows (fills the MXU on v6e/v7x)
    TB = min(256, _rup(B, 8))
    Bp = _rup(B, TB)

    def prep(a):
        fp = _rup(a.shape[1])
        a = jnp.pad(a, ((0, Bp - a.shape[0]), (0, fp - a.shape[1])))
        return a.astype(jnp.bfloat16)             # halve activation DMA bytes

    xp, yp, zp, wp = prep(x), prep(y), prep(z), prep(w)   # (Bp,1024/256/512/128)

    weights = params["slice1"] + params["slice2"] + params["slice3"] + params["head"]
    args = (xp, yp, zp, wp) + weights

    def act_spec(a):
        return pl.BlockSpec((TB, a.shape[1]), lambda i: (i, 0))

    def const_spec(a):
        # whole weight/bias resident; block index never changes -> no re-DMA
        return pl.BlockSpec(a.shape, lambda i: (0, 0))

    in_specs = [act_spec(a) for a in (xp, yp, zp, wp)] + \
               [const_spec(a) for a in weights]
    out_specs = pl.BlockSpec((TB, C), lambda i: (i, 0))

    flops = 2 * Bp * (960 * 300 + 300 * 300 + 201 * 200 + 200 * 200
                      + 400 * 400 + 400 * 400 + 927 * 500 + 500 * 500 + 500 * nc)
    bytes_accessed = sum(int(a.size) * a.dtype.itemsize for a in args) + Bp * C * 4
    cost = pl.CostEstimate(flops=flops, transcendentals=Bp * C,
                           bytes_accessed=bytes_accessed)

    out = pl.pallas_call(
        _sherlock_fused_kernel,
        grid=(Bp // TB,),
        out_shape=jax.ShapeDtypeStruct((Bp, C), jnp.float32),
        in_specs=in_specs,
        out_specs=out_specs,
        compiler_params=pltpu.CompilerParams(
            dimension_semantics=("parallel",),
            vmem_limit_bytes=32 * 1024 * 1024),
        cost_estimate=cost,
    )(*args)
    return out[:B, :nc]                    # drop padded rows / softmax columns


# ----------------------------- main -----------------------------------------

if __name__ == "__main__":
    key = jax.random.PRNGKey(0)
    kp, kx, ky, kz, kw = jax.random.split(key, 5)

    B = 8
    x = jax.random.normal(kx, (B, 960), jnp.float32)
    y = jax.random.normal(ky, (B, 201), jnp.float32)
    z = jax.random.normal(kz, (B, 400), jnp.float32)
    w = jax.random.normal(kw, (B, 27), jnp.float32)

    params = make_sherlock_params(kp, label_categories=78)

    fwd = jax.jit(sherlock_forward, static_argnames=("label_categories",))
    out = jax.block_until_ready(fwd(params, x, y, z, w, label_categories=78))

    assert out.shape == (B, 78), out.shape
    row_sums = jnp.sum(out, axis=1)
    assert bool(jnp.all(jnp.abs(row_sums - 1.0) < 1e-3)), row_sums
    assert bool(jnp.all(out >= 0.0))
    print("KERNEL_OK")
</pallas_src>

<mosaic_0001>
module attributes {stable_mosaic.version = 11 : i64} {
  func.func @_sherlock_fused_kernel(%arg0: i32, %arg1: memref<8x1024xbf16, #tpu.memory_space<vmem>>, %arg2: memref<8x256xbf16, #tpu.memory_space<vmem>>, %arg3: memref<8x512xbf16, #tpu.memory_space<vmem>>, %arg4: memref<8x128xbf16, #tpu.memory_space<vmem>>, %arg5: memref<1024x384xbf16, #tpu.memory_space<vmem>>, %arg6: memref<1x384xf32, #tpu.memory_space<vmem>>, %arg7: memref<384x384xbf16, #tpu.memory_space<vmem>>, %arg8: memref<1x384xf32, #tpu.memory_space<vmem>>, %arg9: memref<256x256xbf16, #tpu.memory_space<vmem>>, %arg10: memref<1x256xf32, #tpu.memory_space<vmem>>, %arg11: memref<256x256xbf16, #tpu.memory_space<vmem>>, %arg12: memref<1x256xf32, #tpu.memory_space<vmem>>, %arg13: memref<512x512xbf16, #tpu.memory_space<vmem>>, %arg14: memref<1x512xf32, #tpu.memory_space<vmem>>, %arg15: memref<512x512xbf16, #tpu.memory_space<vmem>>, %arg16: memref<1x512xf32, #tpu.memory_space<vmem>>, %arg17: memref<384x512xbf16, #tpu.memory_space<vmem>>, %arg18: memref<256x512xbf16, #tpu.memory_space<vmem>>, %arg19: memref<512x512xbf16, #tpu.memory_space<vmem>>, %arg20: memref<128x512xbf16, #tpu.memory_space<vmem>>, %arg21: memref<1x512xf32, #tpu.memory_space<vmem>>, %arg22: memref<512x512xbf16, #tpu.memory_space<vmem>>, %arg23: memref<1x512xf32, #tpu.memory_space<vmem>>, %arg24: memref<512x128xbf16, #tpu.memory_space<vmem>>, %arg25: memref<1x128xf32, #tpu.memory_space<vmem>>, %arg26: memref<8x128xf32, #tpu.memory_space<vmem>>) attributes {dimension_semantics = [#tpu.dimension_semantics<parallel>], iteration_bounds = array<i64: 1>, scalar_prefetch = 0 : i64, scratch_operands = 0 : i64, tpu.core_type = #tpu.core_type<tc>, window_params = [{transform_indices = @transform_0, window_bounds = array<i64: 8, 1024>}, {transform_indices = @transform_1, window_bounds = array<i64: 8, 256>}, {transform_indices = @transform_2, window_bounds = array<i64: 8, 512>}, {transform_indices = @transform_3, window_bounds = array<i64: 8, 128>}, {pipeline_mode = #tpu.pipeline_mode<synchronous>, transform_indices = @transform_4, window_bounds = array<i64: 1024, 384>}, {pipeline_mode = #tpu.pipeline_mode<synchronous>, transform_indices = @transform_5, window_bounds = array<i64: 1, 384>}, {pipeline_mode = #tpu.pipeline_mode<synchronous>, transform_indices = @transform_6, window_bounds = array<i64: 384, 384>}, {pipeline_mode = #tpu.pipeline_mode<synchronous>, transform_indices = @transform_7, window_bounds = array<i64: 1, 384>}, {pipeline_mode = #tpu.pipeline_mode<synchronous>, transform_indices = @transform_8, window_bounds = array<i64: 256, 256>}, {pipeline_mode = #tpu.pipeline_mode<synchronous>, transform_indices = @transform_9, window_bounds = array<i64: 1, 256>}, {pipeline_mode = #tpu.pipeline_mode<synchronous>, transform_indices = @transform_10, window_bounds = array<i64: 256, 256>}, {pipeline_mode = #tpu.pipeline_mode<synchronous>, transform_indices = @transform_11, window_bounds = array<i64: 1, 256>}, {pipeline_mode = #tpu.pipeline_mode<synchronous>, transform_indices = @transform_12, window_bounds = array<i64: 512, 512>}, {pipeline_mode = #tpu.pipeline_mode<synchronous>, transform_indices = @transform_13, window_bounds = array<i64: 1, 512>}, {pipeline_mode = #tpu.pipeline_mode<synchronous>, transform_indices = @transform_14, window_bounds = array<i64: 512, 512>}, {pipeline_mode = #tpu.pipeline_mode<synchronous>, transform_indices = @transform_15, window_bounds = array<i64: 1, 512>}, {pipeline_mode = #tpu.pipeline_mode<synchronous>, transform_indices = @transform_16, window_bounds = array<i64: 384, 512>}, {pipeline_mode = #tpu.pipeline_mode<synchronous>, transform_indices = @transform_17, window_bounds = array<i64: 256, 512>}, {pipeline_mode = #tpu.pipeline_mode<synchronous>, transform_indices = @transform_18, window_bounds = array<i64: 512, 512>}, {pipeline_mode = #tpu.pipeline_mode<synchronous>, transform_indices = @transform_19, window_bounds = array<i64: 128, 512>}, {pipeline_mode = #tpu.pipeline_mode<synchronous>, transform_indices = @transform_20, window_bounds = array<i64: 1, 512>}, {pipeline_mode = #tpu.pipeline_mode<synchronous>, transform_indices = @transform_21, window_bounds = array<i64: 512, 512>}, {pipeline_mode = #tpu.pipeline_mode<synchronous>, transform_indices = @transform_22, window_bounds = array<i64: 1, 512>}, {pipeline_mode = #tpu.pipeline_mode<synchronous>, transform_indices = @transform_23, window_bounds = array<i64: 512, 128>}, {pipeline_mode = #tpu.pipeline_mode<synchronous>, transform_indices = @transform_24, window_bounds = array<i64: 1, 128>}, {transform_indices = @transform_25, window_bounds = array<i64: 8, 128>}]} {
    %c0 = arith.constant 0 : index
    %c0_0 = arith.constant 0 : index
    %0 = vector.load %arg1[%c0, %c0_0] : memref<8x1024xbf16, #tpu.memory_space<vmem>>, vector<8x1024xbf16>
    %c0_1 = arith.constant 0 : index
    %c0_2 = arith.constant 0 : index
    %1 = vector.load %arg5[%c0_1, %c0_2] : memref<1024x384xbf16, #tpu.memory_space<vmem>>, vector<1024x384xbf16>
    %cst = arith.constant dense<0.000000e+00> : vector<8x384xf32>
    %2 = tpu.matmul %0, %1, %cst {dimension_numbers = #tpu.dot_dimension_numbers<[1], [0], [0], [1], [0, 0, 1, 1], [], []>} : vector<8x1024xbf16>, vector<1024x384xbf16>, vector<8x384xf32> -> vector<8x384xf32>
    %c0_3 = arith.constant 0 : index
    %c0_4 = arith.constant 0 : index
    %3 = vector.load %arg6[%c0_3, %c0_4] : memref<1x384xf32, #tpu.memory_space<vmem>>, vector<1x384xf32>
    %4 = vector.broadcast %3 : vector<1x384xf32> to vector<8x384xf32>
    %5 = arith.addf %2, %4 : vector<8x384xf32>
    %cst_5 = arith.constant 0.000000e+00 : f32
    %6 = vector.broadcast %cst_5 : f32 to vector<8x384xf32>
    %7 = arith.maximumf %5, %6 : vector<8x384xf32>
    %8 = arith.truncf %7 : vector<8x384xf32> to vector<8x384xbf16>
    %c0_6 = arith.constant 0 : index
    %c0_7 = arith.constant 0 : index
    %9 = vector.load %arg7[%c0_6, %c0_7] : memref<384x384xbf16, #tpu.memory_space<vmem>>, vector<384x384xbf16>
    %cst_8 = arith.constant dense<0.000000e+00> : vector<8x384xf32>
    %10 = tpu.matmul %8, %9, %cst_8 {dimension_numbers = #tpu.dot_dimension_numbers<[1], [0], [0], [1], [0, 0, 1, 1], [], []>} : vector<8x384xbf16>, vector<384x384xbf16>, vector<8x384xf32> -> vector<8x384xf32>
    %c0_9 = arith.constant 0 : index
    %c0_10 = arith.constant 0 : index
    %11 = vector.load %arg8[%c0_9, %c0_10] : memref<1x384xf32, #tpu.memory_space<vmem>>, vector<1x384xf32>
    %12 = vector.broadcast %11 : vector<1x384xf32> to vector<8x384xf32>
    %13 = arith.addf %10, %12 : vector<8x384xf32>
    %cst_11 = arith.constant 0.000000e+00 : f32
    %14 = vector.broadcast %cst_11 : f32 to vector<8x384xf32>
    %15 = arith.maximumf %13, %14 : vector<8x384xf32>
    %16 = arith.truncf %15 : vector<8x384xf32> to vector<8x384xbf16>
    %c0_12 = arith.constant 0 : index
    %c0_13 = arith.constant 0 : index
    %17 = vector.load %arg2[%c0_12, %c0_13] : memref<8x256xbf16, #tpu.memory_space<vmem>>, vector<8x256xbf16>
    %c0_14 = arith.constant 0 : index
    %c0_15 = arith.constant 0 : index
    %18 = vector.load %arg9[%c0_14, %c0_15] : memref<256x256xbf16, #tpu.memory_space<vmem>>, vector<256x256xbf16>
    %cst_16 = arith.constant dense<0.000000e+00> : vector<8x256xf32>
    %19 = tpu.matmul %17, %18, %cst_16 {dimension_numbers = #tpu.dot_dimension_numbers<[1], [0], [0], [1], [0, 0, 1, 1], [], []>} : vector<8x256xbf16>, vector<256x256xbf16>, vector<8x256xf32> -> vector<8x256xf32>
    %c0_17 = arith.constant 0 : index
    %c0_18 = arith.constant 0 : index
    %20 = vector.load %arg10[%c0_17, %c0_18] : memref<1x256xf32, #tpu.memory_space<vmem>>, vector<1x256xf32>
    %21 = vector.broadcast %20 : vector<1x256xf32> to vector<8x256xf32>
    %22 = arith.addf %19, %21 : vector<8x256xf32>
    %cst_19 = arith.constant 0.000000e+00 : f32
    %23 = vector.broadcast %cst_19 : f32 to vector<8x256xf32>
    %24 = arith.maximumf %22, %23 : vector<8x256xf32>
    %25 = arith.truncf %24 : vector<8x256xf32> to vector<8x256xbf16>
    %c0_20 = arith.constant 0 : index
    %c0_21 = arith.constant 0 : index
    %26 = vector.load %arg11[%c0_20, %c0_21] : memref<256x256xbf16, #tpu.memory_space<vmem>>, vector<256x256xbf16>
    %cst_22 = arith.constant dense<0.000000e+00> : vector<8x256xf32>
    %27 = tpu.matmul %25, %26, %cst_22 {dimension_numbers = #tpu.dot_dimension_numbers<[1], [0], [0], [1], [0, 0, 1, 1], [], []>} : vector<8x256xbf16>, vector<256x256xbf16>, vector<8x256xf32> -> vector<8x256xf32>
    %c0_23 = arith.constant 0 : index
    %c0_24 = arith.constant 0 : index
    %28 = vector.load %arg12[%c0_23, %c0_24] : memref<1x256xf32, #tpu.memory_space<vmem>>, vector<1x256xf32>
    %29 = vector.broadcast %28 : vector<1x256xf32> to vector<8x256xf32>
    %30 = arith.addf %27, %29 : vector<8x256xf32>
    %cst_25 = arith.constant 0.000000e+00 : f32
    %31 = vector.broadcast %cst_25 : f32 to vector<8x256xf32>
    %32 = arith.maximumf %30, %31 : vector<8x256xf32>
    %33 = arith.truncf %32 : vector<8x256xf32> to vector<8x256xbf16>
    %c0_26 = arith.constant 0 : index
    %c0_27 = arith.constant 0 : index
    %34 = vector.load %arg3[%c0_26, %c0_27] : memref<8x512xbf16, #tpu.memory_space<vmem>>, vector<8x512xbf16>
    %c0_28 = arith.constant 0 : index
    %c0_29 = arith.constant 0 : index
    %35 = vector.load %arg13[%c0_28, %c0_29] : memref<512x512xbf16, #tpu.memory_space<vmem>>, vector<512x512xbf16>
    %cst_30 = arith.constant dense<0.000000e+00> : vector<8x512xf32>
    %36 = tpu.matmul %34, %35, %cst_30 {dimension_numbers = #tpu.dot_dimension_numbers<[1], [0], [0], [1], [0, 0, 1, 1], [], []>} : vector<8x512xbf16>, vector<512x512xbf16>, vector<8x512xf32> -> vector<8x512xf32>
    %c0_31 = arith.constant 0 : index
    %c0_32 = arith.constant 0 : index
    %37 = vector.load %arg14[%c0_31, %c0_32] : memref<1x512xf32, #tpu.memory_space<vmem>>, vector<1x512xf32>
    %38 = vector.broadcast %37 : vector<1x512xf32> to vector<8x512xf32>
    %39 = arith.addf %36, %38 : vector<8x512xf32>
    %cst_33 = arith.constant 0.000000e+00 : f32
    %40 = vector.broadcast %cst_33 : f32 to vector<8x512xf32>
    %41 = arith.maximumf %39, %40 : vector<8x512xf32>
    %42 = arith.truncf %41 : vector<8x512xf32> to vector<8x512xbf16>
    %c0_34 = arith.constant 0 : index
    %c0_35 = arith.constant 0 : index
    %43 = vector.load %arg15[%c0_34, %c0_35] : memref<512x512xbf16, #tpu.memory_space<vmem>>, vector<512x512xbf16>
    %cst_36 = arith.constant dense<0.000000e+00> : vector<8x512xf32>
    %44 = tpu.matmul %42, %43, %cst_36 {dimension_numbers = #tpu.dot_dimension_numbers<[1], [0], [0], [1], [0, 0, 1, 1], [], []>} : vector<8x512xbf16>, vector<512x512xbf16>, vector<8x512xf32> -> vector<8x512xf32>
    %c0_37 = arith.constant 0 : index
    %c0_38 = arith.constant 0 : index
    %45 = vector.load %arg16[%c0_37, %c0_38] : memref<1x512xf32, #tpu.memory_space<vmem>>, vector<1x512xf32>
    %46 = vector.broadcast %45 : vector<1x512xf32> to vector<8x512xf32>
    %47 = arith.addf %44, %46 : vector<8x512xf32>
    %cst_39 = arith.constant 0.000000e+00 : f32
    %48 = vector.broadcast %cst_39 : f32 to vector<8x512xf32>
    %49 = arith.maximumf %47, %48 : vector<8x512xf32>
    %50 = arith.truncf %49 : vector<8x512xf32> to vector<8x512xbf16>
    %c0_40 = arith.constant 0 : index
    %c0_41 = arith.constant 0 : index
    %51 = vector.load %arg17[%c0_40, %c0_41] : memref<384x512xbf16, #tpu.memory_space<vmem>>, vector<384x512xbf16>
    %cst_42 = arith.constant dense<0.000000e+00> : vector<8x512xf32>
    %52 = tpu.matmul %16, %51, %cst_42 {dimension_numbers = #tpu.dot_dimension_numbers<[1], [0], [0], [1], [0, 0, 1, 1], [], []>} : vector<8x384xbf16>, vector<384x512xbf16>, vector<8x512xf32> -> vector<8x512xf32>
    %c0_43 = arith.constant 0 : index
    %c0_44 = arith.constant 0 : index
    %53 = vector.load %arg18[%c0_43, %c0_44] : memref<256x512xbf16, #tpu.memory_space<vmem>>, vector<256x512xbf16>
    %cst_45 = arith.constant dense<0.000000e+00> : vector<8x512xf32>
    %54 = tpu.matmul %33, %53, %cst_45 {dimension_numbers = #tpu.dot_dimension_numbers<[1], [0], [0], [1], [0, 0, 1, 1], [], []>} : vector<8x256xbf16>, vector<256x512xbf16>, vector<8x512xf32> -> vector<8x512xf32>
    %55 = arith.addf %52, %54 : vector<8x512xf32>
    %c0_46 = arith.constant 0 : index
    %c0_47 = arith.constant 0 : index
    %56 = vector.load %arg19[%c0_46, %c0_47] : memref<512x512xbf16, #tpu.memory_space<vmem>>, vector<512x512xbf16>
    %cst_48 = arith.constant dense<0.000000e+00> : vector<8x512xf32>
    %57 = tpu.matmul %50, %56, %cst_48 {dimension_numbers = #tpu.dot_dimension_numbers<[1], [0], [0], [1], [0, 0, 1, 1], [], []>} : vector<8x512xbf16>, vector<512x512xbf16>, vector<8x512xf32> -> vector<8x512xf32>
    %58 = arith.addf %55, %57 : vector<8x512xf32>
    %c0_49 = arith.constant 0 : index
    %c0_50 = arith.constant 0 : index
    %59 = vector.load %arg4[%c0_49, %c0_50] : memref<8x128xbf16, #tpu.memory_space<vmem>>, vector<8x128xbf16>
    %c0_51 = arith.constant 0 : index
    %c0_52 = arith.constant 0 : index
    %60 = vector.load %arg20[%c0_51, %c0_52] : memref<128x512xbf16, #tpu.memory_space<vmem>>, vector<128x512xbf16>
    %cst_53 = arith.constant dense<0.000000e+00> : vector<8x512xf32>
    %61 = tpu.matmul %59, %60, %cst_53 {dimension_numbers = #tpu.dot_dimension_numbers<[1], [0], [0], [1], [0, 0, 1, 1], [], []>} : vector<8x128xbf16>, vector<128x512xbf16>, vector<8x512xf32> -> vector<8x512xf32>
    %62 = arith.addf %58, %61 : vector<8x512xf32>
    %c0_54 = arith.constant 0 : index
    %c0_55 = arith.constant 0 : index
    %63 = vector.load %arg21[%c0_54, %c0_55] : memref<1x512xf32, #tpu.memory_space<vmem>>, vector<1x512xf32>
    %64 = vector.broadcast %63 : vector<1x512xf32> to vector<8x512xf32>
    %65 = arith.addf %62, %64 : vector<8x512xf32>
    %cst_56 = arith.constant 0.000000e+00 : f32
    %66 = vector.broadcast %cst_56 : f32 to vector<8x512xf32>
    %67 = arith.maximumf %65, %66 : vector<8x512xf32>
    %68 = arith.truncf %67 : vector<8x512xf32> to vector<8x512xbf16>
    %c0_57 = arith.constant 0 : index
    %c0_58 = arith.constant 0 : index
    %69 = vector.load %arg22[%c0_57, %c0_58] : memref<512x512xbf16, #tpu.memory_space<vmem>>, vector<512x512xbf16>
    %cst_59 = arith.constant dense<0.000000e+00> : vector<8x512xf32>
    %70 = tpu.matmul %68, %69, %cst_59 {dimension_numbers = #tpu.dot_dimension_numbers<[1], [0], [0], [1], [0, 0, 1, 1], [], []>} : vector<8x512xbf16>, vector<512x512xbf16>, vector<8x512xf32> -> vector<8x512xf32>
    %c0_60 = arith.constant 0 : index
    %c0_61 = arith.constant 0 : index
    %71 = vector.load %arg23[%c0_60, %c0_61] : memref<1x512xf32, #tpu.memory_space<vmem>>, vector<1x512xf32>
    %72 = vector.broadcast %71 : vector<1x512xf32> to vector<8x512xf32>
    %73 = arith.addf %70, %72 : vector<8x512xf32>
    %cst_62 = arith.constant 0.000000e+00 : f32
    %74 = vector.broadcast %cst_62 : f32 to vector<8x512xf32>
    %75 = arith.maximumf %73, %74 : vector<8x512xf32>
    %76 = arith.truncf %75 : vector<8x512xf32> to vector<8x512xbf16>
    %c0_63 = arith.constant 0 : index
    %c0_64 = arith.constant 0 : index
    %77 = vector.load %arg24[%c0_63, %c0_64] : memref<512x128xbf16, #tpu.memory_space<vmem>>, vector<512x128xbf16>
    %cst_65 = arith.constant dense<0.000000e+00> : vector<8x128xf32>
    %78 = tpu.matmul %76, %77, %cst_65 {dimension_numbers = #tpu.dot_dimension_numbers<[1], [0], [0], [1], [0, 0, 1, 1], [], []>} : vector<8x512xbf16>, vector<512x128xbf16>, vector<8x128xf32> -> vector<8x128xf32>
    %c0_66 = arith.constant 0 : index
    %c0_67 = arith.constant 0 : index
    %79 = vector.load %arg25[%c0_66, %c0_67] : memref<1x128xf32, #tpu.memory_space<vmem>>, vector<1x128xf32>
    %80 = vector.broadcast %79 : vector<1x128xf32> to vector<8x128xf32>
    %81 = arith.addf %78, %80 : vector<8x128xf32>
    %cst_68 = arith.constant dense<0xFF800000> : vector<8xf32>
    %82 = vector.multi_reduction <maximumf>, %81, %cst_68 [1] : vector<8x128xf32> to vector<8xf32>
    %83 = vector.shape_cast %82 : vector<8xf32> to vector<8x1xf32>
    %84 = vector.broadcast %83 : vector<8x1xf32> to vector<8x128xf32>
    %85 = arith.subf %81, %84 : vector<8x128xf32>
    %86 = math.exp %85 : vector<8x128xf32>
    %cst_69 = arith.constant dense<0.000000e+00> : vector<8xf32>
    %87 = vector.multi_reduction <add>, %86, %cst_69 [1] : vector<8x128xf32> to vector<8xf32>
    %88 = vector.shape_cast %87 : vector<8xf32> to vector<8x1xf32>
    %89 = vector.broadcast %88 : vector<8x1xf32> to vector<8x128xf32>
    %90 = arith.divf %86, %89 : vector<8x128xf32>
    %c0_70 = arith.constant 0 : index
    %c0_71 = arith.constant 0 : index
    %91 = vector.load %arg26[%c0_70, %c0_71] : memref<8x128xf32, #tpu.memory_space<vmem>>, vector<8x128xf32>
    tpu.vector_store %arg26[%c0_70, %c0_71], %90 {strides = array<i32>} : memref<8x128xf32, #tpu.memory_space<vmem>>, vector<8x128xf32>,
    return
  }
  func.func @transform_0(%arg0: i32) -> (i32, i32) {
    %c0_i32 = arith.constant 0 : i32
    %c0_i32_0 = arith.constant 0 : i32
    return %arg0, %c0_i32 : i32, i32
  }
  func.func @transform_1(%arg0: i32) -> (i32, i32) {
    %c0_i32 = arith.constant 0 : i32
    %c0_i32_0 = arith.constant 0 : i32
    return %arg0, %c0_i32 : i32, i32
  }
  func.func @transform_2(%arg0: i32) -> (i32, i32) {
    %c0_i32 = arith.constant 0 : i32
    %c0_i32_0 = arith.constant 0 : i32
    return %arg0, %c0_i32 : i32, i32
  }
  func.func @transform_3(%arg0: i32) -> (i32, i32) {
    %c0_i32 = arith.constant 0 : i32
    %c0_i32_0 = arith.constant 0 : i32
    return %arg0, %c0_i32 : i32, i32
  }
  func.func @transform_4(%arg0: i32) -> (i32, i32) {
    %c0_i32 = arith.constant 0 : i32
    %c0_i32_0 = arith.constant 0 : i32
    %c0_i32_1 = arith.constant 0 : i32
    return %c0_i32, %c0_i32_0 : i32, i32
  }
  func.func @transform_5(%arg0: i32) -> (i32, i32) {
    %c0_i32 = arith.constant 0 : i32
    %c0_i32_0 = arith.constant 0 : i32
    %c0_i32_1 = arith.constant 0 : i32
    return %c0_i32, %c0_i32_0 : i32, i32
  }
  func.func @transform_6(%arg0: i32) -> (i32, i32) {
    %c0_i32 = arith.constant 0 : i32
    %c0_i32_0 = arith.constant 0 : i32
    %c0_i32_1 = arith.constant 0 : i32
    return %c0_i32, %c0_i32_0 : i32, i32
  }
  func.func @transform_7(%arg0: i32) -> (i32, i32) {
    %c0_i32 = arith.constant 0 : i32
    %c0_i32_0 = arith.constant 0 : i32
    %c0_i32_1 = arith.constant 0 : i32
    return %c0_i32, %c0_i32_0 : i32, i32
  }
  func.func @transform_8(%arg0: i32) -> (i32, i32) {
    %c0_i32 = arith.constant 0 : i32
    %c0_i32_0 = arith.constant 0 : i32
    %c0_i32_1 = arith.constant 0 : i32
    return %c0_i32, %c0_i32_0 : i32, i32
  }
  func.func @transform_9(%arg0: i32) -> (i32, i32) {
    %c0_i32 = arith.constant 0 : i32
    %c0_i32_0 = arith.constant 0 : i32
    %c0_i32_1 = arith.constant 0 : i32
    return %c0_i32, %c0_i32_0 : i32, i32
  }
  func.func @transform_10(%arg0: i32) -> (i32, i32) {
    %c0_i32 = arith.constant 0 : i32
    %c0_i32_0 = arith.constant 0 : i32
    %c0_i32_1 = arith.constant 0 : i32
    return %c0_i32, %c0_i32_0 : i32, i32
  }
  func.func @transform_11(%arg0: i32) -> (i32, i32) {
    %c0_i32 = arith.constant 0 : i32
    %c0_i32_0 = arith.constant 0 : i32
    %c0_i32_1 = arith.constant 0 : i32
    return %c0_i32, %c0_i32_0 : i32, i32
  }
  func.func @transform_12(%arg0: i32) -> (i32, i32) {
    %c0_i32 = arith.constant 0 : i32
    %c0_i32_0 = arith.constant 0 : i32
    %c0_i32_1 = arith.constant 0 : i32
    return %c0_i32, %c0_i32_0 : i32, i32
  }
  func.func @transform_13(%arg0: i32) -> (i32, i32) {
    %c0_i32 = arith.constant 0 : i32
    %c0_i32_0 = arith.constant 0 : i32
    %c0_i32_1 = arith.constant 0 : i32
    return %c0_i32, %c0_i32_0 : i32, i32
  }
  func.func @transform_14(%arg0: i32) -> (i32, i32) {
    %c0_i32 = arith.constant 0 : i32
    %c0_i32_0 = arith.constant 0 : i32
    %c0_i32_1 = arith.constant 0 : i32
    return %c0_i32, %c0_i32_0 : i32, i32
  }
  func.func @transform_15(%arg0: i32) -> (i32, i32) {
    %c0_i32 = arith.constant 0 : i32
    %c0_i32_0 = arith.constant 0 : i32
    %c0_i32_1 = arith.constant 0 : i32
    return %c0_i32, %c0_i32_0 : i32, i32
  }
  func.func @transform_16(%arg0: i32) -> (i32, i32) {
    %c0_i32 = arith.constant 0 : i32
    %c0_i32_0 = arith.constant 0 : i32
    %c0_i32_1 = arith.constant 0 : i32
    return %c0_i32, %c0_i32_0 : i32, i32
  }
  func.func @transform_17(%arg0: i32) -> (i32, i32) {
    %c0_i32 = arith.constant 0 : i32
    %c0_i32_0 = arith.constant 0 : i32
    %c0_i32_1 = arith.constant 0 : i32
    return %c0_i32, %c0_i32_0 : i32, i32
  }
  func.func @transform_18(%arg0: i32) -> (i32, i32) {
    %c0_i32 = arith.constant 0 : i32
    %c0_i32_0 = arith.constant 0 : i32
    %c0_i32_1 = arith.constant 0 : i32
    return %c0_i32, %c0_i32_0 : i32, i32
  }
  func.func @transform_19(%arg0: i32) -> (i32, i32) {
    %c0_i32 = arith.constant 0 : i32
    %c0_i32_0 = arith.constant 0 : i32
    %c0_i32_1 = arith.constant 0 : i32
    return %c0_i32, %c0_i32_0 : i32, i32
  }
  func.func @transform_20(%arg0: i32) -> (i32, i32) {
    %c0_i32 = arith.constant 0 : i32
    %c0_i32_0 = arith.constant 0 : i32
    %c0_i32_1 = arith.constant 0 : i32
    return %c0_i32, %c0_i32_0 : i32, i32
  }
  func.func @transform_21(%arg0: i32) -> (i32, i32) {
    %c0_i32 = arith.constant 0 : i32
    %c0_i32_0 = arith.constant 0 : i32
    %c0_i32_1 = arith.constant 0 : i32
    return %c0_i32, %c0_i32_0 : i32, i32
  }
  func.func @transform_22(%arg0: i32) -> (i32, i32) {
    %c0_i32 = arith.constant 0 : i32
    %c0_i32_0 = arith.constant 0 : i32
    %c0_i32_1 = arith.constant 0 : i32
    return %c0_i32, %c0_i32_0 : i32, i32
  }
  func.func @transform_23(%arg0: i32) -> (i32, i32) {
    %c0_i32 = arith.constant 0 : i32
    %c0_i32_0 = arith.constant 0 : i32
    %c0_i32_1 = arith.constant 0 : i32
    return %c0_i32, %c0_i32_0 : i32, i32
  }
  func.func @transform_24(%arg0: i32) -> (i32, i32) {
    %c0_i32 = arith.constant 0 : i32
    %c0_i32_0 = arith.constant 0 : i32
    %c0_i32_1 = arith.constant 0 : i32
    return %c0_i32, %c0_i32_0 : i32, i32
  }
  func.func @transform_25(%arg0: i32) -> (i32, i32) {
    %c0_i32 = arith.constant 0 : i32
    %c0_i32_0 = arith.constant 0 : i32
    return %arg0, %c0_i32 : i32, i32
  }
}

</mosaic_0001>

<bundles_post_ra>
// kernel: sherlock_forward.1
= control target key start
LH: loop header
LB: loop body
LE: loop exit
PB: predicated region body
PF: predicated region fallthrough
CT: control target
= control target key end

     0   :  { %s15674_s0 = inlined_call_operand.vmem [shape: bf16[8,1024], index: 0, kind: input, shape index: {}]   ;;  %s15675_s1 = inlined_call_operand.vmem [shape: bf16[8,256], index: 1, kind: input, shape index: {}]   ;;  %s15676_s2 = inlined_call_operand.vmem [shape: bf16[8,512], index: 2, kind: input, shape index: {}]   ;;  %s15677_s3 = inlined_call_operand.vmem [shape: bf16[8,128], index: 3, kind: input, shape index: {}]   ;;  %s15678_s4 = inlined_call_operand.hbm [shape: bf16[1024,384], index: 4, kind: input, shape index: {}]   ;;  %s15679_s5 = inlined_call_operand.hbm [shape: f32[1,384], index: 5, kind: input, shape index: {}]   ;;  %s15680_s6 = inlined_call_operand.hbm [shape: bf16[384,384], index: 6, kind: input, shape index: {}]   ;;  %s15681_s7 = inlined_call_operand.hbm [shape: f32[1,384], index: 7, kind: input, shape index: {}]   ;;  %s15682_s8 = inlined_call_operand.vmem [shape: bf16[256,256], index: 8, kind: input, shape index: {}]   ;;  %s15683_s9 = inlined_call_operand.hbm [shape: f32[1,256], index: 9, kind: input, shape index: {}]   ;;  %s15684_s10 = inlined_call_operand.hbm [shape: bf16[256,256], index: 10, kind: input, shape index: {}]   ;;  %s15685_s11 = inlined_call_operand.hbm [shape: f32[1,256], index: 11, kind: input, shape index: {}]   ;;  %s15686_s12 = inlined_call_operand.hbm [shape: bf16[512,512], index: 12, kind: input, shape index: {}]   ;;  %s15687_s13 = inlined_call_operand.hbm [shape: f32[1,512], index: 13, kind: input, shape index: {}]   ;;  %s15688_s14 = inlined_call_operand.hbm [shape: bf16[512,512], index: 14, kind: input, shape index: {}]   ;;  %s15689_s15 = inlined_call_operand.hbm [shape: f32[1,512], index: 15, kind: input, shape index: {}]   ;;  %s15690_s16 = inlined_call_operand.hbm [shape: bf16[384,512], index: 16, kind: input, shape index: {}]   ;;  %s15691_s17 = inlined_call_operand.hbm [shape: bf16[256,512], index: 17, kind: input, shape index: {}]   ;;  %s15692_s18 = inlined_call_operand.hbm [shape: bf16[512,512], index: 18, kind: input, shape index: {}]   ;;  %s15693_s19 = inlined_call_operand.hbm [shape: bf16[128,512], index: 19, kind: input, shape index: {}]   ;;  %s15694_s20 = inlined_call_operand.vmem [shape: f32[1,512], index: 20, kind: input, shape index: {}]   ;;  %s15695_s21 = inlined_call_operand.hbm [shape: bf16[512,512], index: 21, kind: input, shape index: {}]   ;;  %s15696_s22 = inlined_call_operand.hbm [shape: f32[1,512], index: 22, kind: input, shape index: {}]   ;;  %s15697_s23 = inlined_call_operand.hbm [shape: bf16[512,128], index: 23, kind: input, shape index: {}]   ;;  %s15698_s24 = inlined_call_operand.vmem [shape: f32[1,128], index: 24, kind: input, shape index: {}]   ;;  %s15699_s25 = inlined_call_operand.hbm [shape: f32[8,128], index: 25, kind: output, shape index: {}]  }
   0x1   :  { %15703 = sst [smem:[#allocation43_spill]] %s15674_s0 }
   0x2   :  { %15704 = sst [smem:[#allocation44_spill]] %s15675_s1 }
   0x3   :  { %15705 = sst [smem:[#allocation45_spill]] %s15676_s2 }
   0x4   :  { %15706 = sst [smem:[#allocation46_spill]] %s15677_s3 }
   0x5   :  { %15707 = sst [smem:[#allocation47_spill]] %s15678_s4 }
   0x6   :  { %15708 = sst [smem:[#allocation48_spill]] %s15679_s5 }
   0x7   :  { %15709 = sst [smem:[#allocation49_spill]] %s15680_s6 }
   0x8   :  { %15710 = sst [smem:[#allocation50_spill]] %s15681_s7 }
   0x9   :  { %15711 = sst [smem:[#allocation51_spill]] %s15682_s8 }
   0xa   :  { %15712 = sst [smem:[#allocation52_spill]] %s15683_s9 }
   0xb   :  { %15713 = sst [smem:[#allocation53_spill]] %s15699_s25 }
   0xc   :  { %30 = vsyncpa [#allocation3], 0 }
   0xd   :  { %31 = vsyncpa [#allocation6], 0 }
   0xe   :  { %32 = vsyncpa [#allocation9], 0 }
   0xf   :  { %33 = vsyncpa [#allocation12], 0 }
  0x10   :  { %34 = vsyncpa [#allocation15], 0 }
  0x11   :  { %35 = vsyncpa [#allocation18], 0 }
  0x12   :  { %36 = vsyncpa [#allocation21], 0 }
  0x13   :  { %37 = vsyncpa [#allocation24], 0 }
  0x14   :  { %38 = vsyncpa [#allocation27], 0 }
  0x15   :  { %39 = vsyncpa [#allocation30], 0  ;;  %s15714_s6 = sld [smem:[#allocation48_spill]] }
  0x1b   :  { %s67_s30 = sshll.u32 %s15714_s6, 4  ;;  %s68_s30 = int_to_ptr.hbm [resolvable:$true] %s67_s30 }
  0x1c   :  { %40 = vsyncpa [#allocation4], 0  ;;  %s14772_s7 = smov [#allocation5]   ;;  %s15715_s8 = sld [smem:[#allocation50_spill]] }
  0x1d   :  { %s69_s3 = sshll.u32 %s14772_s7, 4  ;;  %s14773_s4 = smov [#allocation8]   ;;  %s70_s3 = int_to_ptr.vmem [resolvable:$true] %s69_s3 }
  0x1e   :  { %72 = dma.hbm_to_vmem [thread:$0]  %s68_s30, 48, %s70_s3, [#allocation6]  }
  0x1f   :  { %s93_s28 = sshll.u32 %s14773_s4, 4  ;;  %s114_s0 = sshll.u32 %s15684_s10, 4  ;;  %s94_s28 = int_to_ptr.vmem [resolvable:$true] %s93_s28  ;;  %s115_s0 = int_to_ptr.hbm [resolvable:$true] %s114_s0 }
  0x20   :  { %s14774_s29 = smov [#allocation11]   ;;  %s138_s25 = sshll.u32 %s15686_s12, 4  ;;  %s139_s25 = int_to_ptr.hbm [resolvable:$true] %s138_s25 }
  0x21   :  { %s116_s2 = sshll.u32 %s14774_s29, 4  ;;  %s14775_s26 = smov 128   ;;  %s117_s2 = int_to_ptr.vmem [resolvable:$true] %s116_s2 }
  0x22   :  { %s91_s27 = sshll.u32 %s15715_s8, 4  ;;  %s14776_s1 = smov 8   ;;  %s92_s27 = int_to_ptr.hbm [resolvable:$true] %s91_s27 }
  0x23   :  { %96 = dma.hbm_to_vmem [thread:$0]  %s92_s27, 48, %s94_s28, [#allocation9]  }
  0x24   :  { %122 = dma.hbm_to_vmem [thread:$0]  %s115_s0, 4096, %s117_s2, [#allocation12], %s14775_s26, %s14775_s26, %s14776_s1  }
  0x25   :  { %s14777_s30 = smov [#allocation14]   ;;  %s14778_s8 = smov 256  }
  0x26   :  { %s140_s3 = sshll.u32 %s14777_s30, 4  ;;  %s14779_s4 = smov 16   ;;  %s141_s3 = int_to_ptr.vmem [resolvable:$true] %s140_s3 }
  0x27   :  { %146 = dma.hbm_to_vmem [thread:$0]  %s139_s25, 16384, %s141_s3, [#allocation15], %s14778_s8, %s14778_s8, %s14779_s4  }
  0x28   :  { %s162_s28 = sshll.u32 %s15688_s14, 4  ;;  %s14780_s9 = smov [#allocation17]   ;;  %s163_s28 = int_to_ptr.hbm [resolvable:$true] %s162_s28 }
  0x29   :  { %s164_s12 = sshll.u32 %s14780_s9, 4  ;;  %s186_s29 = sshll.u32 %s15690_s16, 4  ;;  %s165_s12 = int_to_ptr.vmem [resolvable:$true] %s164_s12  ;;  %s187_s29 = int_to_ptr.hbm [resolvable:$true] %s186_s29 }
  0x2a   :  { %170 = dma.hbm_to_vmem [thread:$0]  %s163_s28, 16384, %s165_s12, [#allocation18], %s14778_s8, %s14778_s8, %s14779_s4  }
  0x2b   :  { %s14781_s2 = smov [#allocation20]   ;;  %s212_s26 = sshll.u32 %s15692_s18, 4  ;;  %s213_s26 = int_to_ptr.hbm [resolvable:$true] %s212_s26 }
  0x2c   :  { %s188_s6 = sshll.u32 %s14781_s2, 4  ;;  %s240_s16 = sshll.u32 %s15695_s21, 4  ;;  %s189_s6 = int_to_ptr.vmem [resolvable:$true] %s188_s6  ;;  %s241_s16 = int_to_ptr.hbm [resolvable:$true] %s240_s16 }
  0x2d   :  { %194 = dma.hbm_to_vmem [thread:$0]  %s187_s29, 12288, %s189_s6, [#allocation21], %s14778_s8, %s14778_s8, %s14779_s4  }
  0x2e   :  { %s14782_s30 = smov [#allocation23]   ;;  %s14783_s10 = smov [#allocation26]  }
  0x2f   :  { %s214_s3 = sshll.u32 %s14782_s30, 4  ;;  %s242_s18 = sshll.u32 %s14783_s10, 4  ;;  %s215_s3 = int_to_ptr.vmem [resolvable:$true] %s214_s3  ;;  %s243_s18 = int_to_ptr.vmem [resolvable:$true] %s242_s18 }
  0x30   :  { %220 = dma.hbm_to_vmem [thread:$0]  %s213_s26, 16384, %s215_s3, [#allocation24], %s14778_s8, %s14778_s8, %s14779_s4  }
  0x31   :  { %s15716_s9 = sld [smem:[#allocation47_spill]]  ;;  %s14784_s21 = smov [#allocation2]  }
  0x32   :  { %248 = dma.hbm_to_vmem [thread:$0]  %s241_s16, 16384, %s243_s18, [#allocation27], %s14778_s8, %s14778_s8, %s14779_s4  }
  0x33   :  { %s55_s5 = sshll.u32 %s14784_s21, 4  ;;  %s15717_s2 = sld [smem:[#allocation49_spill]]  ;;  %s56_s5 = int_to_ptr.vmem [resolvable:$true] %s55_s5 }
  0x34   :  { %s14785_s25 = smov 192   ;;  %s14786_s7 = smov 12  }
  0x35   :  { %s14787_s26 = smov [#allocation7]   ;;  %s15718_s3 = sld [smem:[#allocation52_spill]] }
  0x36   :  { %s79_s14 = sshll.u32 %s14787_s26, 4  ;;  %s128_s27 = sshll.u32 %s15685_s11, 4  ;;  %s80_s14 = int_to_ptr.vmem [resolvable:$true] %s79_s14  ;;  %s129_s27 = int_to_ptr.hbm [resolvable:$true] %s128_s27 }
  0x37   :  { %s53_s12 = sshll.u32 %s15716_s9, 4  ;;  %s14788_s28 = smov [#allocation10]   ;;  %s54_s12 = int_to_ptr.hbm [resolvable:$true] %s53_s12 }
  0x38   :  { %61 = dma.hbm_to_vmem [thread:$0]  %s54_s12, 24576, %s56_s5, [#allocation3], %s14785_s25, %s14785_s25, %s14786_s7  }
  0x39   :  { %s77_s6 = sshll.u32 %s15717_s2, 4  ;;  %s106_s9 = sshll.u32 %s14788_s28, 4  ;;  %s78_s6 = int_to_ptr.hbm [resolvable:$true] %s77_s6  ;;  %s107_s9 = int_to_ptr.vmem [resolvable:$true] %s106_s9 }
  0x3a   :  { %85 = dma.hbm_to_vmem [thread:$0]  %s78_s6, 9216, %s80_s14, [#allocation6], %s14785_s25, %s14785_s25, %s14786_s7  }
  0x3b   :  { %s104_s10 = sshll.u32 %s15718_s3, 4  ;;  %s14789_s12 = smov [#allocation13]   ;;  %s105_s10 = int_to_ptr.hbm [resolvable:$true] %s104_s10 }
  0x3c   :  { %109 = dma.hbm_to_vmem [thread:$0]  %s105_s10, 32, %s107_s9, [#allocation9]  }
  0x3d   :  { %s130_s21 = sshll.u32 %s14789_s12, 4  ;;  %s152_s29 = sshll.u32 %s15687_s13, 4  ;;  %s131_s21 = int_to_ptr.vmem [resolvable:$true] %s130_s21  ;;  %s153_s29 = int_to_ptr.hbm [resolvable:$true] %s152_s29 }
  0x3e   :  { %133 = dma.hbm_to_vmem [thread:$0]  %s129_s27, 32, %s131_s21, [#allocation12]  }
  0x3f   :  { %s176_s25 = sshll.u32 %s15689_s15, 4  ;;  %s14790_s7 = smov [#allocation16]   ;;  %s177_s25 = int_to_ptr.hbm [resolvable:$true] %s176_s25 }
  0x40   :  { %s154_s11 = sshll.u32 %s14790_s7, 4  ;;  %s14791_s26 = smov [#allocation19]   ;;  %s155_s11 = int_to_ptr.vmem [resolvable:$true] %s154_s11 }
  0x41   :  { %157 = dma.hbm_to_vmem [thread:$0]  %s153_s29, 64, %s155_s11, [#allocation15]  }
  0x42   :  { %s178_s14 = sshll.u32 %s14791_s26, 4  ;;  %s199_s3 = sshll.u32 %s15691_s17, 4  ;;  %s179_s14 = int_to_ptr.vmem [resolvable:$true] %s178_s14  ;;  %s200_s3 = int_to_ptr.hbm [resolvable:$true] %s199_s3 }
  0x43   :  { %181 = dma.hbm_to_vmem [thread:$0]  %s177_s25, 64, %s179_s14, [#allocation18]  }
  0x44   :  { %s225_s16 = sshll.u32 %s15693_s19, 4  ;;  %s14792_s18 = smov [#allocation22]   ;;  %s226_s16 = int_to_ptr.hbm [resolvable:$true] %s225_s16 }
  0x45   :  { %s201_s15 = sshll.u32 %s14792_s18, 4  ;;  %s14793_s27 = smov [#allocation25]   ;;  %s202_s15 = int_to_ptr.vmem [resolvable:$true] %s201_s15 }
  0x46   :  { %207 = dma.hbm_to_vmem [thread:$0]  %s200_s3, 8192, %s202_s15, [#allocation21], %s14778_s8, %s14778_s8, %s14779_s4  }
  0x47   :  { %s227_s28 = sshll.u32 %s14793_s27, 4  ;;  %s254_s17 = sshll.u32 %s15696_s22, 4  ;;  %s228_s28 = int_to_ptr.vmem [resolvable:$true] %s227_s28  ;;  %s255_s17 = int_to_ptr.hbm [resolvable:$true] %s254_s17 }
  0x48   :  { %233 = dma.hbm_to_vmem [thread:$0]  %s226_s16, 4096, %s228_s28, [#allocation24], %s14778_s8, %s14778_s8, %s14779_s4  }
  0x49   :  { %s264_s5 = sshll.u32 %s15697_s23, 4  ;;  %s14794_s0 = smov [#allocation28]   ;;  %s265_s5 = int_to_ptr.hbm [resolvable:$true] %s264_s5 }
  0x4a   :  { %s256_s29 = sshll.u32 %s14794_s0, 4  ;;  %s14795_s2 = smov [#allocation29]   ;;  %s257_s29 = int_to_ptr.vmem [resolvable:$true] %s256_s29 }
  0x4b   :  { %259 = dma.hbm_to_vmem [thread:$0]  %s255_s17, 64, %s257_s29, [#allocation27]  }
  0x4c   :  { %s266_s6 = sshll.u32 %s14795_s2, 4  ;;  %s14796_s25 = smov 64   ;;  %s267_s6 = int_to_ptr.vmem [resolvable:$true] %s266_s6 }
  0x4d   :  { %s14797_s22 = smov 4  }
  0x4e   :  { %272 = dma.hbm_to_vmem [thread:$0]  %s265_s5, 4096, %s267_s6, [#allocation30], %s14796_s25, %s14796_s25, %s14797_s22  }
  0x4f   :  { %14750 = dma.done.wait [#allocation3], 24576  }
  0x50   :  { %14751 = vsyncadd [#allocation3], 4294942720 }
  0x51   :  { %14752 = dma.done.wait [#allocation6], 9264  }
  0x52   :  { %14753 = vsyncadd [#allocation6], 4294958032 }
  0x53   :  { %14754 = dma.done.wait [#allocation9], 80  }
  0x54   :  { %14755 = vsyncadd [#allocation9], 4294967216 }
  0x55   :  { %14756 = dma.done.wait [#allocation12], 4128  }
  0x56   :  { %14757 = vsyncadd [#allocation12], 4294963168 }
  0x57   :  { %14758 = dma.done.wait [#allocation15], 16448  }
  0x58   :  { %14759 = vsyncadd [#allocation15], 4294950848 }
  0x59   :  { %14760 = dma.done.wait [#allocation18], 16448  }
  0x5a   :  { %14761 = vsyncadd [#allocation18], 4294950848 }
  0x5b   :  { %14762 = dma.done.wait [#allocation21], 20480  }
  0x5c   :  { %14763 = vsyncadd [#allocation21], 4294946816 }
  0x5d   :  { %14764 = dma.done.wait [#allocation24], 20480  }
  0x5e   :  { %14765 = vsyncadd [#allocation24], 4294946816 }
  0x5f   :  { %14766 = dma.done.wait [#allocation27], 16448  }
  0x60   :  { %14767 = vsyncadd [#allocation27], 4294950848 }
  0x61   :  { %14768 = dma.done.wait [#allocation30], 4096  }
  0x62   :  { %14769 = vsyncadd [#allocation30], 4294963200  ;;  %v9028_v0 = vld [vmem:[#allocation2 + $0xa8] sm:$0xf]  ;;  %v13220_v1 = vld [vmem:[#allocation2 + $0xb0] sm:$0xf0] }
  0x63   :  { %v9124_v2 = vld [vmem:[#allocation2 + $0x168] sm:$0xf]  ;;  %v9029_v3 = vor.u32 %v13220_v1, %v9028_v0  ;;  %v13244_v4 = vld [vmem:[#allocation2 + $0x170] sm:$0xf0]  ;;  %v9016_v11 = vld [vmem:[#allocation2 + $0x90] sm:$0xf] }
  0x64   :  { %v9220_v5 = vld [vmem:[#allocation2 + $0x228] sm:$0xf]  ;;  %v13268_v6 = vld [vmem:[#allocation2 + $0x230] sm:$0xf0]  ;;  %v9125_v7 = vor.u32 %v13244_v4, %v9124_v2  ;;  %v13217_v13 = vld [vmem:[#allocation2 + $0x98] sm:$0xf0] }
  0x65   :  { %v9221_v8 = vor.u32 %v13268_v6, %v9220_v5  ;;  %v9316_v9 = vld [vmem:[#allocation2 + $0x2e8] sm:$0xf]  ;;  %v13292_v10 = vld [vmem:[#allocation2 + $0x2f0] sm:$0xf0]  ;;  %1667 = vmatpush.bf16.msra.mxu0 %v9029_v3  ;;  %v9112_v14 = vld [vmem:[#allocation2 + $0x150] sm:$0xf]  ;;  %v9017_v16 = vor.u32 %v13217_v13, %v9016_v11 }
  0x66   :  { %v9317_v12 = vor.u32 %v13292_v10, %v9316_v9  ;;  %v13241_v15 = vld [vmem:[#allocation2 + $0x158] sm:$0xf0]  ;;  %1680 = vmatpush.bf16.msra.mxu1 %v9125_v7  ;;  %v9208_v18 = vld [vmem:[#allocation2 + $0x210] sm:$0xf]  ;;  %v9004_v23 = vld [vmem:[#allocation2 + $0x78] sm:$0xf] }
  0x67   :  { %1693 = vmatpush.bf16.msra.mxu2 %v9221_v8  ;;  %v9113_v17 = vor.u32 %v13241_v15, %v9112_v14  ;;  %v13265_v19 = vld [vmem:[#allocation2 + $0x218] sm:$0xf0]  ;;  %v9304_v20 = vld [vmem:[#allocation2 + $0x2d0] sm:$0xf]  ;;  %v13214_v24 = vld [vmem:[#allocation2 + $0x80] sm:$0xf0] }
  0x68   :  { %1706 = vmatpush.bf16.msra.mxu3 %v9317_v12  ;;  %v9209_v21 = vor.u32 %v13265_v19, %v9208_v18  ;;  %v13289_v22 = vld [vmem:[#allocation2 + $0x2d8] sm:$0xf0]  ;;  %v9100_v26 = vld [vmem:[#allocation2 + $0x138] sm:$0xf]  ;;  %v13238_v27 = vld [vmem:[#allocation2 + $0x140] sm:$0xf0]  ;;  %v9005_v29 = vor.u32 %v13214_v24, %v9004_v23 }
  0x69   :  { %v9305_v25 = vor.u32 %v13289_v22, %v9304_v20  ;;  %v9196_v28 = vld [vmem:[#allocation2 + $0x1f8] sm:$0xf]  ;;  %1668 = vmatpush.bf16.msra.mxu0 %v9017_v16  ;;  %v13262_v30 = vld [vmem:[#allocation2 + $0x200] sm:$0xf0]  ;;  %v9101_v33 = vor.u32 %v13238_v27, %v9100_v26  ;;  %v8992_v35 = vld [vmem:[#allocation2 + $0x60] sm:$0xf] }
  0x6a   :  { %v9292_v31 = vld [vmem:[#allocation2 + $0x2b8] sm:$0xf]  ;;  %v13286_v32 = vld [vmem:[#allocation2 + $0x2c0] sm:$0xf0]  ;;  %1681 = vmatpush.bf16.msra.mxu1 %v9113_v17  ;;  %v9197_v34 = vor.u32 %v13262_v30, %v9196_v28  ;;  %v13211_v36 = vld [vmem:[#allocation2 + $0x68] sm:$0xf0] }
  0x6b   :  { %1694 = vmatpush.bf16.msra.mxu2 %v9209_v21  ;;  %v9088_v37 = vld [vmem:[#allocation2 + $0x120] sm:$0xf]  ;;  %v9293_v38 = vor.u32 %v13286_v32, %v9292_v31  ;;  %v13235_v39 = vld [vmem:[#allocation2 + $0x128] sm:$0xf0]  ;;  %v8993_v44 = vor.u32 %v13211_v36, %v8992_v35  ;;  %v8980_v47 = vld [vmem:[#allocation2 + $0x48] sm:$0xf] }
  0x6c   :  { %1707 = vmatpush.bf16.msra.mxu3 %v9305_v25  ;;  %v9184_v40 = vld [vmem:[#allocation2 + $0x1e0] sm:$0xf]  ;;  %v13259_v41 = vld [vmem:[#allocation2 + $0x1e8] sm:$0xf0]  ;;  %v9089_v45 = vor.u32 %v13235_v39, %v9088_v37  ;;  %v13208_v48 = vld [vmem:[#allocation2 + $0x50] sm:$0xf0] }
  0x6d   :  { %v9280_v42 = vld [vmem:[#allocation2 + $0x2a0] sm:$0xf]  ;;  %v13283_v43 = vld [vmem:[#allocation2 + $0x2a8] sm:$0xf0]  ;;  %1669 = vmatpush.bf16.msra.mxu0 %v9005_v29  ;;  %v9185_v46 = vor.u32 %v13259_v41, %v9184_v40  ;;  %v9076_v49 = vld [vmem:[#allocation2 + $0x108] sm:$0xf]  ;;  %v8981_v56 = vor.u32 %v13208_v48, %v8980_v47 }
  0x6e   :  { %1682 = vmatpush.bf16.msra.mxu1 %v9101_v33  ;;  %v9281_v50 = vor.u32 %v13283_v43, %v9280_v42  ;;  %v13232_v51 = vld [vmem:[#allocation2 + $0x110] sm:$0xf0]  ;;  %v9172_v52 = vld [vmem:[#allocation2 + $0x1c8] sm:$0xf]  ;;  %v8968_v59 = vld [vmem:[#allocation2 + $0x30] sm:$0xf] }
  0x6f   :  { %1695 = vmatpush.bf16.msra.mxu2 %v9197_v34  ;;  %v13256_v53 = vld [vmem:[#allocation2 + $0x1d0] sm:$0xf0]  ;;  %v9268_v54 = vld [vmem:[#allocation2 + $0x288] sm:$0xf]  ;;  %v9077_v57 = vor.u32 %v13232_v51, %v9076_v49  ;;  %v13205_v60 = vld [vmem:[#allocation2 + $0x38] sm:$0xf0] }
  0x70   :  { %1708 = vmatpush.bf16.msra.mxu3 %v9293_v38  ;;  %v13280_v55 = vld [vmem:[#allocation2 + $0x290] sm:$0xf0]  ;;  %v9173_v58 = vor.u32 %v13256_v53, %v9172_v52  ;;  %v9064_v61 = vld [vmem:[#allocation2 + $0xf0] sm:$0xf]  ;;  %v13229_v63 = vld [vmem:[#allocation2 + $0xf8] sm:$0xf0]  ;;  %v8969_v4 = vor.u32 %v13205_v60, %v8968_v59 }
  0x71   :  { %1670 = vmatpush.bf16.msra.mxu0 %v8993_v44  ;;  %v9269_v62 = vor.u32 %v13280_v55, %v9268_v54  ;;  %v9160_v0 = vld [vmem:[#allocation2 + $0x1b0] sm:$0xf]  ;;  %v13253_v1 = vld [vmem:[#allocation2 + $0x1b8] sm:$0xf0]  ;;  %v9065_v5 = vor.u32 %v13229_v63, %v9064_v61  ;;  %v8956_v7 = vld [vmem:[#allocation2 + $0x18] sm:$0xf] }
  0x72   :  { %1683 = vmatpush.bf16.msra.mxu1 %v9089_v45  ;;  %v9256_v2 = vld [vmem:[#allocation2 + $0x270] sm:$0xf]  ;;  %v13277_v3 = vld [vmem:[#allocation2 + $0x278] sm:$0xf0]  ;;  %v9161_v6 = vor.u32 %v13253_v1, %v9160_v0  ;;  %v13202_v8 = vld [vmem:[#allocation2 + $0x20] sm:$0xf0] }
  0x73   :  { %1696 = vmatpush.bf16.msra.mxu2 %v9185_v46  ;;  %v9052_v9 = vld [vmem:[#allocation2 + $0xd8] sm:$0xf]  ;;  %v9257_v10 = vor.u32 %v13277_v3, %v9256_v2  ;;  %v13226_v11 = vld [vmem:[#allocation2 + $0xe0] sm:$0xf0]  ;;  %v8957_v16 = vor.u32 %v13202_v8, %v8956_v7  ;;  %v8944_v17 = vld [vmem:[#allocation2] sm:$0xf] }
  0x74   :  { %1709 = vmatpush.bf16.msra.mxu3 %v9281_v50  ;;  %v9148_v12 = vld [vmem:[#allocation2 + $0x198] sm:$0xf]  ;;  %v13250_v13 = vld [vmem:[#allocation2 + $0x1a0] sm:$0xf0]  ;;  %v13199_v18 = vld [vmem:[#allocation2 + $0x8] sm:$0xf0]  ;;  %v9053_v19 = vor.u32 %v13226_v11, %v9052_v9 }
  0x75   :  { %1671 = vmatpush.bf16.msra.mxu0 %v8981_v56  ;;  %v9244_v14 = vld [vmem:[#allocation2 + $0x258] sm:$0xf]  ;;  %v13274_v15 = vld [vmem:[#allocation2 + $0x260] sm:$0xf0]  ;;  %v9149_v20 = vor.u32 %v13250_v13, %v9148_v12  ;;  %v9040_v21 = vld [vmem:[#allocation2 + $0xc0] sm:$0xf]  ;;  %v8945_v31 = vor.u32 %v13199_v18, %v8944_v17 }
  0x76   :  { %1684 = vmatpush.bf16.msra.mxu1 %v9077_v57  ;;  %v13223_v22 = vld [vmem:[#allocation2 + $0xc8] sm:$0xf0]  ;;  %v9136_v23 = vld [vmem:[#allocation2 + $0x180] sm:$0xf]  ;;  %v9245_v24 = vor.u32 %v13274_v15, %v9244_v14  ;;  %v9412_v28 = vld [vmem:[#allocation2 + $0x3a8] sm:$0xf] }
  0x77   :  { %1697 = vmatpush.bf16.msra.mxu2 %v9173_v58  ;;  %v13247_v25 = vld [vmem:[#allocation2 + $0x188] sm:$0xf0]  ;;  %v9232_v26 = vld [vmem:[#allocation2 + $0x240] sm:$0xf]  ;;  %v13316_v29 = vld [vmem:[#allocation2 + $0x3b0] sm:$0xf0]  ;;  %v9041_v35 = vor.u32 %v13223_v22, %v9040_v21 }
  0x78   :  { %1710 = vmatpush.bf16.msra.mxu3 %v9269_v62  ;;  %v13271_v27 = vld [vmem:[#allocation2 + $0x248] sm:$0xf0]  ;;  %v9508_v30 = vld [vmem:[#allocation2 + $0x468] sm:$0xf]  ;;  %v13340_v32 = vld [vmem:[#allocation2 + $0x470] sm:$0xf0]  ;;  %v9137_v36 = vor.u32 %v13247_v25, %v9136_v23  ;;  %v9413_v40 = vor.u32 %v13316_v29, %v9412_v28 }
  0x79   :  { %1672 = vmatpush.bf16.msra.mxu0 %v8969_v4  ;;  %v9604_v33 = vld [vmem:[#allocation2 + $0x528] sm:$0xf]  ;;  %v13364_v34 = vld [vmem:[#allocation2 + $0x530] sm:$0xf0]  ;;  %v9233_v39 = vor.u32 %v13271_v27, %v9232_v26  ;;  %v9509_v41 = vor.u32 %v13340_v32, %v9508_v30  ;;  %v9400_v43 = vld [vmem:[#allocation2 + $0x390] sm:$0xf] }
  0x7a   :  { %1685 = vmatpush.bf16.msra.mxu1 %v9065_v5  ;;  %v9700_v37 = vld [vmem:[#allocation2 + $0x5e8] sm:$0xf]  ;;  %v13388_v38 = vld [vmem:[#allocation2 + $0x5f0] sm:$0xf0]  ;;  %v9605_v42 = vor.u32 %v13364_v34, %v9604_v33  ;;  %v13313_v44 = vld [vmem:[#allocation2 + $0x398] sm:$0xf0] }
  0x7b   :  { %1698 = vmatpush.bf16.msra.mxu2 %v9161_v6  ;;  %v9496_v45 = vld [vmem:[#allocation2 + $0x450] sm:$0xf]  ;;  %v9701_v46 = vor.u32 %v13388_v38, %v9700_v37  ;;  %v13337_v47 = vld [vmem:[#allocation2 + $0x458] sm:$0xf0]  ;;  %v9401_v52 = vor.u32 %v13313_v44, %v9400_v43  ;;  %v9388_v53 = vld [vmem:[#allocation2 + $0x378] sm:$0xf] }
  0x7c   :  { %1711 = vmatpush.bf16.msra.mxu3 %v9257_v10  ;;  %v9592_v48 = vld [vmem:[#allocation2 + $0x510] sm:$0xf]  ;;  %v13361_v49 = vld [vmem:[#allocation2 + $0x518] sm:$0xf0]  ;;  %v9497_v54 = vor.u32 %v13337_v47, %v9496_v45  ;;  %v13310_v56 = vld [vmem:[#allocation2 + $0x380] sm:$0xf0] }
  0x7d   :  { %1673 = vmatpush.bf16.msra.mxu0 %v8957_v16  ;;  %v9688_v50 = vld [vmem:[#allocation2 + $0x5d0] sm:$0xf]  ;;  %v13385_v51 = vld [vmem:[#allocation2 + $0x5d8] sm:$0xf0]  ;;  %v9593_v55 = vor.u32 %v13361_v49, %v9592_v48  ;;  %v9484_v57 = vld [vmem:[#allocation2 + $0x438] sm:$0xf]  ;;  %v9389_v3 = vor.u32 %v13310_v56, %v9388_v53 }
  0x7e   :  { %1686 = vmatpush.bf16.msra.mxu1 %v9053_v19  ;;  %s15719_s4 = sld [smem:[#allocation43_spill]]  ;;  %v9689_v59 = vor.u32 %v13385_v51, %v9688_v50  ;;  %v13334_v60 = vld [vmem:[#allocation2 + $0x440] sm:$0xf0]  ;;  %v9580_v61 = vld [vmem:[#allocation2 + $0x4f8] sm:$0xf] }
  0x7f   :  { %1699 = vmatpush.bf16.msra.mxu2 %v9149_v20  ;;  %v13358_v62 = vld [vmem:[#allocation2 + $0x500] sm:$0xf0]  ;;  %v9676_v1 = vld [vmem:[#allocation2 + $0x5b8] sm:$0xf]  ;;  %v9485_v7 = vor.u32 %v13334_v60, %v9484_v57  ;;  %v9376_v9 = vld [vmem:[#allocation2 + $0x360] sm:$0xf] }
  0x80   :  { %1712 = vmatpush.bf16.msra.mxu3 %v9245_v24  ;;  %v13382_v2 = vld [vmem:[#allocation2 + $0x5c0] sm:$0xf0]  ;;  %v9581_v8 = vor.u32 %v13358_v62, %v9580_v61  ;;  %v13307_v10 = vld [vmem:[#allocation2 + $0x368] sm:$0xf0]  ;;  %v9472_v11 = vld [vmem:[#allocation2 + $0x420] sm:$0xf] }
  0x81   :  { %1674 = vmatpush.bf16.msra.mxu0 %v8945_v31  ;;  %v9677_v14 = vor.u32 %v13382_v2, %v9676_v1  ;;  %v13331_v15 = vld [vmem:[#allocation2 + $0x428] sm:$0xf0]  ;;  %v9568_v16 = vld [vmem:[#allocation2 + $0x4e0] sm:$0xf]  ;;  %v9377_v22 = vor.u32 %v13307_v10, %v9376_v9  ;;  %v9364_v25 = vld [vmem:[#allocation2 + $0x348] sm:$0xf] }
  0x82   :  { %1687 = vmatpush.bf16.msra.mxu1 %v9041_v35  ;;  %v13355_v17 = vld [vmem:[#allocation2 + $0x4e8] sm:$0xf0]  ;;  %v9664_v18 = vld [vmem:[#allocation2 + $0x5a0] sm:$0xf]  ;;  %v9473_v23 = vor.u32 %v13331_v15, %v9472_v11  ;;  %v13304_v26 = vld [vmem:[#allocation2 + $0x350] sm:$0xf0] }
  0x83   :  { %1700 = vmatpush.bf16.msra.mxu2 %v9137_v36  ;;  %v13379_v19 = vld [vmem:[#allocation2 + $0x5a8] sm:$0xf0]  ;;  %v9569_v24 = vor.u32 %v13355_v17, %v9568_v16  ;;  %v9460_v27 = vld [vmem:[#allocation2 + $0x408] sm:$0xf]  ;;  %v13328_v29 = vld [vmem:[#allocation2 + $0x410] sm:$0xf0]  ;;  %v9365_v34 = vor.u32 %v13304_v26, %v9364_v25 }
  0x84   :  { %1713 = vmatpush.bf16.msra.mxu3 %v9233_v39  ;;  %v348_v58 = vld [vmem:[%s15719_s4 + $0x8] sm:$0xff]  ;;  %v347_v5 = vld [vmem:[%s15719_s4] sm:$0xff]  ;;  %v9665_v28 = vor.u32 %v13379_v19, %v9664_v18  ;;  %v13352_v31 = vld [vmem:[#allocation2 + $0x4d0] sm:$0xf0]  ;;  %v9461_v35 = vor.u32 %v13328_v29, %v9460_v27  ;;  %s15720_s10 = sld [smem:[#allocation51_spill]] }
  0x85   :  { %1719 = vmatpush.bf16.msrb.mxu0 %v9413_v40  ;;  %v621_v63 = vunpack.c.l.b16 %v348_v58  ;;  %v622_v0 = vunpack.c.h.b16 %v348_v58  ;;  %v619_v12 = vunpack.c.l.b16 %v347_v5  ;;  %v620_v13 = vunpack.c.h.b16 %v347_v5  ;;  %v9556_v30 = vld [vmem:[#allocation2 + $0x4c8] sm:$0xf]  ;;  %v13376_v33 = vld [vmem:[#allocation2 + $0x590] sm:$0xf0]  ;;  %v9352_v37 = vld [vmem:[#allocation2 + $0x330] sm:$0xf] }
  0x86   :  { %1732 = vmatpush.bf16.msrb.mxu1 %v9509_v41  ;;  %v9652_v32 = vld [vmem:[#allocation2 + $0x588] sm:$0xf]  ;;  %v9557_v36 = vor.u32 %v13352_v31, %v9556_v30  ;;  %v13301_v38 = vld [vmem:[#allocation2 + $0x338] sm:$0xf0]  ;;  %v9448_v39 = vld [vmem:[#allocation2 + $0x3f0] sm:$0xf] }
  0x87   :  { %1745 = vmatpush.bf16.msrb.mxu2 %v9605_v42  ;;  %v15007_v4 = vpack.c.b16 %v621_v63, %v621_v63  ;;  %v15012_v6 = vpack.c.b16 %v622_v0, %v622_v0  ;;  %v15015_v20 = vpack.c.b16 %v619_v12, %v619_v12  ;;  %v15018_v21 = vpack.c.b16 %v620_v13, %v620_v13  ;;  %v13325_v41 = vld [vmem:[#allocation2 + $0x3f8] sm:$0xf0]  ;;  %v9544_v42 = vld [vmem:[#allocation2 + $0x4b0] sm:$0xf]  ;;  %v9340_v49 = vld [vmem:[#allocation2 + $0x318] sm:$0xf] }
  0x88   :  { %1758 = vmatpush.bf16.msrb.mxu3 %v9701_v46  ;;  %v9653_v40 = vor.u32 %v13376_v33, %v9652_v32  ;;  %v13349_v43 = vld [vmem:[#allocation2 + $0x4b8] sm:$0xf0]  ;;  %v9640_v44 = vld [vmem:[#allocation2 + $0x570] sm:$0xf]  ;;  %v9353_v46 = vor.u32 %v13301_v38, %v9352_v37  ;;  %v9449_v47 = vor.u32 %v13325_v41, %v9448_v39  ;;  %v13298_v50 = vld [vmem:[#allocation2 + $0x320] sm:$0xf0] }
  0x89   :  { %1720 = vmatpush.bf16.msrb.mxu0 %v9401_v52  ;;  %1701 = vmatmul.bf16.vlgmr.msra.gmra.mxu2 %v15007_v4  ;;  %v13373_v45 = vld [vmem:[#allocation2 + $0x578] sm:$0xf0]  ;;  %v9545_v48 = vor.u32 %v13349_v43, %v9544_v42  ;;  %v9436_v51 = vld [vmem:[#allocation2 + $0x3d8] sm:$0xf]  ;;  %v13322_v53 = vld [vmem:[#allocation2 + $0x3e0] sm:$0xf0] }
  0x8a   :  { %1733 = vmatpush.bf16.msrb.mxu1 %v9497_v54  ;;  %1714 = vmatmul.bf16.vlgmr.msra.gmra.mxu3 %v15012_v6  ;;  %v9641_v52 = vor.u32 %v13373_v45, %v9640_v44  ;;  %v9532_v54 = vld [vmem:[#allocation2 + $0x498] sm:$0xf]  ;;  %v13370_v57 = vld [vmem:[#allocation2 + $0x560] sm:$0xf0]  ;;  %v9328_v58 = vld [vmem:[#allocation2 + $0x300] sm:$0xf]  ;;  %v9437_v63 = vor.u32 %v13322_v53, %v9436_v51 }
  0x8b   :  { %1746 = vmatpush.bf16.msrb.mxu2 %v9593_v55  ;;  %1675 = vmatmul.bf16.vlgmr.msra.gmra.mxu0 %v15015_v20  ;;  %v13346_v55 = vld [vmem:[#allocation2 + $0x4a0] sm:$0xf0]  ;;  %v9628_v56 = vld [vmem:[#allocation2 + $0x558] sm:$0xf]  ;;  %v13295_v60 = vld [vmem:[#allocation2 + $0x308] sm:$0xf0] }
  0x8c   :  { %1759 = vmatpush.bf16.msrb.mxu3 %v9689_v59  ;;  %1688 = vmatmul.bf16.vlgmr.msra.gmra.mxu1 %v15018_v21  ;;  %v9341_v59 = vor.u32 %v13298_v50, %v9340_v49  ;;  %v9424_v61 = vld [vmem:[#allocation2 + $0x3c0] sm:$0xf]  ;;  %v13319_v62 = vld [vmem:[#allocation2 + $0x3c8] sm:$0xf0]  ;;  %v9533_v0 = vor.u32 %v13346_v55, %v9532_v54  ;;  %v9629_v5 = vor.u32 %v13370_v57, %v9628_v56  ;;  %v349_v9 = vld [vmem:[%s15719_s4 + $0x10] sm:$0xff]  ;;  %s15721_s1 = sld [smem:[#allocation44_spill]] }
  0x8d   :  { %1721 = vmatpush.bf16.msrb.mxu0 %v9389_v3  ;;  %v9520_v1 = vld [vmem:[#allocation2 + $0x480] sm:$0xf]  ;;  %v13343_v2 = vld [vmem:[#allocation2 + $0x488] sm:$0xf0]  ;;  %v350_v3 = vld [vmem:[%s15719_s4 + $0x18] sm:$0xff]  ;;  %v9329_v13 = vor.u32 %v13295_v60, %v9328_v58  ;;  %v9425_v18 = vor.u32 %v13319_v62, %v9424_v61  ;;  %s15722_s8 = sld [smem:[#allocation45_spill]] }
  0x8e   :  { %1734 = vmatpush.bf16.msrb.mxu1 %v9485_v7  ;;  %v9616_v7 = vld [vmem:[#allocation2 + $0x540] sm:$0xf]  ;;  %v13219_v10 = vld [vmem:[#allocation2 + $0xac] sm:$0xf]  ;;  %v9030_v11 = vld [vmem:[#allocation2 + $0xb4] sm:$0xf0]  ;;  %v625_v17 = vunpack.c.l.b16 %v350_v3  ;;  %v9521_v19 = vor.u32 %v13343_v2, %v9520_v1  ;;  %v626_v25 = vunpack.c.h.b16 %v350_v3 }
  0x8f   :  { %1747 = vmatpush.bf16.msrb.mxu2 %v9581_v8  ;;  %v13367_v8 = vld [vmem:[#allocation2 + $0x548] sm:$0xf0]  ;;  %v9222_v16 = vld [vmem:[#allocation2 + $0x234] sm:$0xf0]  ;;  %v9033_v27 = vor.u32 %v13219_v10, %v9030_v11  ;;  %v13216_v31 = vld [vmem:[#allocation2 + $0x94] sm:$0xf] }
  0x90   :  { %1760 = vmatpush.bf16.msrb.mxu3 %v9677_v14  ;;  %v13243_v12 = vld [vmem:[#allocation2 + $0x16c] sm:$0xf]  ;;  %v9126_v14 = vld [vmem:[#allocation2 + $0x174] sm:$0xf0]  ;;  %v9617_v26 = vor.u32 %v13367_v8, %v9616_v7  ;;  %v9018_v32 = vld [vmem:[#allocation2 + $0x9c] sm:$0xf0]  ;;  %v15028_v38 = vpack.c.b16 %v625_v17, %v625_v17  ;;  %v15032_v42 = vpack.c.b16 %v626_v25, %v626_v25 }
  0x91   :  { %1722 = vmatpush.bf16.msrb.mxu0 %v9377_v22  ;;  %v13267_v15 = vld [vmem:[#allocation2 + $0x22c] sm:$0xf]  ;;  %v9129_v29 = vor.u32 %v13243_v12, %v9126_v14  ;;  %v13240_v33 = vld [vmem:[#allocation2 + $0x154] sm:$0xf]  ;;  %v9210_v37 = vld [vmem:[#allocation2 + $0x21c] sm:$0xf0]  ;;  %v9021_v43 = vor.u32 %v13216_v31, %v9018_v32 }
  0x92   :  { %1735 = vmatpush.bf16.msrb.mxu1 %v9473_v23  ;;  %v13291_v22 = vld [vmem:[#allocation2 + $0x2ec] sm:$0xf]  ;;  %v9318_v23 = vld [vmem:[#allocation2 + $0x2f4] sm:$0xf0]  ;;  %v9225_v30 = vor.u32 %v13267_v15, %v9222_v16  ;;  %v13288_v39 = vld [vmem:[#allocation2 + $0x2d4] sm:$0xf] }
  0x93   :  { %1748 = vmatpush.bf16.msrb.mxu2 %v9569_v24  ;;  %v623_v24 = vunpack.c.l.b16 %v349_v9  ;;  %v13237_v49 = vld [vmem:[#allocation2 + $0x13c] sm:$0xf]  ;;  %v9102_v51 = vld [vmem:[#allocation2 + $0x144] sm:$0xf0]  ;;  %v8994_v60 = vld [vmem:[#allocation2 + $0x6c] sm:$0xf0] }
  0x94   :  { %1761 = vmatpush.bf16.msrb.mxu3 %v9665_v28  ;;  %v624_v28 = vunpack.c.h.b16 %v349_v9  ;;  %v9198_v53 = vld [vmem:[#allocation2 + $0x204] sm:$0xf0]  ;;  %v13285_v54 = vld [vmem:[#allocation2 + $0x2bc] sm:$0xf]  ;;  %v9105_v57 = vor.u32 %v13237_v49, %v9102_v51  ;;  %v13234_v61 = vld [vmem:[#allocation2 + $0x124] sm:$0xf] }
  0x95   :  { %1723 = vmatpush.bf16.msrb.mxu0 %v9365_v34  ;;  %v9321_v34 = vor.u32 %v13291_v22, %v9318_v23  ;;  %v15030_v41 = vpack.c.b16 %v623_v24, %v623_v24  ;;  %v9294_v55 = vld [vmem:[#allocation2 + $0x2c4] sm:$0xf0]  ;;  %v9186_v1 = vld [vmem:[#allocation2 + $0x1ec] sm:$0xf0]  ;;  %v13282_v2 = vld [vmem:[#allocation2 + $0x2a4] sm:$0xf] }
  0x96   :  { %1736 = vmatpush.bf16.msrb.mxu1 %v9461_v35  ;;  %v9114_v35 = vld [vmem:[#allocation2 + $0x15c] sm:$0xf0]  ;;  %v15034_v44 = vpack.c.b16 %v624_v28, %v624_v28  ;;  %v9297_v62 = vor.u32 %v13285_v54, %v9294_v55  ;;  %v9282_v3 = vld [vmem:[#allocation2 + $0x2ac] sm:$0xf0]  ;;  %v13207_v9 = vld [vmem:[#allocation2 + $0x4c] sm:$0xf] }
  0x97   :  { %1749 = vmatpush.bf16.msrb.mxu2 %v9557_v36  ;;  %v13264_v36 = vld [vmem:[#allocation2 + $0x214] sm:$0xf]  ;;  %v9117_v45 = vor.u32 %v13240_v33, %v9114_v35  ;;  %v8982_v10 = vld [vmem:[#allocation2 + $0x54] sm:$0xf0]  ;;  %v13231_v11 = vld [vmem:[#allocation2 + $0x10c] sm:$0xf]  ;;  %v9285_v12 = vor.u32 %v13282_v2, %v9282_v3 }
  0x98   :  { %1762 = vmatpush.bf16.msrb.mxu3 %v9653_v40  ;;  %v9306_v40 = vld [vmem:[#allocation2 + $0x2dc] sm:$0xf0]  ;;  %v13255_v14 = vld [vmem:[#allocation2 + $0x1cc] sm:$0xf]  ;;  %v9174_v15 = vld [vmem:[#allocation2 + $0x1d4] sm:$0xf0] }
  0x99   :  { %1724 = vmatpush.bf16.msrb.mxu0 %v9353_v46  ;;  %v9213_v46 = vor.u32 %v13264_v36, %v9210_v37  ;;  %v9309_v50 = vor.u32 %v13288_v39, %v9306_v40  ;;  %v13279_v16 = vld [vmem:[#allocation2 + $0x28c] sm:$0xf]  ;;  %v9270_v17 = vld [vmem:[#allocation2 + $0x294] sm:$0xf0]  ;;  %v9177_v22 = vor.u32 %v13255_v14, %v9174_v15  ;;  %v13204_v23 = vld [vmem:[#allocation2 + $0x34] sm:$0xf] }
  0x9a   :  { %1737 = vmatpush.bf16.msrb.mxu1 %v9449_v47  ;;  %v13213_v47 = vld [vmem:[#allocation2 + $0x7c] sm:$0xf]  ;;  %v8970_v24 = vld [vmem:[#allocation2 + $0x3c] sm:$0xf0]  ;;  %v13228_v25 = vld [vmem:[#allocation2 + $0xf4] sm:$0xf] }
  0x9b   :  { %1750 = vmatpush.bf16.msrb.mxu2 %v9545_v48  ;;  %v9006_v48 = vld [vmem:[#allocation2 + $0x84] sm:$0xf0]  ;;  %v13252_v28 = vld [vmem:[#allocation2 + $0x1b4] sm:$0xf]  ;;  %v9258_v31 = vld [vmem:[#allocation2 + $0x27c] sm:$0xf0]  ;;  %v8973_v32 = vor.u32 %v13204_v23, %v8970_v24 }
  0x9c   :  { %1763 = vmatpush.bf16.msrb.mxu3 %v9641_v52  ;;  %v13261_v52 = vld [vmem:[#allocation2 + $0x1fc] sm:$0xf]  ;;  %v9009_v56 = vor.u32 %v13213_v47, %v9006_v48  ;;  %v8958_v36 = vld [vmem:[#allocation2 + $0x24] sm:$0xf0]  ;;  %v13198_v49 = vld [vmem:[#allocation2 + $0x4] sm:$0xf] }
  0x9d   :  { %1725 = vmatpush.bf16.msrb.mxu0 %v9341_v59  ;;  %v9201_v58 = vor.u32 %v13261_v52, %v9198_v53  ;;  %v13210_v59 = vld [vmem:[#allocation2 + $0x64] sm:$0xf]  ;;  %v13201_v35 = vld [vmem:[#allocation2 + $0x1c] sm:$0xf]  ;;  %v9054_v40 = vld [vmem:[#allocation2 + $0xe4] sm:$0xf0] }
  0x9e   :  { %1738 = vmatpush.bf16.msrb.mxu1 %v9437_v63  ;;  %v9090_v63 = vld [vmem:[#allocation2 + $0x12c] sm:$0xf0]  ;;  %v13225_v37 = vld [vmem:[#allocation2 + $0xdc] sm:$0xf]  ;;  %v9246_v47 = vld [vmem:[#allocation2 + $0x264] sm:$0xf0]  ;;  %v8961_v48 = vor.u32 %v13201_v35, %v8958_v36 }
  0x9f   :  { %1751 = vmatpush.bf16.msrb.mxu2 %v9533_v0  ;;  %v13258_v0 = vld [vmem:[#allocation2 + $0x1e4] sm:$0xf]  ;;  %v9093_v7 = vor.u32 %v13234_v61, %v9090_v63  ;;  %v9057_v51 = vor.u32 %v13225_v37, %v9054_v40  ;;  %v9042_v54 = vld [vmem:[#allocation2 + $0xcc] sm:$0xf0]  ;;  %v9414_v61 = vld [vmem:[#allocation2 + $0x3b4] sm:$0xf0] }
  0xa0   :  { %1764 = vmatpush.bf16.msrb.mxu3 %v9629_v5  ;;  %v8997_v5 = vor.u32 %v13210_v59, %v8994_v60  ;;  %v9189_v8 = vor.u32 %v13258_v0, %v9186_v1  ;;  %v13222_v53 = vld [vmem:[#allocation2 + $0xc4] sm:$0xf]  ;;  %v9234_v59 = vld [vmem:[#allocation2 + $0x24c] sm:$0xf0]  ;;  %v13315_v60 = vld [vmem:[#allocation2 + $0x3ac] sm:$0xf] }
  0xa1   :  { %1726 = vmatpush.bf16.msrb.mxu0 %v9329_v13  ;;  %v9078_v13 = vld [vmem:[#allocation2 + $0x114] sm:$0xf0]  ;;  %v13246_v55 = vld [vmem:[#allocation2 + $0x184] sm:$0xf]  ;;  %v13363_v1 = vld [vmem:[#allocation2 + $0x52c] sm:$0xf]  ;;  %v9045_v3 = vor.u32 %v13222_v53, %v9042_v54 }
  0xa2   :  { %1739 = vmatpush.bf16.msrb.mxu1 %v9425_v18  ;;  %v8985_v18 = vor.u32 %v13207_v9, %v8982_v10  ;;  %v9510_v0 = vld [vmem:[#allocation2 + $0x474] sm:$0xf0]  ;;  %v9417_v10 = vor.u32 %v13315_v60, %v9414_v61  ;;  %v9402_v14 = vld [vmem:[#allocation2 + $0x39c] sm:$0xf0]  ;;  %v13336_v15 = vld [vmem:[#allocation2 + $0x454] sm:$0xf] }
  0xa3   :  { %1752 = vmatpush.bf16.msrb.mxu2 %v9521_v19  ;;  %v9081_v19 = vor.u32 %v13231_v11, %v9078_v13  ;;  %v9606_v2 = vld [vmem:[#allocation2 + $0x534] sm:$0xf0]  ;;  %v13312_v13 = vld [vmem:[#allocation2 + $0x394] sm:$0xf]  ;;  %v9690_v23 = vld [vmem:[#allocation2 + $0x5dc] sm:$0xf0] }
  0xa4   :  { %1765 = vmatpush.bf16.msrb.mxu3 %v9617_v26  ;;  %1727 = vmatmul.bf16.vlgmr.msrb.gmra.mxu0 %v15030_v41  ;;  %v9273_v26 = vor.u32 %v13279_v16, %v9270_v17  ;;  %v9498_v17 = vld [vmem:[#allocation2 + $0x45c] sm:$0xf0]  ;;  %v9405_v24 = vor.u32 %v13312_v13, %v9402_v14  ;;  %v9678_v35 = vld [vmem:[#allocation2 + $0x5c4] sm:$0xf0]  ;;  %v13306_v40 = vld [vmem:[#allocation2 + $0x364] sm:$0xf] }
  0xa5   :  { %1771 = vmatpush.bf16.msra.mxu0 %v9033_v27  ;;  %1740 = vmatmul.bf16.vlgmr.msrb.gmra.mxu1 %v15034_v44  ;;  %v9066_v27 = vld [vmem:[#allocation2 + $0xfc] sm:$0xf0]  ;;  %v13351_v60 = vld [vmem:[#allocation2 + $0x4cc] sm:$0xf]  ;;  %v9558_v61 = vld [vmem:[#allocation2 + $0x4d4] sm:$0xf0] }
  0xa6   :  { %1784 = vmatpush.bf16.msra.mxu1 %v9129_v29  ;;  %1753 = vmatmul.bf16.vlgmr.msrb.gmra.mxu2 %v15028_v38  ;;  %v9162_v29 = vld [vmem:[#allocation2 + $0x1bc] sm:$0xf0]  ;;  %v9069_v33 = vor.u32 %v13228_v25, %v9066_v27  ;;  %v9501_v25 = vor.u32 %v13336_v15, %v9498_v17  ;;  %v13309_v27 = vld [vmem:[#allocation2 + $0x37c] sm:$0xf]  ;;  %s15723_s14 = sld [smem:[#allocation46_spill]] }
  0xa7   :  { %1797 = vmatpush.bf16.msra.mxu2 %v9225_v30  ;;  %1766 = vmatmul.bf16.vlgmr.msrb.gmra.mxu3 %v15032_v42  ;;  %v13276_v30 = vld [vmem:[#allocation2 + $0x274] sm:$0xf]  ;;  %v9642_v13 = vld [vmem:[#allocation2 + $0x57c] sm:$0xf0]  ;;  %v13297_v17 = vld [vmem:[#allocation2 + $0x31c] sm:$0xf] }
  0xa8   :  { %1810 = vmatpush.bf16.msra.mxu3 %v9321_v34  ;;  %v9165_v34 = vor.u32 %v13252_v28, %v9162_v29  ;;  %v9261_v39 = vor.u32 %v13276_v30, %v9258_v31  ;;  %v9390_v28 = vld [vmem:[#allocation2 + $0x384] sm:$0xf0]  ;;  %v13333_v29 = vld [vmem:[#allocation2 + $0x43c] sm:$0xf]  ;;  %s15724_s15 = sld [smem:[#allocation53_spill]] }
  0xa9   :  { %1772 = vmatpush.bf16.msra.mxu0 %v9021_v43  ;;  %v13249_v43 = vld [vmem:[#allocation2 + $0x19c] sm:$0xf]  ;;  %v9486_v31 = vld [vmem:[#allocation2 + $0x444] sm:$0xf0]  ;;  %v9393_v36 = vor.u32 %v13309_v27, %v9390_v28 }
  0xaa   :  { %1785 = vmatpush.bf16.msra.mxu1 %v9117_v45  ;;  %v9150_v45 = vld [vmem:[#allocation2 + $0x1a4] sm:$0xf0]  ;;  %v9489_v37 = vor.u32 %v13333_v29, %v9486_v31  ;;  %v13294_v29 = vld [vmem:[#allocation2 + $0x304] sm:$0xf] }
  0xab   :  { %1798 = vmatpush.bf16.msra.mxu2 %v9213_v46  ;;  %v13273_v46 = vld [vmem:[#allocation2 + $0x25c] sm:$0xf]  ;;  %v9153_v52 = vor.u32 %v13249_v43, %v9150_v45  ;;  %v9378_v43 = vld [vmem:[#allocation2 + $0x36c] sm:$0xf0]  ;;  %v13330_v45 = vld [vmem:[#allocation2 + $0x424] sm:$0xf] }
  0xac   :  { %1811 = vmatpush.bf16.msra.mxu3 %v9309_v50  ;;  %v8946_v50 = vld [vmem:[#allocation2 + $0xc] sm:$0xf0]  ;;  %v9630_v27 = vld [vmem:[#allocation2 + $0x564] sm:$0xf0] }
  0xad   :  { %1773 = vmatpush.bf16.msra.mxu0 %v9009_v56  ;;  %v9249_v56 = vor.u32 %v13273_v46, %v9246_v47  ;;  %v8949_v63 = vor.u32 %v13198_v49, %v8946_v50  ;;  %v9474_v47 = vld [vmem:[#allocation2 + $0x42c] sm:$0xf0]  ;;  %v13378_v50 = vld [vmem:[#allocation2 + $0x5a4] sm:$0xf] }
  0xae   :  { %1786 = vmatpush.bf16.msra.mxu1 %v9105_v57  ;;  %v9138_v57 = vld [vmem:[#allocation2 + $0x18c] sm:$0xf0]  ;;  %v9477_v53 = vor.u32 %v13330_v45, %v9474_v47  ;;  %v13221_v45 = vld [vmem:[#allocation2 + $0xb8] sm:$0xf0]  ;;  %s8923_s27 = sshll.u32 %s15724_s15, 4  ;;  %s8924_s27 = int_to_ptr.hbm [resolvable:$true] %s8923_s27 }
  0xaf   :  { %1799 = vmatpush.bf16.msra.mxu2 %v9201_v58  ;;  %v13270_v58 = vld [vmem:[#allocation2 + $0x244] sm:$0xf]  ;;  %v9570_v49 = vld [vmem:[#allocation2 + $0x4ec] sm:$0xf0] }
  0xb0   :  { %1812 = vmatpush.bf16.msra.mxu3 %v9297_v62  ;;  %v13339_v62 = vld [vmem:[#allocation2 + $0x46c] sm:$0xf]  ;;  %v9237_v9 = vor.u32 %v13270_v58, %v9234_v59  ;;  %v9462_v59 = vld [vmem:[#allocation2 + $0x414] sm:$0xf0] }
  0xb1   :  { %1774 = vmatpush.bf16.msra.mxu0 %v8997_v5  ;;  %v9141_v5 = vor.u32 %v13246_v55, %v9138_v57  ;;  %v9513_v11 = vor.u32 %v13339_v62, %v9510_v0  ;;  %v13303_v55 = vld [vmem:[#allocation2 + $0x34c] sm:$0xf] }
  0xb2   :  { %1787 = vmatpush.bf16.msra.mxu1 %v9093_v7  ;;  %v13387_v7 = vld [vmem:[#allocation2 + $0x5ec] sm:$0xf] }
  0xb3   :  { %1800 = vmatpush.bf16.msra.mxu2 %v9189_v8  ;;  %v9702_v8 = vld [vmem:[#allocation2 + $0x5f4] sm:$0xf0]  ;;  %v13327_v57 = vld [vmem:[#allocation2 + $0x40c] sm:$0xf] }
  0xb4   :  { %1813 = vmatpush.bf16.msra.mxu3 %v9285_v12  ;;  %v9609_v12 = vor.u32 %v13363_v1, %v9606_v2  ;;  %v9705_v16 = vor.u32 %v13387_v7, %v9702_v8  ;;  %v13375_v62 = vld [vmem:[#allocation2 + $0x58c] sm:$0xf]  ;;  %v9465_v1 = vor.u32 %v13327_v57, %v9462_v59  ;;  %v9561_v2 = vor.u32 %v13351_v60, %v9558_v61  ;;  %v13324_v7 = vld [vmem:[#allocation2 + $0x3f4] sm:$0xf]  ;;  %v9024_v59 = vld [vmem:[#allocation2 + $0x98] sm:$0xf] }
  0xb5   :  { %1775 = vmatpush.bf16.msra.mxu0 %v8985_v18  ;;  %v13360_v18 = vld [vmem:[#allocation2 + $0x514] sm:$0xf]  ;;  %v13218_v60 = vld [vmem:[#allocation2 + $0xa0] sm:$0xf0]  ;;  %v9120_v61 = vld [vmem:[#allocation2 + $0x158] sm:$0xf] }
  0xb6   :  { %1788 = vmatpush.bf16.msra.mxu1 %v9081_v19  ;;  %v9594_v19 = vld [vmem:[#allocation2 + $0x51c] sm:$0xf0] }
  0xb7   :  { %1801 = vmatpush.bf16.msra.mxu2 %v9177_v22  ;;  %v13384_v22 = vld [vmem:[#allocation2 + $0x5d4] sm:$0xf] }
  0xb8   :  { %1814 = vmatpush.bf16.msra.mxu3 %v9273_v26  ;;  %v9597_v26 = vor.u32 %v13360_v18, %v9594_v19  ;;  %v9693_v30 = vor.u32 %v13384_v22, %v9690_v23  ;;  %v9342_v18 = vld [vmem:[#allocation2 + $0x324] sm:$0xf0]  ;;  %v13321_v19 = vld [vmem:[#allocation2 + $0x3dc] sm:$0xf] }
  0xb9   :  { %1776 = vmatpush.bf16.msra.mxu0 %v8973_v32  ;;  %v13357_v32 = vld [vmem:[#allocation2 + $0x4fc] sm:$0xf]  ;;  %v9438_v23 = vld [vmem:[#allocation2 + $0x3e4] sm:$0xf0]  ;;  %v9345_v28 = vor.u32 %v13297_v17, %v9342_v18  ;;  %v13287_v17 = vld [vmem:[#allocation2 + $0x2c8] sm:$0xf0] }
  0xba   :  { %1789 = vmatpush.bf16.msra.mxu1 %v9069_v33  ;;  %v9582_v33 = vld [vmem:[#allocation2 + $0x504] sm:$0xf0]  ;;  %v9441_v31 = vor.u32 %v13321_v19, %v9438_v23 }
  0xbb   :  { %1802 = vmatpush.bf16.msra.mxu2 %v9165_v34  ;;  %v13381_v34 = vld [vmem:[#allocation2 + $0x5bc] sm:$0xf]  ;;  %v9000_v23 = vld [vmem:[#allocation2 + $0x68] sm:$0xf] }
  0xbc   :  { %1815 = vmatpush.bf16.msra.mxu3 %v9261_v39  ;;  %v9585_v39 = vor.u32 %v13357_v32, %v9582_v33  ;;  %v9681_v46 = vor.u32 %v13381_v34, %v9678_v35  ;;  %v13318_v33 = vld [vmem:[#allocation2 + $0x3c4] sm:$0xf]  ;;  %v9426_v34 = vld [vmem:[#allocation2 + $0x3cc] sm:$0xf0] }
  0xbd   :  { %1777 = vmatpush.bf16.msra.mxu0 %v8961_v48  ;;  %v13354_v48 = vld [vmem:[#allocation2 + $0x4e4] sm:$0xf] }
  0xbe   :  { %1790 = vmatpush.bf16.msra.mxu1 %v9057_v51  ;;  %v9666_v51 = vld [vmem:[#allocation2 + $0x5ac] sm:$0xf0]  ;;  %v9573_v54 = vor.u32 %v13354_v48, %v9570_v49  ;;  %v13342_v35 = vld [vmem:[#allocation2 + $0x484] sm:$0xf]  ;;  %v13245_v48 = vld [vmem:[#allocation2 + $0x178] sm:$0xf0] }
  0xbf   :  { %1803 = vmatpush.bf16.msra.mxu2 %v9153_v52  ;;  %v9381_v52 = vor.u32 %v13306_v40, %v9378_v43  ;;  %v9669_v58 = vor.u32 %v13378_v50, %v9666_v51  ;;  %v9618_v40 = vld [vmem:[#allocation2 + $0x54c] sm:$0xf0]  ;;  %v13269_v50 = vld [vmem:[#allocation2 + $0x238] sm:$0xf0]  ;;  %v9429_v51 = vor.u32 %v13318_v33, %v9426_v34 }
  0xc0   :  { %1816 = vmatpush.bf16.msra.mxu3 %v9249_v56  ;;  %v9366_v56 = vld [vmem:[#allocation2 + $0x354] sm:$0xf0]  ;;  %v9036_v43 = vld [vmem:[#allocation2 + $0xb0] sm:$0xf] }
  0xc1   :  { %1778 = vmatpush.bf16.msra.mxu0 %v8949_v63  ;;  %v9654_v63 = vld [vmem:[#allocation2 + $0x594] sm:$0xf0]  ;;  %v9369_v0 = vor.u32 %v13303_v55, %v9366_v56  ;;  %v9228_v49 = vld [vmem:[#allocation2 + $0x230] sm:$0xf]  ;;  %v9037_v56 = vor.u32 %v13221_v45, %v9036_v43  ;;  %v13257_v45 = vld [vmem:[#allocation2 + $0x1d8] sm:$0xf0] }
  0xc2   :  { %1791 = vmatpush.bf16.msra.mxu1 %v9045_v3  ;;  %v13300_v3 = vld [vmem:[#allocation2 + $0x334] sm:$0xf]  ;;  %v9657_v8 = vor.u32 %v13375_v62, %v9654_v63  ;;  %v13242_v63 = vld [vmem:[#allocation2 + $0x160] sm:$0xf0]  ;;  %v9180_v43 = vld [vmem:[#allocation2 + $0x1d0] sm:$0xf] }
  0xc3   :  { %1804 = vmatpush.bf16.msra.mxu2 %v9141_v5  ;;  %v9354_v5 = vld [vmem:[#allocation2 + $0x33c] sm:$0xf0] }
  0xc4   :  { %1817 = vmatpush.bf16.msra.mxu3 %v9237_v9  ;;  %1779 = vmatmul.bf16.vlgmr.msra.gmra.mxu0 %v15015_v20  ;;  %v9450_v9 = vld [vmem:[#allocation2 + $0x3fc] sm:$0xf0]  ;;  %v9357_v14 = vor.u32 %v13300_v3, %v9354_v5  ;;  %v13290_v3 = vld [vmem:[#allocation2 + $0x2e0] sm:$0xf0]  ;;  %v9025_v5 = vor.u32 %v13218_v60, %v9024_v59 }
  0xc5   :  { %1823 = vmatpush.bf16.msrb.mxu0 %v9417_v10  ;;  %1792 = vmatmul.bf16.vlgmr.msra.gmra.mxu1 %v15018_v21  ;;  %v13348_v10 = vld [vmem:[#allocation2 + $0x4b4] sm:$0xf]  ;;  %v9453_v15 = vor.u32 %v13324_v7, %v9450_v9  ;;  %v9121_v7 = vor.u32 %v13242_v63, %v9120_v61  ;;  %v9012_v9 = vld [vmem:[#allocation2 + $0x80] sm:$0xf]  ;;  %v13278_v59 = vld [vmem:[#allocation2 + $0x280] sm:$0xf0] }
  0xc6   :  { %1836 = vmatpush.bf16.msrb.mxu1 %v9513_v11  ;;  %1805 = vmatmul.bf16.vlgmr.msra.gmra.mxu2 %v15007_v4  ;;  %v9546_v11 = vld [vmem:[#allocation2 + $0x4bc] sm:$0xf0] }
  0xc7   :  { %1849 = vmatpush.bf16.msrb.mxu2 %v9609_v12  ;;  %1818 = vmatmul.bf16.vlgmr.msra.gmra.mxu3 %v15012_v6  ;;  %v13372_v12 = vld [vmem:[#allocation2 + $0x574] sm:$0xf]  ;;  %v8964_v63 = vld [vmem:[#allocation2 + $0x20] sm:$0xf] }
  0xc8   :  { %1862 = vmatpush.bf16.msrb.mxu3 %v9705_v16  ;;  %v9549_v16 = vor.u32 %v13348_v10, %v9546_v11  ;;  %v9645_v22 = vor.u32 %v13372_v12, %v9642_v13  ;;  %v13215_v10 = vld [vmem:[#allocation2 + $0x88] sm:$0xf0]  ;;  %v9108_v11 = vld [vmem:[#allocation2 + $0x140] sm:$0xf] }
  0xc9   :  { %1824 = vmatpush.bf16.msrb.mxu0 %v9405_v24  ;;  %v13345_v24 = vld [vmem:[#allocation2 + $0x49c] sm:$0xf]  ;;  %v13239_v13 = vld [vmem:[#allocation2 + $0x148] sm:$0xf0]  ;;  %v9013_v18 = vor.u32 %v13215_v10, %v9012_v9 }
  0xca   :  { %1837 = vmatpush.bf16.msrb.mxu1 %v9501_v25  ;;  %v9534_v25 = vld [vmem:[#allocation2 + $0x4a4] sm:$0xf0]  ;;  %v9109_v19 = vor.u32 %v13239_v13, %v9108_v11  ;;  %v13275_v9 = vld [vmem:[#allocation2 + $0x268] sm:$0xf0] }
  0xcb   :  { %1850 = vmatpush.bf16.msrb.mxu2 %v9597_v26  ;;  %v13369_v26 = vld [vmem:[#allocation2 + $0x55c] sm:$0xf]  ;;  %v9537_v32 = vor.u32 %v13345_v24, %v9534_v25  ;;  %v13212_v24 = vld [vmem:[#allocation2 + $0x70] sm:$0xf0]  ;;  %v9096_v25 = vld [vmem:[#allocation2 + $0x128] sm:$0xf] }
  0xcc   :  { %1863 = vmatpush.bf16.msrb.mxu3 %v9693_v30  ;;  %v9330_v30 = vld [vmem:[#allocation2 + $0x30c] sm:$0xf0]  ;;  %v8952_v11 = vld [vmem:[#allocation2 + $0x8] sm:$0xf] }
  0xcd   :  { %1825 = vmatpush.bf16.msrb.mxu0 %v9393_v36  ;;  %v9633_v36 = vor.u32 %v13369_v26, %v9630_v27  ;;  %v9333_v47 = vor.u32 %v13294_v29, %v9330_v30  ;;  %v13236_v27 = vld [vmem:[#allocation2 + $0x130] sm:$0xf0]  ;;  %v9288_v30 = vld [vmem:[#allocation2 + $0x2a8] sm:$0xf] }
  0xce   :  { %1838 = vmatpush.bf16.msrb.mxu1 %v9489_v37  ;;  %v9522_v37 = vld [vmem:[#allocation2 + $0x48c] sm:$0xf0]  ;;  %v13260_v29 = vld [vmem:[#allocation2 + $0x1f0] sm:$0xf0]  ;;  %v9097_v33 = vor.u32 %v13236_v27, %v9096_v25  ;;  %v13317_v25 = vld [vmem:[#allocation2 + $0x3b8] sm:$0xf0] }
  0xcf   :  { %1851 = vmatpush.bf16.msrb.mxu2 %v9585_v39  ;;  %v13366_v39 = vld [vmem:[#allocation2 + $0x544] sm:$0xf] }
  0xd0   :  { %1864 = vmatpush.bf16.msrb.mxu3 %v9681_v46  ;;  %v9132_v46 = vld [vmem:[#allocation2 + $0x170] sm:$0xf]  ;;  %v9621_v55 = vor.u32 %v13366_v39, %v9618_v40  ;;  %v13233_v40 = vld [vmem:[#allocation2 + $0x118] sm:$0xf0] }
  0xd1   :  { %1826 = vmatpush.bf16.msrb.mxu0 %v9381_v52  ;;  %v9525_v52 = vor.u32 %v13342_v35, %v9522_v37  ;;  %v9133_v57 = vor.u32 %v13245_v48, %v9132_v46  ;;  %v8988_v35 = vld [vmem:[#allocation2 + $0x50] sm:$0xf] }
  0xd2   :  { %1839 = vmatpush.bf16.msrb.mxu1 %v9477_v53  ;;  %v9324_v53 = vld [vmem:[#allocation2 + $0x2f0] sm:$0xf] }
  0xd3   :  { %1852 = vmatpush.bf16.msrb.mxu2 %v9573_v54  ;;  %v13293_v54 = vld [vmem:[#allocation2 + $0x2f8] sm:$0xf0]  ;;  %v9084_v37 = vld [vmem:[#allocation2 + $0x110] sm:$0xf] }
  0xd4   :  { %1865 = vmatpush.bf16.msrb.mxu3 %v9669_v58  ;;  %v9229_v58 = vor.u32 %v13269_v50, %v9228_v49  ;;  %v9325_v62 = vor.u32 %v13293_v54, %v9324_v53  ;;  %v9276_v46 = vld [vmem:[#allocation2 + $0x290] sm:$0xf]  ;;  %v9085_v49 = vor.u32 %v13233_v40, %v9084_v37  ;;  %v9181_v50 = vor.u32 %v13257_v45, %v9180_v43  ;;  %v9072_v53 = vld [vmem:[#allocation2 + $0xf8] sm:$0xf]  ;;  %v13314_v43 = vld [vmem:[#allocation2 + $0x3a0] sm:$0xf0] }
  0xd5   :  { %1827 = vmatpush.bf16.msrb.mxu0 %v9369_v0  ;;  %v9216_v0 = vld [vmem:[#allocation2 + $0x218] sm:$0xf] }
  0xd6   :  { %1840 = vmatpush.bf16.msrb.mxu1 %v9465_v1  ;;  %v13266_v1 = vld [vmem:[#allocation2 + $0x220] sm:$0xf0]  ;;  %v9408_v40 = vld [vmem:[#allocation2 + $0x398] sm:$0xf] }
  0xd7   :  { %1853 = vmatpush.bf16.msrb.mxu2 %v9561_v2  ;;  %v9312_v2 = vld [vmem:[#allocation2 + $0x2d8] sm:$0xf] }
  0xd8   :  { %1866 = vmatpush.bf16.msrb.mxu3 %v9657_v8  ;;  %v9217_v8 = vor.u32 %v13266_v1, %v9216_v0  ;;  %v9313_v12 = vor.u32 %v13290_v3, %v9312_v2  ;;  %v13203_v0 = vld [vmem:[#allocation2 + $0x28] sm:$0xf0]  ;;  %v9060_v1 = vld [vmem:[#allocation2 + $0xe0] sm:$0xf]  ;;  %v9504_v45 = vld [vmem:[#allocation2 + $0x458] sm:$0xf] }
  0xd9   :  { %1828 = vmatpush.bf16.msrb.mxu0 %v9357_v14  ;;  %v9204_v14 = vld [vmem:[#allocation2 + $0x200] sm:$0xf]  ;;  %v13227_v3 = vld [vmem:[#allocation2 + $0xe8] sm:$0xf0]  ;;  %v8965_v10 = vor.u32 %v13203_v0, %v8964_v63 }
  0xda   :  { %1841 = vmatpush.bf16.msrb.mxu1 %v9453_v15  ;;  %v13263_v15 = vld [vmem:[#allocation2 + $0x208] sm:$0xf0]  ;;  %v9061_v13 = vor.u32 %v13227_v3, %v9060_v1  ;;  %v9384_v3 = vld [vmem:[#allocation2 + $0x368] sm:$0xf] }
  0xdb   :  { %1854 = vmatpush.bf16.msrb.mxu2 %v9549_v16  ;;  %v9300_v16 = vld [vmem:[#allocation2 + $0x2c0] sm:$0xf]  ;;  %v13383_v63 = vld [vmem:[#allocation2 + $0x5c8] sm:$0xf0] }
  0xdc   :  { %1867 = vmatpush.bf16.msrb.mxu3 %v9645_v22  ;;  %v9205_v22 = vor.u32 %v13263_v15, %v9204_v14  ;;  %v9301_v26 = vor.u32 %v13287_v17, %v9300_v16  ;;  %v9048_v15 = vld [vmem:[#allocation2 + $0xc8] sm:$0xf]  ;;  %v13224_v16 = vld [vmem:[#allocation2 + $0xd0] sm:$0xf0] }
  0xdd   :  { %1829 = vmatpush.bf16.msrb.mxu0 %v9345_v28  ;;  %v9192_v28 = vld [vmem:[#allocation2 + $0x1e8] sm:$0xf] }
  0xde   :  { %1842 = vmatpush.bf16.msrb.mxu1 %v9441_v31  ;;  %v13284_v31 = vld [vmem:[#allocation2 + $0x2b0] sm:$0xf0]  ;;  %v9193_v34 = vor.u32 %v13260_v29, %v9192_v28  ;;  %v9144_v17 = vld [vmem:[#allocation2 + $0x188] sm:$0xf]  ;;  %v13341_v28 = vld [vmem:[#allocation2 + $0x478] sm:$0xf0] }
  0xdf   :  { %1855 = vmatpush.bf16.msrb.mxu2 %v9537_v32  ;;  %v9001_v32 = vor.u32 %v13212_v24, %v9000_v23  ;;  %v9289_v39 = vor.u32 %v13284_v31, %v9288_v30  ;;  %v13272_v23 = vld [vmem:[#allocation2 + $0x250] sm:$0xf0]  ;;  %v9420_v24 = vld [vmem:[#allocation2 + $0x3b0] sm:$0xf]  ;;  %v13365_v30 = vld [vmem:[#allocation2 + $0x538] sm:$0xf0]  ;;  %v9049_v31 = vor.u32 %v13224_v16, %v9048_v15 }
  0xe0   :  { %1868 = vmatpush.bf16.msrb.mxu3 %v9633_v36  ;;  %v13209_v36 = vld [vmem:[#allocation2 + $0x58] sm:$0xf0]  ;;  %v9612_v29 = vld [vmem:[#allocation2 + $0x530] sm:$0xf] }
  0xe1   :  { %1830 = vmatpush.bf16.msrb.mxu0 %v9333_v47  ;;  %v13281_v47 = vld [vmem:[#allocation2 + $0x298] sm:$0xf0]  ;;  %v8989_v48 = vor.u32 %v13209_v36, %v8988_v35  ;;  %v9421_v36 = vor.u32 %v13317_v25, %v9420_v24  ;;  %v9468_v15 = vld [vmem:[#allocation2 + $0x410] sm:$0xf] }
  0xe2   :  { %1843 = vmatpush.bf16.msrb.mxu1 %v9429_v51  ;;  %v8976_v51 = vld [vmem:[#allocation2 + $0x38] sm:$0xf]  ;;  %v9277_v54 = vor.u32 %v13281_v47, %v9276_v46  ;;  %v13338_v47 = vld [vmem:[#allocation2 + $0x460] sm:$0xf0] }
  0xe3   :  { %1856 = vmatpush.bf16.msrb.mxu2 %v9525_v52  ;;  %v13206_v52 = vld [vmem:[#allocation2 + $0x40] sm:$0xf0] }
  0xe4   :  { %1869 = vmatpush.bf16.msrb.mxu3 %v9621_v55  ;;  %1831 = vmatmul.bf16.vlgmr.msrb.gmra.mxu0 %v15030_v41  ;;  %v13230_v55 = vld [vmem:[#allocation2 + $0x100] sm:$0xf0]  ;;  %v8977_v60 = vor.u32 %v13206_v52, %v8976_v51  ;;  %v9409_v52 = vor.u32 %v13314_v43, %v9408_v40 }
  0xe5   :  { %1875 = vmatpush.bf16.msra.mxu0 %v9037_v56  ;;  %1844 = vmatmul.bf16.vlgmr.msrb.gmra.mxu1 %v15034_v44  ;;  %v9168_v56 = vld [vmem:[#allocation2 + $0x1b8] sm:$0xf]  ;;  %v9073_v61 = vor.u32 %v13230_v55, %v9072_v53  ;;  %v13386_v51 = vld [vmem:[#allocation2 + $0x5e0] sm:$0xf0]  ;;  %v9505_v53 = vor.u32 %v13338_v47, %v9504_v45  ;;  %v9396_v55 = vld [vmem:[#allocation2 + $0x380] sm:$0xf] }
  0xe6   :  { %1888 = vmatpush.bf16.msra.mxu1 %v9133_v57  ;;  %1857 = vmatmul.bf16.vlgmr.msrb.gmra.mxu2 %v15028_v38  ;;  %v13254_v57 = vld [vmem:[#allocation2 + $0x1c0] sm:$0xf0]  ;;  %v13299_v47 = vld [vmem:[#allocation2 + $0x328] sm:$0xf0] }
  0xe7   :  { %1901 = vmatpush.bf16.msra.mxu2 %v9229_v58  ;;  %1870 = vmatmul.bf16.vlgmr.msrb.gmra.mxu3 %v15032_v42  ;;  %v9264_v58 = vld [vmem:[#allocation2 + $0x278] sm:$0xf] }
  0xe8   :  { %1914 = vmatpush.bf16.msra.mxu3 %v9325_v62  ;;  %v9169_v62 = vor.u32 %v13254_v57, %v9168_v56  ;;  %v9265_v2 = vor.u32 %v13278_v59, %v9264_v58  ;;  %v13311_v56 = vld [vmem:[#allocation2 + $0x388] sm:$0xf0]  ;;  %v9492_v57 = vld [vmem:[#allocation2 + $0x440] sm:$0xf] }
  0xe9   :  { %1876 = vmatpush.bf16.msra.mxu0 %v9025_v5  ;;  %v9156_v5 = vld [vmem:[#allocation2 + $0x1a0] sm:$0xf]  ;;  %v13335_v59 = vld [vmem:[#allocation2 + $0x448] sm:$0xf0]  ;;  %v9397_v0 = vor.u32 %v13311_v56, %v9396_v55 }
  0xea   :  { %1889 = vmatpush.bf16.msra.mxu1 %v9121_v7  ;;  %v13251_v7 = vld [vmem:[#allocation2 + $0x1a8] sm:$0xf0]  ;;  %v9493_v1 = vor.u32 %v13335_v59, %v9492_v57  ;;  %v9636_v55 = vld [vmem:[#allocation2 + $0x560] sm:$0xf]  ;;  %v9336_v59 = vld [vmem:[#allocation2 + $0x308] sm:$0xf] }
  0xeb   :  { %1902 = vmatpush.bf16.msra.mxu2 %v9217_v8  ;;  %v9252_v8 = vld [vmem:[#allocation2 + $0x260] sm:$0xf]  ;;  %v9157_v14 = vor.u32 %v13251_v7, %v9156_v5  ;;  %v13308_v5 = vld [vmem:[#allocation2 + $0x370] sm:$0xf0]  ;;  %v13371_v56 = vld [vmem:[#allocation2 + $0x568] sm:$0xf0] }
  0xec   :  { %1915 = vmatpush.bf16.msra.mxu3 %v9313_v12  ;;  %v13200_v12 = vld [vmem:[#allocation2 + $0x10] sm:$0xf0] }
  0xed   :  { %1877 = vmatpush.bf16.msra.mxu0 %v9013_v18  ;;  %v9253_v18 = vor.u32 %v13275_v9, %v9252_v8  ;;  %v8953_v27 = vor.u32 %v13200_v12, %v8952_v11  ;;  %v13332_v8 = vld [vmem:[#allocation2 + $0x430] sm:$0xf0]  ;;  %v9576_v9 = vld [vmem:[#allocation2 + $0x4e8] sm:$0xf] }
  0xee   :  { %1890 = vmatpush.bf16.msra.mxu1 %v9109_v19  ;;  %v13248_v19 = vld [vmem:[#allocation2 + $0x190] sm:$0xf0]  ;;  %v9672_v11 = vld [vmem:[#allocation2 + $0x5a8] sm:$0xf] }
  0xef   :  { %1903 = vmatpush.bf16.msra.mxu2 %v9205_v22  ;;  %v9240_v22 = vld [vmem:[#allocation2 + $0x248] sm:$0xf] }
  0xf0   :  { %1916 = vmatpush.bf16.msra.mxu3 %v9301_v26  ;;  %v9516_v26 = vld [vmem:[#allocation2 + $0x470] sm:$0xf]  ;;  %v9241_v35 = vor.u32 %v13272_v23, %v9240_v22  ;;  %v13377_v23 = vld [vmem:[#allocation2 + $0x598] sm:$0xf0] }
  0xf1   :  { %1878 = vmatpush.bf16.msra.mxu0 %v9001_v32  ;;  %v9145_v32 = vor.u32 %v13248_v19, %v9144_v17  ;;  %v9517_v37 = vor.u32 %v13341_v28, %v9516_v26  ;;  %v13329_v17 = vld [vmem:[#allocation2 + $0x418] sm:$0xf0]  ;;  %v9660_v22 = vld [vmem:[#allocation2 + $0x590] sm:$0xf]  ;;  %v13302_v28 = vld [vmem:[#allocation2 + $0x340] sm:$0xf0] }
  0xf2   :  { %1891 = vmatpush.bf16.msra.mxu1 %v9097_v33  ;;  %v9708_v33 = vld [vmem:[#allocation2 + $0x5f0] sm:$0xf]  ;;  %v13353_v19 = vld [vmem:[#allocation2 + $0x4d8] sm:$0xf0]  ;;  %v9469_v25 = vor.u32 %v13329_v17, %v9468_v15 }
  0xf3   :  { %1904 = vmatpush.bf16.msra.mxu2 %v9193_v34  ;;  %v13389_v34 = vld [vmem:[#allocation2 + $0x5f8] sm:$0xf0] }
  0xf4   :  { %1917 = vmatpush.bf16.msra.mxu3 %v9289_v39  ;;  %v9613_v39 = vor.u32 %v13365_v30, %v9612_v29  ;;  %v9709_v46 = vor.u32 %v13389_v34, %v9708_v33  ;;  %v9456_v29 = vld [vmem:[#allocation2 + $0x3f8] sm:$0xf]  ;;  %v9661_v30 = vor.u32 %v13377_v23, %v9660_v22  ;;  %v13350_v33 = vld [vmem:[#allocation2 + $0x4c0] sm:$0xf0]  ;;  %v9784_v22 = vld [vmem:[#allocation7 + $0x90] sm:$0xf] }
  0xf5   :  { %1879 = vmatpush.bf16.msra.mxu0 %v8989_v48  ;;  %v9600_v48 = vld [vmem:[#allocation2 + $0x518] sm:$0xf]  ;;  %v13409_v23 = vld [vmem:[#allocation7 + $0x98] sm:$0xf0] }
  0xf6   :  { %1892 = vmatpush.bf16.msra.mxu1 %v9085_v49  ;;  %v13362_v49 = vld [vmem:[#allocation2 + $0x520] sm:$0xf0]  ;;  %v9648_v34 = vld [vmem:[#allocation2 + $0x578] sm:$0xf] }
  0xf7   :  { %1905 = vmatpush.bf16.msra.mxu2 %v9181_v50  ;;  %v9696_v50 = vld [vmem:[#allocation2 + $0x5d8] sm:$0xf] }
  0xf8   :  { %1918 = vmatpush.bf16.msra.mxu3 %v9277_v54  ;;  %v9601_v54 = vor.u32 %v13362_v49, %v9600_v48  ;;  %v9697_v58 = vor.u32 %v13386_v51, %v9696_v50  ;;  %v9444_v48 = vld [vmem:[#allocation2 + $0x3e0] sm:$0xf]  ;;  %v13323_v51 = vld [vmem:[#allocation2 + $0x3e8] sm:$0xf0] }
  0xf9   :  { %1880 = vmatpush.bf16.msra.mxu0 %v8977_v60  ;;  %v9588_v60 = vld [vmem:[#allocation2 + $0x500] sm:$0xf] }
  0xfa   :  { %1893 = vmatpush.bf16.msra.mxu1 %v9073_v61  ;;  %v13359_v61 = vld [vmem:[#allocation2 + $0x508] sm:$0xf0] }
  0xfb   :  { %1906 = vmatpush.bf16.msra.mxu2 %v9169_v62  ;;  %v9684_v62 = vld [vmem:[#allocation2 + $0x5c0] sm:$0xf] }
  0xfc   :  { %1919 = vmatpush.bf16.msra.mxu3 %v9265_v2  ;;  %v9589_v2 = vor.u32 %v13359_v61, %v9588_v60  ;;  %v9685_v7 = vor.u32 %v13383_v63, %v9684_v62  ;;  %v9445_v60 = vor.u32 %v13323_v51, %v9444_v48  ;;  %v13296_v62 = vld [vmem:[#allocation2 + $0x310] sm:$0xf0]  ;;  %v9432_v63 = vld [vmem:[#allocation2 + $0x3c8] sm:$0xf] }
  0xfd   :  { %1881 = vmatpush.bf16.msra.mxu0 %v8965_v10  ;;  %v13356_v10 = vld [vmem:[#allocation2 + $0x4f0] sm:$0xf0] }
  0xfe   :  { %1894 = vmatpush.bf16.msra.mxu1 %v9061_v13  ;;  %v9372_v13 = vld [vmem:[#allocation2 + $0x350] sm:$0xf]  ;;  %v9880_v51 = vld [vmem:[#allocation7 + $0x150] sm:$0xf] }
  0xff   :  { %1907 = vmatpush.bf16.msra.mxu2 %v9157_v14  ;;  %v13305_v14 = vld [vmem:[#allocation2 + $0x358] sm:$0xf0] }
 0x100   :  { %1920 = vmatpush.bf16.msra.mxu3 %v9253_v18  ;;  %v9564_v18 = vld [vmem:[#allocation2 + $0x4d0] sm:$0xf]  ;;  %v9373_v24 = vor.u32 %v13305_v14, %v9372_v13 }
 0x101   :  { %1882 = vmatpush.bf16.msra.mxu0 %v8953_v27  ;;  %v9565_v26 = vor.u32 %v13353_v19, %v9564_v18  ;;  %v9360_v27 = vld [vmem:[#allocation2 + $0x338] sm:$0xf] }
 0x102   :  { %1895 = vmatpush.bf16.msra.mxu1 %v9049_v31  ;;  %v13326_v31 = vld [vmem:[#allocation2 + $0x400] sm:$0xf0] }
 0x103   :  { %1908 = vmatpush.bf16.msra.mxu2 %v9145_v32  ;;  %v9552_v32 = vld [vmem:[#allocation2 + $0x4b8] sm:$0xf]  ;;  %v9457_v43 = vor.u32 %v13326_v31, %v9456_v29  ;;  %v9772_v31 = vld [vmem:[#allocation7 + $0x78] sm:$0xf] }
 0x104   :  { %1921 = vmatpush.bf16.msra.mxu3 %v9241_v35  ;;  %1883 = vmatmul.bf16.vlgmr.msra.gmra.mxu0 %v15015_v20  ;;  %v13380_v20 = vld [vmem:[#allocation2 + $0x5b0] sm:$0xf0]  ;;  %v13374_v35 = vld [vmem:[#allocation2 + $0x580] sm:$0xf0]  ;;  %v9553_v45 = vor.u32 %v13350_v33, %v9552_v32  ;;  %v13406_v32 = vld [vmem:[#allocation7 + $0x80] sm:$0xf0] }
 0x105   :  { %1927 = vmatpush.bf16.msrb.mxu0 %v9421_v36  ;;  %1896 = vmatmul.bf16.vlgmr.msra.gmra.mxu1 %v15018_v21  ;;  %v9577_v21 = vor.u32 %v13356_v10, %v9576_v9  ;;  %v9673_v16 = vor.u32 %v13380_v20, %v9672_v11  ;;  %v9649_v50 = vor.u32 %v13374_v35, %v9648_v34  ;;  %v13411_v20 = vld [vmem:[#allocation7 + $0xac] sm:$0xf]  ;;  %v13405_v34 = vld [vmem:[#allocation7 + $0x7c] sm:$0xf]  ;;  %v9774_v35 = vld [vmem:[#allocation7 + $0x84] sm:$0xf0] }
 0x106   :  { %1940 = vmatpush.bf16.msrb.mxu1 %v9517_v37  ;;  %1909 = vmatmul.bf16.vlgmr.msra.gmra.mxu2 %v15007_v4  ;;  %v9480_v4 = vld [vmem:[#allocation2 + $0x428] sm:$0xf]  ;;  %v9361_v37 = vor.u32 %v13302_v28, %v9360_v27  ;;  %v9337_v11 = vor.u32 %v13296_v62, %v9336_v59  ;;  %v9892_v27 = vld [vmem:[#allocation7 + $0x168] sm:$0xf]  ;;  %v13436_v28 = vld [vmem:[#allocation7 + $0x170] sm:$0xf0] }
 0x107   :  { %1953 = vmatpush.bf16.msrb.mxu2 %v9613_v39  ;;  %1922 = vmatmul.bf16.vlgmr.msra.gmra.mxu3 %v15012_v6  ;;  %v9385_v6 = vor.u32 %v13308_v5, %v9384_v3  ;;  %v9481_v12 = vor.u32 %v13332_v8, %v9480_v4  ;;  %v15052_v39 = vld [vmem:[#allocation5] sm:$0x7]  ;;  %v13344_v3 = vld [vmem:[#allocation2 + $0x490] sm:$0xf0]  ;;  %v9624_v5 = vld [vmem:[#allocation2 + $0x548] sm:$0xf]  ;;  %v9893_v33 = vor.u32 %v13436_v28, %v9892_v27 }
 0x108   :  { %1966 = vmatpush.bf16.msrb.mxu3 %v9709_v46  ;;  %v1676_v36 = vpop.f32.mrf.mxu0  ;;  %v9348_v46 = vld [vmem:[#allocation2 + $0x320] sm:$0xf]  ;;  %v609_v57 = vperm.slane %v15052_v39, 0  ;;  %v13368_v4 = vld [vmem:[#allocation2 + $0x550] sm:$0xf0] }
 0x109   :  { %1928 = vmatpush.bf16.msrb.mxu0 %v9409_v52  ;;  %v1689_v40 = vpop.f32.mrf.mxu1  ;;  %v9540_v52 = vld [vmem:[#allocation2 + $0x4a0] sm:$0xf]  ;;  %v13412_v8 = vld [vmem:[#allocation7 + $0xb0] sm:$0xf0]  ;;  %v9625_v15 = vor.u32 %v13368_v4, %v9624_v5  ;;  %v9736_v59 = vld [vmem:[#allocation7 + $0x30] sm:$0xf] }
 0x10a   :  { %1941 = vmatpush.bf16.msrb.mxu1 %v9505_v53  ;;  %v13347_v53 = vld [vmem:[#allocation2 + $0x4a8] sm:$0xf0]  ;;  %v1677_v9 = vadd.f32 %v1676_v36, %v609_v57  ;;  %v9773_v36 = vor.u32 %v13406_v32, %v9772_v31  ;;  %v13435_v28 = vld [vmem:[#allocation7 + $0x16c] sm:$0xf]  ;;  %v9900_v31 = vld [vmem:[#allocation7 + $0x170] sm:$0xf] }
 0x10b   :  { %1954 = vmatpush.bf16.msrb.mxu2 %v9601_v54  ;;  %v9541_v61 = vor.u32 %v13347_v53, %v9540_v52  ;;  %v13433_v52 = vld [vmem:[#allocation7 + $0x158] sm:$0xf0]  ;;  %v13399_v53 = vld [vmem:[#allocation7 + $0x4c] sm:$0xf] }
 0x10c   :  { %1967 = vmatpush.bf16.msrb.mxu3 %v9697_v58  ;;  %v1702_v49 = vpop.f32.mrf.mxu2  ;;  %v9349_v58 = vor.u32 %v13299_v47, %v9348_v46  ;;  %v1690_v19 = vadd.f32 %v1689_v40, %v1677_v9  ;;  %v9760_v40 = vld [vmem:[#allocation7 + $0x60] sm:$0xf]  ;;  %v9762_v46 = vld [vmem:[#allocation7 + $0x6c] sm:$0xf0]  ;;  %v13427_v9 = vld [vmem:[#allocation7 + $0x128] sm:$0xf0] }
 0x10d   :  { %1929 = vmatpush.bf16.msrb.mxu0 %v9397_v0  ;;  %v15054_v54 = vpop.f32.mrf.mxu3  ;;  %v13320_v0 = vld [vmem:[#allocation2 + $0x3d0] sm:$0xf0]  ;;  %v13437_v32 = vld [vmem:[#allocation7 + $0x178] sm:$0xf0] }
 0x10e   :  { %1942 = vmatpush.bf16.msrb.mxu1 %v9493_v1  ;;  %v9637_v1 = vor.u32 %v13371_v56, %v9636_v55  ;;  %v9750_v55 = vld [vmem:[#allocation7 + $0x54] sm:$0xf0]  ;;  %v9881_v56 = vor.u32 %v13433_v52, %v9880_v51  ;;  %v13426_v51 = vld [vmem:[#allocation7 + $0x124] sm:$0xf]  ;;  %v9858_v52 = vld [vmem:[#allocation7 + $0x12c] sm:$0xf0] }
 0x10f   :  { %1955 = vmatpush.bf16.msrb.mxu2 %v9589_v2  ;;  %v9528_v2 = vld [vmem:[#allocation2 + $0x488] sm:$0xf] }
 0x110   :  { %1968 = vmatpush.bf16.msrb.mxu3 %v9685_v7  ;;  %v9796_v7 = vld [vmem:[#allocation7 + $0xa8] sm:$0xf]  ;;  %v1678_v10 = vpop.f32.mrf.mxu0  ;;  %v9529_v13 = vor.u32 %v13344_v3, %v9528_v2  ;;  %v13430_v2 = vld [vmem:[#allocation7 + $0x140] sm:$0xf0] }
 0x111   :  { %1930 = vmatpush.bf16.msrb.mxu0 %v9385_v6  ;;  %v9798_v6 = vld [vmem:[#allocation7 + $0xb4] sm:$0xf0] }
 0x112   :  { %1943 = vmatpush.bf16.msrb.mxu1 %v9481_v12  ;;  %v1691_v12 = vpop.f32.mrf.mxu1  ;;  %v9801_v18 = vor.u32 %v13411_v20, %v9798_v6  ;;  %v13394_v20 = vld [vmem:[#allocation7 + $0x20] sm:$0xf0] }
 0x113   :  { %1956 = vmatpush.bf16.msrb.mxu2 %v9577_v21  ;;  %v9433_v21 = vor.u32 %v13320_v0, %v9432_v63  ;;  %v9738_v63 = vld [vmem:[#allocation7 + $0x3c] sm:$0xf0] }
 0x114   :  { %1969 = vmatpush.bf16.msrb.mxu3 %v9673_v16  ;;  %v1704_v14 = vpop.f32.mrf.mxu2  ;;  %v9797_v16 = vor.u32 %v13412_v8, %v9796_v7  ;;  %v9856_v8 = vld [vmem:[#allocation7 + $0x120] sm:$0xf] }
 0x115   :  { %1931 = vmatpush.bf16.msrb.mxu0 %v9373_v24  ;;  %v1717_v17 = vpop.f32.mrf.mxu3  ;;  %v13408_v24 = vld [vmem:[#allocation7 + $0x94] sm:$0xf]  ;;  %v9857_v12 = vor.u32 %v13427_v9, %v9856_v8  ;;  %v13422_v9 = vld [vmem:[#allocation7 + $0x100] sm:$0xf0] }
 0x116   :  { %1944 = vmatpush.bf16.msrb.mxu1 %v9469_v25  ;;  %v9786_v25 = vld [vmem:[#allocation7 + $0x9c] sm:$0xf0]  ;;  %v13424_v17 = vld [vmem:[#allocation7 + $0x110] sm:$0xf0] }
 0x117   :  { %1957 = vmatpush.bf16.msrb.mxu2 %v9565_v26  ;;  %v9785_v26 = vor.u32 %v13409_v23, %v9784_v22  ;;  %v9789_v29 = vor.u32 %v13408_v24, %v9786_v25  ;;  %v13391_v22 = vld [vmem:[#allocation7 + $0x8] sm:$0xf0]  ;;  %v13390_v23 = vld [vmem:[#allocation7 + $0x4] sm:$0xf] }
 0x118   :  { %1970 = vmatpush.bf16.msrb.mxu3 %v9661_v30  ;;  %v1703_v30 = vadd.f32 %v1702_v49, %v1690_v19  ;;  %v13400_v49 = vld [vmem:[#allocation7 + $0x50] sm:$0xf0]  ;;  %v9712_v19 = vld [vmem:[#allocation7] sm:$0xf] }
 0x119   :  { %1932 = vmatpush.bf16.msrb.mxu0 %v9361_v37 }
 0x11a   :  { %1945 = vmatpush.bf16.msrb.mxu1 %v9457_v43  ;;  %v1716_v37 = vadd.f32 %v15054_v54, %v1703_v30  ;;  %v13403_v43 = vld [vmem:[#allocation7 + $0x68] sm:$0xf0] }
 0x11b   :  { %1958 = vmatpush.bf16.msrb.mxu2 %v9553_v45  ;;  %v13402_v45 = vld [vmem:[#allocation7 + $0x64] sm:$0xf]  ;;  %v9761_v47 = vor.u32 %v13403_v43, %v9760_v40  ;;  %v9888_v43 = vld [vmem:[#allocation7 + $0x158] sm:$0xf] }
 0x11c   :  { %1971 = vmatpush.bf16.msrb.mxu3 %v9649_v50 }
 0x11d   :  { %1933 = vmatpush.bf16.msrb.mxu0 %v9349_v58  ;;  %v9753_v58 = vor.u32 %v13399_v53, %v9750_v55  ;;  %v9864_v53 = vld [vmem:[#allocation7 + $0x128] sm:$0xf]  ;;  %v13428_v55 = vld [vmem:[#allocation7 + $0x130] sm:$0xf0] }
 0x11e   :  { %1946 = vmatpush.bf16.msrb.mxu1 %v9445_v60  ;;  %v13397_v60 = vld [vmem:[#allocation7 + $0x38] sm:$0xf0] }
 0x11f   :  { %1959 = vmatpush.bf16.msrb.mxu2 %v9541_v61  ;;  %v13396_v61 = vld [vmem:[#allocation7 + $0x34] sm:$0xf]  ;;  %v9737_v4 = vor.u32 %v13397_v60, %v9736_v59  ;;  %v9846_v59 = vld [vmem:[#allocation7 + $0x114] sm:$0xf0]  ;;  %v9852_v60 = vld [vmem:[#allocation7 + $0x110] sm:$0xf] }
 0x120   :  { %1972 = vmatpush.bf16.msrb.mxu3 %v9637_v1  ;;  %v9868_v1 = vld [vmem:[#allocation7 + $0x138] sm:$0xf]  ;;  %v9741_v10 = vor.u32 %v13396_v61, %v9738_v63  ;;  %v9832_v63 = vld [vmem:[#allocation7 + $0xf0] sm:$0xf] }
 0x121   :  { %1934 = vmatpush.bf16.msrb.mxu0 %v9337_v11  ;;  %v1728_v48 = vpop.f32.mrf.mxu0  ;;  %v9869_v5 = vor.u32 %v13430_v2, %v9868_v1  ;;  %v9724_v11 = vld [vmem:[#allocation7 + $0x18] sm:$0xf] }
 0x122   :  { %1947 = vmatpush.bf16.msrb.mxu1 %v9433_v21  ;;  %v1729_v50 = vadd.f32 %v1728_v48, %v1716_v37  ;;  %v13393_v21 = vld [vmem:[#allocation7 + $0x1c] sm:$0xf]  ;;  %v13432_v37 = vld [vmem:[#allocation7 + $0x154] sm:$0xf]  ;;  %v9870_v48 = vld [vmem:[#allocation7 + $0x144] sm:$0xf0] }
 0x123   :  { %1960 = vmatpush.bf16.msrb.mxu2 %v9529_v13  ;;  %v9726_v13 = vld [vmem:[#allocation7 + $0x24] sm:$0xf0] }
 0x124   :  { %1973 = vmatpush.bf16.msrb.mxu3 %v9625_v15  ;;  %1935 = vmatmul.bf16.vlgmr.msrb.gmra.mxu0 %v15030_v41  ;;  %v9777_v41 = vor.u32 %v13405_v34, %v9774_v35  ;;  %v9725_v15 = vor.u32 %v13394_v20, %v9724_v11  ;;  %v13418_v11 = vld [vmem:[#allocation7 + $0xe0] sm:$0xf0] }
 0x125   :  { %2473 = vmatpush.bf16.msra.mxu0 %v9797_v16  ;;  %1948 = vmatmul.bf16.vlgmr.msrb.gmra.mxu1 %v15034_v44  ;;  %v9748_v44 = vld [vmem:[#allocation7 + $0x48] sm:$0xf] }
 0x126   :  { %1961 = vmatmul.bf16.vlgmr.msrb.gmra.mxu2 %v15028_v38  ;;  %2486 = vmatpush.bf16.msra.mxu1 %v9893_v33  ;;  %v9765_v38 = vor.u32 %v13402_v45, %v9762_v46  ;;  %v9749_v57 = vor.u32 %v13400_v49, %v9748_v44  ;;  %v9844_v16 = vld [vmem:[#allocation7 + $0x108] sm:$0xf]  ;;  %v9713_v33 = vor.u32 %v13391_v22, %v9712_v19  ;;  %v13434_v45 = vld [vmem:[#allocation7 + $0x160] sm:$0xf0]  ;;  %v13429_v44 = vld [vmem:[#allocation7 + $0x13c] sm:$0xf] }
 0x127   :  { %1974 = vmatmul.bf16.vlgmr.msrb.gmra.mxu3 %v15032_v42  ;;  %v1741_v42 = vpop.f32.mrf.mxu1  ;;  %v9845_v25 = vor.u32 %v13424_v17, %v9844_v16  ;;  %v13431_v49 = vld [vmem:[#allocation7 + $0x148] sm:$0xf0]  ;;  %v9828_v16 = vld [vmem:[#allocation7 + $0xe0] sm:$0xf] }
 0x128   :  { %2512 = vmatpush.bf16.msra.mxu3 %v9801_v18  ;;  %v1742_v54 = vadd.f32 %v1741_v42, %v1729_v50  ;;  %v9729_v18 = vor.u32 %v13393_v21, %v9726_v13  ;;  %v9873_v50 = vor.u32 %v13429_v44, %v9870_v48  ;;  %v9808_v19 = vld [vmem:[#allocation7 + $0xc0] sm:$0xf]  ;;  %v13415_v22 = vld [vmem:[#allocation7 + $0xc8] sm:$0xf0]  ;;  %v13454_v44 = vld [vmem:[#allocation7 + $0x200] sm:$0xf0] }
 0x129   :  { %2474 = vmatpush.bf16.msra.mxu0 %v9785_v26  ;;  %v1754_v62 = vpop.f32.mrf.mxu2  ;;  %v1730_v7 = vpop.f32.mrf.mxu0  ;;  %v9714_v26 = vld [vmem:[#allocation7 + $0xc] sm:$0xf0] }
 0x12a   :  { %2487 = vmatpush.bf16.msra.mxu1 %v9881_v56  ;;  %v1767_v0 = vpop.f32.mrf.mxu3  ;;  %v1755_v3 = vadd.f32 %v1754_v62, %v1742_v54  ;;  %v9717_v34 = vor.u32 %v13390_v23, %v9714_v26  ;;  %v9861_v56 = vor.u32 %v13426_v51, %v9858_v52  ;;  %v13425_v62 = vld [vmem:[#allocation7 + $0x118] sm:$0xf0]  ;;  %v9840_v7 = vld [vmem:[#allocation7 + $0xf8] sm:$0xf]  ;;  %v9809_v23 = vor.u32 %v13415_v22, %v9808_v19  ;;  %v13414_v26 = vld [vmem:[#allocation7 + $0xc4] sm:$0xf] }
 0x12b   :  { %v9841_v13 = vor.u32 %v13422_v9, %v9840_v7  ;;  %v9940_v52 = vld [vmem:[#allocation7 + $0x1c8] sm:$0xf]  ;;  %v9804_v19 = vld [vmem:[#allocation7 + $0xb0] sm:$0xf]  ;;  %v13413_v22 = vld [vmem:[#allocation7 + $0xb8] sm:$0xf0] }
 0x12c   :  { %2513 = vmatpush.bf16.msra.mxu3 %v9789_v29  ;;  %v1768_v14 = vadd.f32 %v1767_v0, %v1755_v3  ;;  %v9894_v29 = vld [vmem:[#allocation7 + $0x174] sm:$0xf0]  ;;  %v13421_v0 = vld [vmem:[#allocation7 + $0xf8] sm:$0xf0]  ;;  %v9853_v3 = vor.u32 %v13425_v62, %v9852_v60 }
 0x12d   :  { %2475 = vmatpush.bf16.msra.mxu0 %v9773_v36  ;;  %v9897_v35 = vor.u32 %v13435_v28, %v9894_v29  ;;  %v9901_v36 = vor.u32 %v13437_v32, %v9900_v31  ;;  %v9833_v1 = vor.u32 %v13421_v0, %v9832_v63  ;;  %v9810_v28 = vld [vmem:[#allocation7 + $0xcc] sm:$0xf0]  ;;  %v9816_v29 = vld [vmem:[#allocation7 + $0xc8] sm:$0xf]  ;;  %v9916_v63 = vld [vmem:[#allocation7 + $0x198] sm:$0xf] }
 0x12e   :  { %2488 = vmatpush.bf16.msra.mxu1 %v9869_v5  ;;  %v1979_v30 = vmax.f32 %v1768_v14, 0.0  ;;  %v13420_v5 = vld [vmem:[#allocation7 + $0xf4] sm:$0xf]  ;;  %v13417_v14 = vld [vmem:[#allocation7 + $0xdc] sm:$0xf] }
 0x12f   :  { %v1743_v6 = vpop.f32.mrf.mxu1  ;;  %v9988_v32 = vld [vmem:[#allocation7 + $0x228] sm:$0xf]  ;;  %v13442_v0 = vld [vmem:[#allocation7 + $0x1a0] sm:$0xf0] }
 0x130   :  { %2514 = vmatpush.bf16.msra.mxu3 %v9777_v41  ;;  %v9882_v41 = vld [vmem:[#allocation7 + $0x15c] sm:$0xf0]  ;;  %v15062_v40 = vpack.c.bf16 %v1979_v30, %v1979_v30  ;;  %v13416_v30 = vld [vmem:[#allocation7 + $0xd0] sm:$0xf0]  ;;  %v9917_v9 = vor.u32 %v13442_v0, %v9916_v63  ;;  %v13401_v63 = vld [vmem:[#allocation7 + $0x58] sm:$0xf0] }
 0x131   :  { %2476 = vmatpush.bf16.msra.mxu0 %v9761_v47  ;;  %v1756_v24 = vpop.f32.mrf.mxu2  ;;  %v9885_v46 = vor.u32 %v13432_v37, %v9882_v41  ;;  %v9889_v47 = vor.u32 %v13434_v45, %v9888_v43  ;;  %v13457_v37 = vld [vmem:[#allocation7 + $0x218] sm:$0xf0]  ;;  %v9813_v43 = vor.u32 %v13414_v26, %v9810_v28  ;;  %v9817_v45 = vor.u32 %v13416_v30, %v9816_v29  ;;  %v9936_v0 = vld [vmem:[#allocation7 + $0x1b8] sm:$0xf] }
 0x132   :  { %2489 = vmatpush.bf16.msra.mxu1 %v9857_v12  ;;  %v1769_v27 = vpop.f32.mrf.mxu3  ;;  %v610_v24 = vperm.slane %v15052_v39, 1  ;;  %v13453_v26 = vld [vmem:[#allocation7 + $0x1fc] sm:$0xf]  ;;  %v9805_v29 = vor.u32 %v13413_v22, %v9804_v19 }
 0x134   :  { %2515 = vmatpush.bf16.msra.mxu3 %v9765_v38  ;;  %v9876_v38 = vld [vmem:[#allocation7 + $0x140] sm:$0xf] }
 0x135   :  { %2477 = vmatpush.bf16.msra.mxu0 %v9749_v57  ;;  %v9877_v42 = vor.u32 %v13431_v49, %v9876_v38  ;;  %v9865_v57 = vor.u32 %v13428_v55, %v9864_v53  ;;  %v9952_v49 = vld [vmem:[#allocation7 + $0x1e0] sm:$0xf]  ;;  %v13448_v53 = vld [vmem:[#allocation7 + $0x1d0] sm:$0xf0] }
 0x136   :  { %2490 = vmatpush.bf16.msra.mxu1 %v9845_v25 }
 0x138   :  { %2516 = vmatpush.bf16.msra.mxu3 %v9753_v58  ;;  %v13423_v58 = vld [vmem:[#allocation7 + $0x10c] sm:$0xf] }
 0x139   :  { %2478 = vmatpush.bf16.msra.mxu0 %v9737_v4  ;;  %v9849_v2 = vor.u32 %v13423_v58, %v9846_v59  ;;  %v9834_v4 = vld [vmem:[#allocation7 + $0xfc] sm:$0xf0] }
 0x13a   :  { %2491 = vmatpush.bf16.msra.mxu1 %v9833_v1  ;;  %v9837_v12 = vor.u32 %v13420_v5, %v9834_v4  ;;  %v13459_v1 = vld [vmem:[#allocation7 + $0x22c] sm:$0xf]  ;;  %v9996_v5 = vld [vmem:[#allocation7 + $0x230] sm:$0xf]  ;;  %v13461_v4 = vld [vmem:[#allocation7 + $0x238] sm:$0xf0] }
 0x13c   :  { %2517 = vmatpush.bf16.msra.mxu3 %v9741_v10  ;;  %v9820_v10 = vld [vmem:[#allocation7 + $0xd8] sm:$0xf] }
 0x13d   :  { %2479 = vmatpush.bf16.msra.mxu0 %v9725_v15  ;;  %v9821_v6 = vor.u32 %v13418_v11, %v9820_v10  ;;  %v9822_v15 = vld [vmem:[#allocation7 + $0xe4] sm:$0xf0]  ;;  %v9997_v11 = vor.u32 %v13461_v4, %v9996_v5  ;;  %v13476_v4 = vld [vmem:[%s15720_s10 + $0x74] sm:$0xf] }
 0x13e   :  { %v9825_v25 = vor.u32 %v13417_v14, %v9822_v15  ;;  %v13439_v14 = vld [vmem:[#allocation7 + $0x188] sm:$0xf0] }
 0x13f   :  { %2492 = vmatpush.bf16.msra.mxu1 %v9821_v6  ;;  %v9904_v6 = vld [vmem:[#allocation7 + $0x180] sm:$0xf] }
 0x140   :  { %2518 = vmatpush.bf16.msra.mxu3 %v9729_v18  ;;  %v13419_v18 = vld [vmem:[#allocation7 + $0xe8] sm:$0xf0] }
 0x141   :  { %2480 = vmatpush.bf16.msra.mxu0 %v9713_v33  ;;  %v1780_v54 = vpop.f32.mrf.mxu0  ;;  %v9829_v27 = vor.u32 %v13419_v18, %v9828_v16  ;;  %v13460_v33 = vld [vmem:[#allocation7 + $0x230] sm:$0xf0]  ;;  %v9984_v16 = vld [vmem:[#allocation7 + $0x218] sm:$0xf] }
 0x142   :  { %v1793_v61 = vpop.f32.mrf.mxu1  ;;  %v1781_v41 = vadd.f32 %v1780_v54, %v610_v24  ;;  %v9928_v54 = vld [vmem:[#allocation7 + $0x1b0] sm:$0xf] }
 0x143   :  { %2493 = vmatpush.bf16.msra.mxu1 %v9809_v23 }
 0x144   :  { %2519 = vmatpush.bf16.msra.mxu3 %v9717_v34  ;;  %2481 = vmatmul.bf16.vlgmr.msra.gmra.mxu0 %v15062_v40  ;;  %v9976_v34 = vld [vmem:[#allocation7 + $0x210] sm:$0xf]  ;;  %v1794_v48 = vadd.f32 %v1793_v61, %v1781_v41 }
 0x145   :  { %2525 = vmatpush.bf16.msrb.mxu0 %v9897_v35  ;;  %v9954_v41 = vld [vmem:[#allocation7 + $0x1ec] sm:$0xf0] }
 0x147   :  { %2520 = vmatmul.bf16.vlgmr.msra.gmra.mxu3 %v15062_v40 }
 0x148   :  { %2564 = vmatpush.bf16.msrb.mxu3 %v9901_v36  ;;  %v9989_v36 = vor.u32 %v13460_v33, %v9988_v32  ;;  %v9972_v32 = vld [vmem:[#allocation7 + $0x200] sm:$0xf]  ;;  %v13455_v33 = vld [vmem:[#allocation7 + $0x208] sm:$0xf0] }
 0x149   :  { %2526 = vmatpush.bf16.msrb.mxu0 %v9885_v46  ;;  %v1806_v8 = vpop.f32.mrf.mxu2  ;;  %v1782_v21 = vpop.f32.mrf.mxu0  ;;  %v9977_v46 = vor.u32 %v13457_v37, %v9976_v34  ;;  %v13450_v37 = vld [vmem:[#allocation7 + $0x1e4] sm:$0xf] }
 0x14a   :  { %v1819_v20 = vpop.f32.mrf.mxu3  ;;  %v1795_v17 = vpop.f32.mrf.mxu1  ;;  %2499 = vmatpush.bf16.msra.mxu2 %v9989_v36  ;;  %v9973_v36 = vor.u32 %v13455_v33, %v9972_v32  ;;  %v10056_v33 = vld [vmem:[%s15720_s10 + $0x70] sm:$0xf] }
 0x14b   :  { %v13458_v17 = vld [vmem:[#allocation7 + $0x220] sm:$0xf0] }
 0x14c   :  { %2565 = vmatpush.bf16.msrb.mxu3 %v9889_v47  ;;  %v9964_v47 = vld [vmem:[#allocation7 + $0x1f8] sm:$0xf]  ;;  %v9985_v23 = vor.u32 %v13458_v17, %v9984_v16  ;;  %v13474_v16 = vld [vmem:[%s15720_s10 + $0x64] sm:$0xf]  ;;  %v10050_v17 = vld [vmem:[%s15720_s10 + $0x68] sm:$0xf0] }
 0x14d   :  { %2527 = vmatpush.bf16.msrb.mxu0 %v9873_v50  ;;  %v9965_v38 = vor.u32 %v13454_v44, %v9964_v47  ;;  %v13451_v50 = vld [vmem:[#allocation7 + $0x1e8] sm:$0xf0]  ;;  %v9957_v44 = vor.u32 %v13450_v37, %v9954_v41  ;;  %v10053_v19 = vor.u32 %v13474_v16, %v10050_v17  ;;  %v10042_v41 = vld [vmem:[%s15720_s10 + $0x58] sm:$0xf0] }
 0x14e   :  { %2500 = vmatpush.bf16.msra.mxu2 %v9977_v46  ;;  %v9953_v51 = vor.u32 %v13451_v50, %v9952_v49  ;;  %v13452_v46 = vld [vmem:[#allocation7 + $0x1f0] sm:$0xf0]  ;;  %v13447_v50 = vld [vmem:[#allocation7 + $0x1cc] sm:$0xf]  ;;  %v10010_v17 = vld [vmem:[%s15720_s10 + $0x18] sm:$0xf0] }
 0x150   :  { %2566 = vmatpush.bf16.msrb.mxu3 %v9877_v42  ;;  %v1807_v42 = vadd.f32 %v1806_v8, %v1794_v48  ;;  %v9780_v48 = vld [vmem:[#allocation7 + $0x80] sm:$0xf] }
 0x151   :  { %2528 = vmatpush.bf16.msrb.mxu0 %v9861_v56  ;;  %v1808_v31 = vpop.f32.mrf.mxu2  ;;  %v9941_v56 = vor.u32 %v13448_v53, %v9940_v52  ;;  %v13449_v52 = vld [vmem:[#allocation7 + $0x1d8] sm:$0xf0] }
 0x152   :  { %v1821_v35 = vpop.f32.mrf.mxu3  ;;  %2501 = vmatpush.bf16.msra.mxu2 %v9965_v38  ;;  %v1820_v55 = vadd.f32 %v1819_v20, %v1807_v42  ;;  %v13456_v20 = vld [vmem:[#allocation7 + $0x214] sm:$0xf]  ;;  %v9792_v31 = vld [vmem:[#allocation7 + $0x98] sm:$0xf]  ;;  %v13407_v38 = vld [vmem:[#allocation7 + $0x88] sm:$0xf0] }
 0x153   :  { %v13410_v35 = vld [vmem:[#allocation7 + $0xa0] sm:$0xf0]  ;;  %v9942_v42 = vld [vmem:[#allocation7 + $0x1d4] sm:$0xf0]  ;;  %v9781_v53 = vor.u32 %v13407_v38, %v9780_v48  ;;  %v13392_v48 = vld [vmem:[#allocation7 + $0x10] sm:$0xf0] }
 0x154   :  { %2567 = vmatpush.bf16.msrb.mxu3 %v9865_v57  ;;  %v13445_v57 = vld [vmem:[#allocation7 + $0x1b8] sm:$0xf0]  ;;  %v9793_v47 = vor.u32 %v13410_v35, %v9792_v31  ;;  %v13472_v35 = vld [vmem:[%s15720_s10 + $0x54] sm:$0xf] }
 0x155   :  { %2529 = vmatpush.bf16.msrb.mxu0 %v9849_v2  ;;  %v9929_v61 = vor.u32 %v13445_v57, %v9928_v54  ;;  %v13404_v54 = vld [vmem:[#allocation7 + $0x70] sm:$0xf0] }
 0x156   :  { %2502 = vmatpush.bf16.msra.mxu2 %v9953_v51  ;;  %v9948_v51 = vld [vmem:[#allocation7 + $0x1d0] sm:$0xf] }
 0x157   :  { %v9949_v57 = vor.u32 %v13449_v52, %v9948_v51  ;;  %v13470_v52 = vld [vmem:[%s15720_s10 + $0x44] sm:$0xf] }
 0x158   :  { %2568 = vmatpush.bf16.msrb.mxu3 %v9853_v3  ;;  %v9990_v3 = vld [vmem:[#allocation7 + $0x234] sm:$0xf0] }
 0x159   :  { %2530 = vmatpush.bf16.msrb.mxu0 %v9837_v12  ;;  %v9993_v10 = vor.u32 %v13459_v1, %v9990_v3  ;;  %v9978_v12 = vld [vmem:[#allocation7 + $0x21c] sm:$0xf0]  ;;  %v13446_v1 = vld [vmem:[#allocation7 + $0x1c0] sm:$0xf0] }
 0x15a   :  { %2503 = vmatpush.bf16.msra.mxu2 %v9941_v56  ;;  %v9981_v15 = vor.u32 %v13456_v20, %v9978_v12  ;;  %v9768_v56 = vld [vmem:[#allocation7 + $0x68] sm:$0xf]  ;;  %v9937_v5 = vor.u32 %v13446_v1, %v9936_v0  ;;  %v9744_v20 = vld [vmem:[#allocation7 + $0x38] sm:$0xf]  ;;  %v13398_v12 = vld [vmem:[#allocation7 + $0x40] sm:$0xf0] }
 0x15b   :  { %2538 = vmatpush.bf16.msrb.mxu1 %v9993_v10  ;;  %v13441_v10 = vld [vmem:[#allocation7 + $0x19c] sm:$0xf]  ;;  %v13488_v0 = vld [vmem:[%s15720_s10 + $0xd4] sm:$0xf] }
 0x15c   :  { %2569 = vmatpush.bf16.msrb.mxu3 %v9841_v13 }
 0x15d   :  { %2531 = vmatpush.bf16.msrb.mxu0 %v9825_v25  ;;  %v9905_v25 = vor.u32 %v13439_v14, %v9904_v6  ;;  %v9745_v14 = vor.u32 %v13398_v12, %v9744_v20  ;;  %v13486_v20 = vld [vmem:[%s15720_s10 + $0xc4] sm:$0xf] }
 0x15e   :  { %2504 = vmatpush.bf16.msra.mxu2 %v9929_v61  ;;  %v9756_v61 = vld [vmem:[#allocation7 + $0x50] sm:$0xf] }
 0x15f   :  { %2539 = vmatpush.bf16.msrb.mxu1 %v9981_v15  ;;  %v9757_v3 = vor.u32 %v13401_v63, %v9756_v61  ;;  %v10026_v63 = vld [vmem:[%s15720_s10 + $0x38] sm:$0xf0] }
 0x160   :  { %2570 = vmatpush.bf16.msrb.mxu3 %v9829_v27  ;;  %v9966_v27 = vld [vmem:[#allocation7 + $0x204] sm:$0xf0] }
 0x161   :  { %2532 = vmatpush.bf16.msrb.mxu0 %v9813_v43  ;;  %v1832_v58 = vpop.f32.mrf.mxu0  ;;  %v9969_v30 = vor.u32 %v13453_v26, %v9966_v27  ;;  %v13395_v27 = vld [vmem:[#allocation7 + $0x28] sm:$0xf0] }
 0x162   :  { %v1833_v59 = vadd.f32 %v1832_v58, %v1820_v55  ;;  %v1845_v60 = vpop.f32.mrf.mxu1  ;;  %2505 = vmatpush.bf16.msra.mxu2 %v9917_v9  ;;  %v9945_v55 = vor.u32 %v13447_v50, %v9942_v42  ;;  %v9769_v58 = vor.u32 %v13404_v54, %v9768_v56  ;;  %v13475_v50 = vld [vmem:[%s15720_s10 + $0x64] sm:$0xf0]  ;;  %v611_v42 = vperm.slane %v15052_v39, 2  ;;  %v13490_v54 = vld [vmem:[%s15720_s10 + $0xe4] sm:$0xf] }
 0x163   :  { %2540 = vmatpush.bf16.msrb.mxu1 %v9969_v30  ;;  %v10114_v39 = vld [vmem:[%s15720_s10 + $0xe8] sm:$0xf0] }
 0x164   :  { %2571 = vmatpush.bf16.msrb.mxu3 %v9817_v45  ;;  %v1846_v62 = vadd.f32 %v1845_v60, %v1833_v59  ;;  %v9960_v45 = vld [vmem:[#allocation7 + $0x1e8] sm:$0xf]  ;;  %v13444_v59 = vld [vmem:[#allocation7 + $0x1b4] sm:$0xf]  ;;  %v9930_v60 = vld [vmem:[#allocation7 + $0x1bc] sm:$0xf0] }
 0x165   :  { %2577 = vmatpush.bf16.msra.mxu0 %v9997_v11  ;;  %v9961_v49 = vor.u32 %v13452_v46, %v9960_v45  ;;  %v9918_v11 = vld [vmem:[#allocation7 + $0x1a4] sm:$0xf0]  ;;  %v10122_v45 = vld [vmem:[%s15720_s10 + $0xf8] sm:$0xf0]  ;;  %v10045_v46 = vor.u32 %v13472_v35, %v10042_v41  ;;  %v13482_v35 = vld [vmem:[%s15720_s10 + $0xa4] sm:$0xf] }
 0x166   :  { %2506 = vmatpush.bf16.msra.mxu2 %v9905_v25  ;;  %v9921_v6 = vor.u32 %v13441_v10, %v9918_v11  ;;  %v9732_v25 = vld [vmem:[#allocation7 + $0x20] sm:$0xf]  ;;  %v10018_v11 = vld [vmem:[%s15720_s10 + $0x28] sm:$0xf0] }
 0x167   :  { %2541 = vmatpush.bf16.msrb.mxu1 %v9957_v44  ;;  %v9733_v31 = vor.u32 %v13395_v27, %v9732_v25  ;;  %v9720_v44 = vld [vmem:[#allocation7 + $0x8] sm:$0xf]  ;;  %v10090_v25 = vld [vmem:[%s15720_s10 + $0xb8] sm:$0xf0]  ;;  %v10016_v27 = vld [vmem:[%s15720_s10 + $0x20] sm:$0xf] }
 0x168   :  { %v9721_v38 = vor.u32 %v13392_v48, %v9720_v44  ;;  %v13480_v48 = vld [vmem:[%s15720_s10 + $0x94] sm:$0xf] }
 0x169   :  { %v1858_v2 = vpop.f32.mrf.mxu2  ;;  %v1834_v13 = vpop.f32.mrf.mxu0  ;;  %2578 = vmatpush.bf16.msra.mxu0 %v9985_v23  ;;  %v13438_v23 = vld [vmem:[#allocation7 + $0x184] sm:$0xf] }
 0x16a   :  { %v1859_v7 = vadd.f32 %v1858_v2, %v1846_v62  ;;  %v1871_v8 = vpop.f32.mrf.mxu3  ;;  %v1847_v18 = vpop.f32.mrf.mxu1  ;;  %2551 = vmatpush.bf16.msrb.mxu2 %v9805_v29  ;;  %v9933_v62 = vor.u32 %v13444_v59, %v9930_v60  ;;  %v13443_v13 = vld [vmem:[#allocation7 + $0x1a8] sm:$0xf0]  ;;  %v13440_v29 = vld [vmem:[#allocation7 + $0x190] sm:$0xf0]  ;;  %v10117_v59 = vor.u32 %v13490_v54, %v10114_v39 }
 0x16b   :  { %2542 = vmatpush.bf16.msrb.mxu1 %v9945_v55  ;;  %v13473_v60 = vld [vmem:[%s15720_s10 + $0x54] sm:$0xf0] }
 0x16c   :  { %v1872_v21 = vadd.f32 %v1871_v8, %v1859_v7  ;;  %v10058_v7 = vld [vmem:[%s15720_s10 + $0x78] sm:$0xf0] }
 0x16d   :  { %2579 = vmatpush.bf16.msra.mxu0 %v9973_v36  ;;  %v10061_v9 = vor.u32 %v13476_v4, %v10058_v7  ;;  %v10032_v7 = vld [vmem:[%s15720_s10 + $0x40] sm:$0xf] }
 0x16e   :  { %v1980_v24 = vmax.f32 %v1872_v21, 0.0  ;;  %2552 = vmatpush.bf16.msrb.mxu2 %v9793_v47  ;;  %v9924_v21 = vld [vmem:[#allocation7 + $0x1a0] sm:$0xf] }
 0x16f   :  { %2543 = vmatpush.bf16.msrb.mxu1 %v9933_v62  ;;  %2828 = vmatpush.bf16.msra.mxu3 %v10061_v9  ;;  %v9925_v15 = vor.u32 %v13443_v13, %v9924_v21  ;;  %v13468_v62 = vld [vmem:[%s15720_s10 + $0x34] sm:$0xf]  ;;  %v13471_v9 = vld [vmem:[%s15720_s10 + $0x44] sm:$0xf0]  ;;  %v10098_v21 = vld [vmem:[%s15720_s10 + $0xc8] sm:$0xf0] }
 0x170   :  { %v1983_v28 = vpack.c.bf16 %v1980_v24, %v1980_v24  ;;  %v9906_v24 = vld [vmem:[#allocation7 + $0x18c] sm:$0xf0]  ;;  %v10033_v10 = vor.u32 %v13471_v9, %v10032_v7  ;;  %v10101_v13 = vor.u32 %v13486_v20, %v10098_v21  ;;  %v10096_v20 = vld [vmem:[%s15720_s10 + $0xc0] sm:$0xf] }
 0x171   :  { %v1860_v34 = vpop.f32.mrf.mxu2  ;;  %2580 = vmatpush.bf16.msra.mxu0 %v9961_v49  ;;  %v9909_v26 = vor.u32 %v13438_v23, %v9906_v24  ;;  %v10048_v49 = vld [vmem:[%s15720_s10 + $0x60] sm:$0xf] }
 0x172   :  { %2494 = vmatmul.bf16.vlgmr.msra.gmra.mxu1 %v1983_v28  ;;  %2533 = vmatmul.bf16.vlgmr.msrb.gmra.mxu0 %v1983_v28  ;;  %v1873_v43 = vpop.f32.mrf.mxu3  ;;  %v13477_v34 = vld [vmem:[%s15720_s10 + $0x74] sm:$0xf0]  ;;  %v10049_v51 = vor.u32 %v13475_v50, %v10048_v49 }
 0x173   :  { %2572 = vmatmul.bf16.vlgmr.msrb.gmra.mxu3 %v1983_v28  ;;  %2553 = vmatpush.bf16.msrb.mxu2 %v9781_v53  ;;  %v9912_v28 = vld [vmem:[#allocation7 + $0x188] sm:$0xf]  ;;  %v10057_v37 = vor.u32 %v13477_v34, %v10056_v33  ;;  %v13492_v43 = vld [vmem:[%s15720_s10 + $0xf4] sm:$0xf] }
 0x174   :  { %2544 = vmatpush.bf16.msrb.mxu1 %v9921_v6  ;;  %2829 = vmatpush.bf16.msra.mxu3 %v10053_v19  ;;  %v9913_v32 = vor.u32 %v13440_v29, %v9912_v28  ;;  %v10125_v47 = vor.u32 %v13492_v43, %v10122_v45  ;;  %v10034_v53 = vld [vmem:[%s15720_s10 + $0x48] sm:$0xf0]  ;;  %v13484_v19 = vld [vmem:[%s15720_s10 + $0xb4] sm:$0xf]  ;;  %v13467_v28 = vld [vmem:[%s15720_s10 + $0x24] sm:$0xf0] }
 0x175   :  { %2581 = vmatpush.bf16.msra.mxu0 %v9949_v57  ;;  %v10037_v56 = vor.u32 %v13470_v52, %v10034_v53  ;;  %v10040_v57 = vld [vmem:[%s15720_s10 + $0x50] sm:$0xf] }
 0x176   :  { %v10041_v61 = vor.u32 %v13473_v60, %v10040_v57  ;;  %v10008_v45 = vld [vmem:[%s15720_s10 + $0x10] sm:$0xf] }
 0x177   :  { %2554 = vmatpush.bf16.msrb.mxu2 %v9769_v58 }
 0x178   :  { %2545 = vmatpush.bf16.msrb.mxu1 %v9909_v26  ;;  %2830 = vmatpush.bf16.msra.mxu3 %v10045_v46  ;;  %v10093_v26 = vor.u32 %v13484_v19, %v10090_v25  ;;  %v13465_v46 = vld [vmem:[%s15720_s10 + $0x14] sm:$0xf0]  ;;  %v13483_v19 = vld [vmem:[%s15720_s10 + $0xa4] sm:$0xf0] }
 0x179   :  { %2582 = vmatpush.bf16.msra.mxu0 %v9937_v5  ;;  %v10106_v5 = vld [vmem:[%s15720_s10 + $0xd8] sm:$0xf0]  ;;  %v10009_v44 = vor.u32 %v13465_v46, %v10008_v45  ;;  %v13481_v25 = vld [vmem:[%s15720_s10 + $0x94] sm:$0xf0]  ;;  %v10186_v45 = vld [vmem:[#allocation11 + $0x78] sm:$0xf0] }
 0x17a   :  { %v10109_v4 = vor.u32 %v13488_v0, %v10106_v5  ;;  %v13491_v5 = vld [vmem:[%s15720_s10 + $0xe4] sm:$0xf0]  ;;  %v13524_v46 = vld [vmem:[#allocation11 + $0xf4] sm:$0xf] }
 0x17b   :  { %2555 = vmatpush.bf16.msrb.mxu2 %v9757_v3  ;;  %v10029_v3 = vor.u32 %v13468_v62, %v10026_v63  ;;  %v13493_v62 = vld [vmem:[%s15720_s10 + $0xf4] sm:$0xf0] }
 0x17c   :  { %2802 = vmatpush.bf16.msra.mxu1 %v10057_v37  ;;  %2831 = vmatpush.bf16.msra.mxu3 %v10037_v56  ;;  %v10066_v56 = vld [vmem:[%s15720_s10 + $0x88] sm:$0xf0] }
 0x17d   :  { %2583 = vmatpush.bf16.msra.mxu0 %v9925_v15  ;;  %v13469_v15 = vld [vmem:[%s15720_s10 + $0x34] sm:$0xf0] }
 0x17f   :  { %2556 = vmatpush.bf16.msrb.mxu2 %v9745_v14  ;;  %v10024_v14 = vld [vmem:[%s15720_s10 + $0x30] sm:$0xf] }
 0x180   :  { %2803 = vmatpush.bf16.msra.mxu1 %v10049_v51  ;;  %2832 = vmatpush.bf16.msra.mxu3 %v10029_v3  ;;  %v10025_v16 = vor.u32 %v13469_v15, %v10024_v14  ;;  %v13463_v51 = vld [vmem:[%s15720_s10 + $0x4] sm:$0xf0]  ;;  %v10112_v3 = vld [vmem:[%s15720_s10 + $0xe0] sm:$0xf]  ;;  %v13485_v14 = vld [vmem:[%s15720_s10 + $0xb4] sm:$0xf0] }
 0x181   :  { %v15067_v2 = vpop.f32.mrf.mxu0  ;;  %2584 = vmatpush.bf16.msra.mxu0 %v9913_v32  ;;  %v10002_v32 = vld [vmem:[%s15720_s10 + $0x8] sm:$0xf0]  ;;  %v10113_v9 = vor.u32 %v13491_v5, %v10112_v3  ;;  %v10234_v5 = vld [vmem:[#allocation11 + $0xd8] sm:$0xf0] }
 0x182   :  { %v15075_v8 = vpop.f32.mrf.mxu1  ;;  %v1885_v1 = vadd.f32 %v15067_v2, %v611_v42  ;;  %v13466_v2 = vld [vmem:[%s15720_s10 + $0x24] sm:$0xf]  ;;  %v10000_v42 = vld [vmem:[%s15720_s10] sm:$0xf] }
 0x183   :  { %2557 = vmatpush.bf16.msrb.mxu2 %v9733_v31  ;;  %v10021_v12 = vor.u32 %v13466_v2, %v10018_v11  ;;  %v13462_v31 = vld [vmem:[%s15720_s10 + $0x4] sm:$0xf]  ;;  %v10001_v53 = vor.u32 %v13463_v51, %v10000_v42  ;;  %v13489_v2 = vld [vmem:[%s15720_s10 + $0xd4] sm:$0xf0]  ;;  %v13507_v42 = vld [vmem:[#allocation11 + $0x64] sm:$0xf0] }
 0x184   :  { %2804 = vmatpush.bf16.msra.mxu1 %v10041_v61  ;;  %v1898_v6 = vadd.f32 %v15075_v8, %v1885_v1  ;;  %v13464_v8 = vld [vmem:[%s15720_s10 + $0x14] sm:$0xf]  ;;  %v10005_v34 = vor.u32 %v13462_v31, %v10002_v32  ;;  %v10120_v61 = vld [vmem:[%s15720_s10 + $0xf0] sm:$0xf]  ;;  %v10248_v31 = vld [vmem:[#allocation11 + $0xf0] sm:$0xf] }
 0x185   :  { %2841 = vmatpush.bf16.msrb.mxu0 %v10125_v47  ;;  %2833 = vmatpush.bf16.msra.mxu3 %v10021_v12  ;;  %v10013_v24 = vor.u32 %v13464_v8, %v10010_v17  ;;  %v10121_v0 = vor.u32 %v13493_v62, %v10120_v61  ;;  %v10080_v17 = vld [vmem:[%s15720_s10 + $0xa0] sm:$0xf]  ;;  %v13506_v51 = vld [vmem:[#allocation11 + $0x64] sm:$0xf] }
 0x186   :  { %v13525_v32 = vld [vmem:[#allocation11 + $0xf4] sm:$0xf0]  ;;  %v13504_v62 = vld [vmem:[#allocation11 + $0x54] sm:$0xf] }
 0x187   :  { %2558 = vmatpush.bf16.msrb.mxu2 %v9721_v38  ;;  %v10074_v38 = vld [vmem:[%s15720_s10 + $0x98] sm:$0xf0]  ;;  %v13505_v61 = vld [vmem:[#allocation11 + $0x54] sm:$0xf0] }
 0x188   :  { %2805 = vmatpush.bf16.msra.mxu1 %v10033_v10  ;;  %v10077_v49 = vor.u32 %v13480_v48, %v10074_v38  ;;  %v10104_v10 = vld [vmem:[%s15720_s10 + $0xd0] sm:$0xf]  ;;  %v13521_v48 = vld [vmem:[#allocation11 + $0xd4] sm:$0xf0] }
 0x189   :  { %v15083_v18 = vpop.f32.mrf.mxu2  ;;  %v1886_v30 = vpop.f32.mrf.mxu0  ;;  %2842 = vmatpush.bf16.msrb.mxu0 %v10117_v59  ;;  %2834 = vmatpush.bf16.msra.mxu3 %v10013_v24  ;;  %v10105_v11 = vor.u32 %v13489_v2, %v10104_v10  ;;  %v10072_v24 = vld [vmem:[%s15720_s10 + $0x90] sm:$0xf] }
 0x18a   :  { %v15085_v22 = vpop.f32.mrf.mxu3  ;;  %v1899_v36 = vpop.f32.mrf.mxu1  ;;  %v1911_v23 = vadd.f32 %v15083_v18, %v1898_v6  ;;  %v10017_v30 = vor.u32 %v13467_v28, %v10016_v27  ;;  %v13487_v6 = vld [vmem:[%s15720_s10 + $0xc4] sm:$0xf0]  ;;  %v10073_v27 = vor.u32 %v13481_v25, %v10072_v24  ;;  %v13503_v10 = vld [vmem:[#allocation11 + $0x44] sm:$0xf0]  ;;  %v13502_v2 = vld [vmem:[#allocation11 + $0x44] sm:$0xf] }
 0x18b   :  { %v2596_v36 = vld [vmem:[%s15721_s1] sm:$0xff]  ;;  %v10097_v12 = vor.u32 %v13487_v6, %v10096_v20  ;;  %v10162_v20 = vld [vmem:[#allocation11 + $0x48] sm:$0xf0]  ;;  %v13518_v6 = vld [vmem:[#allocation11 + $0xc4] sm:$0xf] }
 0x18c   :  { %2806 = vmatpush.bf16.msra.mxu1 %v10025_v16  ;;  %v1924_v29 = vadd.f32 %v15085_v22, %v1911_v23  ;;  %v10082_v22 = vld [vmem:[%s15720_s10 + $0xa8] sm:$0xf0]  ;;  %v2636_v43 = vunpack.c.l.b16 %v2596_v36  ;;  %v2637_v21 = vunpack.c.h.b16 %v2596_v36  ;;  %v10081_v23 = vor.u32 %v13483_v19, %v10080_v17  ;;  %v13509_v36 = vld [vmem:[#allocation11 + $0x74] sm:$0xf0] }
 0x18d   :  { %2843 = vmatpush.bf16.msrb.mxu0 %v10109_v4  ;;  %v10085_v41 = vor.u32 %v13482_v35, %v10082_v22  ;;  %2835 = vmatpush.bf16.msra.mxu3 %v10005_v34  ;;  %v10249_v34 = vor.u32 %v13525_v32, %v10248_v31  ;;  %v13523_v35 = vld [vmem:[#allocation11 + $0xe4] sm:$0xf0]  ;;  %v10184_v22 = vld [vmem:[#allocation11 + $0x70] sm:$0xf]  ;;  %v10165_v17 = vor.u32 %v13502_v2, %v10162_v20  ;;  %v10464_v20 = vld [vmem:[#allocation14 + $0x1a0] sm:$0xf] }
 0x18e   :  { %v2638_v47 = vpack.c.b16 %v2636_v43, %v2636_v43  ;;  %v2639_v16 = vpack.c.b16 %v2637_v21, %v2637_v21  ;;  %v10185_v43 = vor.u32 %v13509_v36, %v10184_v22  ;;  %v10152_v36 = vld [vmem:[#allocation11 + $0x30] sm:$0xf] }
 0x190   :  { %2807 = vmatpush.bf16.msra.mxu1 %v10017_v30  ;;  %2836 = vmatmul.bf16.vlgmr.msra.gmra.mxu3 %v2638_v47 }
 0x191   :  { %v1912_v55 = vpop.f32.mrf.mxu2  ;;  %2844 = vmatpush.bf16.msrb.mxu0 %v10101_v13  ;;  %v10088_v13 = vld [vmem:[%s15720_s10 + $0xb0] sm:$0xf] }
 0x192   :  { %v1925_v58 = vpop.f32.mrf.mxu3  ;;  %v13478_v55 = vld [vmem:[%s15720_s10 + $0x84] sm:$0xf]  ;;  %v10089_v15 = vor.u32 %v13485_v14, %v10088_v13  ;;  %v10216_v14 = vld [vmem:[#allocation11 + $0xb0] sm:$0xf] }
 0x193   :  { %v10069_v58 = vor.u32 %v13478_v55, %v10066_v56 }
 0x194   :  { %2808 = vmatpush.bf16.msra.mxu1 %v10009_v44  ;;  %v10232_v44 = vld [vmem:[#allocation11 + $0xd0] sm:$0xf] }
 0x195   :  { %2845 = vmatpush.bf16.msrb.mxu0 %v10093_v26 }
 0x198   :  { %2809 = vmatpush.bf16.msra.mxu1 %v10001_v53  ;;  %v10224_v53 = vld [vmem:[#allocation11 + $0xc0] sm:$0xf] }
 0x199   :  { %2846 = vmatpush.bf16.msrb.mxu0 %v10085_v41 }
 0x19d   :  { %2847 = vmatpush.bf16.msrb.mxu0 %v10077_v49 }
 0x1a1   :  { %v1936_v18 = vpop.f32.mrf.mxu0  ;;  %2848 = vmatpush.bf16.msrb.mxu0 %v10069_v58  ;;  %v13519_v58 = vld [vmem:[#allocation11 + $0xc4] sm:$0xf0] }
 0x1a2   :  { %v1949_v33 = vpop.f32.mrf.mxu1  ;;  %v1937_v37 = vadd.f32 %v1936_v18, %v1924_v29  ;;  %v13479_v29 = vld [vmem:[%s15720_s10 + $0x84] sm:$0xf0] }
 0x1a4   :  { %v1950_v50 = vadd.f32 %v1949_v33, %v1937_v37  ;;  %v10240_v33 = vld [vmem:[#allocation11 + $0xe0] sm:$0xf]  ;;  %v13508_v37 = vld [vmem:[#allocation11 + $0x74] sm:$0xf] }
 0x1a5   :  { %v10241_v41 = vor.u32 %v13523_v35, %v10240_v33  ;;  %v10189_v38 = vor.u32 %v13508_v37, %v10186_v45  ;;  %v13513_v35 = vld [vmem:[#allocation11 + $0x94] sm:$0xf0]  ;;  %v10154_v45 = vld [vmem:[#allocation11 + $0x38] sm:$0xf0] }
 0x1a6   :  { %v13501_v37 = vld [vmem:[#allocation11 + $0x34] sm:$0xf0] }
 0x1a7   :  { %3082 = vmatpush.bf16.msrb.mxu3 %v10189_v38  ;;  %v10192_v38 = vld [vmem:[#allocation11 + $0x80] sm:$0xf] }
 0x1a9   :  { %v1962_v52 = vpop.f32.mrf.mxu2  ;;  %v1938_v57 = vpop.f32.mrf.mxu0 }
 0x1aa   :  { %v1963_v54 = vadd.f32 %v1962_v52, %v1950_v50  ;;  %v1975_v39 = vpop.f32.mrf.mxu3  ;;  %v1951_v59 = vpop.f32.mrf.mxu1  ;;  %v10176_v50 = vld [vmem:[#allocation11 + $0x60] sm:$0xf]  ;;  %v10178_v52 = vld [vmem:[#allocation11 + $0x68] sm:$0xf0]  ;;  %v10233_v57 = vor.u32 %v13521_v48, %v10232_v44 }
 0x1ab   :  { %v10177_v55 = vor.u32 %v13507_v42, %v10176_v50  ;;  %v10181_v56 = vor.u32 %v13506_v51, %v10178_v52  ;;  %v10496_v42 = vld [vmem:[#allocation14 + $0x1e0] sm:$0xf]  ;;  %v13588_v51 = vld [vmem:[#allocation14 + $0x1ec] sm:$0xf0] }
 0x1ac   :  { %v1976_v60 = vadd.f32 %v1975_v39, %v1963_v54  ;;  %v13522_v54 = vld [vmem:[#allocation11 + $0xe4] sm:$0xf]  ;;  %v10242_v39 = vld [vmem:[#allocation11 + $0xe8] sm:$0xf0]  ;;  %v10497_v52 = vor.u32 %v13588_v51, %v10496_v42  ;;  %v13548_v51 = vld [vmem:[#allocation14 + $0xac] sm:$0xf0] }
 0x1ad   :  { %v10245_v59 = vor.u32 %v13522_v54, %v10242_v39  ;;  %3083 = vmatpush.bf16.msrb.mxu3 %v10181_v56  ;;  %v13498_v56 = vld [vmem:[#allocation11 + $0x24] sm:$0xf]  ;;  %v10146_v39 = vld [vmem:[#allocation11 + $0x28] sm:$0xf0] }
 0x1ae   :  { %v1981_v63 = vmax.f32 %v1976_v60, 0.0  ;;  %v10168_v60 = vld [vmem:[#allocation11 + $0x50] sm:$0xf]  ;;  %v10336_v42 = vld [vmem:[#allocation14 + $0xa0] sm:$0xf] }
 0x1af   :  { %v10169_v3 = vor.u32 %v13505_v61, %v10168_v60  ;;  %v10480_v61 = vld [vmem:[#allocation14 + $0x1c0] sm:$0xf] }
 0x1b0   :  { %v1984_v1 = vpack.c.bf16 %v1981_v63, %v1981_v63  ;;  %v10170_v63 = vld [vmem:[#allocation11 + $0x58] sm:$0xf0] }
 0x1b1   :  { %v1964_v4 = vpop.f32.mrf.mxu2 }
 0x1b2   :  { %v1977_v7 = vpop.f32.mrf.mxu3  ;;  %2507 = vmatmul.bf16.vlgmr.msra.gmra.mxu2 %v1984_v1  ;;  %2546 = vmatmul.bf16.vlgmr.msrb.gmra.mxu1 %v1984_v1  ;;  %v10173_v4 = vor.u32 %v13504_v62, %v10170_v63  ;;  %v13584_v62 = vld [vmem:[#allocation14 + $0x1cc] sm:$0xf0] }
 0x1b3   :  { %2585 = vmatmul.bf16.vlgmr.msra.gmra.mxu0 %v1984_v1  ;;  %2815 = vmatpush.bf16.msra.mxu2 %v10121_v0  ;;  %v13520_v0 = vld [vmem:[#allocation11 + $0xd4] sm:$0xf]  ;;  %v15280_v1 = vld [vmem:[#allocation8] sm:$0x7]  ;;  %v10481_v63 = vor.u32 %v13584_v62, %v10480_v61  ;;  %v10320_v61 = vld [vmem:[#allocation14 + $0x80] sm:$0xf] }
 0x1b4   :  { %3056 = vmatpush.bf16.msrb.mxu1 %v10185_v43  ;;  %v10237_v7 = vor.u32 %v13520_v0, %v10234_v5  ;;  %v2083_v21 = vperm.slane %v15280_v1, 0  ;;  %v2084_v13 = vperm.slane %v15280_v1, 1  ;;  %3084 = vmatpush.bf16.msrb.mxu3 %v10173_v4  ;;  %v10153_v43 = vor.u32 %v13501_v37, %v10152_v36  ;;  %v10136_v0 = vld [vmem:[#allocation11 + $0x10] sm:$0xf]  ;;  %v13496_v5 = vld [vmem:[#allocation11 + $0x14] sm:$0xf] }
 0x1b5   :  { %v13552_v37 = vld [vmem:[#allocation14 + $0xcc] sm:$0xf0] }
 0x1b6   :  { %v13544_v62 = vld [vmem:[#allocation14 + $0x8c] sm:$0xf0] }
 0x1b7   :  { %2816 = vmatpush.bf16.msra.mxu2 %v10113_v9  ;;  %v10160_v9 = vld [vmem:[#allocation11 + $0x40] sm:$0xf] }
 0x1b8   :  { %3057 = vmatpush.bf16.msrb.mxu1 %v10177_v55  ;;  %3085 = vmatpush.bf16.msrb.mxu3 %v10165_v17  ;;  %v13499_v55 = vld [vmem:[#allocation11 + $0x24] sm:$0xf0]  ;;  %v13510_v17 = vld [vmem:[#allocation11 + $0x84] sm:$0xf] }
 0x1bb   :  { %2817 = vmatpush.bf16.msra.mxu2 %v10105_v11  ;;  %v10225_v11 = vor.u32 %v13519_v58, %v10224_v53  ;;  %v10144_v53 = vld [vmem:[#allocation11 + $0x20] sm:$0xf]  ;;  %v10210_v58 = vld [vmem:[#allocation11 + $0xa8] sm:$0xf0] }
 0x1bc   :  { %3058 = vmatpush.bf16.msrb.mxu1 %v10169_v3  ;;  %v10145_v54 = vor.u32 %v13499_v55, %v10144_v53  ;;  %v13497_v3 = vld [vmem:[#allocation11 + $0x14] sm:$0xf0]  ;;  %v10337_v53 = vor.u32 %v13548_v51, %v10336_v42  ;;  %v13612_v55 = vld [vmem:[#allocation14 + $0x2ac] sm:$0xf0] }
 0x1bd   :  { %v10137_v4 = vor.u32 %v13497_v3, %v10136_v0  ;;  %v10576_v0 = vld [vmem:[#allocation14 + $0x280] sm:$0xf]  ;;  %v13608_v3 = vld [vmem:[#allocation14 + $0x28c] sm:$0xf0] }
 0x1bf   :  { %2818 = vmatpush.bf16.msra.mxu2 %v10097_v12  ;;  %v10226_v12 = vld [vmem:[#allocation11 + $0xc8] sm:$0xf0] }
 0x1c0   :  { %v10229_v19 = vor.u32 %v13518_v6, %v10226_v12  ;;  %v13580_v6 = vld [vmem:[#allocation14 + $0x1ac] sm:$0xf0] }
 0x1c1   :  { %v15257_v8 = vpop.f32.mrf.mxu0  ;;  %v10465_v12 = vor.u32 %v13580_v6, %v10464_v20  ;;  %v10304_v6 = vld [vmem:[#allocation14 + $0x60] sm:$0xf] }
 0x1c2   :  { %2559 = vmatmul.bf16.vlgmr.msrb.gmra.mxu2 %v15062_v40  ;;  %2810 = vmatmul.bf16.vlgmr.msra.gmra.mxu1 %v2638_v47  ;;  %v10064_v40 = vld [vmem:[%s15720_s10 + $0x80] sm:$0xf]  ;;  %v10250_v47 = vld [vmem:[#allocation11 + $0xf8] sm:$0xf0]  ;;  %v2483_v24 = vadd.f32 %v15257_v8, %v2083_v21  ;;  %v10128_v21 = vld [vmem:[#allocation11] sm:$0xf] }
 0x1c3   :  { %2819 = vmatpush.bf16.msra.mxu2 %v10089_v15  ;;  %2849 = vmatmul.bf16.vlgmr.msrb.gmra.mxu0 %v2639_v16  ;;  %v10065_v18 = vor.u32 %v13479_v29, %v10064_v40  ;;  %v10253_v49 = vor.u32 %v13524_v46, %v10250_v47  ;;  %v13517_v15 = vld [vmem:[#allocation11 + $0xb4] sm:$0xf0]  ;;  %v13516_v46 = vld [vmem:[#allocation11 + $0xb4] sm:$0xf]  ;;  %v10218_v47 = vld [vmem:[#allocation11 + $0xb8] sm:$0xf0] }
 0x1c4   :  { %v10221_v48 = vor.u32 %v13516_v46, %v10218_v47  ;;  %v10736_v47 = vld [vmem:[#allocation14 + $0x3c0] sm:$0xf] }
 0x1c5   :  { %3095 = vmatpush.bf16.msra.mxu0 %v10253_v49  ;;  %v13511_v49 = vld [vmem:[#allocation11 + $0x84] sm:$0xf0] }
 0x1c6   :  { %v10193_v50 = vor.u32 %v13511_v49, %v10192_v38  ;;  %v10432_v38 = vld [vmem:[#allocation14 + $0x160] sm:$0xf]  ;;  %v13572_v49 = vld [vmem:[#allocation14 + $0x16c] sm:$0xf0] }
 0x1c7   :  { %2820 = vmatpush.bf16.msra.mxu2 %v10081_v23  ;;  %v10217_v23 = vor.u32 %v13517_v15, %v10216_v14  ;;  %v13494_v14 = vld [vmem:[#allocation11 + $0x4] sm:$0xf] }
 0x1c9   :  { %v2484_v28 = vpop.f32.mrf.mxu0  ;;  %3096 = vmatpush.bf16.msra.mxu0 %v10245_v59  ;;  %v10149_v59 = vor.u32 %v13498_v56, %v10146_v39  ;;  %v10720_v56 = vld [vmem:[#allocation14 + $0x3a0] sm:$0xf] }
 0x1ca   :  { %v15272_v26 = vpop.f32.mrf.mxu3  ;;  %v13515_v28 = vld [vmem:[#allocation11 + $0xa4] sm:$0xf0] }
 0x1cb   :  { %2821 = vmatpush.bf16.msra.mxu2 %v10073_v27  ;;  %v2522_v25 = vadd.f32 %v15272_v26, %v2084_v13  ;;  %v10208_v27 = vld [vmem:[#allocation11 + $0xa0] sm:$0xf]  ;;  %v10200_v26 = vld [vmem:[#allocation11 + $0x90] sm:$0xf]  ;;  %v13495_v13 = vld [vmem:[#allocation11 + $0x4] sm:$0xf0] }
 0x1cc   :  { %v10209_v31 = vor.u32 %v13515_v28, %v10208_v27  ;;  %v10201_v22 = vor.u32 %v13513_v35, %v10200_v26  ;;  %v10129_v15 = vor.u32 %v13495_v13, %v10128_v21  ;;  %v13556_v27 = vld [vmem:[#allocation14 + $0xec] sm:$0xf0]  ;;  %v10624_v28 = vld [vmem:[#allocation14 + $0x2e0] sm:$0xf] }
 0x1cd   :  { %3097 = vmatpush.bf16.msra.mxu0 %v10237_v7  ;;  %v10138_v7 = vld [vmem:[#allocation11 + $0x18] sm:$0xf0]  ;;  %v10448_v26 = vld [vmem:[#allocation14 + $0x180] sm:$0xf]  ;;  %v13576_v35 = vld [vmem:[#allocation14 + $0x18c] sm:$0xf0] }
 0x1ce   :  { %v10141_v2 = vor.u32 %v13496_v5, %v10138_v7  ;;  %v10449_v36 = vor.u32 %v13576_v35, %v10448_v26  ;;  %v10704_v5 = vld [vmem:[#allocation14 + $0x380] sm:$0xf]  ;;  %v13640_v7 = vld [vmem:[#allocation14 + $0x38c] sm:$0xf0] }
 0x1cf   :  { %2822 = vmatpush.bf16.msra.mxu2 %v10065_v18  ;;  %v10560_v21 = vld [vmem:[#allocation14 + $0x260] sm:$0xf] }
 0x1d0   :  { %v10672_v35 = vld [vmem:[#allocation14 + $0x340] sm:$0xf] }
 0x1d1   :  { %3098 = vmatpush.bf16.msra.mxu0 %v10229_v19  ;;  %v10194_v19 = vld [vmem:[#allocation11 + $0x88] sm:$0xf0] }
 0x1d2   :  { %v2523_v30 = vpop.f32.mrf.mxu3  ;;  %2823 = vmatmul.bf16.vlgmr.msra.gmra.mxu2 %v2639_v16  ;;  %v10161_v16 = vor.u32 %v13503_v10, %v10160_v9  ;;  %v13512_v9 = vld [vmem:[#allocation11 + $0x94] sm:$0xf]  ;;  %v10202_v10 = vld [vmem:[#allocation11 + $0x98] sm:$0xf0] }
 0x1d3   :  { %3069 = vmatpush.bf16.msrb.mxu2 %v10249_v34 }
 0x1d4   :  { %3059 = vmatpush.bf16.msrb.mxu1 %v10161_v16  ;;  %v10130_v16 = vld [vmem:[#allocation11 + $0x8] sm:$0xf0] }
 0x1d5   :  { %3099 = vmatpush.bf16.msra.mxu0 %v10221_v48 }
 0x1d7   :  { %3070 = vmatpush.bf16.msrb.mxu2 %v10241_v41  ;;  %v13500_v41 = vld [vmem:[#allocation11 + $0x34] sm:$0xf] }
 0x1d8   :  { %v10157_v44 = vor.u32 %v13500_v41, %v10154_v45  ;;  %3060 = vmatpush.bf16.msrb.mxu1 %v10153_v43  ;;  %v10608_v41 = vld [vmem:[#allocation14 + $0x2c0] sm:$0xf]  ;;  %v13616_v43 = vld [vmem:[#allocation14 + $0x2cc] sm:$0xf0] }
 0x1d9   :  { %v10609_v46 = vor.u32 %v13616_v43, %v10608_v41  ;;  %v10272_v43 = vld [vmem:[#allocation14 + $0x20] sm:$0xf] }
 0x1da   :  { %3086 = vmatpush.bf16.msrb.mxu3 %v10157_v44  ;;  %v13648_v44 = vld [vmem:[#allocation14 + $0x3cc] sm:$0xf0] }
 0x1db   :  { %3071 = vmatpush.bf16.msrb.mxu2 %v10233_v57  ;;  %v13514_v57 = vld [vmem:[#allocation11 + $0xa4] sm:$0xf]  ;;  %v10737_v48 = vor.u32 %v13648_v44, %v10736_v47 }
 0x1dc   :  { %v10213_v60 = vor.u32 %v13514_v57, %v10210_v58  ;;  %3061 = vmatpush.bf16.msrb.mxu1 %v10145_v54  ;;  %v13644_v54 = vld [vmem:[#allocation14 + $0x3ac] sm:$0xf0]  ;;  %v10416_v58 = vld [vmem:[#allocation14 + $0x140] sm:$0xf] }
 0x1dd   :  { %v10721_v57 = vor.u32 %v13644_v54, %v10720_v56  ;;  %v13528_v56 = vld [vmem:[#allocation14 + $0xc] sm:$0xf0]  ;;  %v10512_v54 = vld [vmem:[#allocation14 + $0x200] sm:$0xf] }
 0x1de   :  { %3087 = vmatpush.bf16.msrb.mxu3 %v10149_v59  ;;  %3100 = vmatpush.bf16.msra.mxu0 %v10213_v60  ;;  %v13568_v59 = vld [vmem:[#allocation14 + $0x14c] sm:$0xf0] }
 0x1df   :  { %3072 = vmatpush.bf16.msrb.mxu2 %v10225_v11  ;;  %v10205_v11 = vor.u32 %v13512_v9, %v10202_v10  ;;  %v10417_v60 = vor.u32 %v13568_v59, %v10416_v58  ;;  %v10400_v9 = vld [vmem:[#allocation14 + $0x120] sm:$0xf]  ;;  %v13564_v10 = vld [vmem:[#allocation14 + $0x12c] sm:$0xf0] }
 0x1e0   :  { %3062 = vmatpush.bf16.msrb.mxu1 %v10137_v4  ;;  %v10577_v4 = vor.u32 %v13608_v3, %v10576_v0  ;;  %v10401_v20 = vor.u32 %v13564_v10, %v10400_v9  ;;  %v13624_v58 = vld [vmem:[#allocation14 + $0x30c] sm:$0xf0]  ;;  %v13586_v3 = vld [vmem:[#allocation14 + $0x1e4] sm:$0xf]  ;;  %v10754_v9 = vld [vmem:[#allocation14 + $0x3f0] sm:$0xf0] }
 0x1e1   :  { %v2085_v10 = vperm.slane %v15280_v1, 2 }
 0x1e2   :  { %3088 = vmatpush.bf16.msrb.mxu3 %v10141_v2  ;;  %3101 = vmatpush.bf16.msra.mxu0 %v10205_v11  ;;  %v10705_v11 = vor.u32 %v13640_v7, %v10704_v5  ;;  %v13650_v7 = vld [vmem:[#allocation14 + $0x3e4] sm:$0xf] }
 0x1e3   :  { %3073 = vmatpush.bf16.msrb.mxu2 %v10217_v23  ;;  %v10133_v23 = vor.u32 %v13494_v14, %v10130_v16  ;;  %v13604_v14 = vld [vmem:[#allocation14 + $0x26c] sm:$0xf0] }
 0x1e4   :  { %3063 = vmatpush.bf16.msrb.mxu1 %v10129_v15  ;;  %v10688_v15 = vld [vmem:[#allocation14 + $0x360] sm:$0xf] }
 0x1e6   :  { %3089 = vmatpush.bf16.msrb.mxu3 %v10133_v23  ;;  %v10384_v23 = vld [vmem:[#allocation14 + $0x100] sm:$0xf] }
 0x1e7   :  { %3074 = vmatpush.bf16.msrb.mxu2 %v10209_v31  ;;  %v10752_v31 = vld [vmem:[#allocation14 + $0x3e0] sm:$0xf] }
 0x1eb   :  { %3075 = vmatpush.bf16.msrb.mxu2 %v10201_v22  ;;  %v10352_v22 = vld [vmem:[#allocation14 + $0xc0] sm:$0xf] }
 0x1ec   :  { %v10353_v45 = vor.u32 %v13552_v37, %v10352_v22  ;;  %v13632_v22 = vld [vmem:[#allocation14 + $0x34c] sm:$0xf0]  ;;  %v15299_v37 = vld [vmem:[#allocation10] sm:$0x3] }
 0x1ef   :  { %v2495_v40 = vpop.f32.mrf.mxu1  ;;  %v2534_v29 = vpop.f32.mrf.mxu0  ;;  %3076 = vmatpush.bf16.msrb.mxu2 %v10193_v50  ;;  %v10433_v50 = vor.u32 %v13572_v49, %v10432_v38  ;;  %v10656_v38 = vld [vmem:[#allocation14 + $0x320] sm:$0xf]  ;;  %v13628_v49 = vld [vmem:[#allocation14 + $0x32c] sm:$0xf0] }
 0x1f0   :  { %v15286_v18 = vadd.f32 %v2495_v40, %v2483_v24  ;;  %v15288_v30 = vadd.f32 %v2534_v29, %v2522_v25  ;;  %v10197_v24 = vor.u32 %v13510_v17, %v10194_v19  ;;  %v10368_v25 = vld [vmem:[#allocation14 + $0xe0] sm:$0xf]  ;;  %v13620_v29 = vld [vmem:[#allocation14 + $0x2ec] sm:$0xf0]  ;;  %v10561_v17 = vor.u32 %v13604_v14, %v10560_v21  ;;  %v10482_v14 = vld [vmem:[#allocation14 + $0x1d0] sm:$0xf0] }
 0x1f1   :  { %v10369_v40 = vor.u32 %v13556_v27, %v10368_v25  ;;  %v13636_v19 = vld [vmem:[#allocation14 + $0x36c] sm:$0xf0]  ;;  %v10657_v51 = vor.u32 %v13628_v49, %v10656_v38  ;;  %v13634_v38 = vld [vmem:[#allocation14 + $0x364] sm:$0xf]  ;;  %v10690_v49 = vld [vmem:[#allocation14 + $0x370] sm:$0xf0] }
 0x1f2   :  { %3102 = vmatpush.bf16.msra.mxu0 %v10197_v24  ;;  %v13560_v24 = vld [vmem:[#allocation14 + $0x10c] sm:$0xf0] }
 0x1f3   :  { %3919 = vmatpush.bf16.msra.mxu2 %v10497_v52  ;;  %3906 = vmatpush.bf16.msra.mxu1 %v10369_v40  ;;  %v10592_v52 = vld [vmem:[#allocation14 + $0x2a0] sm:$0xf]  ;;  %v10385_v40 = vor.u32 %v13560_v24, %v10384_v23 }
 0x1f4   :  { %v10593_v39 = vor.u32 %v13612_v55, %v10592_v52  ;;  %v10256_v55 = vld [vmem:[#allocation14] sm:$0xf] }
 0x1f6   :  { %v15290_v32 = vpop.f32.mrf.mxu3 }
 0x1f7   :  { %v2497_v33 = vpop.f32.mrf.mxu1  ;;  %v2536_v8 = vpop.f32.mrf.mxu0  ;;  %3920 = vmatpush.bf16.msra.mxu2 %v10481_v63  ;;  %3907 = vmatpush.bf16.msra.mxu1 %v10353_v45  ;;  %v10321_v63 = vor.u32 %v13544_v62, %v10320_v61  ;;  %v13532_v45 = vld [vmem:[#allocation14 + $0x2c] sm:$0xf0] }
 0x1f8   :  { %v13652_v33 = vld [vmem:[#allocation14 + $0x3ec] sm:$0xf0]  ;;  %v10625_v8 = vor.u32 %v13620_v29, %v10624_v28  ;;  %v10689_v28 = vor.u32 %v13636_v19, %v10688_v15  ;;  %v10288_v29 = vld [vmem:[#allocation14 + $0x40] sm:$0xf]  ;;  %v10273_v44 = vor.u32 %v13532_v45, %v10272_v43  ;;  %v10738_v15 = vld [vmem:[#allocation14 + $0x3d0] sm:$0xf0] }
 0x1f9   :  { %v13570_v45 = vld [vmem:[#allocation14 + $0x164] sm:$0xf] }
 0x1fa   :  { %3932 = vmatpush.bf16.msra.mxu3 %v10625_v8  ;;  %v13600_v8 = vld [vmem:[#allocation14 + $0x24c] sm:$0xf0] }
 0x1fb   :  { %3921 = vmatpush.bf16.msra.mxu2 %v10465_v12  ;;  %3908 = vmatpush.bf16.msra.mxu1 %v10337_v53  ;;  %v13540_v12 = vld [vmem:[#allocation14 + $0x6c] sm:$0xf0]  ;;  %v2632_v53 = vperm.slane %v15299_v37, 1 }
 0x1fc   :  { %v10305_v13 = vor.u32 %v13540_v12, %v10304_v6  ;;  %v13582_v6 = vld [vmem:[#allocation14 + $0x1c4] sm:$0xf]  ;;  %v10757_v12 = vor.u32 %v13650_v7, %v10754_v9  ;;  %v10610_v9 = vld [vmem:[#allocation14 + $0x2d0] sm:$0xf0] }
 0x1fd   :  { %v10485_v24 = vor.u32 %v13582_v6, %v10482_v14  ;;  %v13614_v7 = vld [vmem:[#allocation14 + $0x2c4] sm:$0xf]  ;;  %v10402_v6 = vld [vmem:[#allocation14 + $0x130] sm:$0xf0] }
 0x1fe   :  { %v2575_v34 = vpop.f32.mrf.mxu3  ;;  %3933 = vmatpush.bf16.msra.mxu3 %v10609_v46  ;;  %v10528_v46 = vld [vmem:[#allocation14 + $0x220] sm:$0xf] }
 0x1ff   :  { %v10753_v34 = vor.u32 %v13652_v33, %v10752_v31  ;;  %3922 = vmatpush.bf16.msra.mxu2 %v10449_v36  ;;  %3909 = vmatpush.bf16.msra.mxu1 %v10321_v63  ;;  %v13536_v31 = vld [vmem:[#allocation14 + $0x4c] sm:$0xf0]  ;;  %v10544_v33 = vld [vmem:[#allocation14 + $0x240] sm:$0xf]  ;;  %v10673_v36 = vor.u32 %v13632_v22, %v10672_v35  ;;  %v10450_v22 = vld [vmem:[#allocation14 + $0x190] sm:$0xf0] }
 0x200   :  { %v10545_v26 = vor.u32 %v13600_v8, %v10544_v33 }
 0x201   :  { %3945 = vmatpush.bf16.msrb.mxu0 %v10753_v34  ;;  %v10289_v34 = vor.u32 %v13536_v31, %v10288_v29  ;;  %v13642_v29 = vld [vmem:[#allocation14 + $0x3a4] sm:$0xf]  ;;  %v10722_v31 = vld [vmem:[#allocation14 + $0x3b0] sm:$0xf0] }
 0x202   :  { %3934 = vmatpush.bf16.msra.mxu3 %v10593_v39  ;;  %v13592_v39 = vld [vmem:[#allocation14 + $0x20c] sm:$0xf0] }
 0x203   :  { %3923 = vmatpush.bf16.msra.mxu2 %v10433_v50  ;;  %3910 = vmatpush.bf16.msra.mxu1 %v10305_v13  ;;  %v10513_v59 = vor.u32 %v13592_v39, %v10512_v54  ;;  %v10370_v54 = vld [vmem:[#allocation14 + $0xf0] sm:$0xf0]  ;;  %v13618_v39 = vld [vmem:[#allocation14 + $0x2e4] sm:$0xf] }
 0x205   :  { %3946 = vmatpush.bf16.msrb.mxu0 %v10737_v48  ;;  %v13596_v48 = vld [vmem:[#allocation14 + $0x22c] sm:$0xf0] }
 0x206   :  { %3935 = vmatpush.bf16.msra.mxu3 %v10577_v4  ;;  %v10529_v42 = vor.u32 %v13596_v48, %v10528_v46  ;;  %v10498_v4 = vld [vmem:[#allocation14 + $0x1f0] sm:$0xf0] }
 0x207   :  { %3924 = vmatpush.bf16.msra.mxu2 %v10417_v60  ;;  %3911 = vmatpush.bf16.msra.mxu1 %v10289_v34  ;;  %v13574_v34 = vld [vmem:[#allocation14 + $0x184] sm:$0xf]  ;;  %v10434_v48 = vld [vmem:[#allocation14 + $0x170] sm:$0xf0] }
 0x209   :  { %3947 = vmatpush.bf16.msrb.mxu0 %v10721_v57  ;;  %v10640_v57 = vld [vmem:[#allocation14 + $0x300] sm:$0xf] }
 0x20a   :  { %3936 = vmatpush.bf16.msra.mxu3 %v10561_v17  ;;  %v10641_v60 = vor.u32 %v13624_v58, %v10640_v57  ;;  %v10626_v57 = vld [vmem:[#allocation14 + $0x2f0] sm:$0xf0]  ;;  %v13566_v58 = vld [vmem:[#allocation14 + $0x144] sm:$0xf] }
 0x20b   :  { %3925 = vmatpush.bf16.msra.mxu2 %v10401_v20  ;;  %3912 = vmatpush.bf16.msra.mxu1 %v10273_v44  ;;  %v10501_v20 = vor.u32 %v13586_v3, %v10498_v4  ;;  %v15321_v44 = vld [vmem:[%s15722_s8 + $0x8] sm:$0xff]  ;;  %v13550_v3 = vld [vmem:[#allocation14 + $0xc4] sm:$0xf] }
 0x20d   :  { %3948 = vmatpush.bf16.msrb.mxu0 %v10705_v11 }
 0x20e   :  { %3937 = vmatpush.bf16.msra.mxu3 %v10545_v26  ;;  %v10725_v26 = vor.u32 %v13642_v29, %v10722_v31  ;;  %v13622_v29 = vld [vmem:[#allocation14 + $0x304] sm:$0xf]  ;;  %v10642_v31 = vld [vmem:[#allocation14 + $0x310] sm:$0xf0] }
 0x20f   :  { %3926 = vmatpush.bf16.msra.mxu2 %v10385_v40  ;;  %v10466_v40 = vld [vmem:[#allocation14 + $0x1b0] sm:$0xf0] }
 0x211   :  { %3949 = vmatpush.bf16.msrb.mxu0 %v10689_v28  ;;  %v13578_v28 = vld [vmem:[#allocation14 + $0x1a4] sm:$0xf] }
 0x212   :  { %3938 = vmatpush.bf16.msra.mxu3 %v10529_v42  ;;  %v10469_v8 = vor.u32 %v13578_v28, %v10466_v40  ;;  %v10386_v28 = vld [vmem:[#allocation14 + $0x110] sm:$0xf0]  ;;  %v10504_v40 = vld [vmem:[#allocation14 + $0x1e8] sm:$0xf] }
 0x213   :  { %v15292_v2 = vpop.f32.mrf.mxu3 }
 0x214   :  { %v2838_v62 = vadd.f32 %v15292_v2, %v2632_v53  ;;  %v13646_v2 = vld [vmem:[#allocation14 + $0x3c4] sm:$0xf]  ;;  %v10693_v53 = vor.u32 %v13634_v38, %v10690_v49  ;;  %v3256_v49 = vunpack.c.l.b16 %v15321_v44 }
 0x215   :  { %3950 = vmatpush.bf16.msrb.mxu0 %v10673_v36  ;;  %v10741_v1 = vor.u32 %v13646_v2, %v10738_v15  ;;  %v13638_v36 = vld [vmem:[#allocation14 + $0x384] sm:$0xf]  ;;  %v10613_v2 = vor.u32 %v13614_v7, %v10610_v9  ;;  %v10546_v9 = vld [vmem:[#allocation14 + $0x250] sm:$0xf0] }
 0x216   :  { %3939 = vmatpush.bf16.msra.mxu3 %v10513_v59  ;;  %v10418_v59 = vld [vmem:[#allocation14 + $0x150] sm:$0xf0]  ;;  %v13546_v15 = vld [vmem:[#allocation14 + $0xa4] sm:$0xf] }
 0x217   :  { %v13598_v7 = vld [vmem:[#allocation14 + $0x244] sm:$0xf] }
 0x219   :  { %3951 = vmatpush.bf16.msrb.mxu0 %v10657_v51 }
 0x21d   :  { %3952 = vmatpush.bf16.msrb.mxu0 %v10641_v60  ;;  %v13630_v60 = vld [vmem:[#allocation14 + $0x344] sm:$0xf] }
 0x22f   :  { %v2547_v16 = vpop.f32.mrf.mxu1 }
 0x230   :  { %v15295_v25 = vadd.f32 %v2547_v16, %v15288_v30  ;;  %v15297_v27 = vpop.f32.mrf.mxu0  ;;  %v2839_v30 = vpop.f32.mrf.mxu3 }
 0x231   :  { %v10706_v30 = vld [vmem:[#allocation14 + $0x390] sm:$0xf0] }
 0x232   :  { %v10709_v46 = vor.u32 %v13638_v36, %v10706_v30  ;;  %v13542_v36 = vld [vmem:[#allocation14 + $0x84] sm:$0xf]  ;;  %v10322_v30 = vld [vmem:[#allocation14 + $0x90] sm:$0xf0] }
 0x235   :  { %v2508_v41 = vpop.f32.mrf.mxu2 }
 0x236   :  { %v15302_v47 = vadd.f32 %v2508_v41, %v15286_v18  ;;  %v10257_v18 = vor.u32 %v13528_v56, %v10256_v55  ;;  %v2631_v41 = vperm.slane %v15299_v37, 0  ;;  %v13554_v56 = vld [vmem:[#allocation14 + $0xe4] sm:$0xf] }
 0x237   :  { %v2549_v50 = vpop.f32.mrf.mxu1 }
 0x238   :  { %v2588_v52 = vpop.f32.mrf.mxu0  ;;  %3913 = vmatpush.bf16.msra.mxu1 %v10257_v18  ;;  %v3257_v50 = vunpack.c.h.b16 %v15321_v44 }
 0x239   :  { %v10437_v52 = vor.u32 %v13570_v45, %v10434_v48  ;;  %v10645_v45 = vor.u32 %v13622_v29, %v10642_v31  ;;  %v10488_v48 = vld [vmem:[#allocation14 + $0x1c8] sm:$0xf] }
 0x23a   :  { %v15326_v37 = vpack.c.b16 %v3257_v50, %v3257_v50 }
 0x23d   :  { %v2510_v61 = vpop.f32.mrf.mxu2 }
 0x23e   :  { %v10674_v61 = vld [vmem:[#allocation14 + $0x350] sm:$0xf0] }
 0x23f   :  { %v2811_v63 = vpop.f32.mrf.mxu1 }
 0x240   :  { %v2850_v0 = vpop.f32.mrf.mxu0  ;;  %v2812_v42 = vadd.f32 %v2811_v63, %v2631_v41  ;;  %v10373_v63 = vor.u32 %v13554_v56, %v10370_v54  ;;  %v13606_v41 = vld [vmem:[#allocation14 + $0x284] sm:$0xf] }
 0x241   :  { %v2851_v5 = vadd.f32 %v2850_v0, %v2838_v62  ;;  %v10629_v0 = vor.u32 %v13618_v39, %v10626_v57  ;;  %v13538_v54 = vld [vmem:[#allocation14 + $0x64] sm:$0xf]  ;;  %v10562_v57 = vld [vmem:[#allocation14 + $0x270] sm:$0xf0] }
 0x242   :  { %v13602_v39 = vld [vmem:[#allocation14 + $0x264] sm:$0xf] }
 0x243   :  { %v2855_v11 = vmax.f32 %v2851_v5, 0.0  ;;  %v10354_v5 = vld [vmem:[#allocation14 + $0xd0] sm:$0xf0] }
 0x244   :  { %v10357_v14 = vor.u32 %v13550_v3, %v10354_v5  ;;  %v10565_v3 = vor.u32 %v13602_v39, %v10562_v57  ;;  %v13534_v5 = vld [vmem:[#allocation14 + $0x44] sm:$0xf]  ;;  %v10408_v39 = vld [vmem:[#allocation14 + $0x128] sm:$0xf] }
 0x245   :  { %v2560_v21 = vpop.f32.mrf.mxu2  ;;  %v2857_v13 = vpack.c.bf16 %v2855_v11, %v2855_v11  ;;  %v13562_v11 = vld [vmem:[#allocation14 + $0x124] sm:$0xf] }
 0x246   :  { %v2561_v16 = vadd.f32 %v2560_v21, %v2085_v10  ;;  %v10421_v10 = vor.u32 %v13566_v58, %v10418_v59  ;;  %v10658_v21 = vld [vmem:[#allocation14 + $0x330] sm:$0xf0]  ;;  %v10472_v59 = vld [vmem:[#allocation14 + $0x1a8] sm:$0xf] }
 0x247   :  { %3077 = vmatmul.bf16.vlgmr.msrb.gmra.mxu2 %v2857_v13  ;;  %3103 = vmatmul.bf16.vlgmr.msra.gmra.mxu0 %v2857_v13  ;;  %v2813_v17 = vpop.f32.mrf.mxu1 }
 0x248   :  { %v2574_v19 = vadd.f32 %v15290_v32, %v2561_v16  ;;  %3971 = vmatpush.bf16.msrb.mxu2 %v10501_v20  ;;  %v2852_v23 = vpop.f32.mrf.mxu0  ;;  %3997 = vmatpush.bf16.msra.mxu0 %v10757_v12  ;;  %v15314_v32 = vld [vmem:[%s15722_s8] sm:$0xff]  ;;  %v10677_v20 = vor.u32 %v13630_v60, %v10674_v61  ;;  %v13626_v12 = vld [vmem:[#allocation14 + $0x324] sm:$0xf]  ;;  %v15332_v60 = vpack.c.b16 %v3256_v49, %v3256_v49 }
 0x249   :  { %v3255_v43 = vunpack.c.h.b16 %v15314_v32  ;;  %v10338_v16 = vld [vmem:[#allocation14 + $0xb0] sm:$0xf0]  ;;  %v13610_v17 = vld [vmem:[#allocation14 + $0x2a4] sm:$0xf]  ;;  %v10405_v23 = vor.u32 %v13562_v11, %v10402_v6  ;;  %v3254_v50 = vunpack.c.l.b16 %v15314_v32  ;;  %v13581_v61 = vld [vmem:[#allocation14 + $0x1b4] sm:$0xf0] }
 0x24a   :  { %v15309_v33 = vadd.f32 %v15297_v27, %v2574_v19  ;;  %v10453_v27 = vor.u32 %v13574_v34, %v10450_v22  ;;  %v10594_v19 = vld [vmem:[#allocation14 + $0x2b0] sm:$0xf0]  ;;  %v10760_v34 = vld [vmem:[#allocation14 + $0x3e8] sm:$0xf]  ;;  %v13577_v6 = vld [vmem:[#allocation14 + $0x194] sm:$0xf0] }
 0x24b   :  { %v15324_v51 = vpack.c.b16 %v3255_v43, %v3255_v43  ;;  %v10597_v22 = vor.u32 %v13610_v17, %v10594_v19  ;;  %v10578_v43 = vld [vmem:[#allocation14 + $0x290] sm:$0xf0]  ;;  %v15334_v32 = vpack.c.b16 %v3254_v50, %v3254_v50  ;;  %v10456_v11 = vld [vmem:[#allocation14 + $0x188] sm:$0xf] }
 0x24c   :  { %3972 = vmatpush.bf16.msrb.mxu2 %v10485_v24  ;;  %3998 = vmatpush.bf16.msra.mxu0 %v10741_v1  ;;  %v13558_v24 = vld [vmem:[#allocation14 + $0x104] sm:$0xf]  ;;  %v10661_v1 = vor.u32 %v13626_v12, %v10658_v21  ;;  %v10581_v56 = vor.u32 %v13606_v41, %v10578_v43  ;;  %v10712_v12 = vld [vmem:[#allocation14 + $0x388] sm:$0xf]  ;;  %v13641_v21 = vld [vmem:[#allocation14 + $0x394] sm:$0xf0]  ;;  %v10457_v19 = vor.u32 %v13577_v6, %v10456_v11 }
 0x24d   :  { %v2562_v35 = vpop.f32.mrf.mxu2  ;;  %v10530_v17 = vld [vmem:[#allocation14 + $0x230] sm:$0xf0]  ;;  %v13621_v41 = vld [vmem:[#allocation14 + $0x2f4] sm:$0xf0]  ;;  %v13587_v11 = vld [vmem:[#allocation14 + $0x1ec] sm:$0xf] }
 0x24e   :  { %v10341_v35 = vor.u32 %v13546_v15, %v10338_v16  ;;  %v10274_v15 = vld [vmem:[#allocation14 + $0x30] sm:$0xf0]  ;;  %v13594_v16 = vld [vmem:[#allocation14 + $0x224] sm:$0xf]  ;;  %v13625_v6 = vld [vmem:[#allocation14 + $0x314] sm:$0xf0] }
 0x24f   :  { %v10533_v31 = vor.u32 %v13594_v16, %v10530_v17  ;;  %v13545_v16 = vld [vmem:[#allocation14 + $0x94] sm:$0xf0]  ;;  %v10584_v17 = vld [vmem:[#allocation14 + $0x288] sm:$0xf] }
 0x250   :  { %3973 = vmatpush.bf16.msrb.mxu2 %v10469_v8  ;;  %3999 = vmatpush.bf16.msra.mxu0 %v10725_v26  ;;  %v13589_v8 = vld [vmem:[#allocation14 + $0x1f4] sm:$0xf0] }
 0x251   :  { %v13653_v26 = vld [vmem:[#allocation14 + $0x3f4] sm:$0xf0] }
 0x252   :  { %v10761_v38 = vor.u32 %v13653_v26, %v10760_v34  ;;  %v10258_v34 = vld [vmem:[#allocation14 + $0x10] sm:$0xf0]  ;;  %v13590_v26 = vld [vmem:[#allocation14 + $0x204] sm:$0xf] }
 0x254   :  { %3974 = vmatpush.bf16.msrb.mxu2 %v10453_v27  ;;  %4000 = vmatpush.bf16.msra.mxu0 %v10709_v46  ;;  %v10389_v27 = vor.u32 %v13558_v24, %v10386_v28  ;;  %v10505_v46 = vor.u32 %v13589_v8, %v10504_v40  ;;  %v10713_v24 = vor.u32 %v13641_v21, %v10712_v12  ;;  %v13573_v28 = vld [vmem:[#allocation14 + $0x174] sm:$0xf0]  ;;  %v13526_v8 = vld [vmem:[#allocation14 + $0x4] sm:$0xf]  ;;  %v10506_v12 = vld [vmem:[#allocation14 + $0x1f8] sm:$0xf0] }
 0x255   :  { %v2824_v55 = vpop.f32.mrf.mxu2  ;;  %v13637_v40 = vld [vmem:[#allocation14 + $0x374] sm:$0xf0]  ;;  %v10261_v49 = vor.u32 %v13526_v8, %v10258_v34  ;;  %v13651_v21 = vld [vmem:[#allocation14 + $0x3ec] sm:$0xf]  ;;  %v10746_v8 = vld [vmem:[#allocation14 + $0x3d8] sm:$0xf0] }
 0x256   :  { %v2825_v18 = vadd.f32 %v2824_v55, %v2812_v42  ;;  %v13585_v42 = vld [vmem:[#allocation14 + $0x1d4] sm:$0xf0]  ;;  %v10325_v55 = vor.u32 %v13542_v36, %v10322_v30  ;;  %v10632_v30 = vld [vmem:[#allocation14 + $0x2e8] sm:$0xf] }
 0x257   :  { %3927 = vmatmul.bf16.vlgmr.msra.gmra.mxu2 %v15324_v51  ;;  %3953 = vmatmul.bf16.vlgmr.msrb.gmra.mxu0 %v15326_v37  ;;  %v10489_v58 = vor.u32 %v13585_v42, %v10488_v48  ;;  %v13557_v36 = vld [vmem:[#allocation14 + $0xf4] sm:$0xf0]  ;;  %v10680_v48 = vld [vmem:[#allocation14 + $0x348] sm:$0xf] }
 0x258   :  { %v2854_v62 = vmax.f32 %v2825_v18, 0.0  ;;  %3975 = vmatpush.bf16.msrb.mxu2 %v10437_v52  ;;  %4001 = vmatpush.bf16.msra.mxu0 %v10693_v53  ;;  %v10744_v52 = vld [vmem:[#allocation14 + $0x3c8] sm:$0xf]  ;;  %v13649_v53 = vld [vmem:[#allocation14 + $0x3d4] sm:$0xf0] }
 0x259   :  { %v10306_v18 = vld [vmem:[#allocation14 + $0x70] sm:$0xf0]  ;;  %v10745_v44 = vor.u32 %v13649_v53, %v10744_v52  ;;  %v10633_v52 = vor.u32 %v13621_v41, %v10632_v30  ;;  %v10360_v53 = vld [vmem:[#allocation14 + $0xc8] sm:$0xf]  ;;  %v13605_v30 = vld [vmem:[#allocation14 + $0x274] sm:$0xf0] }
 0x25a   :  { %v2856_v4 = vpack.c.bf16 %v2854_v62, %v2854_v62  ;;  %v10728_v62 = vld [vmem:[#allocation14 + $0x3a8] sm:$0xf] }
 0x25c   :  { %3064 = vmatmul.bf16.vlgmr.msrb.gmra.mxu1 %v2856_v4  ;;  %3090 = vmatmul.bf16.vlgmr.msrb.gmra.mxu3 %v2856_v4  ;;  %v10290_v4 = vld [vmem:[#allocation14 + $0x50] sm:$0xf0] }
 0x25d   :  { %3958 = vmatpush.bf16.msrb.mxu1 %v10373_v63  ;;  %3984 = vmatpush.bf16.msrb.mxu3 %v10629_v0  ;;  %v2826_v13 = vpop.f32.mrf.mxu2  ;;  %v13645_v63 = vld [vmem:[#allocation14 + $0x3b4] sm:$0xf0]  ;;  %v10309_v0 = vor.u32 %v13538_v54, %v10306_v18 }
 0x25e   :  { %3976 = vmatpush.bf16.msrb.mxu2 %v10421_v10  ;;  %4002 = vmatpush.bf16.msra.mxu0 %v10677_v20  ;;  %v10473_v10 = vor.u32 %v13581_v61, %v10472_v59  ;;  %v10729_v20 = vor.u32 %v13645_v63, %v10728_v62  ;;  %v10293_v13 = vor.u32 %v13534_v5, %v10290_v4  ;;  %v13617_v54 = vld [vmem:[#allocation14 + $0x2d4] sm:$0xf0]  ;;  %v10664_v59 = vld [vmem:[#allocation14 + $0x328] sm:$0xf] }
 0x25f   :  { %v10344_v63 = vld [vmem:[#allocation14 + $0xa8] sm:$0xf]  ;;  %v13613_v5 = vld [vmem:[#allocation14 + $0x2b4] sm:$0xf0] }
 0x261   :  { %3959 = vmatpush.bf16.msrb.mxu1 %v10357_v14  ;;  %3985 = vmatpush.bf16.msrb.mxu3 %v10613_v2  ;;  %v10549_v14 = vor.u32 %v13598_v7, %v10546_v9  ;;  %v13530_v2 = vld [vmem:[#allocation14 + $0x24] sm:$0xf]  ;;  %v10392_v7 = vld [vmem:[#allocation14 + $0x108] sm:$0xf]  ;;  %v13561_v9 = vld [vmem:[#allocation14 + $0x114] sm:$0xf0] }
 0x262   :  { %3977 = vmatpush.bf16.msrb.mxu2 %v10405_v23  ;;  %4003 = vmatpush.bf16.msra.mxu0 %v10661_v1  ;;  %v10440_v23 = vld [vmem:[#allocation14 + $0x168] sm:$0xf]  ;;  %v10277_v29 = vor.u32 %v13530_v2, %v10274_v15 }
 0x263   :  { %v10696_v1 = vld [vmem:[#allocation14 + $0x368] sm:$0xf]  ;;  %v10441_v43 = vor.u32 %v13573_v28, %v10440_v23  ;;  %v10393_v23 = vor.u32 %v13561_v9, %v10392_v7  ;;  %v10509_v28 = vor.u32 %v13587_v11, %v10506_v12  ;;  %v13635_v7 = vld [vmem:[#allocation14 + $0x36c] sm:$0xf]  ;;  %v10698_v9 = vld [vmem:[#allocation14 + $0x378] sm:$0xf0] }
 0x264   :  { %v10328_v15 = vld [vmem:[#allocation14 + $0x88] sm:$0xf] }
 0x265   :  { %3960 = vmatpush.bf16.msrb.mxu1 %v10341_v35  ;;  %3986 = vmatpush.bf16.msrb.mxu3 %v10597_v22  ;;  %v10514_v35 = vld [vmem:[#allocation14 + $0x210] sm:$0xf0]  ;;  %v10376_v22 = vld [vmem:[#allocation14 + $0xe8] sm:$0xf]  ;;  %v10329_v34 = vor.u32 %v13545_v16, %v10328_v15  ;;  %v10634_v15 = vld [vmem:[#allocation14 + $0x2f8] sm:$0xf0] }
 0x266   :  { %3978 = vmatpush.bf16.msrb.mxu2 %v10389_v27  ;;  %4004 = vmatpush.bf16.msra.mxu0 %v10645_v45  ;;  %v10424_v27 = vld [vmem:[#allocation14 + $0x148] sm:$0xf]  ;;  %v10697_v45 = vor.u32 %v13637_v40, %v10696_v1  ;;  %v10517_v50 = vor.u32 %v13590_v26, %v10514_v35  ;;  %v10377_v42 = vor.u32 %v13557_v36, %v10376_v22  ;;  %v13583_v1 = vld [vmem:[#allocation14 + $0x1cc] sm:$0xf]  ;;  %v13541_v22 = vld [vmem:[#allocation14 + $0x74] sm:$0xf0] }
 0x267   :  { %v10312_v35 = vld [vmem:[#allocation14 + $0x68] sm:$0xf] }
 0x268   :  { %v10568_v36 = vld [vmem:[#allocation14 + $0x268] sm:$0xf] }
 0x269   :  { %3961 = vmatpush.bf16.msrb.mxu1 %v10325_v55  ;;  %3987 = vmatpush.bf16.msrb.mxu3 %v10581_v56  ;;  %v13553_v55 = vld [vmem:[#allocation14 + $0xd4] sm:$0xf0]  ;;  %v10616_v56 = vld [vmem:[#allocation14 + $0x2c8] sm:$0xf] }
 0x26a   :  { %4023 = vmatpush.bf16.msra.mxu2 %v10505_v46  ;;  %4049 = vmatpush.bf16.msrb.mxu0 %v10761_v38  ;;  %v13569_v46 = vld [vmem:[#allocation14 + $0x154] sm:$0xf0]  ;;  %v10361_v61 = vor.u32 %v13553_v55, %v10360_v53  ;;  %v10617_v62 = vor.u32 %v13617_v54, %v10616_v56  ;;  %v13575_v56 = vld [vmem:[#allocation14 + $0x18c] sm:$0xf]  ;;  %v10520_v12 = vld [vmem:[#allocation14 + $0x208] sm:$0xf] }
 0x26b   :  { %3979 = vmatmul.bf16.vlgmr.msrb.gmra.mxu2 %v15324_v51  ;;  %4005 = vmatmul.bf16.vlgmr.msra.gmra.mxu0 %v15326_v37  ;;  %v13633_v38 = vld [vmem:[#allocation14 + $0x354] sm:$0xf0]  ;;  %v10425_v18 = vor.u32 %v13569_v46, %v10424_v27  ;;  %v13643_v46 = vld [vmem:[#allocation14 + $0x3ac] sm:$0xf] }
 0x26c   :  { %3940 = vmatmul.bf16.vlgmr.msra.gmra.mxu3 %v15332_v60  ;;  %3914 = vmatmul.bf16.vlgmr.msra.gmra.mxu1 %v15334_v32  ;;  %v10681_v57 = vor.u32 %v13633_v38, %v10680_v48  ;;  %v10730_v48 = vld [vmem:[#allocation14 + $0x3b8] sm:$0xf0]  ;;  %v10313_v38 = vor.u32 %v13541_v22, %v10312_v35  ;;  %v13601_v53 = vld [vmem:[#allocation14 + $0x254] sm:$0xf0] }
 0x26d   :  { %3962 = vmatpush.bf16.msrb.mxu1 %v10309_v0  ;;  %3988 = vmatpush.bf16.msrb.mxu3 %v10565_v3  ;;  %v13549_v0 = vld [vmem:[#allocation14 + $0xb4] sm:$0xf0]  ;;  %v10600_v3 = vld [vmem:[#allocation14 + $0x2a8] sm:$0xf]  ;;  %v10733_v54 = vor.u32 %v13643_v46, %v10730_v48  ;;  %v10618_v35 = vld [vmem:[#allocation14 + $0x2d8] sm:$0xf0] }
 0x26e   :  { %4024 = vmatpush.bf16.msra.mxu2 %v10489_v58  ;;  %4050 = vmatpush.bf16.msrb.mxu0 %v10745_v44  ;;  %v13565_v58 = vld [vmem:[#allocation14 + $0x134] sm:$0xf0]  ;;  %v10601_v2 = vor.u32 %v13613_v5, %v10600_v3  ;;  %v13571_v3 = vld [vmem:[#allocation14 + $0x16c] sm:$0xf] }
 0x26f   :  { %v13629_v44 = vld [vmem:[#allocation14 + $0x334] sm:$0xf0]  ;;  %v10409_v4 = vor.u32 %v13565_v58, %v10408_v39  ;;  %v13639_v39 = vld [vmem:[#allocation14 + $0x38c] sm:$0xf] }
 0x270   :  { %v13547_v48 = vld [vmem:[#allocation14 + $0xac] sm:$0xf] }
 0x271   :  { %3963 = vmatpush.bf16.msrb.mxu1 %v10293_v13  ;;  %3989 = vmatpush.bf16.msrb.mxu3 %v10549_v14  ;;  %v10762_v13 = vld [vmem:[#allocation14 + $0x3f8] sm:$0xf0]  ;;  %v10345_v14 = vor.u32 %v13549_v0, %v10344_v63  ;;  %v13597_v63 = vld [vmem:[#allocation14 + $0x234] sm:$0xf0] }
 0x272   :  { %4025 = vmatpush.bf16.msra.mxu2 %v10473_v10  ;;  %4051 = vmatpush.bf16.msrb.mxu0 %v10729_v20  ;;  %v10665_v10 = vor.u32 %v13629_v44, %v10664_v59  ;;  %v10648_v20 = vld [vmem:[#allocation14 + $0x308] sm:$0xf]  ;;  %v10765_v40 = vor.u32 %v13651_v21, %v10762_v13  ;;  %v13593_v21 = vld [vmem:[#allocation14 + $0x214] sm:$0xf0]  ;;  %v13555_v13 = vld [vmem:[#allocation14 + $0xec] sm:$0xf] }
 0x273   :  { %v10280_v44 = vld [vmem:[#allocation14 + $0x28] sm:$0xf] }
 0x275   :  { %3964 = vmatpush.bf16.msrb.mxu1 %v10277_v29  ;;  %3990 = vmatpush.bf16.msrb.mxu3 %v10533_v31  ;;  %v10490_v29 = vld [vmem:[#allocation14 + $0x1d8] sm:$0xf0]  ;;  %v13647_v31 = vld [vmem:[#allocation14 + $0x3cc] sm:$0xf] }
 0x276   :  { %4026 = vmatpush.bf16.msra.mxu2 %v10457_v19  ;;  %4052 = vmatpush.bf16.msrb.mxu0 %v10713_v24  ;;  %v13609_v19 = vld [vmem:[#allocation14 + $0x294] sm:$0xf0]  ;;  %v10649_v24 = vor.u32 %v13625_v6, %v10648_v20  ;;  %v10493_v41 = vor.u32 %v13583_v1, %v10490_v29  ;;  %v10749_v27 = vor.u32 %v13647_v31, %v10746_v8  ;;  %v10264_v20 = vld [vmem:[#allocation14 + $0x8] sm:$0xf]  ;;  %v13551_v8 = vld [vmem:[#allocation14 + $0xcc] sm:$0xf] }
 0x277   :  { %v10585_v26 = vor.u32 %v13609_v19, %v10584_v17  ;;  %v13529_v6 = vld [vmem:[#allocation14 + $0x14] sm:$0xf0]  ;;  %v13567_v17 = vld [vmem:[#allocation14 + $0x14c] sm:$0xf]  ;;  %v10701_v19 = vor.u32 %v13635_v7, %v10698_v9  ;;  %v10570_v7 = vld [vmem:[#allocation14 + $0x278] sm:$0xf0] }
 0x278   :  { %v10265_v1 = vor.u32 %v13529_v6, %v10264_v20  ;;  %v10298_v20 = vld [vmem:[#allocation14 + $0x58] sm:$0xf0]  ;;  %v13599_v6 = vld [vmem:[#allocation14 + $0x24c] sm:$0xf] }
 0x279   :  { %3965 = vmatpush.bf16.msrb.mxu1 %v10261_v49  ;;  %3991 = vmatpush.bf16.msrb.mxu3 %v10517_v50  ;;  %v10569_v49 = vor.u32 %v13605_v30, %v10568_v36  ;;  %v10296_v50 = vld [vmem:[#allocation14 + $0x48] sm:$0xf]  ;;  %v13563_v36 = vld [vmem:[#allocation14 + $0x12c] sm:$0xf] }
 0x27a   :  { %4027 = vmatpush.bf16.msra.mxu2 %v10441_v43  ;;  %4053 = vmatpush.bf16.msrb.mxu0 %v10697_v45  ;;  %v13579_v43 = vld [vmem:[#allocation14 + $0x1ac] sm:$0xf]  ;;  %v10474_v45 = vld [vmem:[#allocation14 + $0x1b8] sm:$0xf0] }
 0x27b   :  { %v10477_v55 = vor.u32 %v13579_v43, %v10474_v45  ;;  %v13627_v43 = vld [vmem:[#allocation14 + $0x32c] sm:$0xf] }
 0x27c   :  { %3992 = vmatmul.bf16.vlgmr.msrb.gmra.mxu3 %v15332_v60  ;;  %3966 = vmatmul.bf16.vlgmr.msrb.gmra.mxu1 %v15334_v32 }
 0x27d   :  { %4010 = vmatpush.bf16.msra.mxu1 %v10377_v42  ;;  %4036 = vmatpush.bf16.msra.mxu3 %v10633_v52  ;;  %v13537_v42 = vld [vmem:[#allocation14 + $0x54] sm:$0xf0]  ;;  %v10552_v52 = vld [vmem:[#allocation14 + $0x248] sm:$0xf] }
 0x27e   :  { %4028 = vmatpush.bf16.msra.mxu2 %v10425_v18  ;;  %4054 = vmatpush.bf16.msrb.mxu0 %v10681_v57  ;;  %v10458_v18 = vld [vmem:[#allocation14 + $0x198] sm:$0xf0]  ;;  %v10297_v58 = vor.u32 %v13537_v42, %v10296_v50  ;;  %v10553_v59 = vor.u32 %v13601_v53, %v10552_v52  ;;  %v13559_v52 = vld [vmem:[#allocation14 + $0x10c] sm:$0xf] }
 0x27f   :  { %v10714_v57 = vld [vmem:[#allocation14 + $0x398] sm:$0xf0]  ;;  %v10461_v0 = vor.u32 %v13575_v56, %v10458_v18  ;;  %v13623_v56 = vld [vmem:[#allocation14 + $0x30c] sm:$0xf] }
 0x280   :  { %v10717_v5 = vor.u32 %v13639_v39, %v10714_v57  ;;  %v10602_v50 = vld [vmem:[#allocation14 + $0x2b8] sm:$0xf0]  ;;  %v13543_v57 = vld [vmem:[#allocation14 + $0x8c] sm:$0xf] }
 0x281   :  { %4011 = vmatpush.bf16.msra.mxu1 %v10361_v61  ;;  %4037 = vmatpush.bf16.msra.mxu3 %v10617_v62  ;;  %v13533_v61 = vld [vmem:[#allocation14 + $0x34] sm:$0xf0]  ;;  %v10536_v62 = vld [vmem:[#allocation14 + $0x228] sm:$0xf] }
 0x282   :  { %4029 = vmatpush.bf16.msra.mxu2 %v10409_v4  ;;  %4055 = vmatpush.bf16.msrb.mxu0 %v10665_v10  ;;  %v10442_v4 = vld [vmem:[#allocation14 + $0x178] sm:$0xf0]  ;;  %v10281_v10 = vor.u32 %v13533_v61, %v10280_v44  ;;  %v10537_v11 = vor.u32 %v13597_v63, %v10536_v62 }
 0x283   :  { %v10445_v16 = vor.u32 %v13571_v3, %v10442_v4  ;;  %v10586_v44 = vld [vmem:[#allocation14 + $0x298] sm:$0xf0]  ;;  %v13539_v3 = vld [vmem:[#allocation14 + $0x6c] sm:$0xf] }
 0x284   :  { %v13603_v4 = vld [vmem:[#allocation14 + $0x26c] sm:$0xf] }
 0x285   :  { %4012 = vmatpush.bf16.msra.mxu1 %v10345_v14  ;;  %4038 = vmatpush.bf16.msra.mxu3 %v10601_v2  ;;  %v10378_v14 = vld [vmem:[#allocation14 + $0xf8] sm:$0xf0]  ;;  %v13619_v2 = vld [vmem:[#allocation14 + $0x2ec] sm:$0xf] }
 0x286   :  { %4030 = vmatpush.bf16.msra.mxu2 %v10393_v23  ;;  %4056 = vmatpush.bf16.msrb.mxu0 %v10649_v24  ;;  %v10426_v23 = vld [vmem:[#allocation14 + $0x158] sm:$0xf0]  ;;  %v13631_v24 = vld [vmem:[#allocation14 + $0x34c] sm:$0xf]  ;;  %v10381_v29 = vor.u32 %v13555_v13, %v10378_v14  ;;  %v10637_v31 = vor.u32 %v13619_v2, %v10634_v15  ;;  %v13716_v13 = vld [vmem:[#allocation17 + $0x1ec] sm:$0xf0] }
 0x287   :  { %v10429_v22 = vor.u32 %v13567_v17, %v10426_v23  ;;  %v10282_v17 = vld [vmem:[#allocation14 + $0x38] sm:$0xf0] }
 0x288   :  { %v10538_v23 = vld [vmem:[#allocation14 + $0x238] sm:$0xf0] }
 0x289   :  { %4013 = vmatpush.bf16.msra.mxu1 %v10329_v34  ;;  %4039 = vmatpush.bf16.msra.mxu3 %v10585_v26  ;;  %v10362_v34 = vld [vmem:[#allocation14 + $0xd8] sm:$0xf0]  ;;  %v13615_v26 = vld [vmem:[#allocation14 + $0x2cc] sm:$0xf] }
 0x28a   :  { %4075 = vmatpush.bf16.msrb.mxu2 %v10509_v28  ;;  %4101 = vmatpush.bf16.msra.mxu0 %v10765_v40  ;;  %v10682_v28 = vld [vmem:[#allocation14 + $0x358] sm:$0xf0]  ;;  %v10521_v40 = vor.u32 %v13593_v21, %v10520_v12  ;;  %v10365_v45 = vor.u32 %v13551_v8, %v10362_v34  ;;  %v10621_v46 = vor.u32 %v13615_v26, %v10618_v35  ;;  %v11008_v21 = vld [vmem:[#allocation17 + $0x1e0] sm:$0xf]  ;;  %v13708_v26 = vld [vmem:[#allocation17 + $0x1ac] sm:$0xf0] }
 0x28b   :  { %4031 = vmatmul.bf16.vlgmr.msra.gmra.mxu2 %v15324_v51  ;;  %4057 = vmatmul.bf16.vlgmr.msrb.gmra.mxu0 %v15326_v37  ;;  %v10685_v30 = vor.u32 %v13631_v24, %v10682_v28  ;;  %v10554_v12 = vld [vmem:[#allocation14 + $0x258] sm:$0xf0]  ;;  %v11009_v14 = vor.u32 %v13716_v13, %v11008_v21  ;;  %v10992_v24 = vld [vmem:[#allocation17 + $0x1c0] sm:$0xf]  ;;  %v13712_v28 = vld [vmem:[#allocation17 + $0x1cc] sm:$0xf0] }
 0x28c   :  { %v10557_v15 = vor.u32 %v13599_v6, %v10554_v12  ;;  %v10522_v8 = vld [vmem:[#allocation14 + $0x218] sm:$0xf0]  ;;  %v10976_v34 = vld [vmem:[#allocation17 + $0x1a0] sm:$0xf]  ;;  %v13748_v21 = vld [vmem:[#allocation17 + $0x2ec] sm:$0xf0] }
 0x28d   :  { %4014 = vmatpush.bf16.msra.mxu1 %v10313_v38  ;;  %4040 = vmatpush.bf16.msra.mxu3 %v10569_v49  ;;  %v10346_v38 = vld [vmem:[#allocation14 + $0xb8] sm:$0xf0]  ;;  %v13611_v49 = vld [vmem:[#allocation14 + $0x2ac] sm:$0xf]  ;;  %v10880_v35 = vld [vmem:[#allocation17 + $0xe0] sm:$0xf] }
 0x28e   :  { %4076 = vmatpush.bf16.msrb.mxu2 %v10493_v41  ;;  %4102 = vmatpush.bf16.msra.mxu0 %v10749_v27  ;;  %v10410_v41 = vld [vmem:[#allocation14 + $0x138] sm:$0xf0]  ;;  %v10349_v18 = vor.u32 %v13547_v48, %v10346_v38  ;;  %v10605_v39 = vor.u32 %v13611_v49, %v10602_v50  ;;  %v10848_v48 = vld [vmem:[#allocation17 + $0xa0] sm:$0xf]  ;;  %v13676_v38 = vld [vmem:[#allocation17 + $0xac] sm:$0xf0] }
 0x28f   :  { %v10666_v27 = vld [vmem:[#allocation14 + $0x338] sm:$0xf0]  ;;  %v10413_v42 = vor.u32 %v13563_v36, %v10410_v41  ;;  %v10977_v36 = vor.u32 %v13708_v26, %v10976_v34  ;;  %v10849_v49 = vor.u32 %v13676_v38, %v10848_v48  ;;  %v10960_v50 = vld [vmem:[#allocation17 + $0x180] sm:$0xf]  ;;  %v10866_v34 = vld [vmem:[#allocation17 + $0xd0] sm:$0xf0] }
 0x290   :  { %v10669_v53 = vor.u32 %v13627_v43, %v10666_v27  ;;  %v10864_v27 = vld [vmem:[#allocation17 + $0xc0] sm:$0xf]  ;;  %v10994_v26 = vld [vmem:[#allocation17 + $0x1d0] sm:$0xf0] }
 0x291   :  { %4015 = vmatpush.bf16.msra.mxu1 %v10297_v58  ;;  %4041 = vmatpush.bf16.msra.mxu3 %v10553_v59  ;;  %v10330_v58 = vld [vmem:[#allocation14 + $0x98] sm:$0xf0]  ;;  %v13607_v59 = vld [vmem:[#allocation14 + $0x28c] sm:$0xf]  ;;  %v10768_v13 = vld [vmem:[#allocation17] sm:$0xf] }
 0x292   :  { %4077 = vmatpush.bf16.msrb.mxu2 %v10477_v55  ;;  %4103 = vmatpush.bf16.msra.mxu0 %v10733_v54  ;;  %v10394_v55 = vld [vmem:[#allocation14 + $0x118] sm:$0xf0]  ;;  %v10333_v63 = vor.u32 %v13543_v57, %v10330_v58  ;;  %v13668_v57 = vld [vmem:[#allocation17 + $0x6c] sm:$0xf0]  ;;  %v10850_v48 = vld [vmem:[#allocation17 + $0xb0] sm:$0xf0] }
 0x293   :  { %v10650_v54 = vld [vmem:[#allocation14 + $0x318] sm:$0xf0]  ;;  %v10397_v61 = vor.u32 %v13559_v52, %v10394_v55  ;;  %v13672_v52 = vld [vmem:[#allocation17 + $0x8c] sm:$0xf0]  ;;  %v10978_v38 = vld [vmem:[#allocation17 + $0x1b0] sm:$0xf0] }
 0x294   :  { %v10653_v62 = vor.u32 %v13623_v56, %v10650_v54  ;;  %v10944_v54 = vld [vmem:[#allocation17 + $0x160] sm:$0xf] }
 0x295   :  { %4016 = vmatpush.bf16.msra.mxu1 %v10281_v10  ;;  %4042 = vmatpush.bf16.msra.mxu3 %v10537_v11  ;;  %v10573_v10 = vor.u32 %v13603_v4, %v10570_v7  ;;  %v13535_v11 = vld [vmem:[#allocation14 + $0x4c] sm:$0xf]  ;;  %v10784_v4 = vld [vmem:[#allocation17 + $0x20] sm:$0xf]  ;;  %v13660_v7 = vld [vmem:[#allocation17 + $0x2c] sm:$0xf0] }
 0x296   :  { %4078 = vmatpush.bf16.msrb.mxu2 %v10461_v0  ;;  %4104 = vmatpush.bf16.msra.mxu0 %v10717_v5  ;;  %v10589_v0 = vor.u32 %v13607_v59, %v10586_v44  ;;  %v10314_v5 = vld [vmem:[#allocation14 + $0x78] sm:$0xf0]  ;;  %v10301_v2 = vor.u32 %v13535_v11, %v10298_v20  ;;  %v10800_v44 = vld [vmem:[#allocation17 + $0x40] sm:$0xf]  ;;  %v13688_v11 = vld [vmem:[#allocation17 + $0x10c] sm:$0xf0]  ;;  %v10785_v6 = vor.u32 %v13660_v7, %v10784_v4 }
 0x297   :  { %v10317_v9 = vor.u32 %v13539_v3, %v10314_v5  ;;  %v10912_v3 = vld [vmem:[#allocation17 + $0x120] sm:$0xf]  ;;  %v13692_v5 = vld [vmem:[#allocation17 + $0x12c] sm:$0xf0]  ;;  %v10818_v4 = vld [vmem:[#allocation17 + $0x70] sm:$0xf0] }
 0x298   :  { %v11136_v20 = vld [vmem:[#allocation17 + $0x2e0] sm:$0xf] }
 0x299   :  { %4017 = vmatpush.bf16.msra.mxu1 %v10265_v1  ;;  %4043 = vmatpush.bf16.msra.mxu3 %v10521_v40  ;;  %v10993_v1 = vor.u32 %v13712_v28, %v10992_v24 }
 0x29a   :  { %4079 = vmatpush.bf16.msrb.mxu2 %v10445_v16  ;;  %4105 = vmatpush.bf16.msra.mxu0 %v10701_v19  ;;  %v13531_v16 = vld [vmem:[#allocation14 + $0x2c] sm:$0xf] }
 0x29b   :  { %v13595_v19 = vld [vmem:[#allocation14 + $0x22c] sm:$0xf] }
 0x29c   :  { %4044 = vmatmul.bf16.vlgmr.msra.gmra.mxu3 %v15332_v60  ;;  %4018 = vmatmul.bf16.vlgmr.msra.gmra.mxu1 %v15334_v32  ;;  %v10541_v40 = vor.u32 %v13595_v19, %v10538_v23  ;;  %v13714_v19 = vld [vmem:[#allocation17 + $0x1e4] sm:$0xf]  ;;  %v11010_v23 = vld [vmem:[#allocation17 + $0x1f0] sm:$0xf0] }
 0x29d   :  { %4062 = vmatpush.bf16.msrb.mxu1 %v10381_v29  ;;  %4088 = vmatpush.bf16.msrb.mxu3 %v10637_v31  ;;  %v10266_v29 = vld [vmem:[#allocation14 + $0x18] sm:$0xf0]  ;;  %v13591_v31 = vld [vmem:[#allocation14 + $0x20c] sm:$0xf]  ;;  %v11013_v24 = vor.u32 %v13714_v19, %v11010_v23 }
 0x29e   :  { %4080 = vmatpush.bf16.msrb.mxu2 %v10429_v22  ;;  %4106 = vmatpush.bf16.msra.mxu0 %v10685_v30  ;;  %v13684_v22 = vld [vmem:[#allocation17 + $0xec] sm:$0xf0]  ;;  %v10525_v41 = vor.u32 %v13591_v31, %v10522_v8  ;;  %v13710_v31 = vld [vmem:[#allocation17 + $0x1c4] sm:$0xf] }
 0x29f   :  { %v10881_v43 = vor.u32 %v13684_v22, %v10880_v35  ;;  %v13678_v8 = vld [vmem:[#allocation17 + $0xc4] sm:$0xf]  ;;  %v10997_v35 = vor.u32 %v13710_v31, %v10994_v26  ;;  %v11104_v22 = vld [vmem:[#allocation17 + $0x2a0] sm:$0xf]  ;;  %v10914_v31 = vld [vmem:[#allocation17 + $0x130] sm:$0xf0] }
 0x2a0   :  { %v10786_v26 = vld [vmem:[#allocation17 + $0x30] sm:$0xf0] }
 0x2a1   :  { %4063 = vmatpush.bf16.msrb.mxu1 %v10365_v45  ;;  %4089 = vmatpush.bf16.msrb.mxu3 %v10621_v46  ;;  %v13680_v45 = vld [vmem:[#allocation17 + $0xcc] sm:$0xf0] }
 0x2a2   :  { %4081 = vmatpush.bf16.msrb.mxu2 %v10413_v42  ;;  %4107 = vmatpush.bf16.msra.mxu0 %v10669_v53  ;;  %v10865_v46 = vor.u32 %v13680_v45, %v10864_v27  ;;  %v10832_v42 = vld [vmem:[#allocation17 + $0x80] sm:$0xf]  ;;  %v13704_v53 = vld [vmem:[#allocation17 + $0x18c] sm:$0xf0]  ;;  %v13706_v27 = vld [vmem:[#allocation17 + $0x1a4] sm:$0xf] }
 0x2a3   :  { %v10961_v55 = vor.u32 %v13704_v53, %v10960_v50  ;;  %v10833_v56 = vor.u32 %v13672_v52, %v10832_v42  ;;  %v11088_v42 = vld [vmem:[#allocation17 + $0x280] sm:$0xf]  ;;  %v13736_v52 = vld [vmem:[#allocation17 + $0x28c] sm:$0xf0] }
 0x2a5   :  { %4064 = vmatpush.bf16.msrb.mxu1 %v10349_v18  ;;  %4090 = vmatpush.bf16.msrb.mxu3 %v10605_v39  ;;  %v13700_v18 = vld [vmem:[#allocation17 + $0x16c] sm:$0xf0]  ;;  %v10816_v39 = vld [vmem:[#allocation17 + $0x60] sm:$0xf] }
 0x2a6   :  { %4082 = vmatpush.bf16.msrb.mxu2 %v10397_v61  ;;  %4108 = vmatpush.bf16.msra.mxu0 %v10653_v62  ;;  %v10945_v58 = vor.u32 %v13700_v18, %v10944_v54  ;;  %v10817_v59 = vor.u32 %v13668_v57, %v10816_v39  ;;  %v13664_v61 = vld [vmem:[#allocation17 + $0x4c] sm:$0xf0]  ;;  %v13702_v54 = vld [vmem:[#allocation17 + $0x184] sm:$0xf]  ;;  %v10834_v39 = vld [vmem:[#allocation17 + $0x90] sm:$0xf0] }
 0x2a7   :  { %v13670_v18 = vld [vmem:[#allocation17 + $0x84] sm:$0xf]  ;;  %v10962_v57 = vld [vmem:[#allocation17 + $0x190] sm:$0xf0] }
 0x2a9   :  { %4065 = vmatpush.bf16.msrb.mxu1 %v10333_v63  ;;  %4091 = vmatpush.bf16.msrb.mxu3 %v10589_v0  ;;  %v10801_v0 = vor.u32 %v13664_v61, %v10800_v44  ;;  %v10837_v44 = vor.u32 %v13670_v18, %v10834_v39 }
 0x2aa   :  { %4083 = vmatmul.bf16.vlgmr.msrb.gmra.mxu2 %v15324_v51  ;;  %4109 = vmatmul.bf16.vlgmr.msra.gmra.mxu0 %v15326_v37  ;;  %v10285_v51 = vor.u32 %v13531_v16, %v10282_v17  ;;  %v13527_v37 = vld [vmem:[#allocation14 + $0xc] sm:$0xf]  ;;  %v10882_v17 = vld [vmem:[#allocation17 + $0xf0] sm:$0xf0] }
 0x2ab   :  { %4913 = vmatpush.bf16.msra.mxu2 %v11009_v14  ;;  %v10269_v30 = vor.u32 %v13527_v37, %v10266_v29  ;;  %v13656_v14 = vld [vmem:[#allocation17 + $0xc] sm:$0xf0] }
 0x2ad   :  { %4066 = vmatpush.bf16.msrb.mxu1 %v10317_v9  ;;  %4092 = vmatpush.bf16.msrb.mxu3 %v10573_v10  ;;  %v10913_v9 = vor.u32 %v13692_v5, %v10912_v3  ;;  %v10896_v10 = vld [vmem:[#allocation17 + $0x100] sm:$0xf]  ;;  %v13666_v5 = vld [vmem:[#allocation17 + $0x64] sm:$0xf] }
 0x2ae   :  { %v10897_v12 = vor.u32 %v13688_v11, %v10896_v10 }
 0x2af   :  { %4914 = vmatpush.bf16.msra.mxu2 %v10993_v1  ;;  %v10769_v1 = vor.u32 %v13656_v14, %v10768_v13  ;;  %v13694_v14 = vld [vmem:[#allocation17 + $0x144] sm:$0xf] }
 0x2b1   :  { %4067 = vmatpush.bf16.msrb.mxu1 %v10301_v2  ;;  %4093 = vmatpush.bf16.msrb.mxu3 %v10557_v15  ;;  %v13682_v2 = vld [vmem:[#allocation17 + $0xe4] sm:$0xf]  ;;  %v11137_v15 = vor.u32 %v13748_v21, %v11136_v20  ;;  %v10821_v21 = vor.u32 %v13666_v5, %v10818_v4  ;;  %v11232_v5 = vld [vmem:[#allocation17 + $0x3a0] sm:$0xf]  ;;  %v13772_v4 = vld [vmem:[#allocation17 + $0x3ac] sm:$0xf0] }
 0x2b2   :  { %v10885_v37 = vor.u32 %v13682_v2, %v10882_v17  ;;  %v10930_v2 = vld [vmem:[#allocation17 + $0x150] sm:$0xf0] }
 0x2b3   :  { %4915 = vmatpush.bf16.msra.mxu2 %v10977_v36  ;;  %v13740_v36 = vld [vmem:[#allocation17 + $0x2ac] sm:$0xf0]  ;;  %v10802_v17 = vld [vmem:[#allocation17 + $0x50] sm:$0xf0]  ;;  %v10933_v19 = vor.u32 %v13694_v14, %v10930_v2  ;;  %v11216_v2 = vld [vmem:[#allocation17 + $0x380] sm:$0xf] }
 0x2b5   :  { %4068 = vmatpush.bf16.msrb.mxu1 %v10285_v51  ;;  %4094 = vmatpush.bf16.msrb.mxu3 %v10541_v40  ;;  %v11120_v51 = vld [vmem:[#allocation17 + $0x2c0] sm:$0xf]  ;;  %v13744_v40 = vld [vmem:[#allocation17 + $0x2cc] sm:$0xf0] }
 0x2b6   :  { %v11121_v29 = vor.u32 %v13744_v40, %v11120_v51 }
 0x2b7   :  { %4916 = vmatpush.bf16.msra.mxu2 %v10961_v55 }
 0x2b9   :  { %4069 = vmatpush.bf16.msrb.mxu1 %v10269_v30  ;;  %4095 = vmatpush.bf16.msrb.mxu3 %v10525_v41  ;;  %v2890_v30 = vld [vmem:[#allocation13] sm:$0x3]  ;;  %v10869_v41 = vor.u32 %v13678_v8, %v10866_v34  ;;  %v13658_v34 = vld [vmem:[#allocation17 + $0x24] sm:$0xf] }
 0x2ba   :  { %v2892_v53 = vperm.slane %v2890_v30, 0  ;;  %v2893_v11 = vperm.slane %v2890_v30, 1  ;;  %v13654_v30 = vld [vmem:[#allocation17 + $0x4] sm:$0xf] }
 0x2bb   :  { %4917 = vmatpush.bf16.msra.mxu2 %v10945_v58  ;;  %v10965_v58 = vor.u32 %v13702_v54, %v10962_v57 }
 0x2bc   :  { %4070 = vmatmul.bf16.vlgmr.msrb.gmra.mxu1 %v15334_v32  ;;  %4096 = vmatmul.bf16.vlgmr.msrb.gmra.mxu3 %v15332_v60  ;;  %v10928_v32 = vld [vmem:[#allocation17 + $0x140] sm:$0xf]  ;;  %v13696_v60 = vld [vmem:[#allocation17 + $0x14c] sm:$0xf0] }
 0x2bd   :  { %4900 = vmatpush.bf16.msra.mxu1 %v10881_v43  ;;  %v10929_v62 = vor.u32 %v13696_v60, %v10928_v32  ;;  %4926 = vmatpush.bf16.msra.mxu3 %v11137_v15  ;;  %v11105_v43 = vor.u32 %v13740_v36, %v11104_v22  ;;  %v13732_v32 = vld [vmem:[#allocation17 + $0x26c] sm:$0xf0]  ;;  %v13662_v15 = vld [vmem:[#allocation17 + $0x44] sm:$0xf] }
 0x2be   :  { %v10805_v40 = vor.u32 %v13662_v15, %v10802_v17  ;;  %v13768_v15 = vld [vmem:[#allocation17 + $0x38c] sm:$0xf0]  ;;  %v13734_v17 = vld [vmem:[#allocation17 + $0x284] sm:$0xf] }
 0x2bf   :  { %4918 = vmatpush.bf16.msra.mxu2 %v10929_v62  ;;  %v13698_v62 = vld [vmem:[#allocation17 + $0x164] sm:$0xf] }
 0x2c1   :  { %4901 = vmatpush.bf16.msra.mxu1 %v10865_v46  ;;  %4927 = vmatpush.bf16.msra.mxu3 %v11121_v29  ;;  %v13674_v46 = vld [vmem:[#allocation17 + $0xa4] sm:$0xf] }
 0x2c2   :  { %v10853_v55 = vor.u32 %v13674_v46, %v10850_v48  ;;  %v13690_v29 = vld [vmem:[#allocation17 + $0x124] sm:$0xf]  ;;  %v11264_v48 = vld [vmem:[#allocation17 + $0x3e0] sm:$0xf] }
 0x2c3   :  { %4919 = vmatpush.bf16.msra.mxu2 %v10913_v9  ;;  %v10917_v22 = vor.u32 %v13690_v29, %v10914_v31  ;;  %v11200_v31 = vld [vmem:[#allocation17 + $0x360] sm:$0xf] }
 0x2c4   :  { %v15350_v63 = vpop.f32.mrf.mxu0 }
 0x2c5   :  { %4902 = vmatpush.bf16.msra.mxu1 %v10849_v49  ;;  %4928 = vmatpush.bf16.msra.mxu3 %v11105_v43  ;;  %v10981_v49 = vor.u32 %v13706_v27, %v10978_v38  ;;  %v11024_v43 = vld [vmem:[#allocation17 + $0x200] sm:$0xf]  ;;  %v13720_v27 = vld [vmem:[#allocation17 + $0x20c] sm:$0xf0] }
 0x2c6   :  { %v11025_v46 = vor.u32 %v13720_v27, %v11024_v43  ;;  %v13780_v38 = vld [vmem:[#allocation17 + $0x3ec] sm:$0xf0] }
 0x2c7   :  { %4920 = vmatpush.bf16.msra.mxu2 %v10897_v12  ;;  %v13728_v12 = vld [vmem:[#allocation17 + $0x24c] sm:$0xf0] }
 0x2c9   :  { %4903 = vmatpush.bf16.msra.mxu1 %v10833_v56  ;;  %v11089_v56 = vor.u32 %v13736_v52, %v11088_v42  ;;  %v10898_v42 = vld [vmem:[#allocation17 + $0x110] sm:$0xf0]  ;;  %v13746_v52 = vld [vmem:[#allocation17 + $0x2e4] sm:$0xf] }
 0x2ca   :  { %v15352_v16 = vpop.f32.mrf.mxu2 }
 0x2cb   :  { %4965 = vmatpush.bf16.msrb.mxu2 %v11013_v24  ;;  %4929 = vmatpush.bf16.msra.mxu3 %v11089_v56 }
 0x2cc   :  { %v3106_v28 = vpop.f32.mrf.mxu0 }
 0x2cd   :  { %4904 = vmatpush.bf16.msra.mxu1 %v10817_v59  ;;  %v11072_v59 = vld [vmem:[#allocation17 + $0x260] sm:$0xf]  ;;  %v15361_v28 = vld [vmem:[#allocation16] sm:$0xf] }
 0x2ce   :  { %v11073_v61 = vor.u32 %v13732_v32, %v11072_v59  ;;  %v3244_v36 = vperm.slane %v15361_v28, 0  ;;  %v13776_v59 = vld [vmem:[#allocation17 + $0x3cc] sm:$0xf0]  ;;  %v13742_v32 = vld [vmem:[#allocation17 + $0x2c4] sm:$0xf] }
 0x2cf   :  { %4966 = vmatpush.bf16.msrb.mxu2 %v10997_v35 }
 0x2d0   :  { %4930 = vmatpush.bf16.msra.mxu3 %v11073_v61  ;;  %v11122_v61 = vld [vmem:[#allocation17 + $0x2d0] sm:$0xf0] }
 0x2d1   :  { %4905 = vmatpush.bf16.msra.mxu1 %v10801_v0  ;;  %v10946_v0 = vld [vmem:[#allocation17 + $0x170] sm:$0xf0] }
 0x2d2   :  { %v3080_v45 = vpop.f32.mrf.mxu2  ;;  %v10949_v9 = vor.u32 %v13698_v62, %v10946_v0  ;;  %v11125_v62 = vor.u32 %v13742_v32, %v11122_v61  ;;  %v13673_v32 = vld [vmem:[#allocation17 + $0x94] sm:$0xf0] }
 0x2d3   :  { %4967 = vmatpush.bf16.msrb.mxu2 %v10981_v49  ;;  %v10789_v45 = vor.u32 %v13658_v34, %v10786_v26  ;;  %v13686_v49 = vld [vmem:[#allocation17 + $0x104] sm:$0xf]  ;;  %v13764_v34 = vld [vmem:[#allocation17 + $0x36c] sm:$0xf0] }
 0x2d4   :  { %v15354_v50 = vpop.f32.mrf.mxu0  ;;  %v10901_v54 = vor.u32 %v13686_v49, %v10898_v42  ;;  %v13730_v26 = vld [vmem:[#allocation17 + $0x264] sm:$0xf]  ;;  %v13677_v42 = vld [vmem:[#allocation17 + $0xb4] sm:$0xf0] }
 0x2d5   :  { %4906 = vmatpush.bf16.msra.mxu1 %v10785_v6  ;;  %v11056_v6 = vld [vmem:[#allocation17 + $0x240] sm:$0xf] }
 0x2d6   :  { %v11057_v13 = vor.u32 %v13728_v12, %v11056_v6 }
 0x2d7   :  { %4968 = vmatpush.bf16.msrb.mxu2 %v10965_v58  ;;  %v11248_v58 = vld [vmem:[#allocation17 + $0x3c0] sm:$0xf] }
 0x2d8   :  { %4931 = vmatpush.bf16.msra.mxu3 %v11057_v13 }
 0x2d9   :  { %4907 = vmatpush.bf16.msra.mxu1 %v10769_v1  ;;  %v3065_v60 = vpop.f32.mrf.mxu1  ;;  %v13724_v1 = vld [vmem:[#allocation17 + $0x22c] sm:$0xf0] }
 0x2da   :  { %v3066_v3 = vadd.f32 %v3065_v60, %v2892_v53  ;;  %v15356_v7 = vpop.f32.mrf.mxu2  ;;  %v11138_v53 = vld [vmem:[#allocation17 + $0x2f0] sm:$0xf0] }
 0x2db   :  { %4969 = vmatpush.bf16.msrb.mxu2 %v10949_v9  ;;  %v11141_v18 = vor.u32 %v13746_v52, %v11138_v53  ;;  %v13738_v9 = vld [vmem:[#allocation17 + $0x2a4] sm:$0xf]  ;;  %v11058_v53 = vld [vmem:[#allocation17 + $0x250] sm:$0xf0] }
 0x2dc   :  { %v15359_v10 = vadd.f32 %v15352_v16, %v3066_v3  ;;  %v3956_v20 = vpop.f32.mrf.mxu0  ;;  %v11040_v16 = vld [vmem:[#allocation17 + $0x220] sm:$0xf] }
 0x2dd   :  { %4952 = vmatpush.bf16.msrb.mxu1 %v10885_v37  ;;  %v11041_v37 = vor.u32 %v13724_v1, %v11040_v16  ;;  %v11106_v20 = vld [vmem:[#allocation17 + $0x2b0] sm:$0xf0] }
 0x2de   :  { %v11109_v12 = vor.u32 %v13738_v9, %v11106_v20  ;;  %v11090_v16 = vld [vmem:[#allocation17 + $0x290] sm:$0xf0]  ;;  %v11016_v9 = vld [vmem:[#allocation17 + $0x1e8] sm:$0xf] }
 0x2df   :  { %v3091_v23 = vpop.f32.mrf.mxu3  ;;  %4970 = vmatpush.bf16.msrb.mxu2 %v10933_v19  ;;  %4932 = vmatpush.bf16.msra.mxu3 %v11041_v37  ;;  %v10888_v19 = vld [vmem:[#allocation17 + $0xe8] sm:$0xf]  ;;  %v11093_v1 = vor.u32 %v13734_v17, %v11090_v16  ;;  %v11266_v17 = vld [vmem:[#allocation17 + $0x3f0] sm:$0xf0] }
 0x2e0   :  { %v3092_v24 = vadd.f32 %v3091_v23, %v2893_v11  ;;  %v11233_v11 = vor.u32 %v13772_v4, %v11232_v5  ;;  %v13685_v23 = vld [vmem:[#allocation17 + $0xf4] sm:$0xf0]  ;;  %v10824_v5 = vld [vmem:[#allocation17 + $0x68] sm:$0xf] }
 0x2e1   :  { %4953 = vmatpush.bf16.msrb.mxu1 %v10869_v41  ;;  %v3067_v51 = vpop.f32.mrf.mxu1  ;;  %v10770_v41 = vld [vmem:[#allocation17 + $0x10] sm:$0xf0]  ;;  %v10889_v37 = vor.u32 %v13685_v23, %v10888_v19  ;;  %v13669_v4 = vld [vmem:[#allocation17 + $0x74] sm:$0xf0] }
 0x2e2   :  { %v15364_v8 = vadd.f32 %v15350_v63, %v3092_v24  ;;  %v3930_v35 = vpop.f32.mrf.mxu2  ;;  %v11265_v63 = vor.u32 %v13780_v38, %v11264_v48  ;;  %v10773_v57 = vor.u32 %v13654_v30, %v10770_v41  ;;  %v11217_v24 = vor.u32 %v13768_v15, %v11216_v2  ;;  %v11074_v30 = vld [vmem:[#allocation17 + $0x270] sm:$0xf0]  ;;  %v13760_v48 = vld [vmem:[#allocation17 + $0x34c] sm:$0xf0]  ;;  %v13726_v38 = vld [vmem:[#allocation17 + $0x244] sm:$0xf] }
 0x2e3   :  { %4971 = vmatpush.bf16.msrb.mxu2 %v10917_v22  ;;  %4933 = vmatpush.bf16.msra.mxu3 %v11025_v46  ;;  %v10872_v22 = vld [vmem:[#allocation17 + $0xc8] sm:$0xf]  ;;  %v11077_v43 = vor.u32 %v13730_v26, %v11074_v30  ;;  %v11184_v46 = vld [vmem:[#allocation17 + $0x340] sm:$0xf]  ;;  %v11026_v2 = vld [vmem:[#allocation17 + $0x210] sm:$0xf0]  ;;  %v10825_v16 = vor.u32 %v13669_v4, %v10824_v5 }
 0x2e4   :  { %4939 = vmatpush.bf16.msrb.mxu0 %v11265_v63  ;;  %v10856_v63 = vld [vmem:[#allocation17 + $0xa8] sm:$0xf]  ;;  %v11185_v52 = vor.u32 %v13760_v48, %v11184_v46  ;;  %v13778_v15 = vld [vmem:[#allocation17 + $0x3e4] sm:$0xf]  ;;  %v11250_v26 = vld [vmem:[#allocation17 + $0x3d0] sm:$0xf0] }
 0x2e5   :  { %4954 = vmatpush.bf16.msrb.mxu1 %v10853_v55  ;;  %v11269_v19 = vor.u32 %v13778_v15, %v11266_v17  ;;  %v10792_v30 = vld [vmem:[#allocation17 + $0x28] sm:$0xf]  ;;  %v13770_v46 = vld [vmem:[#allocation17 + $0x3a4] sm:$0xf]  ;;  %v11234_v48 = vld [vmem:[#allocation17 + $0x3b0] sm:$0xf0] }
 0x2e6   :  { %v13679_v5 = vld [vmem:[#allocation17 + $0xcc] sm:$0xf]  ;;  %v10858_v17 = vld [vmem:[#allocation17 + $0xb8] sm:$0xf0] }
 0x2e7   :  { %v3093_v55 = vpop.f32.mrf.mxu3  ;;  %4972 = vmatpush.bf16.msrb.mxu2 %v10901_v54  ;;  %4978 = vmatpush.bf16.msrb.mxu3 %v11141_v18  ;;  %v10857_v18 = vor.u32 %v13677_v42, %v10856_v63 }
 0x2e8   :  { %v15367_v56 = vpop.f32.mrf.mxu0  ;;  %v11061_v55 = vor.u32 %v13726_v38, %v11058_v53  ;;  %v13657_v53 = vld [vmem:[#allocation17 + $0x14] sm:$0xf0] }
 0x2e9   :  { %4955 = vmatpush.bf16.msrb.mxu1 %v10837_v44  ;;  %v3915_v39 = vpop.f32.mrf.mxu1  ;;  %v11249_v44 = vor.u32 %v13776_v59, %v11248_v58  ;;  %v13722_v58 = vld [vmem:[#allocation17 + $0x224] sm:$0xf]  ;;  %v10840_v59 = vld [vmem:[#allocation17 + $0x88] sm:$0xf] }
 0x2ea   :  { %v3916_v60 = vadd.f32 %v3915_v39, %v3244_v36  ;;  %v13681_v36 = vld [vmem:[#allocation17 + $0xd4] sm:$0xf0]  ;;  %v11168_v39 = vld [vmem:[#allocation17 + $0x320] sm:$0xf] }
 0x2eb   :  { %4940 = vmatpush.bf16.msrb.mxu0 %v11249_v44  ;;  %4979 = vmatpush.bf16.msrb.mxu3 %v11125_v62  ;;  %v11042_v44 = vld [vmem:[#allocation17 + $0x230] sm:$0xf0] }
 0x2ec   :  { %v3929_v0 = vadd.f32 %v15356_v7, %v3916_v60  ;;  %v11045_v62 = vor.u32 %v13722_v58, %v11042_v44  ;;  %v11218_v58 = vld [vmem:[#allocation17 + $0x390] sm:$0xf0]  ;;  %v3246_v44 = vperm.slane %v15361_v28, 2 }
 0x2ed   :  { %4956 = vmatpush.bf16.msrb.mxu1 %v10821_v21 }
 0x2ee   :  { %v3980_v3 = vpop.f32.mrf.mxu2 }
 0x2ef   :  { %v3941_v6 = vpop.f32.mrf.mxu3  ;;  %4941 = vmatpush.bf16.msrb.mxu0 %v11233_v11  ;;  %4980 = vmatpush.bf16.msrb.mxu3 %v11109_v12  ;;  %v13717_v11 = vld [vmem:[#allocation17 + $0x1f4] sm:$0xf0]  ;;  %v13752_v12 = vld [vmem:[#allocation17 + $0x30c] sm:$0xf0] }
 0x2f0   :  { %v4008_v21 = vpop.f32.mrf.mxu0  ;;  %v3942_v13 = vadd.f32 %v3941_v6, %v3929_v0  ;;  %v11152_v6 = vld [vmem:[#allocation17 + $0x300] sm:$0xf] }
 0x2f1   :  { %4957 = vmatpush.bf16.msrb.mxu1 %v10805_v40  ;;  %v3917_v14 = vpop.f32.mrf.mxu1  ;;  %v3245_v40 = vperm.slane %v15361_v28, 1  ;;  %v13718_v21 = vld [vmem:[#allocation17 + $0x204] sm:$0xf] }
 0x2f2   :  { %v3955_v7 = vadd.f32 %v15354_v50, %v3942_v13  ;;  %v11201_v50 = vor.u32 %v13764_v34, %v11200_v31  ;;  %v11153_v14 = vor.u32 %v13752_v12, %v11152_v6  ;;  %v13774_v34 = vld [vmem:[#allocation17 + $0x3c4] sm:$0xf] }
 0x2f3   :  { %4942 = vmatpush.bf16.msrb.mxu0 %v11217_v24  ;;  %4981 = vmatpush.bf16.msrb.mxu3 %v11093_v1  ;;  %v11017_v1 = vor.u32 %v13717_v11, %v11016_v9  ;;  %v10874_v9 = vld [vmem:[#allocation17 + $0xd8] sm:$0xf0]  ;;  %v13762_v11 = vld [vmem:[#allocation17 + $0x364] sm:$0xf] }
 0x2f4   :  { %v4114_v51 = vmax.f32 %v3955_v7, 0.0  ;;  %v11029_v7 = vor.u32 %v13718_v21, %v11026_v2  ;;  %v10877_v21 = vor.u32 %v13679_v5, %v10874_v9  ;;  %v13675_v2 = vld [vmem:[#allocation17 + $0xac] sm:$0xf] }
 0x2f5   :  { %4958 = vmatpush.bf16.msrb.mxu1 %v10789_v45  ;;  %v10873_v45 = vor.u32 %v13681_v36, %v10872_v22  ;;  %v11253_v22 = vor.u32 %v13774_v34, %v11250_v26  ;;  %v13754_v34 = vld [vmem:[#allocation17 + $0x324] sm:$0xf]  ;;  %v11170_v26 = vld [vmem:[#allocation17 + $0x330] sm:$0xf0]  ;;  %v13711_v5 = vld [vmem:[#allocation17 + $0x1cc] sm:$0xf] }
 0x2f6   :  { %v3982_v29 = vpop.f32.mrf.mxu2  ;;  %v15372_v35 = vpack.c.bf16 %v4114_v51, %v4114_v51  ;;  %v10808_v51 = vld [vmem:[#allocation17 + $0x48] sm:$0xf] }
 0x2f7   :  { %v3943_v41 = vpop.f32.mrf.mxu3  ;;  %4943 = vmatpush.bf16.msrb.mxu0 %v11201_v50  ;;  %4982 = vmatpush.bf16.msrb.mxu3 %v11077_v43  ;;  %v13713_v29 = vld [vmem:[#allocation17 + $0x1d4] sm:$0xf0]  ;;  %v10984_v43 = vld [vmem:[#allocation17 + $0x1a8] sm:$0xf] }
 0x2f8   :  { %4908 = vmatmul.bf16.vlgmr.msra.gmra.mxu1 %v15372_v35  ;;  %v13661_v41 = vld [vmem:[#allocation17 + $0x34] sm:$0xf0] }
 0x2f9   :  { %4959 = vmatpush.bf16.msrb.mxu1 %v10773_v57  ;;  %v3967_v27 = vpop.f32.mrf.mxu1  ;;  %v13756_v57 = vld [vmem:[#allocation17 + $0x32c] sm:$0xf0]  ;;  %v10793_v63 = vor.u32 %v13661_v41, %v10792_v30  ;;  %v10904_v41 = vld [vmem:[#allocation17 + $0x108] sm:$0xf] }
 0x2fa   :  { %v3968_v49 = vadd.f32 %v3967_v27, %v3245_v40  ;;  %v11169_v60 = vor.u32 %v13756_v57, %v11168_v39  ;;  %v13709_v27 = vld [vmem:[#allocation17 + $0x1b4] sm:$0xf0]  ;;  %v10890_v39 = vld [vmem:[#allocation17 + $0xf8] sm:$0xf0]  ;;  %v13766_v57 = vld [vmem:[#allocation17 + $0x384] sm:$0xf] }
 0x2fb   :  { %4944 = vmatpush.bf16.msrb.mxu0 %v11185_v52  ;;  %4983 = vmatpush.bf16.msrb.mxu3 %v11061_v55  ;;  %v10985_v42 = vor.u32 %v13709_v27, %v10984_v43  ;;  %v10776_v52 = vld [vmem:[#allocation17 + $0x8] sm:$0xf]  ;;  %v13689_v43 = vld [vmem:[#allocation17 + $0x114] sm:$0xf0] }
 0x2fc   :  { %v3981_v54 = vadd.f32 %v3980_v3, %v3968_v49  ;;  %v10841_v3 = vor.u32 %v13673_v32, %v10840_v59  ;;  %v11237_v49 = vor.u32 %v13770_v46, %v11234_v48  ;;  %v10968_v55 = vld [vmem:[#allocation17 + $0x188] sm:$0xf]  ;;  %v11221_v59 = vor.u32 %v13766_v57, %v11218_v58  ;;  %v13749_v48 = vld [vmem:[#allocation17 + $0x2f4] sm:$0xf0] }
 0x2fd   :  { %5004 = vmatpush.bf16.msra.mxu1 %v10889_v37  ;;  %v13665_v37 = vld [vmem:[#allocation17 + $0x54] sm:$0xf0]  ;;  %v10777_v32 = vor.u32 %v13657_v53, %v10776_v52  ;;  %v11144_v46 = vld [vmem:[#allocation17 + $0x2e8] sm:$0xf]  ;;  %v11154_v52 = vld [vmem:[#allocation17 + $0x310] sm:$0xf0] }
 0x2fe   :  { %v10809_v36 = vor.u32 %v13665_v37, %v10808_v51  ;;  %v10861_v51 = vor.u32 %v13675_v2, %v10858_v17  ;;  %v10920_v37 = vld [vmem:[#allocation17 + $0x128] sm:$0xf]  ;;  %v13715_v53 = vld [vmem:[#allocation17 + $0x1ec] sm:$0xf]  ;;  %v11145_v58 = vor.u32 %v13749_v48, %v11144_v46  ;;  %v10986_v2 = vld [vmem:[#allocation17 + $0x1b8] sm:$0xf0] }
 0x2ff   :  { %v3993_v61 = vpop.f32.mrf.mxu3  ;;  %4945 = vmatpush.bf16.msrb.mxu0 %v11169_v60  ;;  %4984 = vmatpush.bf16.msrb.mxu3 %v11045_v62  ;;  %v10952_v62 = vld [vmem:[#allocation17 + $0x168] sm:$0xf]  ;;  %v11376_v46 = vld [vmem:[#allocation22 + $0xc0] sm:$0xf]  ;;  %v13904_v48 = vld [vmem:[#allocation22 + $0xcc] sm:$0xf0] }
 0x300   :  { %v3994_v0 = vadd.f32 %v3993_v61, %v3981_v54  ;;  %v13705_v54 = vld [vmem:[#allocation17 + $0x194] sm:$0xf0] }
 0x301   :  { %5005 = vmatpush.bf16.msra.mxu1 %v10873_v45  ;;  %v3969_v20 = vpop.f32.mrf.mxu1  ;;  %v10969_v60 = vor.u32 %v13705_v54, %v10968_v55  ;;  %v11018_v55 = vld [vmem:[#allocation17 + $0x1f8] sm:$0xf0] }
 0x302   :  { %v4007_v13 = vadd.f32 %v15367_v56, %v3994_v0  ;;  %v11000_v56 = vld [vmem:[#allocation17 + $0x1c8] sm:$0xf]  ;;  %v13701_v0 = vld [vmem:[#allocation17 + $0x174] sm:$0xf0] }
 0x303   :  { %4946 = vmatpush.bf16.msrb.mxu0 %v11153_v14  ;;  %4985 = vmatpush.bf16.msrb.mxu3 %v11029_v7  ;;  %v11001_v50 = vor.u32 %v13713_v29, %v11000_v56  ;;  %v10953_v6 = vor.u32 %v13701_v0, %v10952_v62  ;;  %v13697_v14 = vld [vmem:[#allocation17 + $0x154] sm:$0xf0]  ;;  %v13758_v7 = vld [vmem:[#allocation17 + $0x344] sm:$0xf]  ;;  %v13671_v29 = vld [vmem:[#allocation17 + $0x8c] sm:$0xf] }
 0x304   :  { %v4115_v23 = vmax.f32 %v4007_v13, 0.0  ;;  %v10936_v13 = vld [vmem:[#allocation17 + $0x148] sm:$0xf]  ;;  %v13693_v56 = vld [vmem:[#allocation17 + $0x134] sm:$0xf0] }
 0x305   :  { %5006 = vmatpush.bf16.msra.mxu1 %v10857_v18  ;;  %v13683_v18 = vld [vmem:[#allocation17 + $0xec] sm:$0xf]  ;;  %v10921_v30 = vor.u32 %v13693_v56, %v10920_v37  ;;  %v10810_v62 = vld [vmem:[#allocation17 + $0x58] sm:$0xf0] }
 0x306   :  { %v15378_v40 = vpack.c.bf16 %v4115_v23, %v4115_v23  ;;  %v10893_v61 = vor.u32 %v13683_v18, %v10890_v39  ;;  %v10905_v39 = vor.u32 %v13689_v43, %v10904_v41  ;;  %v13703_v37 = vld [vmem:[#allocation17 + $0x18c] sm:$0xf]  ;;  %v10970_v56 = vld [vmem:[#allocation17 + $0x198] sm:$0xf0]  ;;  %v13733_v41 = vld [vmem:[#allocation17 + $0x274] sm:$0xf0] }
 0x307   :  { %4991 = vmatpush.bf16.msra.mxu0 %v11269_v19  ;;  %v3995_v31 = vpop.f32.mrf.mxu3  ;;  %v11186_v19 = vld [vmem:[#allocation17 + $0x350] sm:$0xf0]  ;;  %v13699_v43 = vld [vmem:[#allocation17 + $0x16c] sm:$0xf] }
 0x308   :  { %v15376_v24 = vpop.f32.mrf.mxu0  ;;  %4921 = vmatmul.bf16.vlgmr.msra.gmra.mxu2 %v15378_v40  ;;  %4960 = vmatmul.bf16.vlgmr.msrb.gmra.mxu1 %v15372_v35  ;;  %v11189_v23 = vor.u32 %v13758_v7, %v11186_v19  ;;  %v10842_v31 = vld [vmem:[#allocation17 + $0x98] sm:$0xf0]  ;;  %v11096_v19 = vld [vmem:[#allocation17 + $0x288] sm:$0xf] }
 0x309   :  { %5007 = vmatpush.bf16.msra.mxu1 %v10841_v3  ;;  %5017 = vmatpush.bf16.msra.mxu2 %v11017_v1  ;;  %v11202_v3 = vld [vmem:[#allocation17 + $0x370] sm:$0xf0]  ;;  %v10937_v1 = vor.u32 %v13697_v14, %v10936_v13  ;;  %v10845_v27 = vor.u32 %v13671_v29, %v10842_v31  ;;  %v13707_v14 = vld [vmem:[#allocation17 + $0x1ac] sm:$0xf]  ;;  %v11392_v29 = vld [vmem:[#allocation22 + $0xe0] sm:$0xf] }
 0x30a   :  { %v11205_v20 = vor.u32 %v13762_v11, %v11202_v3  ;;  %v11112_v3 = vld [vmem:[#allocation17 + $0x2a8] sm:$0xf]  ;;  %v13908_v31 = vld [vmem:[#allocation22 + $0xec] sm:$0xf0] }
 0x30b   :  { %4992 = vmatpush.bf16.msra.mxu0 %v11253_v22 }
 0x30d   :  { %5008 = vmatpush.bf16.msra.mxu1 %v10825_v16  ;;  %5018 = vmatpush.bf16.msra.mxu2 %v11001_v50 }
 0x30e   :  { %v4032_v45 = vpop.f32.mrf.mxu2 }
 0x30f   :  { %4993 = vmatpush.bf16.msra.mxu0 %v11237_v49 }
 0x310   :  { %v4060_v38 = vpop.f32.mrf.mxu0 }
 0x311   :  { %5009 = vmatpush.bf16.msra.mxu1 %v10809_v36  ;;  %5019 = vmatpush.bf16.msra.mxu2 %v10985_v42  ;;  %v11173_v36 = vor.u32 %v13754_v34, %v11170_v26  ;;  %v13667_v38 = vld [vmem:[#allocation17 + $0x6c] sm:$0xf]  ;;  %v13750_v42 = vld [vmem:[#allocation17 + $0x304] sm:$0xf] }
 0x312   :  { %v11157_v54 = vor.u32 %v13750_v42, %v11154_v52  ;;  %v11377_v42 = vor.u32 %v13904_v48, %v11376_v46  ;;  %v11064_v52 = vld [vmem:[#allocation17 + $0x248] sm:$0xf]  ;;  %v11504_v46 = vld [vmem:[#allocation22 + $0x1c0] sm:$0xf]  ;;  %v13936_v48 = vld [vmem:[#allocation22 + $0x1cc] sm:$0xf0] }
 0x313   :  { %4994 = vmatpush.bf16.msra.mxu0 %v11221_v59 }
 0x315   :  { %5010 = vmatpush.bf16.msra.mxu1 %v10793_v63  ;;  %5020 = vmatpush.bf16.msra.mxu2 %v10969_v60  ;;  %v10826_v63 = vld [vmem:[#allocation17 + $0x78] sm:$0xf0] }
 0x316   :  { %v4034_v4 = vpop.f32.mrf.mxu2  ;;  %v10829_v59 = vor.u32 %v13667_v38, %v10826_v63 }
 0x317   :  { %4995 = vmatpush.bf16.msra.mxu0 %v11205_v20  ;;  %v11002_v4 = vld [vmem:[#allocation17 + $0x1d8] sm:$0xf0] }
 0x318   :  { %4973 = vmatmul.bf16.vlgmr.msrb.gmra.mxu2 %v15378_v40  ;;  %v11005_v20 = vor.u32 %v13711_v5, %v11002_v4  ;;  %v11344_v5 = vld [vmem:[#allocation22 + $0x80] sm:$0xf]  ;;  %v13896_v4 = vld [vmem:[#allocation22 + $0x8c] sm:$0xf0] }
 0x319   :  { %5011 = vmatpush.bf16.msra.mxu1 %v10777_v32  ;;  %v4019_v12 = vpop.f32.mrf.mxu1  ;;  %5021 = vmatpush.bf16.msra.mxu2 %v10953_v6  ;;  %v11128_v32 = vld [vmem:[#allocation17 + $0x2c8] sm:$0xf]  ;;  %v13741_v6 = vld [vmem:[#allocation17 + $0x2b4] sm:$0xf0] }
 0x31a   :  { %v4020_v15 = vadd.f32 %v4019_v12, %v3246_v44  ;;  %v11021_v44 = vor.u32 %v13715_v53, %v11018_v55  ;;  %v13659_v12 = vld [vmem:[#allocation17 + $0x2c] sm:$0xf]  ;;  %v11113_v17 = vor.u32 %v13741_v6, %v11112_v3 }
 0x31b   :  { %4996 = vmatpush.bf16.msra.mxu0 %v11189_v23  ;;  %v13737_v23 = vld [vmem:[#allocation17 + $0x294] sm:$0xf0]  ;;  %v13695_v53 = vld [vmem:[#allocation17 + $0x14c] sm:$0xf] }
 0x31c   :  { %5012 = vmatmul.bf16.vlgmr.msra.gmra.mxu1 %v15372_v35  ;;  %v4033_v16 = vadd.f32 %v4032_v45, %v4020_v15  ;;  %v11097_v34 = vor.u32 %v13737_v23, %v11096_v19  ;;  %v11146_v19 = vld [vmem:[#allocation17 + $0x2f8] sm:$0xf0]  ;;  %v11328_v23 = vld [vmem:[#allocation22 + $0x60] sm:$0xf] }
 0x31d   :  { %5056 = vmatpush.bf16.msrb.mxu1 %v10893_v61  ;;  %5022 = vmatpush.bf16.msra.mxu2 %v10937_v1  ;;  %v13663_v61 = vld [vmem:[#allocation17 + $0x4c] sm:$0xf] }
 0x31e   :  { %v10813_v11 = vor.u32 %v13663_v61, %v10810_v62  ;;  %v13655_v1 = vld [vmem:[#allocation17 + $0xc] sm:$0xf]  ;;  %v13725_v61 = vld [vmem:[#allocation17 + $0x234] sm:$0xf0] }
 0x31f   :  { %v4045_v22 = vpop.f32.mrf.mxu3  ;;  %4997 = vmatpush.bf16.msra.mxu0 %v11173_v36  ;;  %v10973_v36 = vor.u32 %v13703_v37, %v10970_v56  ;;  %v13691_v62 = vld [vmem:[#allocation17 + $0x12c] sm:$0xf]  ;;  %v11520_v37 = vld [vmem:[#allocation22 + $0x1e0] sm:$0xf]  ;;  %v13940_v56 = vld [vmem:[#allocation22 + $0x1ec] sm:$0xf0] }
 0x320   :  { %v4046_v50 = vadd.f32 %v4045_v22, %v4033_v16  ;;  %v10989_v16 = vor.u32 %v13707_v14, %v10986_v2  ;;  %v3247_v22 = vperm.slane %v15361_v28, 3  ;;  %v13729_v28 = vld [vmem:[#allocation17 + $0x254] sm:$0xf0] }
 0x321   :  { %5057 = vmatpush.bf16.msrb.mxu1 %v10877_v21  ;;  %v4021_v45 = vpop.f32.mrf.mxu1  ;;  %5023 = vmatpush.bf16.msra.mxu2 %v10921_v30  ;;  %v10794_v21 = vld [vmem:[#allocation17 + $0x38] sm:$0xf0]  ;;  %v11080_v30 = vld [vmem:[#allocation17 + $0x268] sm:$0xf]  ;;  %v13781_v14 = vld [vmem:[#allocation17 + $0x3f4] sm:$0xf0] }
 0x322   :  { %v4059_v49 = vadd.f32 %v15376_v24, %v4046_v50  ;;  %v13745_v24 = vld [vmem:[#allocation17 + $0x2d4] sm:$0xf0]  ;;  %v10797_v7 = vor.u32 %v13659_v12, %v10794_v21  ;;  %v11393_v50 = vor.u32 %v13908_v31, %v11392_v29  ;;  %v10954_v45 = vld [vmem:[#allocation17 + $0x178] sm:$0xf0]  ;;  %v11081_v38 = vor.u32 %v13733_v41, %v11080_v30 }
 0x323   :  { %4998 = vmatpush.bf16.msra.mxu0 %v11157_v54  ;;  %v11129_v9 = vor.u32 %v13745_v24, %v11128_v32  ;;  %v10957_v63 = vor.u32 %v13699_v43, %v10954_v45  ;;  %v10938_v54 = vld [vmem:[#allocation17 + $0x158] sm:$0xf0]  ;;  %v11048_v24 = vld [vmem:[#allocation17 + $0x228] sm:$0xf]  ;;  %v11345_v12 = vor.u32 %v13896_v4, %v11344_v5  ;;  %v13721_v21 = vld [vmem:[#allocation17 + $0x214] sm:$0xf0]  ;;  %v11521_v41 = vor.u32 %v13940_v56, %v11520_v37 }
 0x324   :  { %v4116_v18 = vmax.f32 %v4059_v49, 0.0  ;;  %v10941_v32 = vor.u32 %v13695_v53, %v10938_v54  ;;  %v11049_v3 = vor.u32 %v13725_v61, %v11048_v24  ;;  %v11130_v43 = vld [vmem:[#allocation17 + $0x2d8] sm:$0xf0]  ;;  %v13888_v45 = vld [vmem:[#allocation22 + $0x4c] sm:$0xf0]  ;;  %v11505_v53 = vor.u32 %v13936_v48, %v11504_v46 }
 0x325   :  { %5058 = vmatpush.bf16.msrb.mxu1 %v10861_v51  ;;  %5024 = vmatpush.bf16.msra.mxu2 %v10905_v39  ;;  %v10778_v51 = vld [vmem:[#allocation17 + $0x18] sm:$0xf0]  ;;  %v13900_v39 = vld [vmem:[#allocation22 + $0xac] sm:$0xf0]  ;;  %v11296_v54 = vld [vmem:[#allocation22 + $0x20] sm:$0xf] }
 0x326   :  { %v15388_v60 = vpack.c.bf16 %v4116_v18, %v4116_v18  ;;  %v10781_v26 = vor.u32 %v13655_v1, %v10778_v51  ;;  %v11360_v18 = vld [vmem:[#allocation22 + $0xa0] sm:$0xf]  ;;  %v13769_v61 = vld [vmem:[#allocation17 + $0x394] sm:$0xf0]  ;;  %v11192_v37 = vld [vmem:[#allocation17 + $0x348] sm:$0xf] }
 0x327   :  { %v15386_v57 = vpop.f32.mrf.mxu0  ;;  %v4047_v0 = vpop.f32.mrf.mxu3  ;;  %v11280_v4 = vld [vmem:[#allocation22] sm:$0xf]  ;;  %v13761_v56 = vld [vmem:[#allocation17 + $0x354] sm:$0xf0] }
 0x328   :  { %4934 = vmatmul.bf16.vlgmr.msra.gmra.mxu3 %v15388_v60  ;;  %5025 = vmatmul.bf16.vlgmr.msra.gmra.mxu2 %v15378_v40  ;;  %v10922_v0 = vld [vmem:[#allocation17 + $0x138] sm:$0xf0]  ;;  %v13757_v46 = vld [vmem:[#allocation17 + $0x334] sm:$0xf0] }
 0x329   :  { %5059 = vmatpush.bf16.msrb.mxu1 %v10845_v27  ;;  %5030 = vmatpush.bf16.msra.mxu3 %v11145_v58  ;;  %v10925_v6 = vor.u32 %v13691_v62, %v10922_v0  ;;  %v13735_v62 = vld [vmem:[#allocation17 + $0x28c] sm:$0xf]  ;;  %v11098_v0 = vld [vmem:[#allocation17 + $0x298] sm:$0xf0] }
 0x32a   :  { %5069 = vmatpush.bf16.msrb.mxu2 %v11021_v44  ;;  %v11361_v44 = vor.u32 %v13900_v39, %v11360_v18  ;;  %v13884_v18 = vld [vmem:[#allocation22 + $0x2c] sm:$0xf0]  ;;  %v11488_v39 = vld [vmem:[#allocation22 + $0x1a0] sm:$0xf] }
 0x32b   :  { %v11297_v24 = vor.u32 %v13884_v18, %v11296_v54  ;;  %v11160_v54 = vld [vmem:[#allocation17 + $0x308] sm:$0xf]  ;;  %v13753_v18 = vld [vmem:[#allocation17 + $0x314] sm:$0xf0] }
 0x32d   :  { %5060 = vmatpush.bf16.msrb.mxu1 %v10829_v59  ;;  %v4084_v13 = vpop.f32.mrf.mxu2  ;;  %5031 = vmatpush.bf16.msra.mxu3 %v11129_v9  ;;  %v11065_v59 = vor.u32 %v13729_v28, %v11064_v52  ;;  %v13773_v52 = vld [vmem:[#allocation17 + $0x3b4] sm:$0xf0]  ;;  %v13739_v28 = vld [vmem:[#allocation17 + $0x2ac] sm:$0xf] }
 0x32e   :  { %5070 = vmatpush.bf16.msrb.mxu2 %v11005_v20  ;;  %v11032_v20 = vld [vmem:[#allocation17 + $0x208] sm:$0xf] }
 0x32f   :  { %v4112_v15 = vpop.f32.mrf.mxu0  ;;  %v11033_v51 = vor.u32 %v13721_v21, %v11032_v20  ;;  %v11400_v20 = vld [vmem:[#allocation22 + $0xe8] sm:$0xf] }
 0x330   :  { %v13687_v15 = vld [vmem:[#allocation17 + $0x10c] sm:$0xf] }
 0x331   :  { %5061 = vmatpush.bf16.msrb.mxu1 %v10813_v11  ;;  %5032 = vmatpush.bf16.msra.mxu3 %v11113_v17  ;;  %v10906_v17 = vld [vmem:[#allocation17 + $0x118] sm:$0xf0] }
 0x332   :  { %5071 = vmatpush.bf16.msrb.mxu2 %v10989_v16  ;;  %v13892_v16 = vld [vmem:[#allocation22 + $0x6c] sm:$0xf0]  ;;  %v10909_v31 = vor.u32 %v13687_v15, %v10906_v17  ;;  %v13731_v17 = vld [vmem:[#allocation17 + $0x26c] sm:$0xf] }
 0x335   :  { %5062 = vmatpush.bf16.msrb.mxu1 %v10797_v7  ;;  %v4086_v27 = vpop.f32.mrf.mxu2  ;;  %5033 = vmatpush.bf16.msra.mxu3 %v11097_v34  ;;  %v13747_v7 = vld [vmem:[#allocation17 + $0x2ec] sm:$0xf] }
 0x336   :  { %5072 = vmatpush.bf16.msrb.mxu2 %v10973_v36  ;;  %v13777_v36 = vld [vmem:[#allocation17 + $0x3d4] sm:$0xf0]  ;;  %v11312_v27 = vld [vmem:[#allocation22 + $0x40] sm:$0xf] }
 0x338   :  { %4986 = vmatmul.bf16.vlgmr.msrb.gmra.mxu3 %v15388_v60 }
 0x339   :  { %5063 = vmatpush.bf16.msrb.mxu1 %v10781_v26  ;;  %v4071_v49 = vpop.f32.mrf.mxu1  ;;  %5034 = vmatpush.bf16.msra.mxu3 %v11081_v38  ;;  %v11149_v26 = vor.u32 %v13747_v7, %v11146_v19  ;;  %v11082_v7 = vld [vmem:[#allocation17 + $0x278] sm:$0xf0]  ;;  %v11456_v19 = vld [vmem:[#allocation22 + $0x160] sm:$0xf] }
 0x33a   :  { %v4072_v55 = vadd.f32 %v4071_v49, %v3247_v22  ;;  %5073 = vmatpush.bf16.msrb.mxu2 %v10957_v63  ;;  %v11329_v22 = vor.u32 %v13892_v16, %v11328_v23  ;;  %v11313_v63 = vor.u32 %v13888_v45, %v11312_v27  ;;  %v13924_v23 = vld [vmem:[#allocation22 + $0x16c] sm:$0xf0]  ;;  %v11384_v16 = vld [vmem:[#allocation22 + $0xc8] sm:$0xf]  ;;  %v11176_v45 = vld [vmem:[#allocation17 + $0x328] sm:$0xf] }
 0x33c   :  { %5064 = vmatmul.bf16.vlgmr.msrb.gmra.mxu1 %v15372_v35  ;;  %v4085_v58 = vadd.f32 %v4084_v13, %v4072_v55  ;;  %v11272_v13 = vld [vmem:[#allocation17 + $0x3e8] sm:$0xf]  ;;  %v11114_v55 = vld [vmem:[#allocation17 + $0x2b8] sm:$0xf0] }
 0x33d   :  { %5596 = vmatpush.bf16.msra.mxu1 %v11393_v50  ;;  %5035 = vmatpush.bf16.msra.mxu3 %v11065_v59  ;;  %v11273_v29 = vor.u32 %v13781_v14, %v11272_v13  ;;  %v13743_v50 = vld [vmem:[#allocation17 + $0x2cc] sm:$0xf]  ;;  %v11208_v13 = vld [vmem:[#allocation17 + $0x368] sm:$0xf]  ;;  %v13765_v14 = vld [vmem:[#allocation17 + $0x374] sm:$0xf0] }
 0x33e   :  { %5074 = vmatpush.bf16.msrb.mxu2 %v10941_v32  ;;  %v11133_v49 = vor.u32 %v13743_v50, %v11130_v43  ;;  %v11224_v32 = vld [vmem:[#allocation17 + $0x388] sm:$0xf]  ;;  %v13920_v50 = vld [vmem:[#allocation22 + $0x14c] sm:$0xf0]  ;;  %v11193_v43 = vor.u32 %v13761_v56, %v11192_v37  ;;  %v13771_v37 = vld [vmem:[#allocation17 + $0x3ac] sm:$0xf] }
 0x33f   :  { %v4097_v9 = vpop.f32.mrf.mxu3  ;;  %v11242_v56 = vld [vmem:[#allocation17 + $0x3b8] sm:$0xf0] }
 0x340   :  { %v4098_v11 = vadd.f32 %v4097_v9, %v4085_v58  ;;  %v13932_v58 = vld [vmem:[#allocation22 + $0x1ac] sm:$0xf0] }
 0x341   :  { %5597 = vmatpush.bf16.msra.mxu1 %v11377_v42  ;;  %v4073_v35 = vpop.f32.mrf.mxu1  ;;  %5036 = vmatpush.bf16.msra.mxu3 %v11049_v3  ;;  %v11240_v42 = vld [vmem:[#allocation17 + $0x3a8] sm:$0xf]  ;;  %v11489_v5 = vor.u32 %v13932_v58, %v11488_v39  ;;  %v13880_v9 = vld [vmem:[#allocation22 + $0xc] sm:$0xf0]  ;;  %v13719_v58 = vld [vmem:[#allocation17 + $0x20c] sm:$0xf] }
 0x342   :  { %v4111_v2 = vadd.f32 %v15386_v57, %v4098_v11  ;;  %5075 = vmatpush.bf16.msrb.mxu2 %v10925_v6  ;;  %v11256_v57 = vld [vmem:[#allocation17 + $0x3c8] sm:$0xf]  ;;  %v11241_v59 = vor.u32 %v13773_v52, %v11240_v42  ;;  %v11472_v11 = vld [vmem:[#allocation22 + $0x180] sm:$0xf]  ;;  %v13928_v3 = vld [vmem:[#allocation22 + $0x18c] sm:$0xf0]  ;;  %v11225_v35 = vor.u32 %v13769_v61, %v11224_v32  ;;  %v11281_v21 = vor.u32 %v13880_v9, %v11280_v4 }
 0x343   :  { %v11257_v38 = vor.u32 %v13777_v36, %v11256_v57  ;;  %v3108_v6 = vmax.f32 %v15359_v10, 0.0  ;;  %v11085_v10 = vor.u32 %v13731_v17, %v11082_v7  ;;  %v11066_v57 = vld [vmem:[#allocation17 + $0x258] sm:$0xf0]  ;;  %v11440_v36 = vld [vmem:[#allocation22 + $0x140] sm:$0xf] }
 0x344   :  { %v4117_v1 = vmax.f32 %v4111_v2, 0.0  ;;  %v11473_v2 = vor.u32 %v13928_v3, %v11472_v11  ;;  %v11441_v48 = vor.u32 %v13920_v50, %v11440_v36  ;;  %v11424_v42 = vld [vmem:[#allocation22 + $0x120] sm:$0xf]  ;;  %v13916_v52 = vld [vmem:[#allocation22 + $0x12c] sm:$0xf0]  ;;  %v11161_v11 = vor.u32 %v13753_v18, %v11160_v54 }
 0x345   :  { %5598 = vmatpush.bf16.msra.mxu1 %v11361_v44  ;;  %5037 = vmatpush.bf16.msra.mxu3 %v11033_v51  ;;  %v11117_v44 = vor.u32 %v13739_v28, %v11114_v55  ;;  %v11209_v51 = vor.u32 %v13765_v14, %v11208_v13  ;;  %v11352_v28 = vld [vmem:[#allocation22 + $0x88] sm:$0xf]  ;;  %v11177_v55 = vor.u32 %v13757_v46, %v11176_v45  ;;  %v11274_v61 = vld [vmem:[#allocation17 + $0x3f8] sm:$0xf0]  ;;  %v11394_v4 = vld [vmem:[#allocation22 + $0xf0] sm:$0xf0] }
 0x346   :  { %v15396_v34 = vpack.c.bf16 %v4117_v1, %v4117_v1  ;;  %5076 = vmatpush.bf16.msrb.mxu2 %v10909_v31  ;;  %v13905_v1 = vld [vmem:[#allocation22 + $0xd4] sm:$0xf0]  ;;  %v11457_v31 = vor.u32 %v13924_v23, %v11456_v19  ;;  %v13779_v32 = vld [vmem:[#allocation17 + $0x3ec] sm:$0xf]  ;;  %v13902_v7 = vld [vmem:[#allocation22 + $0xc4] sm:$0xf] }
 0x347   :  { %v4099_v30 = vpop.f32.mrf.mxu3  ;;  %v11336_v9 = vld [vmem:[#allocation22 + $0x68] sm:$0xf]  ;;  %v13893_v3 = vld [vmem:[#allocation22 + $0x74] sm:$0xf0]  ;;  %v11378_v19 = vld [vmem:[#allocation22 + $0xd0] sm:$0xf0] }
 0x348   :  { %4947 = vmatmul.bf16.vlgmr.msrb.gmra.mxu0 %v15396_v34  ;;  %5038 = vmatmul.bf16.vlgmr.msra.gmra.mxu3 %v15388_v60  ;;  %v11368_v30 = vld [vmem:[#allocation22 + $0xa8] sm:$0xf]  ;;  %v11362_v36 = vld [vmem:[#allocation22 + $0xb0] sm:$0xf0]  ;;  %v11648_v54 = vld [vmem:[#allocation20 + $0xe0] sm:$0xf] }
 0x349   :  { %5599 = vmatpush.bf16.msra.mxu1 %v11345_v12  ;;  %5043 = vmatpush.bf16.msrb.mxu0 %v11273_v29  ;;  %v11101_v12 = vor.u32 %v13735_v62, %v11098_v0  ;;  %v15402_v29 = vpack.c.bf16 %v3108_v6, %v3108_v6  ;;  %v11408_v62 = vld [vmem:[#allocation22 + $0x100] sm:$0xf]  ;;  %v13912_v0 = vld [vmem:[#allocation22 + $0x10c] sm:$0xf0]  ;;  %v11277_v6 = vor.u32 %v13779_v32, %v11274_v61  ;;  %v13775_v14 = vld [vmem:[#allocation17 + $0x3cc] sm:$0xf] }
 0x34a   :  { %5082 = vmatpush.bf16.msrb.mxu3 %v11149_v26  ;;  %5609 = vmatpush.bf16.msra.mxu2 %v11521_v41  ;;  %v11385_v26 = vor.u32 %v13905_v1, %v11384_v16  ;;  %v13901_v41 = vld [vmem:[#allocation22 + $0xb4] sm:$0xf0]  ;;  %v11320_v23 = vld [vmem:[#allocation22 + $0x48] sm:$0xf]  ;;  %v13812_v18 = vld [vmem:[#allocation20 + $0xec] sm:$0xf0] }
 0x34b   :  { %5077 = vmatmul.bf16.vlgmr.msrb.gmra.mxu2 %v15378_v40  ;;  %v13909_v40 = vld [vmem:[#allocation22 + $0xf4] sm:$0xf0]  ;;  %v11512_v1 = vld [vmem:[#allocation22 + $0x1c8] sm:$0xf]  ;;  %v11330_v61 = vld [vmem:[#allocation22 + $0x70] sm:$0xf0] }
 0x34c   :  { %v11401_v15 = vor.u32 %v13909_v40, %v11400_v20  ;;  %v11528_v20 = vld [vmem:[#allocation22 + $0x1e8] sm:$0xf]  ;;  %v13941_v40 = vld [vmem:[#allocation22 + $0x1f4] sm:$0xf0] }
 0x34d   :  { %5600 = vmatpush.bf16.msra.mxu1 %v11329_v22  ;;  %5044 = vmatpush.bf16.msrb.mxu0 %v11257_v38  ;;  %v13727_v22 = vld [vmem:[#allocation17 + $0x24c] sm:$0xf]  ;;  %v11369_v38 = vor.u32 %v13901_v41, %v11368_v30  ;;  %v11529_v17 = vor.u32 %v13941_v40, %v11528_v20  ;;  %v13889_v16 = vld [vmem:[#allocation22 + $0x54] sm:$0xf0] }
 0x34e   :  { %5083 = vmatpush.bf16.msrb.mxu3 %v11133_v49  ;;  %5610 = vmatpush.bf16.msra.mxu2 %v11505_v53  ;;  %v11069_v27 = vor.u32 %v13727_v22, %v11066_v57  ;;  %v13723_v49 = vld [vmem:[#allocation17 + $0x22c] sm:$0xf]  ;;  %v13897_v53 = vld [vmem:[#allocation22 + $0x94] sm:$0xf0]  ;;  %v13898_v57 = vld [vmem:[#allocation22 + $0xa4] sm:$0xf] }
 0x34f   :  { %v11304_v50 = vld [vmem:[#allocation22 + $0x28] sm:$0xf]  ;;  %v13885_v30 = vld [vmem:[#allocation22 + $0x34] sm:$0xf0]  ;;  %v11365_v45 = vor.u32 %v13898_v57, %v11362_v36 }
 0x350   :  { %v11496_v41 = vld [vmem:[#allocation22 + $0x1a8] sm:$0xf]  ;;  %v11194_v40 = vld [vmem:[#allocation17 + $0x358] sm:$0xf0] }
 0x351   :  { %5601 = vmatpush.bf16.msra.mxu1 %v11313_v63  ;;  %5045 = vmatpush.bf16.msrb.mxu0 %v11241_v59  ;;  %v11050_v63 = vld [vmem:[#allocation17 + $0x238] sm:$0xf0]  ;;  %v13767_v46 = vld [vmem:[#allocation17 + $0x38c] sm:$0xf] }
 0x352   :  { %5084 = vmatpush.bf16.msrb.mxu3 %v11117_v44  ;;  %5611 = vmatpush.bf16.msra.mxu2 %v11489_v5  ;;  %v11053_v39 = vor.u32 %v13723_v49, %v11050_v63  ;;  %v11034_v59 = vld [vmem:[#allocation17 + $0x218] sm:$0xf0]  ;;  %v11425_v44 = vor.u32 %v13916_v52, %v11424_v42  ;;  %v13906_v5 = vld [vmem:[#allocation22 + $0xe4] sm:$0xf]  ;;  %v11346_v42 = vld [vmem:[#allocation22 + $0x90] sm:$0xf0] }
 0x353   :  { %v11397_v13 = vor.u32 %v13906_v5, %v11394_v4  ;;  %v13894_v63 = vld [vmem:[#allocation22 + $0x84] sm:$0xf]  ;;  %v13881_v52 = vld [vmem:[#allocation22 + $0x14] sm:$0xf0]  ;;  %v13759_v20 = vld [vmem:[#allocation17 + $0x34c] sm:$0xf] }
 0x354   :  { %v13925_v5 = vld [vmem:[#allocation22 + $0x174] sm:$0xf0]  ;;  %v13751_v57 = vld [vmem:[#allocation17 + $0x30c] sm:$0xf] }
 0x355   :  { %5602 = vmatpush.bf16.msra.mxu1 %v11297_v24  ;;  %5046 = vmatpush.bf16.msrb.mxu0 %v11225_v35  ;;  %v11353_v24 = vor.u32 %v13897_v53, %v11352_v28  ;;  %v11037_v35 = vor.u32 %v13719_v58, %v11034_v59  ;;  %v11480_v28 = vld [vmem:[#allocation22 + $0x188] sm:$0xf]  ;;  %v13929_v53 = vld [vmem:[#allocation22 + $0x194] sm:$0xf0] }
 0x356   :  { %5085 = vmatpush.bf16.msrb.mxu3 %v11101_v12  ;;  %5612 = vmatpush.bf16.msra.mxu2 %v11473_v2  ;;  %v3109_v12 = vmax.f32 %v15364_v8, 0.0  ;;  %v11258_v2 = vld [vmem:[#allocation17 + $0x3d8] sm:$0xf0]  ;;  %v11381_v8 = vor.u32 %v13902_v7, %v11378_v19  ;;  %v13763_v58 = vld [vmem:[#allocation17 + $0x36c] sm:$0xf] }
 0x357   :  { %v11210_v59 = vld [vmem:[#allocation17 + $0x378] sm:$0xf0]  ;;  %v13755_v19 = vld [vmem:[#allocation17 + $0x32c] sm:$0xf] }
 0x358   :  { %4999 = vmatmul.bf16.vlgmr.msra.gmra.mxu0 %v15396_v34  ;;  %v11213_v4 = vor.u32 %v13763_v58, %v11210_v59  ;;  %v11162_v36 = vld [vmem:[#allocation17 + $0x318] sm:$0xf0]  ;;  %v13934_v59 = vld [vmem:[#allocation22 + $0x1c4] sm:$0xf] }
 0x359   :  { %5603 = vmatpush.bf16.msra.mxu1 %v11281_v21  ;;  %5047 = vmatpush.bf16.msrb.mxu0 %v11209_v51  ;;  %v11409_v21 = vor.u32 %v13912_v0, %v11408_v62  ;;  %v13937_v51 = vld [vmem:[#allocation22 + $0x1d4] sm:$0xf0]  ;;  %v11649_v62 = vor.u32 %v13812_v18, %v11648_v54  ;;  %v11464_v0 = vld [vmem:[#allocation22 + $0x168] sm:$0xf] }
 0x35a   :  { %5086 = vmatpush.bf16.msrb.mxu3 %v11085_v10  ;;  %5613 = vmatpush.bf16.msra.mxu2 %v11457_v31  ;;  %v11261_v10 = vor.u32 %v13775_v14, %v11258_v2  ;;  %v15407_v31 = vpack.c.bf16 %v3109_v12, %v3109_v12  ;;  %v11513_v22 = vor.u32 %v13937_v51, %v11512_v1  ;;  %v11314_v12 = vld [vmem:[#allocation22 + $0x50] sm:$0xf0]  ;;  %v13921_v14 = vld [vmem:[#allocation22 + $0x154] sm:$0xf0]  ;;  %v13882_v1 = vld [vmem:[#allocation22 + $0x24] sm:$0xf] }
 0x35b   :  { %v11197_v2 = vor.u32 %v13759_v20, %v11194_v40  ;;  %v11298_v51 = vld [vmem:[#allocation22 + $0x30] sm:$0xf0]  ;;  %v13930_v40 = vld [vmem:[#allocation22 + $0x1a4] sm:$0xf] }
 0x35c   :  { %5604 = vmatmul.bf16.vlgmr.msra.gmra.mxu1 %v15402_v29 }
 0x35d   :  { %5648 = vmatpush.bf16.msrb.mxu1 %v11401_v15  ;;  %5048 = vmatpush.bf16.msrb.mxu0 %v11193_v43  ;;  %v11337_v15 = vor.u32 %v13893_v3, %v11336_v9  ;;  %v13933_v43 = vld [vmem:[#allocation22 + $0x1b4] sm:$0xf0]  ;;  %v11632_v9 = vld [vmem:[#allocation20 + $0xc0] sm:$0xf] }
 0x35e   :  { %5087 = vmatpush.bf16.msrb.mxu3 %v11069_v27  ;;  %5614 = vmatpush.bf16.msra.mxu2 %v11441_v48  ;;  %v11245_v27 = vor.u32 %v13771_v37, %v11242_v56  ;;  %v11226_v48 = vld [vmem:[#allocation17 + $0x398] sm:$0xf0]  ;;  %v11497_v49 = vor.u32 %v13933_v43, %v11496_v41  ;;  %v11600_v56 = vld [vmem:[#allocation20 + $0x80] sm:$0xf]  ;;  %v13878_v41 = vld [vmem:[#allocation22 + $0x4] sm:$0xf] }
 0x35f   :  { %v13917_v37 = vld [vmem:[#allocation22 + $0x134] sm:$0xf0]  ;;  %v11282_v43 = vld [vmem:[#allocation22 + $0x10] sm:$0xf0] }
 0x360   :  { %v11285_v54 = vor.u32 %v13878_v41, %v11282_v43  ;;  %v11778_v41 = vld [vmem:[#allocation20 + $0x1f0] sm:$0xf0] }
 0x361   :  { %5649 = vmatpush.bf16.msrb.mxu1 %v11385_v26  ;;  %5049 = vmatpush.bf16.msrb.mxu0 %v11177_v55  ;;  %v11321_v26 = vor.u32 %v13889_v16, %v11320_v23  ;;  %v11229_v55 = vor.u32 %v13767_v46, %v11226_v48  ;;  %v11178_v23 = vld [vmem:[#allocation17 + $0x338] sm:$0xf0]  ;;  %v11522_v46 = vld [vmem:[#allocation22 + $0x1f0] sm:$0xf0]  ;;  %v11416_v48 = vld [vmem:[#allocation22 + $0x108] sm:$0xf] }
 0x362   :  { %5088 = vmatpush.bf16.msrb.mxu3 %v11053_v39  ;;  %5615 = vmatpush.bf16.msra.mxu2 %v11425_v44  ;;  %v11349_v39 = vor.u32 %v13894_v63, %v11346_v42  ;;  %v11481_v44 = vor.u32 %v13929_v53, %v11480_v28  ;;  %v13907_v63 = vld [vmem:[#allocation22 + $0xec] sm:$0xf]  ;;  %v11402_v42 = vld [vmem:[#allocation22 + $0xf8] sm:$0xf0]  ;;  %v13796_v28 = vld [vmem:[#allocation20 + $0x6c] sm:$0xf0] }
 0x363   :  { %v11776_v53 = vld [vmem:[#allocation20 + $0x1e0] sm:$0xf]  ;;  %v11405_v58 = vor.u32 %v13907_v63, %v11402_v42  ;;  %v11338_v63 = vld [vmem:[#allocation22 + $0x78] sm:$0xf0]  ;;  %v2590_v42 = vmax.f32 %v15302_v47, 0.0 }
 0x365   :  { %5650 = vmatpush.bf16.msrb.mxu1 %v11369_v38  ;;  %5050 = vmatpush.bf16.msrb.mxu0 %v11161_v11  ;;  %v11305_v38 = vor.u32 %v13885_v30, %v11304_v50  ;;  %v13808_v11 = vld [vmem:[#allocation20 + $0xcc] sm:$0xf0]  ;;  %v11301_v30 = vor.u32 %v13882_v1, %v11298_v51  ;;  %v11474_v1 = vld [vmem:[#allocation22 + $0x190] sm:$0xf0]  ;;  %v15425_v47 = vpack.c.bf16 %v2590_v42, %v2590_v42 }
 0x366   :  { %5089 = vmatpush.bf16.msrb.mxu3 %v11037_v35  ;;  %5616 = vmatpush.bf16.msra.mxu2 %v11409_v21  ;;  %v11465_v35 = vor.u32 %v13925_v5, %v11464_v0  ;;  %v11633_v21 = vor.u32 %v13808_v11, %v11632_v9  ;;  %v11568_v0 = vld [vmem:[#allocation20 + $0x40] sm:$0xf]  ;;  %v13792_v5 = vld [vmem:[#allocation20 + $0x4c] sm:$0xf0] }
 0x367   :  { %v13840_v9 = vld [vmem:[#allocation20 + $0x1cc] sm:$0xf0] }
 0x368   :  { %5051 = vmatmul.bf16.vlgmr.msrb.gmra.mxu0 %v15396_v34 }
 0x369   :  { %5651 = vmatpush.bf16.msrb.mxu1 %v11353_v24  ;;  %5095 = vmatpush.bf16.msra.mxu0 %v11277_v6  ;;  %v13890_v24 = vld [vmem:[#allocation22 + $0x64] sm:$0xf] }
 0x36a   :  { %5622 = vmatpush.bf16.msra.mxu3 %v11397_v13  ;;  %5661 = vmatpush.bf16.msrb.mxu2 %v11529_v17  ;;  %v11333_v3 = vor.u32 %v13890_v24, %v11330_v61  ;;  %v13886_v6 = vld [vmem:[#allocation22 + $0x44] sm:$0xf]  ;;  %v11448_v13 = vld [vmem:[#allocation22 + $0x148] sm:$0xf]  ;;  %v13804_v17 = vld [vmem:[#allocation20 + $0xac] sm:$0xf0] }
 0x36b   :  { %5090 = vmatmul.bf16.vlgmr.msrb.gmra.mxu3 %v15388_v60  ;;  %5617 = vmatmul.bf16.vlgmr.msra.gmra.mxu2 %v15407_v31  ;;  %v11288_v60 = vld [vmem:[#allocation22 + $0x8] sm:$0xf]  ;;  %v11317_v7 = vor.u32 %v13886_v6, %v11314_v12  ;;  %v11449_v16 = vor.u32 %v13921_v14, %v11448_v13  ;;  %v13903_v61 = vld [vmem:[#allocation22 + $0xcc] sm:$0xf]  ;;  %v11569_v6 = vor.u32 %v13792_v5, %v11568_v0  ;;  %v11370_v13 = vld [vmem:[#allocation22 + $0xb8] sm:$0xf0] }
 0x36c   :  { %v11289_v32 = vor.u32 %v13881_v52, %v11288_v60  ;;  %v11584_v60 = vld [vmem:[#allocation20 + $0x60] sm:$0xf]  ;;  %v11165_v52 = vor.u32 %v13751_v57, %v11162_v36 }
 0x36d   :  { %5652 = vmatpush.bf16.msrb.mxu1 %v11337_v15  ;;  %5096 = vmatpush.bf16.msra.mxu0 %v11261_v10  ;;  %v11616_v15 = vld [vmem:[#allocation20 + $0xa0] sm:$0xf] }
 0x36e   :  { %5623 = vmatpush.bf16.msra.mxu3 %v11381_v8  ;;  %5662 = vmatpush.bf16.msrb.mxu2 %v11513_v22  ;;  %v11617_v10 = vor.u32 %v13804_v17, %v11616_v15  ;;  %v11432_v8 = vld [vmem:[#allocation22 + $0x128] sm:$0xf]  ;;  %v13800_v22 = vld [vmem:[#allocation20 + $0x8c] sm:$0xf0]  ;;  %v11552_v14 = vld [vmem:[#allocation20 + $0x20] sm:$0xf] }
 0x36f   :  { %v11744_v15 = vld [vmem:[#allocation20 + $0x1a0] sm:$0xf]  ;;  %v13836_v17 = vld [vmem:[#allocation20 + $0x1ac] sm:$0xf0] }
 0x370   :  { %v11696_v5 = vld [vmem:[#allocation20 + $0x140] sm:$0xf] }
 0x371   :  { %5653 = vmatpush.bf16.msrb.mxu1 %v11321_v26  ;;  %5097 = vmatpush.bf16.msra.mxu0 %v11245_v27  ;;  %v11181_v26 = vor.u32 %v13755_v19, %v11178_v23  ;;  %v13938_v27 = vld [vmem:[#allocation22 + $0x1e4] sm:$0xf]  ;;  %v15418_v19 = vld [vmem:[#allocation19] sm:$0xf] }
 0x372   :  { %5624 = vmatpush.bf16.msra.mxu3 %v11365_v45  ;;  %5663 = vmatpush.bf16.msrb.mxu2 %v11497_v49  ;;  %v11433_v45 = vor.u32 %v13917_v37, %v11432_v8  ;;  %v11601_v49 = vor.u32 %v13800_v22, %v11600_v56  ;;  %v11525_v18 = vor.u32 %v13938_v27, %v11522_v46  ;;  %v11354_v8 = vld [vmem:[#allocation22 + $0x98] sm:$0xf0]  ;;  %v11536_v37 = vld [vmem:[#allocation20] sm:$0xf]  ;;  %v13784_v56 = vld [vmem:[#allocation20 + $0xc] sm:$0xf0] }
 0x373   :  { %v13832_v22 = vld [vmem:[#allocation20 + $0x18c] sm:$0xf0]  ;;  %v4252_v43 = vperm.slane %v15418_v19, 0  ;;  %v11458_v46 = vld [vmem:[#allocation22 + $0x170] sm:$0xf0] }
 0x375   :  { %5654 = vmatpush.bf16.msrb.mxu1 %v11305_v38  ;;  %5098 = vmatpush.bf16.msra.mxu0 %v11229_v55  ;;  %v15413_v50 = vpop.f32.mrf.mxu1  ;;  %v13913_v38 = vld [vmem:[#allocation22 + $0x114] sm:$0xf0]  ;;  %v13844_v55 = vld [vmem:[#allocation20 + $0x1ec] sm:$0xf0] }
 0x376   :  { %5625 = vmatpush.bf16.msra.mxu3 %v11349_v39  ;;  %5664 = vmatpush.bf16.msrb.mxu2 %v11481_v44  ;;  %v11417_v39 = vor.u32 %v13913_v38, %v11416_v48  ;;  %v11585_v44 = vor.u32 %v13796_v28, %v11584_v60  ;;  %v11777_v24 = vor.u32 %v13844_v55, %v11776_v53  ;;  %v13828_v28 = vld [vmem:[#allocation20 + $0x16c] sm:$0xf0]  ;;  %v13838_v55 = vld [vmem:[#allocation20 + $0x1c4] sm:$0xf] }
 0x377   :  { %v11537_v48 = vor.u32 %v13784_v56, %v11536_v37  ;;  %v11530_v56 = vld [vmem:[#allocation22 + $0x1f8] sm:$0xf0] }
 0x379   :  { %5655 = vmatpush.bf16.msrb.mxu1 %v11289_v32  ;;  %5099 = vmatpush.bf16.msra.mxu0 %v11213_v4  ;;  %v11506_v32 = vld [vmem:[#allocation22 + $0x1d0] sm:$0xf0]  ;;  %v11760_v4 = vld [vmem:[#allocation20 + $0x1c0] sm:$0xf] }
 0x37a   :  { %5626 = vmatpush.bf16.msra.mxu3 %v11333_v3  ;;  %5665 = vmatpush.bf16.msrb.mxu2 %v11465_v35  ;;  %v11509_v3 = vor.u32 %v13934_v59, %v11506_v32  ;;  %v11490_v35 = vld [vmem:[#allocation22 + $0x1b0] sm:$0xf0]  ;;  %v11761_v12 = vor.u32 %v13840_v9, %v11760_v4  ;;  %v13824_v4 = vld [vmem:[#allocation20 + $0x14c] sm:$0xf0] }
 0x37b   :  { %v11442_v59 = vld [vmem:[#allocation22 + $0x150] sm:$0xf0] }
 0x37c   :  { %5656 = vmatmul.bf16.vlgmr.msrb.gmra.mxu1 %v15402_v29 }
 0x37d   :  { %6180 = vmatpush.bf16.msra.mxu1 %v11649_v62  ;;  %5100 = vmatpush.bf16.msra.mxu0 %v11197_v2  ;;  %v11386_v62 = vld [vmem:[#allocation22 + $0xd8] sm:$0xf0]  ;;  %v4911_v11 = vpop.f32.mrf.mxu1  ;;  %v13788_v2 = vld [vmem:[#allocation20 + $0x2c] sm:$0xf0] }
 0x37e   :  { %5627 = vmatpush.bf16.msra.mxu3 %v11317_v7  ;;  %5666 = vmatpush.bf16.msrb.mxu2 %v11449_v16  ;;  %v11389_v20 = vor.u32 %v13903_v61, %v11386_v62  ;;  %v11493_v7 = vor.u32 %v13930_v40, %v11490_v35  ;;  %v13926_v16 = vld [vmem:[#allocation22 + $0x184] sm:$0xf]  ;;  %v11553_v51 = vor.u32 %v13788_v2, %v11552_v14  ;;  %v11322_v61 = vld [vmem:[#allocation22 + $0x58] sm:$0xf0]  ;;  %v11426_v35 = vld [vmem:[#allocation22 + $0x130] sm:$0xf0] }
 0x37f   :  { %v11477_v36 = vor.u32 %v13926_v16, %v11474_v1  ;;  %v13834_v11 = vld [vmem:[#allocation20 + $0x1a4] sm:$0xf]  ;;  %v11680_v14 = vld [vmem:[#allocation20 + $0x120] sm:$0xf]  ;;  %v13820_v2 = vld [vmem:[#allocation20 + $0x12c] sm:$0xf0] }
 0x380   :  { %v13914_v40 = vld [vmem:[#allocation22 + $0x124] sm:$0xf]  ;;  %v11410_v16 = vld [vmem:[#allocation22 + $0x110] sm:$0xf0]  ;;  %v11681_v37 = vor.u32 %v13820_v2, %v11680_v14 }
 0x381   :  { %6181 = vmatpush.bf16.msra.mxu1 %v11633_v21  ;;  %5101 = vmatpush.bf16.msra.mxu0 %v11181_v26  ;;  %v13899_v21 = vld [vmem:[#allocation22 + $0xac] sm:$0xf]  ;;  %v11728_v26 = vld [vmem:[#allocation20 + $0x180] sm:$0xf] }
 0x382   :  { %5628 = vmatpush.bf16.msra.mxu3 %v11301_v30  ;;  %5667 = vmatpush.bf16.msrb.mxu2 %v11433_v45  ;;  %v11373_v23 = vor.u32 %v13899_v21, %v11370_v13  ;;  %v13842_v30 = vld [vmem:[#allocation20 + $0x1e4] sm:$0xf]  ;;  %v11729_v38 = vor.u32 %v13832_v22, %v11728_v26  ;;  %v11306_v21 = vld [vmem:[#allocation22 + $0x38] sm:$0xf0]  ;;  %v11664_v26 = vld [vmem:[#allocation20 + $0x100] sm:$0xf] }
 0x383   :  { %v13922_v45 = vld [vmem:[#allocation22 + $0x164] sm:$0xf]  ;;  %v11781_v60 = vor.u32 %v13842_v30, %v11778_v41  ;;  %v13816_v22 = vld [vmem:[#allocation20 + $0x10c] sm:$0xf0]  ;;  %v11904_v30 = vld [vmem:[#allocation20 + $0x2e0] sm:$0xf] }
 0x384   :  { %v11461_v53 = vor.u32 %v13922_v45, %v11458_v46  ;;  %v13876_v41 = vld [vmem:[#allocation20 + $0x2ec] sm:$0xf0]  ;;  %v11714_v46 = vld [vmem:[#allocation20 + $0x170] sm:$0xf0] }
 0x385   :  { %6182 = vmatpush.bf16.msra.mxu1 %v11617_v10  ;;  %5102 = vmatpush.bf16.msra.mxu0 %v11165_v52  ;;  %v11745_v10 = vor.u32 %v13836_v17, %v11744_v15  ;;  %v15420_v57 = vpop.f32.mrf.mxu1  ;;  %v11712_v52 = vld [vmem:[#allocation20 + $0x160] sm:$0xf]  ;;  %v13830_v15 = vld [vmem:[#allocation20 + $0x184] sm:$0xf]  ;;  %v11429_v17 = vor.u32 %v13914_v40, %v11426_v35  ;;  %v13868_v35 = vld [vmem:[#allocation20 + $0x2ac] sm:$0xf0] }
 0x386   :  { %5629 = vmatpush.bf16.msra.mxu3 %v11285_v54  ;;  %5668 = vmatpush.bf16.msrb.mxu2 %v11417_v39  ;;  %v11762_v54 = vld [vmem:[#allocation20 + $0x1d0] sm:$0xf0]  ;;  %v11872_v40 = vld [vmem:[#allocation20 + $0x2a0] sm:$0xf] }
 0x387   :  { %v11765_v0 = vor.u32 %v13838_v55, %v11762_v54  ;;  %v11514_v55 = vld [vmem:[#allocation22 + $0x1d8] sm:$0xf0]  ;;  %v11873_v2 = vor.u32 %v13868_v35, %v11872_v40  ;;  %v11808_v35 = vld [vmem:[#allocation20 + $0x220] sm:$0xf] }
 0x388   :  { %5103 = vmatmul.bf16.vlgmr.msra.gmra.mxu0 %v15396_v34  ;;  %v13895_v34 = vld [vmem:[#allocation22 + $0x8c] sm:$0xf] }
 0x389   :  { %6183 = vmatpush.bf16.msra.mxu1 %v11601_v49  ;;  %5635 = vmatpush.bf16.msrb.mxu0 %v11525_v18  ;;  %v11357_v27 = vor.u32 %v13895_v34, %v11354_v8  ;;  %v13891_v49 = vld [vmem:[#allocation22 + $0x6c] sm:$0xf]  ;;  %v4910_v18 = vadd.f32 %v15413_v50, %v4252_v43  ;;  %v13826_v43 = vld [vmem:[#allocation20 + $0x164] sm:$0xf] }
 0x38a   :  { %5674 = vmatpush.bf16.msrb.mxu3 %v11405_v58  ;;  %6193 = vmatpush.bf16.msra.mxu2 %v11777_v24  ;;  %v11341_v39 = vor.u32 %v13891_v49, %v11338_v63  ;;  %v13918_v58 = vld [vmem:[#allocation22 + $0x144] sm:$0xf]  ;;  %v13887_v24 = vld [vmem:[#allocation22 + $0x4c] sm:$0xf]  ;;  %v4253_v49 = vperm.slane %v15418_v19, 1  ;;  %v11717_v54 = vor.u32 %v13826_v43, %v11714_v46 }
 0x38b   :  { %5630 = vmatmul.bf16.vlgmr.msra.gmra.mxu3 %v15402_v29  ;;  %5669 = vmatmul.bf16.vlgmr.msrb.gmra.mxu2 %v15407_v31  ;;  %v4922_v32 = vpop.f32.mrf.mxu2  ;;  %v11445_v9 = vor.u32 %v13918_v58, %v11442_v59  ;;  %v13939_v34 = vld [vmem:[#allocation22 + $0x1ec] sm:$0xf]  ;;  %v13872_v58 = vld [vmem:[#allocation20 + $0x2cc] sm:$0xf0]  ;;  %v13822_v59 = vld [vmem:[#allocation20 + $0x144] sm:$0xf] }
 0x38c   :  { %v15427_v62 = vadd.f32 %v4922_v32, %v4910_v18  ;;  %v11533_v42 = vor.u32 %v13939_v34, %v11530_v56  ;;  %v11698_v32 = vld [vmem:[#allocation20 + $0x150] sm:$0xf0]  ;;  %v13877_v56 = vld [vmem:[#allocation20 + $0x2f4] sm:$0xf0]  ;;  %v13860_v46 = vld [vmem:[#allocation20 + $0x26c] sm:$0xf0] }
 0x38d   :  { %6184 = vmatpush.bf16.msra.mxu1 %v11585_v44  ;;  %5636 = vmatpush.bf16.msrb.mxu0 %v11509_v3  ;;  %v11713_v44 = vor.u32 %v13828_v28, %v11712_v52  ;;  %v4963_v50 = vpop.f32.mrf.mxu1  ;;  %v11746_v3 = vld [vmem:[#allocation20 + $0x1b0] sm:$0xf0]  ;;  %v11665_v52 = vor.u32 %v13816_v22, %v11664_v26  ;;  %v11905_v28 = vor.u32 %v13876_v41, %v11904_v30  ;;  %v11466_v30 = vld [vmem:[#allocation22 + $0x178] sm:$0xf0] }
 0x38e   :  { %5675 = vmatpush.bf16.msrb.mxu3 %v11389_v20  ;;  %6194 = vmatpush.bf16.msra.mxu2 %v11761_v12  ;;  %v11325_v20 = vor.u32 %v13887_v24, %v11322_v61  ;;  %v13883_v12 = vld [vmem:[#allocation22 + $0x2c] sm:$0xf]  ;;  %v11749_v13 = vor.u32 %v13834_v11, %v11746_v3  ;;  %v11890_v24 = vld [vmem:[#allocation20 + $0x2d0] sm:$0xf0]  ;;  %v4962_v61 = vadd.f32 %v15420_v57, %v4253_v49  ;;  %v13818_v57 = vld [vmem:[#allocation20 + $0x124] sm:$0xf] }
 0x38f   :  { %v11309_v1 = vor.u32 %v13883_v12, %v11306_v21  ;;  %v13931_v50 = vld [vmem:[#allocation22 + $0x1ac] sm:$0xf]  ;;  %v11701_v3 = vor.u32 %v13822_v59, %v11698_v32  ;;  %v11682_v12 = vld [vmem:[#allocation20 + $0x130] sm:$0xf0]  ;;  %v13866_v21 = vld [vmem:[#allocation20 + $0x2a4] sm:$0xf] }
 0x390   :  { %v11858_v34 = vld [vmem:[#allocation20 + $0x290] sm:$0xf0]  ;;  %v13854_v32 = vld [vmem:[#allocation20 + $0x244] sm:$0xf] }
 0x391   :  { %6185 = vmatpush.bf16.msra.mxu1 %v11569_v6  ;;  %5637 = vmatpush.bf16.msrb.mxu0 %v11493_v7  ;;  %v11697_v6 = vor.u32 %v13824_v4, %v11696_v5  ;;  %v11730_v7 = vld [vmem:[#allocation20 + $0x190] sm:$0xf0] }
 0x392   :  { %5676 = vmatpush.bf16.msrb.mxu3 %v11373_v23  ;;  %6195 = vmatpush.bf16.msra.mxu2 %v11745_v10  ;;  %v13910_v23 = vld [vmem:[#allocation22 + $0x104] sm:$0xf]  ;;  %v11290_v10 = vld [vmem:[#allocation22 + $0x18] sm:$0xf0]  ;;  %v11842_v49 = vld [vmem:[#allocation20 + $0x270] sm:$0xf0] }
 0x393   :  { %v4924_v8 = vpop.f32.mrf.mxu2  ;;  %v11413_v45 = vor.u32 %v13910_v23, %v11410_v16  ;;  %v11856_v16 = vld [vmem:[#allocation20 + $0x280] sm:$0xf] }
 0x395   :  { %6186 = vmatpush.bf16.msra.mxu1 %v11553_v51  ;;  %5638 = vmatpush.bf16.msrb.mxu0 %v11477_v36  ;;  %v13879_v51 = vld [vmem:[#allocation22 + $0xc] sm:$0xf]  ;;  %v11733_v36 = vor.u32 %v13830_v15, %v11730_v7  ;;  %v11685_v7 = vor.u32 %v13818_v57, %v11682_v12  ;;  %v13852_v57 = vld [vmem:[#allocation20 + $0x22c] sm:$0xf0]  ;;  %v11810_v12 = vld [vmem:[#allocation20 + $0x230] sm:$0xf0] }
 0x396   :  { %5677 = vmatpush.bf16.msrb.mxu3 %v11357_v27  ;;  %6196 = vmatpush.bf16.msra.mxu2 %v11729_v38  ;;  %v11906_v38 = vld [vmem:[#allocation20 + $0x2f0] sm:$0xf0]  ;;  %v11293_v63 = vor.u32 %v13879_v51, %v11290_v10  ;;  %v13927_v15 = vld [vmem:[#allocation22 + $0x18c] sm:$0xf]  ;;  %v13814_v51 = vld [vmem:[#allocation20 + $0x104] sm:$0xf] }
 0x397   :  { %v13862_v10 = vld [vmem:[#allocation20 + $0x284] sm:$0xf] }
 0x398   :  { %v11861_v43 = vor.u32 %v13862_v10, %v11858_v34  ;;  %v11650_v10 = vld [vmem:[#allocation20 + $0xf0] sm:$0xf0]  ;;  %v13846_v34 = vld [vmem:[#allocation20 + $0x204] sm:$0xf] }
 0x399   :  { %6187 = vmatpush.bf16.msra.mxu1 %v11537_v48  ;;  %5639 = vmatpush.bf16.msrb.mxu0 %v11461_v53  ;;  %v15430_v27 = vpop.f32.mrf.mxu1  ;;  %v13874_v48 = vld [vmem:[#allocation20 + $0x2e4] sm:$0xf]  ;;  %v13935_v53 = vld [vmem:[#allocation22 + $0x1cc] sm:$0xf] }
 0x39a   :  { %5678 = vmatpush.bf16.msrb.mxu3 %v11341_v39  ;;  %6197 = vmatpush.bf16.msra.mxu2 %v11713_v44  ;;  %v11909_v18 = vor.u32 %v13874_v48, %v11906_v38  ;;  %v11888_v39 = vld [vmem:[#allocation20 + $0x2c0] sm:$0xf]  ;;  %v13870_v44 = vld [vmem:[#allocation20 + $0x2c4] sm:$0xf] }
 0x39b   :  { %v4974_v5 = vpop.f32.mrf.mxu2  ;;  %v11889_v4 = vor.u32 %v13872_v58, %v11888_v39  ;;  %v13858_v38 = vld [vmem:[#allocation20 + $0x264] sm:$0xf]  ;;  %v11824_v39 = vld [vmem:[#allocation20 + $0x240] sm:$0xf]  ;;  %v13856_v58 = vld [vmem:[#allocation20 + $0x24c] sm:$0xf0] }
 0x39c   :  { %6188 = vmatmul.bf16.vlgmr.msra.gmra.mxu1 %v15425_v47  ;;  %v15437_v11 = vadd.f32 %v4974_v5, %v4962_v61  ;;  %v13869_v5 = vld [vmem:[#allocation20 + $0x2b4] sm:$0xf0] }
 0x39d   :  { %6232 = vmatpush.bf16.msrb.mxu1 %v11781_v60  ;;  %5640 = vmatpush.bf16.msrb.mxu0 %v11445_v9  ;;  %v2591_v60 = vmax.f32 %v15295_v25, 0.0  ;;  %v11517_v25 = vor.u32 %v13935_v53, %v11514_v55  ;;  %v11498_v9 = vld [vmem:[#allocation22 + $0x1b8] sm:$0xf0]  ;;  %v13919_v53 = vld [vmem:[#allocation22 + $0x14c] sm:$0xf] }
 0x39e   :  { %5679 = vmatpush.bf16.msrb.mxu3 %v11325_v20  ;;  %6198 = vmatpush.bf16.msra.mxu2 %v11697_v6  ;;  %v11893_v20 = vor.u32 %v13870_v44, %v11890_v24  ;;  %v11501_v14 = vor.u32 %v13931_v50, %v11498_v9  ;;  %v11450_v55 = vld [vmem:[#allocation22 + $0x158] sm:$0xf0]  ;;  %v11826_v44 = vld [vmem:[#allocation20 + $0x250] sm:$0xf0]  ;;  %v11825_v50 = vor.u32 %v13856_v58, %v11824_v39  ;;  %v13915_v9 = vld [vmem:[#allocation22 + $0x12c] sm:$0xf] }
 0x39f   :  { %v11453_v61 = vor.u32 %v13919_v53, %v11450_v55  ;;  %v11829_v40 = vor.u32 %v13854_v32, %v11826_v44  ;;  %v11640_v55 = vld [vmem:[#allocation20 + $0xc8] sm:$0xf]  ;;  %v13857_v58 = vld [vmem:[#allocation20 + $0x254] sm:$0xf0]  ;;  %v11642_v32 = vld [vmem:[#allocation20 + $0xd8] sm:$0xf0] }
 0x3a0   :  { %v11832_v39 = vld [vmem:[#allocation20 + $0x248] sm:$0xf] }
 0x3a1   :  { %6233 = vmatpush.bf16.msrb.mxu1 %v11765_v0  ;;  %5641 = vmatpush.bf16.msrb.mxu0 %v11429_v17  ;;  %v15435_v0 = vpack.c.bf16 %v2591_v60, %v2591_v60  ;;  %v5015_v6 = vpop.f32.mrf.mxu1  ;;  %v11482_v17 = vld [vmem:[#allocation22 + $0x198] sm:$0xf0]  ;;  %v11896_v60 = vld [vmem:[#allocation20 + $0x2c8] sm:$0xf] }
 0x3a2   :  { %5680 = vmatpush.bf16.msrb.mxu3 %v11309_v1  ;;  %6199 = vmatpush.bf16.msra.mxu2 %v11681_v37  ;;  %v13864_v1 = vld [vmem:[#allocation20 + $0x28c] sm:$0xf0]  ;;  %v11485_v8 = vor.u32 %v13927_v15, %v11482_v17  ;;  %v11912_v37 = vld [vmem:[#allocation20 + $0x2e8] sm:$0xf]  ;;  %v13850_v6 = vld [vmem:[#allocation20 + $0x224] sm:$0xf] }
 0x3a3   :  { %v4976_v26 = vpop.f32.mrf.mxu2  ;;  %v11857_v22 = vor.u32 %v13864_v1, %v11856_v16  ;;  %v11913_v48 = vor.u32 %v13877_v56, %v11912_v37  ;;  %v13911_v15 = vld [vmem:[#allocation22 + $0x10c] sm:$0xf]  ;;  %v11418_v17 = vld [vmem:[#allocation22 + $0x118] sm:$0xf0]  ;;  %v13848_v16 = vld [vmem:[#allocation20 + $0x20c] sm:$0xf0] }
 0x3a4   :  { %v13810_v1 = vld [vmem:[#allocation20 + $0xe4] sm:$0xf]  ;;  %v11656_v56 = vld [vmem:[#allocation20 + $0xe8] sm:$0xf]  ;;  %v13813_v26 = vld [vmem:[#allocation20 + $0xf4] sm:$0xf0] }
 0x3a5   :  { %6234 = vmatpush.bf16.msrb.mxu1 %v11749_v13  ;;  %5642 = vmatpush.bf16.msrb.mxu0 %v11413_v45  ;;  %v11874_v13 = vld [vmem:[#allocation20 + $0x2b0] sm:$0xf0]  ;;  %v11840_v45 = vld [vmem:[#allocation20 + $0x260] sm:$0xf] }
 0x3a6   :  { %5681 = vmatpush.bf16.msrb.mxu3 %v11293_v63  ;;  %6200 = vmatpush.bf16.msra.mxu2 %v11665_v52  ;;  %v11877_v23 = vor.u32 %v13866_v21, %v11874_v13  ;;  %v4254_v63 = vperm.slane %v15418_v19, 2  ;;  %v13873_v52 = vld [vmem:[#allocation20 + $0x2d4] sm:$0xf0]  ;;  %v11864_v21 = vld [vmem:[#allocation20 + $0x288] sm:$0xf] }
 0x3a7   :  { %v11897_v59 = vor.u32 %v13873_v52, %v11896_v60  ;;  %v13865_v13 = vld [vmem:[#allocation20 + $0x294] sm:$0xf0]  ;;  %v13806_v60 = vld [vmem:[#allocation20 + $0xc4] sm:$0xf]  ;;  %v11634_v52 = vld [vmem:[#allocation20 + $0xd0] sm:$0xf0] }
 0x3a8   :  { %5643 = vmatmul.bf16.vlgmr.msrb.gmra.mxu0 %v15407_v31  ;;  %v5014_v24 = vadd.f32 %v15430_v27, %v4254_v63  ;;  %v11865_v37 = vor.u32 %v13865_v13, %v11864_v21  ;;  %v11637_v44 = vor.u32 %v13806_v60, %v11634_v52  ;;  %v13798_v13 = vld [vmem:[#allocation20 + $0x84] sm:$0xf]  ;;  %v11570_v60 = vld [vmem:[#allocation20 + $0x50] sm:$0xf0] }
 0x3a9   :  { %6235 = vmatpush.bf16.msrb.mxu1 %v11733_v36  ;;  %5687 = vmatpush.bf16.msra.mxu0 %v11533_v42  ;;  %v13923_v36 = vld [vmem:[#allocation22 + $0x16c] sm:$0xf] }
 0x3aa   :  { %6206 = vmatpush.bf16.msra.mxu3 %v11905_v28  ;;  %6245 = vmatpush.bf16.msrb.mxu2 %v11909_v18  ;;  %v11469_v42 = vor.u32 %v13923_v36, %v11466_v30  ;;  %v11841_v28 = vor.u32 %v13860_v46, %v11840_v45  ;;  %v11845_v18 = vor.u32 %v13858_v38, %v11842_v49  ;;  %v13861_v30 = vld [vmem:[#allocation20 + $0x274] sm:$0xf0]  ;;  %v2592_v49 = vmax.f32 %v15309_v33, 0.0 }
 0x3ab   :  { %5682 = vmatmul.bf16.vlgmr.msrb.gmra.mxu3 %v15402_v29  ;;  %6201 = vmatmul.bf16.vlgmr.msra.gmra.mxu2 %v15435_v0  ;;  %v11666_v29 = vld [vmem:[#allocation20 + $0x110] sm:$0xf0]  ;;  %v11421_v36 = vor.u32 %v13911_v15, %v11418_v17  ;;  %v11653_v38 = vor.u32 %v13810_v1, %v11650_v10  ;;  %v11608_v17 = vld [vmem:[#allocation20 + $0x88] sm:$0xf]  ;;  %v11610_v1 = vld [vmem:[#allocation20 + $0x98] sm:$0xf0] }
 0x3ac   :  { %v11669_v41 = vor.u32 %v13814_v51, %v11666_v29  ;;  %v11813_v29 = vor.u32 %v13850_v6, %v11810_v12  ;;  %v13803_v6 = vld [vmem:[#allocation20 + $0xac] sm:$0xf]  ;;  %v12032_v10 = vld [vmem:[#allocation23 + $0xe0] sm:$0xf] }
 0x3ad   :  { %6236 = vmatpush.bf16.msrb.mxu1 %v11717_v54  ;;  %5688 = vmatpush.bf16.msra.mxu0 %v11517_v25  ;;  %v15443_v54 = vpop.f32.mrf.mxu3  ;;  %v11880_v25 = vld [vmem:[#allocation20 + $0x2a8] sm:$0xf] }
 0x3ae   :  { %6207 = vmatpush.bf16.msra.mxu3 %v11889_v4  ;;  %6246 = vmatpush.bf16.msrb.mxu2 %v11893_v20  ;;  %v5026_v4 = vpop.f32.mrf.mxu2  ;;  %v11881_v27 = vor.u32 %v13869_v5, %v11880_v25  ;;  %v13802_v25 = vld [vmem:[#allocation20 + $0xa4] sm:$0xf]  ;;  %v11618_v5 = vld [vmem:[#allocation20 + $0xb0] sm:$0xf0] }
 0x3af   :  { %v15447_v20 = vadd.f32 %v5026_v4, %v5014_v24  ;;  %v15453_v24 = vpack.c.bf16 %v2592_v49, %v2592_v49  ;;  %v11833_v4 = vor.u32 %v13857_v58, %v11832_v39  ;;  %v11621_v12 = vor.u32 %v13802_v25, %v11618_v5  ;;  %v13968_v49 = vld [vmem:[#allocation23 + $0xcc] sm:$0xf0]  ;;  %v11578_v39 = vld [vmem:[#allocation20 + $0x58] sm:$0xf0]  ;;  %v13786_v5 = vld [vmem:[#allocation20 + $0x24] sm:$0xf] }
 0x3b1   :  { %6237 = vmatpush.bf16.msrb.mxu1 %v11701_v3  ;;  %5689 = vmatpush.bf16.msra.mxu0 %v11501_v14  ;;  %v11434_v3 = vld [vmem:[#allocation22 + $0x138] sm:$0xf0] }
 0x3b2   :  { %6208 = vmatpush.bf16.msra.mxu3 %v11873_v2  ;;  %6247 = vmatpush.bf16.msrb.mxu2 %v11877_v23  ;;  %v11437_v14 = vor.u32 %v13915_v9, %v11434_v3  ;;  %v4255_v2 = vperm.slane %v15418_v19, 3  ;;  %v11792_v23 = vld [vmem:[#allocation20 + $0x200] sm:$0xf]  ;;  %v11624_v9 = vld [vmem:[#allocation20 + $0xa8] sm:$0xf] }
 0x3b3   :  { %v13805_v3 = vld [vmem:[#allocation20 + $0xb4] sm:$0xf0] }
 0x3b4   :  { %v11625_v21 = vor.u32 %v13805_v3, %v11624_v9 }
 0x3b5   :  { %6238 = vmatpush.bf16.msrb.mxu1 %v11685_v7  ;;  %5690 = vmatpush.bf16.msra.mxu0 %v11485_v8  ;;  %v11809_v7 = vor.u32 %v13852_v57, %v11808_v35  ;;  %v4937_v51 = vpop.f32.mrf.mxu3  ;;  %v11794_v8 = vld [vmem:[#allocation20 + $0x210] sm:$0xf0]  ;;  %v13853_v57 = vld [vmem:[#allocation20 + $0x234] sm:$0xf0] }
 0x3b6   :  { %6209 = vmatpush.bf16.msra.mxu3 %v11857_v22  ;;  %6248 = vmatpush.bf16.msrb.mxu2 %v11861_v43  ;;  %v11848_v22 = vld [vmem:[#allocation20 + $0x268] sm:$0xf]  ;;  %v11658_v43 = vld [vmem:[#allocation20 + $0xf8] sm:$0xf0]  ;;  %v5028_v46 = vpop.f32.mrf.mxu2  ;;  %v11797_v63 = vor.u32 %v13846_v34, %v11794_v8  ;;  %v13972_v34 = vld [vmem:[#allocation23 + $0xec] sm:$0xf0] }
 0x3b7   :  { %v11594_v46 = vld [vmem:[#allocation20 + $0x78] sm:$0xf0] }
 0x3b9   :  { %6239 = vmatpush.bf16.msrb.mxu1 %v11669_v41  ;;  %5691 = vmatpush.bf16.msra.mxu0 %v11469_v42  ;;  %v5065_v19 = vpop.f32.mrf.mxu1  ;;  %v13811_v41 = vld [vmem:[#allocation20 + $0xec] sm:$0xf]  ;;  %v11657_v42 = vor.u32 %v13813_v26, %v11656_v56  ;;  %v13794_v56 = vld [vmem:[#allocation20 + $0x64] sm:$0xf]  ;;  %v11586_v26 = vld [vmem:[#allocation20 + $0x70] sm:$0xf0] }
 0x3ba   :  { %6210 = vmatpush.bf16.msra.mxu3 %v11841_v28  ;;  %6249 = vmatpush.bf16.msrb.mxu2 %v11845_v18  ;;  %v15450_v45 = vadd.f32 %v5065_v19, %v4255_v2  ;;  %v11849_v28 = vor.u32 %v13861_v30, %v11848_v22  ;;  %v11661_v53 = vor.u32 %v13811_v41, %v11658_v43  ;;  %v13809_v18 = vld [vmem:[#allocation20 + $0xd4] sm:$0xf0]  ;;  %v13795_v43 = vld [vmem:[#allocation20 + $0x6c] sm:$0xf] }
 0x3bb   :  { %v13797_v30 = vld [vmem:[#allocation20 + $0x74] sm:$0xf0]  ;;  %v12033_v41 = vor.u32 %v13972_v34, %v12032_v10  ;;  %v11597_v52 = vor.u32 %v13795_v43, %v11594_v46  ;;  %v13843_v10 = vld [vmem:[#allocation20 + $0x1ec] sm:$0xf]  ;;  %v11786_v34 = vld [vmem:[#allocation20 + $0x1f8] sm:$0xf0] }
 0x3bc   :  { %6240 = vmatmul.bf16.vlgmr.msrb.gmra.mxu1 %v15435_v0 }
 0x3bd   :  { %6284 = vmatpush.bf16.msra.mxu1 %v11913_v48  ;;  %5692 = vmatpush.bf16.msra.mxu0 %v11453_v61  ;;  %v11793_v48 = vor.u32 %v13848_v16, %v11792_v23  ;;  %v15455_v33 = vpop.f32.mrf.mxu3  ;;  %v11641_v61 = vor.u32 %v13809_v18, %v11640_v55  ;;  %v13849_v23 = vld [vmem:[#allocation20 + $0x214] sm:$0xf0]  ;;  %v13799_v16 = vld [vmem:[#allocation20 + $0x8c] sm:$0xf] }
 0x3be   :  { %6211 = vmatpush.bf16.msra.mxu3 %v11825_v50  ;;  %6250 = vmatpush.bf16.msrb.mxu2 %v11829_v40  ;;  %v11816_v40 = vld [vmem:[#allocation20 + $0x228] sm:$0xf]  ;;  %v11613_v19 = vor.u32 %v13799_v16, %v11610_v1  ;;  %v13791_v18 = vld [vmem:[#allocation20 + $0x4c] sm:$0xf]  ;;  %v13845_v16 = vld [vmem:[#allocation20 + $0x1f4] sm:$0xf0] }
 0x3bf   :  { %v11817_v2 = vor.u32 %v13853_v57, %v11816_v40  ;;  %v11581_v3 = vor.u32 %v13791_v18, %v11578_v39  ;;  %v11560_v40 = vld [vmem:[#allocation20 + $0x28] sm:$0xf]  ;;  %v11546_v1 = vld [vmem:[#allocation20 + $0x18] sm:$0xf0]  ;;  %v12144_v18 = vld [vmem:[#allocation23 + $0x1c0] sm:$0xf] }
 0x3c0   :  { %v14000_v39 = vld [vmem:[#allocation23 + $0x1cc] sm:$0xf0] }
 0x3c1   :  { %6285 = vmatpush.bf16.msra.mxu1 %v11897_v59  ;;  %5693 = vmatpush.bf16.msra.mxu0 %v11437_v14  ;;  %v13807_v59 = vld [vmem:[#allocation20 + $0xcc] sm:$0xf]  ;;  %v5067_v35 = vpop.f32.mrf.mxu1  ;;  %v11602_v14 = vld [vmem:[#allocation20 + $0x90] sm:$0xf0] }
 0x3c2   :  { %6212 = vmatpush.bf16.msra.mxu3 %v11809_v7  ;;  %6251 = vmatpush.bf16.msrb.mxu2 %v11813_v29  ;;  %v11645_v50 = vor.u32 %v13807_v59, %v11642_v32  ;;  %v11800_v7 = vld [vmem:[#allocation20 + $0x208] sm:$0xf]  ;;  %v11605_v29 = vor.u32 %v13798_v13, %v11602_v14  ;;  %v12000_v32 = vld [vmem:[#allocation23 + $0xa0] sm:$0xf]  ;;  %v13789_v35 = vld [vmem:[#allocation20 + $0x34] sm:$0xf0] }
 0x3c3   :  { %v11801_v22 = vor.u32 %v13849_v23, %v11800_v7  ;;  %v13960_v14 = vld [vmem:[#allocation23 + $0x8c] sm:$0xf0]  ;;  %v11784_v7 = vld [vmem:[#allocation20 + $0x1e8] sm:$0xf] }
 0x3c4   :  { %v11785_v43 = vor.u32 %v13845_v16, %v11784_v7  ;;  %v11920_v7 = vld [vmem:[#allocation23] sm:$0xf] }
 0x3c5   :  { %6286 = vmatpush.bf16.msra.mxu1 %v11881_v27  ;;  %5694 = vmatpush.bf16.msra.mxu0 %v11421_v36  ;;  %v11626_v27 = vld [vmem:[#allocation20 + $0xb8] sm:$0xf0]  ;;  %v15460_v51 = vpop.f32.mrf.mxu0  ;;  %v4989_v8 = vpop.f32.mrf.mxu3  ;;  %v11592_v36 = vld [vmem:[#allocation20 + $0x68] sm:$0xf]  ;;  %v12112_v16 = vld [vmem:[#allocation23 + $0x180] sm:$0xf] }
 0x3c6   :  { %6213 = vmatpush.bf16.msra.mxu3 %v11793_v48  ;;  %6252 = vmatpush.bf16.msrb.mxu2 %v11797_v63  ;;  %v11629_v15 = vor.u32 %v13803_v6, %v11626_v27  ;;  %v11589_v48 = vor.u32 %v13794_v56, %v11586_v26  ;;  %v11593_v63 = vor.u32 %v13797_v30, %v11592_v36  ;;  %v13787_v27 = vld [vmem:[#allocation20 + $0x2c] sm:$0xf]  ;;  %v11968_v8 = vld [vmem:[#allocation23 + $0x60] sm:$0xf]  ;;  %v13956_v26 = vld [vmem:[#allocation23 + $0x6c] sm:$0xf0] }
 0x3c8   :  { %5695 = vmatmul.bf16.vlgmr.msra.gmra.mxu0 %v15407_v31  ;;  %v13801_v31 = vld [vmem:[#allocation20 + $0x94] sm:$0xf0] }
 0x3c9   :  { %6287 = vmatpush.bf16.msra.mxu1 %v11865_v37  ;;  %6219 = vmatpush.bf16.msrb.mxu0 %v11653_v38  ;;  %v11609_v37 = vor.u32 %v13801_v31, %v11608_v17  ;;  %v12016_v38 = vld [vmem:[#allocation23 + $0xc0] sm:$0xf]  ;;  %v11544_v17 = vld [vmem:[#allocation20 + $0x8] sm:$0xf]  ;;  %v13785_v31 = vld [vmem:[#allocation20 + $0x14] sm:$0xf0] }
 0x3ca   :  { %6258 = vmatpush.bf16.msrb.mxu3 %v11657_v42  ;;  %6297 = vmatpush.bf16.msra.mxu2 %v11661_v53  ;;  %v13790_v42 = vld [vmem:[#allocation20 + $0x44] sm:$0xf]  ;;  %v13793_v53 = vld [vmem:[#allocation20 + $0x54] sm:$0xf0]  ;;  %v12017_v55 = vor.u32 %v13968_v49, %v12016_v38  ;;  %v11789_v38 = vor.u32 %v13843_v10, %v11786_v34  ;;  %v11768_v49 = vld [vmem:[#allocation20 + $0x1c8] sm:$0xf] }
 0x3cb   :  { %6214 = vmatmul.bf16.vlgmr.msra.gmra.mxu3 %v15453_v24  ;;  %6253 = vmatmul.bf16.vlgmr.msrb.gmra.mxu2 %v15453_v24  ;;  %v11573_v59 = vor.u32 %v13790_v42, %v11570_v60  ;;  %v11969_v42 = vor.u32 %v13956_v26, %v11968_v8  ;;  %v11720_v10 = vld [vmem:[#allocation20 + $0x168] sm:$0xf]  ;;  %v13829_v34 = vld [vmem:[#allocation20 + $0x174] sm:$0xf0]  ;;  %v13827_v26 = vld [vmem:[#allocation20 + $0x16c] sm:$0xf] }
 0x3cd   :  { %6288 = vmatpush.bf16.msra.mxu1 %v11849_v28  ;;  %6220 = vmatpush.bf16.msrb.mxu0 %v11637_v44  ;;  %v11576_v28 = vld [vmem:[#allocation20 + $0x48] sm:$0xf]  ;;  %v4950_v58 = vpop.f32.mrf.mxu0  ;;  %v13964_v44 = vld [vmem:[#allocation23 + $0xac] sm:$0xf0] }
 0x3ce   :  { %6259 = vmatpush.bf16.msrb.mxu3 %v11641_v61  ;;  %6298 = vmatpush.bf16.msra.mxu2 %v11645_v50  ;;  %v5039_v61 = vpop.f32.mrf.mxu3  ;;  %v11577_v25 = vor.u32 %v13793_v53, %v11576_v28  ;;  %v5078_v9 = vpop.f32.mrf.mxu2  ;;  %v12001_v6 = vor.u32 %v13964_v44, %v12000_v32  ;;  %v11770_v28 = vld [vmem:[#allocation20 + $0x1d8] sm:$0xf0]  ;;  %v11952_v53 = vld [vmem:[#allocation23 + $0x40] sm:$0xf]  ;;  %v11752_v32 = vld [vmem:[#allocation20 + $0x1a8] sm:$0xf] }
 0x3cf   :  { %v15464_v50 = vadd.f32 %v5039_v61, %v15447_v20  ;;  %v15467_v57 = vadd.f32 %v5078_v9, %v15450_v45  ;;  %v11561_v20 = vor.u32 %v13789_v35, %v11560_v40  ;;  %v13783_v45 = vld [vmem:[#allocation20 + $0xc] sm:$0xf]  ;;  %v13837_v44 = vld [vmem:[#allocation20 + $0x1b4] sm:$0xf0]  ;;  %v11936_v9 = vld [vmem:[#allocation23 + $0x20] sm:$0xf] }
 0x3d0   :  { %v13948_v40 = vld [vmem:[#allocation23 + $0x2c] sm:$0xf0]  ;;  %v12128_v35 = vld [vmem:[#allocation23 + $0x1a0] sm:$0xf] }
 0x3d1   :  { %6289 = vmatpush.bf16.msra.mxu1 %v11833_v4  ;;  %6221 = vmatpush.bf16.msrb.mxu0 %v11621_v12  ;;  %v11554_v4 = vld [vmem:[#allocation20 + $0x30] sm:$0xf0]  ;;  %v11562_v12 = vld [vmem:[#allocation20 + $0x38] sm:$0xf0] }
 0x3d2   :  { %6260 = vmatpush.bf16.msrb.mxu3 %v11625_v21  ;;  %6299 = vmatpush.bf16.msra.mxu2 %v11629_v15  ;;  %v11984_v21 = vld [vmem:[#allocation23 + $0x80] sm:$0xf]  ;;  %v11557_v13 = vor.u32 %v13786_v5, %v11554_v4  ;;  %v11538_v15 = vld [vmem:[#allocation20 + $0x10] sm:$0xf0]  ;;  %v11565_v23 = vor.u32 %v13787_v27, %v11562_v12  ;;  %v13835_v5 = vld [vmem:[#allocation20 + $0x1ac] sm:$0xf]  ;;  %v11753_v12 = vor.u32 %v13837_v44, %v11752_v32 }
 0x3d3   :  { %v11754_v4 = vld [vmem:[#allocation20 + $0x1b8] sm:$0xf0]  ;;  %v12002_v32 = vld [vmem:[#allocation23 + $0xb0] sm:$0xf0] }
 0x3d5   :  { %6290 = vmatpush.bf16.msra.mxu1 %v11817_v2  ;;  %6222 = vmatpush.bf16.msrb.mxu0 %v11605_v29  ;;  %v13782_v2 = vld [vmem:[#allocation20 + $0x4] sm:$0xf]  ;;  %v11985_v29 = vor.u32 %v13960_v14, %v11984_v21  ;;  %v4936_v21 = vadd.f32 %v15443_v54, %v15427_v62  ;;  %v11736_v14 = vld [vmem:[#allocation20 + $0x188] sm:$0xf]  ;;  %v12034_v62 = vld [vmem:[#allocation23 + $0xf0] sm:$0xf0] }
 0x3d6   :  { %6261 = vmatpush.bf16.msrb.mxu3 %v11609_v37  ;;  %6300 = vmatpush.bf16.msra.mxu2 %v11613_v19  ;;  %v15469_v37 = vpop.f32.mrf.mxu0  ;;  %v11541_v56 = vor.u32 %v13782_v2, %v11538_v15  ;;  %v14004_v19 = vld [vmem:[#allocation23 + $0x1ec] sm:$0xf0]  ;;  %v5041_v30 = vpop.f32.mrf.mxu3  ;;  %v13833_v2 = vld [vmem:[#allocation20 + $0x194] sm:$0xf0]  ;;  %v11937_v15 = vor.u32 %v13948_v40, %v11936_v9  ;;  %v13819_v9 = vld [vmem:[#allocation20 + $0x12c] sm:$0xf] }
 0x3d7   :  { %v5080_v46 = vpop.f32.mrf.mxu2 }
 0x3d8   :  { %v11721_v46 = vor.u32 %v13829_v34, %v11720_v10  ;;  %v11970_v34 = vld [vmem:[#allocation23 + $0x70] sm:$0xf0] }
 0x3d9   :  { %6291 = vmatpush.bf16.msra.mxu1 %v11801_v22  ;;  %6223 = vmatpush.bf16.msrb.mxu0 %v11589_v48  ;;  %v12160_v22 = vld [vmem:[#allocation23 + $0x1e0] sm:$0xf]  ;;  %v15471_v36 = vpop.f32.mrf.mxu1  ;;  %v11549_v48 = vor.u32 %v13783_v45, %v11546_v1  ;;  %v13992_v45 = vld [vmem:[#allocation23 + $0x18c] sm:$0xf0]  ;;  %v11737_v1 = vor.u32 %v13833_v2, %v11736_v14 }
 0x3da   :  { %6262 = vmatpush.bf16.msrb.mxu3 %v11593_v63  ;;  %6301 = vmatpush.bf16.msra.mxu2 %v11597_v52  ;;  %v13841_v63 = vld [vmem:[#allocation20 + $0x1d4] sm:$0xf0]  ;;  %v12161_v60 = vor.u32 %v14004_v19, %v12160_v22  ;;  %v13839_v52 = vld [vmem:[#allocation20 + $0x1cc] sm:$0xf]  ;;  %v11722_v22 = vld [vmem:[#allocation20 + $0x178] sm:$0xf0] }
 0x3db   :  { %v11769_v58 = vor.u32 %v13841_v63, %v11768_v49  ;;  %v11725_v49 = vor.u32 %v13827_v26, %v11722_v22  ;;  %v11704_v63 = vld [vmem:[#allocation20 + $0x148] sm:$0xf] }
 0x3dc   :  { %6292 = vmatmul.bf16.vlgmr.msra.gmra.mxu1 %v15453_v24 }
 0x3dd   :  { %7104 = vmatpush.bf16.msrb.mxu1 %v12033_v41  ;;  %6224 = vmatpush.bf16.msrb.mxu0 %v11573_v59  ;;  %v11545_v41 = vor.u32 %v13785_v31, %v11544_v17  ;;  %v11773_v59 = vor.u32 %v13839_v52, %v11770_v28  ;;  %v13831_v17 = vld [vmem:[#allocation20 + $0x18c] sm:$0xf]  ;;  %v11738_v31 = vld [vmem:[#allocation20 + $0x198] sm:$0xf0] }
 0x3de   :  { %6263 = vmatpush.bf16.msrb.mxu3 %v11577_v25  ;;  %6302 = vmatpush.bf16.msra.mxu2 %v11581_v3  ;;  %v12145_v25 = vor.u32 %v14000_v39, %v12144_v18  ;;  %v5002_v3 = vpop.f32.mrf.mxu0  ;;  %v11741_v54 = vor.u32 %v13831_v17, %v11738_v31  ;;  %v13823_v52 = vld [vmem:[#allocation20 + $0x14c] sm:$0xf]  ;;  %v11706_v28 = vld [vmem:[#allocation20 + $0x158] sm:$0xf0]  ;;  %v12080_v18 = vld [vmem:[#allocation23 + $0x140] sm:$0xf] }
 0x3df   :  { %v13984_v39 = vld [vmem:[#allocation23 + $0x14c] sm:$0xf0]  ;;  %v11709_v44 = vor.u32 %v13823_v52, %v11706_v28  ;;  %v11690_v3 = vld [vmem:[#allocation20 + $0x138] sm:$0xf0]  ;;  %v13817_v17 = vld [vmem:[#allocation20 + $0x114] sm:$0xf0] }
 0x3e0   :  { %v11693_v31 = vor.u32 %v13819_v9, %v11690_v3  ;;  %v13950_v52 = vld [vmem:[#allocation23 + $0x44] sm:$0xf]  ;;  %v11954_v28 = vld [vmem:[#allocation23 + $0x50] sm:$0xf0]  ;;  %v14028_v9 = vld [vmem:[#allocation23 + $0x2ac] sm:$0xf0] }
 0x3e1   :  { %7105 = vmatpush.bf16.msrb.mxu1 %v12017_v55  ;;  %6225 = vmatpush.bf16.msrb.mxu0 %v11557_v13  ;;  %v13952_v55 = vld [vmem:[#allocation23 + $0x4c] sm:$0xf0]  ;;  %v5607_v27 = vpop.f32.mrf.mxu1  ;;  %v11757_v13 = vor.u32 %v13835_v5, %v11754_v4  ;;  %v12081_v4 = vor.u32 %v13984_v39, %v12080_v18  ;;  %v12146_v18 = vld [vmem:[#allocation23 + $0x1d0] sm:$0xf0]  ;;  %v13946_v3 = vld [vmem:[#allocation23 + $0x24] sm:$0xf] }
 0x3e2   :  { %6264 = vmatpush.bf16.msrb.mxu3 %v11561_v20  ;;  %6303 = vmatpush.bf16.msra.mxu2 %v11565_v23  ;;  %v11953_v61 = vor.u32 %v13952_v55, %v11952_v53  ;;  %v4949_v23 = vadd.f32 %v15460_v51, %v4936_v21  ;;  %v12096_v51 = vld [vmem:[#allocation23 + $0x160] sm:$0xf]  ;;  %v13980_v27 = vld [vmem:[#allocation23 + $0x12c] sm:$0xf0]  ;;  %v4988_v21 = vadd.f32 %v15455_v33, %v15437_v11 }
 0x3e3   :  { %v12048_v11 = vld [vmem:[#allocation23 + $0x100] sm:$0xf]  ;;  %v13976_v33 = vld [vmem:[#allocation23 + $0x10c] sm:$0xf0] }
 0x3e4   :  { %v5108_v19 = vmax.f32 %v4949_v23, 0.0  ;;  %v11674_v23 = vld [vmem:[#allocation20 + $0x118] sm:$0xf0] }
 0x3e5   :  { %7106 = vmatpush.bf16.msrb.mxu1 %v12001_v6  ;;  %6226 = vmatpush.bf16.msrb.mxu0 %v11541_v56  ;;  %v13996_v6 = vld [vmem:[#allocation23 + $0x1ac] sm:$0xf0]  ;;  %v12113_v56 = vor.u32 %v13992_v45, %v12112_v16  ;;  %v5001_v16 = vadd.f32 %v15469_v37, %v4988_v21 }
 0x3e6   :  { %6265 = vmatpush.bf16.msrb.mxu3 %v11545_v41  ;;  %6304 = vmatpush.bf16.msra.mxu2 %v11549_v48  ;;  %v12129_v20 = vor.u32 %v13996_v6, %v12128_v35  ;;  %v13988_v41 = vld [vmem:[#allocation23 + $0x16c] sm:$0xf0]  ;;  %v13966_v48 = vld [vmem:[#allocation23 + $0xc4] sm:$0xf]  ;;  %v15481_v53 = vpack.c.bf16 %v5108_v19, %v5108_v19  ;;  %v12064_v6 = vld [vmem:[#allocation23 + $0x120] sm:$0xf] }
 0x3e7   :  { %v12065_v45 = vor.u32 %v13980_v27, %v12064_v6  ;;  %v5109_v19 = vmax.f32 %v5001_v16, 0.0  ;;  %v12130_v6 = vld [vmem:[#allocation23 + $0x1b0] sm:$0xf0] }
 0x3e8   :  { %6227 = vmatmul.bf16.vlgmr.msrb.gmra.mxu0 %v15425_v47 }
 0x3e9   :  { %7107 = vmatpush.bf16.msrb.mxu1 %v11985_v29  ;;  %6271 = vmatpush.bf16.msra.mxu0 %v11785_v43  ;;  %v13970_v29 = vld [vmem:[#allocation23 + $0xe4] sm:$0xf]  ;;  %v15479_v43 = vpop.f32.mrf.mxu0 }
 0x3ea   :  { %6310 = vmatpush.bf16.msra.mxu3 %v11789_v38  ;;  %7117 = vmatpush.bf16.msrb.mxu2 %v12161_v60  ;;  %v12037_v30 = vor.u32 %v13970_v29, %v12034_v62  ;;  %v12018_v38 = vld [vmem:[#allocation23 + $0xd0] sm:$0xf0]  ;;  %v12097_v60 = vor.u32 %v13988_v41, %v12096_v51  ;;  %v12288_v29 = vld [vmem:[#allocation23 + $0x2e0] sm:$0xf]  ;;  %v14036_v62 = vld [vmem:[#allocation23 + $0x2ec] sm:$0xf0]  ;;  %v12049_v51 = vor.u32 %v13976_v33, %v12048_v11 }
 0x3eb   :  { %6266 = vmatmul.bf16.vlgmr.msrb.gmra.mxu3 %v15425_v47  ;;  %6305 = vmatmul.bf16.vlgmr.msra.gmra.mxu2 %v15425_v47  ;;  %v13944_v47 = vld [vmem:[#allocation23 + $0xc] sm:$0xf0]  ;;  %v12021_v55 = vor.u32 %v13966_v48, %v12018_v38  ;;  %v12289_v41 = vor.u32 %v14036_v62, %v12288_v29  ;;  %v11898_v48 = vld [vmem:[#allocation20 + $0x2d8] sm:$0xf0]  ;;  %v13859_v33 = vld [vmem:[#allocation20 + $0x26c] sm:$0xf] }
 0x3ec   :  { %v11921_v8 = vor.u32 %v13944_v47, %v11920_v7  ;;  %v13815_v7 = vld [vmem:[#allocation20 + $0x10c] sm:$0xf] }
 0x3ed   :  { %7108 = vmatpush.bf16.msrb.mxu1 %v11969_v42  ;;  %6272 = vmatpush.bf16.msra.mxu0 %v11769_v58  ;;  %v13825_v42 = vld [vmem:[#allocation20 + $0x154] sm:$0xf0]  ;;  %v13875_v47 = vld [vmem:[#allocation20 + $0x2ec] sm:$0xf]  ;;  %v11677_v26 = vor.u32 %v13815_v7, %v11674_v23  ;;  %v13942_v7 = vld [vmem:[#allocation23 + $0x4] sm:$0xf] }
 0x3ee   :  { %6311 = vmatpush.bf16.msra.mxu3 %v11773_v59  ;;  %7118 = vmatpush.bf16.msrb.mxu2 %v12145_v25  ;;  %v11705_v58 = vor.u32 %v13825_v42, %v11704_v63  ;;  %v13962_v59 = vld [vmem:[#allocation23 + $0xa4] sm:$0xf]  ;;  %v13821_v25 = vld [vmem:[#allocation20 + $0x134] sm:$0xf0]  ;;  %v15484_v5 = vpop.f32.mrf.mxu3  ;;  %v5618_v40 = vpop.f32.mrf.mxu2  ;;  %v12272_v42 = vld [vmem:[#allocation23 + $0x2c0] sm:$0xf] }
 0x3ef   :  { %v12005_v35 = vor.u32 %v13962_v59, %v12002_v32  ;;  %v13867_v59 = vld [vmem:[#allocation20 + $0x2ac] sm:$0xf]  ;;  %v11882_v32 = vld [vmem:[#allocation20 + $0x2b8] sm:$0xf0]  ;;  %v13990_v23 = vld [vmem:[#allocation23 + $0x184] sm:$0xf] }
 0x3f0   :  { %v11885_v27 = vor.u32 %v13867_v59, %v11882_v32 }
 0x3f1   :  { %7109 = vmatpush.bf16.msrb.mxu1 %v11953_v61  ;;  %6273 = vmatpush.bf16.msra.mxu0 %v11753_v12  ;;  %v11688_v61 = vld [vmem:[#allocation20 + $0x128] sm:$0xf]  ;;  %v13958_v12 = vld [vmem:[#allocation23 + $0x84] sm:$0xf]  ;;  %v5054_v14 = vpop.f32.mrf.mxu0 }
 0x3f2   :  { %6312 = vmatpush.bf16.msra.mxu3 %v11757_v13  ;;  %7119 = vmatpush.bf16.msrb.mxu2 %v12129_v20  ;;  %v15489_v13 = vadd.f32 %v5618_v40, %v15471_v36  ;;  %v11689_v2 = vor.u32 %v13821_v25, %v11688_v61  ;;  %v11672_v20 = vld [vmem:[#allocation20 + $0x108] sm:$0xf]  ;;  %v11957_v61 = vor.u32 %v13950_v52, %v11954_v28  ;;  %v11938_v40 = vld [vmem:[#allocation23 + $0x30] sm:$0xf0]  ;;  %v13863_v14 = vld [vmem:[#allocation20 + $0x28c] sm:$0xf] }
 0x3f3   :  { %v11673_v10 = vor.u32 %v13817_v17, %v11672_v20  ;;  %v12240_v17 = vld [vmem:[#allocation23 + $0x280] sm:$0xf]  ;;  %v12008_v28 = vld [vmem:[#allocation23 + $0xa8] sm:$0xf] }
 0x3f5   :  { %7110 = vmatpush.bf16.msrb.mxu1 %v11937_v15  ;;  %6274 = vmatpush.bf16.msra.mxu0 %v11737_v1  ;;  %v11986_v15 = vld [vmem:[#allocation23 + $0x90] sm:$0xf0]  ;;  %v11914_v1 = vld [vmem:[#allocation20 + $0x2f8] sm:$0xf0] }
 0x3f6   :  { %6313 = vmatpush.bf16.msra.mxu3 %v11741_v54  ;;  %7120 = vmatpush.bf16.msrb.mxu2 %v12113_v56  ;;  %v11989_v36 = vor.u32 %v13958_v12, %v11986_v15  ;;  %v13954_v54 = vld [vmem:[#allocation23 + $0x64] sm:$0xf]  ;;  %v12162_v56 = vld [vmem:[#allocation23 + $0x1f0] sm:$0xf0]  ;;  %v11917_v22 = vor.u32 %v13875_v47, %v11914_v1  ;;  %v5093_v37 = vpop.f32.mrf.mxu3  ;;  %v5620_v38 = vpop.f32.mrf.mxu2  ;;  %v11941_v15 = vor.u32 %v13946_v3, %v11938_v40  ;;  %v13973_v1 = vld [vmem:[#allocation23 + $0xf4] sm:$0xf0] }
 0x3f7   :  { %v12114_v47 = vld [vmem:[#allocation23 + $0x190] sm:$0xf0]  ;;  %v13969_v37 = vld [vmem:[#allocation23 + $0xd4] sm:$0xf0]  ;;  %v12208_v38 = vld [vmem:[#allocation23 + $0x240] sm:$0xf] }
 0x3f8   :  { %v12117_v62 = vor.u32 %v13990_v23, %v12114_v47  ;;  %v13978_v3 = vld [vmem:[#allocation23 + $0x124] sm:$0xf]  ;;  %v12066_v40 = vld [vmem:[#allocation23 + $0x130] sm:$0xf0]  ;;  %v14068_v23 = vld [vmem:[#allocation23 + $0x3ec] sm:$0xf0] }
 0x3f9   :  { %7111 = vmatpush.bf16.msrb.mxu1 %v11921_v8  ;;  %6275 = vmatpush.bf16.msra.mxu0 %v11721_v46  ;;  %v14002_v8 = vld [vmem:[#allocation23 + $0x1e4] sm:$0xf]  ;;  %v13871_v46 = vld [vmem:[#allocation20 + $0x2cc] sm:$0xf] }
 0x3fa   :  { %6314 = vmatpush.bf16.msra.mxu3 %v11725_v49  ;;  %7121 = vmatpush.bf16.msrb.mxu2 %v12097_v60  ;;  %v11973_v49 = vor.u32 %v13954_v54, %v11970_v34  ;;  %v12165_v63 = vor.u32 %v14002_v8, %v12162_v56  ;;  %v14032_v60 = vld [vmem:[#allocation23 + $0x2cc] sm:$0xf0]  ;;  %v11901_v39 = vor.u32 %v13871_v46, %v11898_v48  ;;  %v12224_v54 = vld [vmem:[#allocation23 + $0x260] sm:$0xf]  ;;  %v13986_v8 = vld [vmem:[#allocation23 + $0x164] sm:$0xf] }
 0x3fb   :  { %v12098_v56 = vld [vmem:[#allocation23 + $0x170] sm:$0xf0]  ;;  %v11834_v46 = vld [vmem:[#allocation20 + $0x258] sm:$0xf0]  ;;  %v13974_v47 = vld [vmem:[#allocation23 + $0x104] sm:$0xf] }
 0x3fc   :  { %7112 = vmatmul.bf16.vlgmr.msrb.gmra.mxu1 %v15481_v53  ;;  %v12101_v48 = vor.u32 %v13986_v8, %v12098_v56 }
 0x3fd   :  { %7156 = vmatpush.bf16.msra.mxu1 %v12037_v30  ;;  %6276 = vmatpush.bf16.msra.mxu0 %v11705_v58  ;;  %v15492_v30 = vpop.f32.mrf.mxu1  ;;  %v12273_v58 = vor.u32 %v14032_v60, %v12272_v42  ;;  %v13982_v42 = vld [vmem:[#allocation23 + $0x144] sm:$0xf]  ;;  %v12082_v60 = vld [vmem:[#allocation23 + $0x150] sm:$0xf0] }
 0x3fe   :  { %6315 = vmatpush.bf16.msra.mxu3 %v11709_v44  ;;  %7122 = vmatpush.bf16.msrb.mxu2 %v12081_v4  ;;  %v15494_v44 = vpack.c.bf16 %v5109_v19, %v5109_v19  ;;  %v12256_v4 = vld [vmem:[#allocation23 + $0x2a0] sm:$0xf]  ;;  %v12024_v19 = vld [vmem:[#allocation23 + $0xc8] sm:$0xf]  ;;  %v12085_v32 = vor.u32 %v13982_v42, %v12082_v60  ;;  %v14001_v60 = vld [vmem:[#allocation23 + $0x1d4] sm:$0xf0] }
 0x3ff   :  { %v12257_v21 = vor.u32 %v14028_v9, %v12256_v4  ;;  %v12152_v42 = vld [vmem:[#allocation23 + $0x1c8] sm:$0xf] }
 0x401   :  { %7157 = vmatpush.bf16.msra.mxu1 %v12021_v55  ;;  %6277 = vmatpush.bf16.msra.mxu0 %v11689_v2  ;;  %v13998_v55 = vld [vmem:[#allocation23 + $0x1c4] sm:$0xf]  ;;  %v11866_v2 = vld [vmem:[#allocation20 + $0x298] sm:$0xf0] }
 0x402   :  { %6316 = vmatpush.bf16.msra.mxu3 %v11693_v31  ;;  %7123 = vmatpush.bf16.msrb.mxu2 %v12065_v45  ;;  %v12149_v25 = vor.u32 %v13998_v55, %v12146_v18  ;;  %v14024_v31 = vld [vmem:[#allocation23 + $0x28c] sm:$0xf0]  ;;  %v11869_v16 = vor.u32 %v13863_v14, %v11866_v2  ;;  %v12040_v45 = vld [vmem:[#allocation23 + $0xe8] sm:$0xf]  ;;  %v13965_v55 = vld [vmem:[#allocation23 + $0xb4] sm:$0xf0] }
 0x403   :  { %v12241_v11 = vor.u32 %v14024_v31, %v12240_v17  ;;  %v12041_v34 = vor.u32 %v13973_v1, %v12040_v45  ;;  %v12009_v9 = vor.u32 %v13965_v55, %v12008_v28  ;;  %v13847_v14 = vld [vmem:[#allocation20 + $0x20c] sm:$0xf]  ;;  %v11802_v2 = vld [vmem:[#allocation20 + $0x218] sm:$0xf0]  ;;  %v14008_v17 = vld [vmem:[#allocation23 + $0x20c] sm:$0xf0] }
 0x404   :  { %v12416_v31 = vld [vmem:[#allocation23 + $0x3e0] sm:$0xf]  ;;  %v14034_v45 = vld [vmem:[#allocation23 + $0x2e4] sm:$0xf]  ;;  %v12290_v1 = vld [vmem:[#allocation23 + $0x2f0] sm:$0xf0] }
 0x405   :  { %7158 = vmatpush.bf16.msra.mxu1 %v12005_v35  ;;  %6278 = vmatpush.bf16.msra.mxu0 %v11673_v10  ;;  %v13994_v35 = vld [vmem:[#allocation23 + $0x1a4] sm:$0xf]  ;;  %v5659_v12 = vpop.f32.mrf.mxu1  ;;  %v14020_v10 = vld [vmem:[#allocation23 + $0x26c] sm:$0xf0]  ;;  %v12293_v56 = vor.u32 %v14034_v45, %v12290_v1  ;;  %v12384_v55 = vld [vmem:[#allocation23 + $0x3a0] sm:$0xf] }
 0x406   :  { %6317 = vmatpush.bf16.msra.mxu3 %v11677_v26  ;;  %7124 = vmatpush.bf16.msrb.mxu2 %v12049_v51  ;;  %v12133_v20 = vor.u32 %v13994_v35, %v12130_v6  ;;  %v15499_v26 = vpop.f32.mrf.mxu0  ;;  %v12225_v51 = vor.u32 %v14020_v10, %v12224_v54  ;;  %v11992_v35 = vld [vmem:[#allocation23 + $0x88] sm:$0xf]  ;;  %v12417_v10 = vor.u32 %v14068_v23, %v12416_v31  ;;  %v13971_v23 = vld [vmem:[#allocation23 + $0xec] sm:$0xf]  ;;  %v14052_v45 = vld [vmem:[#allocation23 + $0x36c] sm:$0xf0] }
 0x407   :  { %v12120_v31 = vld [vmem:[#allocation23 + $0x188] sm:$0xf] }
 0x408   :  { %6279 = vmatmul.bf16.vlgmr.msra.gmra.mxu0 %v15435_v0 }
 0x409   :  { %7159 = vmatpush.bf16.msra.mxu1 %v11989_v36  ;;  %6323 = vmatpush.bf16.msrb.mxu0 %v11917_v22  ;;  %v11850_v36 = vld [vmem:[#allocation20 + $0x278] sm:$0xf0] }
 0x40a   :  { %7130 = vmatpush.bf16.msrb.mxu3 %v12289_v41  ;;  %7169 = vmatpush.bf16.msra.mxu2 %v12165_v63  ;;  %v11853_v22 = vor.u32 %v13859_v33, %v11850_v36  ;;  %v13855_v41 = vld [vmem:[#allocation20 + $0x24c] sm:$0xf]  ;;  %v12025_v63 = vor.u32 %v13969_v37, %v12024_v19  ;;  %v11805_v33 = vor.u32 %v13847_v14, %v11802_v2  ;;  %v13957_v36 = vld [vmem:[#allocation23 + $0x74] sm:$0xf0]  ;;  %v14064_v19 = vld [vmem:[#allocation23 + $0x3cc] sm:$0xf0] }
 0x40b   :  { %6318 = vmatmul.bf16.vlgmr.msra.gmra.mxu3 %v15435_v0  ;;  %7125 = vmatmul.bf16.vlgmr.msrb.gmra.mxu2 %v15494_v44  ;;  %v11922_v0 = vld [vmem:[#allocation23 + $0x10] sm:$0xf0]  ;;  %v11837_v52 = vor.u32 %v13855_v41, %v11834_v46 }
 0x40c   :  { %v11925_v29 = vor.u32 %v13942_v7, %v11922_v0  ;;  %v5053_v7 = vadd.f32 %v15479_v43, %v15464_v50  ;;  %v12069_v0 = vor.u32 %v13978_v3, %v12066_v40  ;;  %v13997_v3 = vld [vmem:[#allocation23 + $0x1b4] sm:$0xf0] }
 0x40d   :  { %7160 = vmatpush.bf16.msra.mxu1 %v11973_v49  ;;  %6324 = vmatpush.bf16.msrb.mxu0 %v11901_v39  ;;  %v14016_v49 = vld [vmem:[#allocation23 + $0x24c] sm:$0xf0]  ;;  %v13851_v39 = vld [vmem:[#allocation20 + $0x22c] sm:$0xf] }
 0x40e   :  { %7131 = vmatpush.bf16.msrb.mxu3 %v12273_v58  ;;  %7170 = vmatpush.bf16.msra.mxu2 %v12149_v25  ;;  %v12209_v18 = vor.u32 %v14016_v49, %v12208_v38  ;;  %v11818_v58 = vld [vmem:[#allocation20 + $0x238] sm:$0xf0]  ;;  %v15502_v59 = vpop.f32.mrf.mxu3  ;;  %v14012_v25 = vld [vmem:[#allocation23 + $0x22c] sm:$0xf0]  ;;  %v5670_v4 = vpop.f32.mrf.mxu2  ;;  %v12274_v38 = vld [vmem:[#allocation23 + $0x2d0] sm:$0xf0] }
 0x40f   :  { %v15505_v6 = vadd.f32 %v5670_v4, %v15492_v30  ;;  %v11821_v12 = vor.u32 %v13851_v39, %v11818_v58  ;;  %v12050_v30 = vld [vmem:[#allocation23 + $0x110] sm:$0xf0]  ;;  %v11960_v49 = vld [vmem:[#allocation23 + $0x48] sm:$0xf]  ;;  %v12153_v58 = vor.u32 %v14001_v60, %v12152_v42  ;;  %v13949_v4 = vld [vmem:[#allocation23 + $0x34] sm:$0xf0] }
 0x410   :  { %v12053_v8 = vor.u32 %v13974_v47, %v12050_v30  ;;  %v12042_v47 = vld [vmem:[#allocation23 + $0xf8] sm:$0xf0]  ;;  %v13963_v42 = vld [vmem:[#allocation23 + $0xac] sm:$0xf] }
 0x411   :  { %7161 = vmatpush.bf16.msra.mxu1 %v11957_v61  ;;  %6325 = vmatpush.bf16.msrb.mxu0 %v11885_v27  ;;  %v12192_v61 = vld [vmem:[#allocation23 + $0x220] sm:$0xf]  ;;  %v5106_v27 = vpop.f32.mrf.mxu0  ;;  %v12010_v60 = vld [vmem:[#allocation23 + $0xb8] sm:$0xf0] }
 0x412   :  { %7132 = vmatpush.bf16.msrb.mxu3 %v12257_v21  ;;  %7171 = vmatpush.bf16.msra.mxu2 %v12133_v20  ;;  %v13961_v21 = vld [vmem:[#allocation23 + $0x94] sm:$0xf0]  ;;  %v12176_v20 = vld [vmem:[#allocation23 + $0x200] sm:$0xf] }
 0x413   :  { %v12177_v54 = vor.u32 %v14008_v17, %v12176_v20  ;;  %v11928_v20 = vld [vmem:[#allocation23 + $0x8] sm:$0xf]  ;;  %v13945_v17 = vld [vmem:[#allocation23 + $0x14] sm:$0xf0] }
 0x414   :  { %v11929_v1 = vor.u32 %v13945_v17, %v11928_v20  ;;  %v14066_v20 = vld [vmem:[#allocation23 + $0x3e4] sm:$0xf] }
 0x415   :  { %7162 = vmatpush.bf16.msra.mxu1 %v11941_v15  ;;  %6326 = vmatpush.bf16.msrb.mxu0 %v11869_v16  ;;  %v12193_v15 = vor.u32 %v14012_v25, %v12192_v61  ;;  %v11993_v16 = vor.u32 %v13961_v21, %v11992_v35  ;;  %v12258_v61 = vld [vmem:[#allocation23 + $0x2b0] sm:$0xf0]  ;;  %v11944_v25 = vld [vmem:[#allocation23 + $0x28] sm:$0xf]  ;;  %v14056_v21 = vld [vmem:[#allocation23 + $0x38c] sm:$0xf0] }
 0x416   :  { %7133 = vmatpush.bf16.msrb.mxu3 %v12241_v11  ;;  %7172 = vmatpush.bf16.msra.mxu2 %v12117_v62  ;;  %v11976_v11 = vld [vmem:[#allocation23 + $0x68] sm:$0xf]  ;;  %v14005_v62 = vld [vmem:[#allocation23 + $0x1f4] sm:$0xf0]  ;;  %v5633_v50 = vpop.f32.mrf.mxu3  ;;  %v11945_v14 = vor.u32 %v13949_v4, %v11944_v25 }
 0x417   :  { %v11977_v41 = vor.u32 %v13957_v36, %v11976_v11  ;;  %v12226_v36 = vld [vmem:[#allocation23 + $0x270] sm:$0xf0]  ;;  %v13967_v50 = vld [vmem:[#allocation23 + $0xcc] sm:$0xf]  ;;  %v12072_v25 = vld [vmem:[#allocation23 + $0x128] sm:$0xf] }
 0x418   :  { %v13981_v4 = vld [vmem:[#allocation23 + $0x134] sm:$0xf0] }
 0x419   :  { %7163 = vmatpush.bf16.msra.mxu1 %v11925_v29  ;;  %6327 = vmatpush.bf16.msrb.mxu0 %v11853_v22  ;;  %v12168_v29 = vld [vmem:[#allocation23 + $0x1e8] sm:$0xf]  ;;  %v6189_v43 = vpop.f32.mrf.mxu1  ;;  %v12400_v22 = vld [vmem:[#allocation23 + $0x3c0] sm:$0xf] }
 0x41a   :  { %7134 = vmatpush.bf16.msrb.mxu3 %v12225_v51  ;;  %7173 = vmatpush.bf16.msra.mxu2 %v12101_v48  ;;  %v15510_v37 = vadd.f32 %v6189_v43, %v15489_v13  ;;  %v5672_v51 = vpop.f32.mrf.mxu2  ;;  %v12169_v46 = vor.u32 %v14005_v62, %v12168_v29  ;;  %v14030_v48 = vld [vmem:[#allocation23 + $0x2c4] sm:$0xf]  ;;  %v12045_v29 = vor.u32 %v13971_v23, %v12042_v47  ;;  %v12104_v62 = vld [vmem:[#allocation23 + $0x168] sm:$0xf]  ;;  %v12026_v43 = vld [vmem:[#allocation23 + $0xd8] sm:$0xf0] }
 0x41b   :  { %v12277_v13 = vor.u32 %v14030_v48, %v12274_v38  ;;  %v12029_v48 = vor.u32 %v13967_v50, %v12026_v43  ;;  %v12088_v38 = vld [vmem:[#allocation23 + $0x148] sm:$0xf]  ;;  %v14037_v23 = vld [vmem:[#allocation23 + $0x2f4] sm:$0xf0]  ;;  %v13955_v47 = vld [vmem:[#allocation23 + $0x6c] sm:$0xf] }
 0x41c   :  { %7164 = vmatmul.bf16.vlgmr.msra.gmra.mxu1 %v15481_v53 }
 0x41d   :  { %7208 = vmatpush.bf16.msrb.mxu1 %v12041_v34  ;;  %6328 = vmatpush.bf16.msrb.mxu0 %v11837_v52  ;;  %v5110_v34 = vmax.f32 %v5053_v7, 0.0  ;;  %v12401_v52 = vor.u32 %v14064_v19, %v12400_v22  ;;  %v13993_v7 = vld [vmem:[#allocation23 + $0x194] sm:$0xf0]  ;;  %v12336_v22 = vld [vmem:[#allocation23 + $0x340] sm:$0xf] }
 0x41e   :  { %7135 = vmatpush.bf16.msrb.mxu3 %v12209_v18  ;;  %7174 = vmatpush.bf16.msra.mxu2 %v12085_v32  ;;  %v14060_v18 = vld [vmem:[#allocation23 + $0x3ac] sm:$0xf0]  ;;  %v14026_v32 = vld [vmem:[#allocation23 + $0x2a4] sm:$0xf]  ;;  %v12121_v11 = vor.u32 %v13993_v7, %v12120_v31  ;;  %v12073_v31 = vor.u32 %v13981_v4, %v12072_v25  ;;  %v12418_v7 = vld [vmem:[#allocation23 + $0x3f0] sm:$0xf0] }
 0x41f   :  { %v15512_v28 = vpack.c.bf16 %v5110_v34, %v5110_v34  ;;  %v12385_v40 = vor.u32 %v14060_v18, %v12384_v55  ;;  %v12261_v27 = vor.u32 %v14026_v32, %v12258_v61  ;;  %v14048_v19 = vld [vmem:[#allocation23 + $0x34c] sm:$0xf0]  ;;  %v12013_v61 = vor.u32 %v13963_v42, %v12010_v60  ;;  %v14058_v42 = vld [vmem:[#allocation23 + $0x3a4] sm:$0xf]  ;;  %v12386_v60 = vld [vmem:[#allocation23 + $0x3b0] sm:$0xf0] }
 0x420   :  { %v12389_v25 = vor.u32 %v14058_v42, %v12386_v60 }
 0x421   :  { %7209 = vmatpush.bf16.msrb.mxu1 %v12025_v63  ;;  %6329 = vmatpush.bf16.msrb.mxu0 %v11821_v12  ;;  %v13953_v63 = vld [vmem:[#allocation23 + $0x54] sm:$0xf0]  ;;  %v6191_v35 = vpop.f32.mrf.mxu1  ;;  %v12368_v12 = vld [vmem:[#allocation23 + $0x380] sm:$0xf] }
 0x422   :  { %7136 = vmatpush.bf16.msrb.mxu3 %v12193_v15  ;;  %7175 = vmatpush.bf16.msra.mxu2 %v12069_v0  ;;  %v11961_v39 = vor.u32 %v13953_v63, %v11960_v49  ;;  %v14022_v15 = vld [vmem:[#allocation23 + $0x284] sm:$0xf]  ;;  %v12369_v0 = vor.u32 %v14056_v21, %v12368_v12  ;;  %v13985_v49 = vld [vmem:[#allocation23 + $0x154] sm:$0xf0]  ;;  %v12337_v63 = vor.u32 %v14048_v19, %v12336_v22  ;;  %v11994_v12 = vld [vmem:[#allocation23 + $0x98] sm:$0xf0] }
 0x423   :  { %v12089_v18 = vor.u32 %v13985_v49, %v12088_v38  ;;  %v12304_v21 = vld [vmem:[#allocation23 + $0x300] sm:$0xf]  ;;  %v12280_v22 = vld [vmem:[#allocation23 + $0x2c8] sm:$0xf]  ;;  %v14033_v19 = vld [vmem:[#allocation23 + $0x2d4] sm:$0xf0] }
 0x425   :  { %7210 = vmatpush.bf16.msrb.mxu1 %v12009_v9  ;;  %6330 = vmatpush.bf16.msrb.mxu0 %v11805_v33  ;;  %v12136_v9 = vld [vmem:[#allocation23 + $0x1a8] sm:$0xf]  ;;  %v14018_v33 = vld [vmem:[#allocation23 + $0x264] sm:$0xf] }
 0x426   :  { %7137 = vmatpush.bf16.msrb.mxu3 %v12177_v54  ;;  %7176 = vmatpush.bf16.msra.mxu2 %v12053_v8  ;;  %v12137_v2 = vor.u32 %v13997_v3, %v12136_v9  ;;  %v13989_v54 = vld [vmem:[#allocation23 + $0x174] sm:$0xf0]  ;;  %v13959_v9 = vld [vmem:[#allocation23 + $0x8c] sm:$0xf]  ;;  %v5092_v3 = vadd.f32 %v15484_v5, %v15467_v57  ;;  %v12056_v57 = vld [vmem:[#allocation23 + $0x108] sm:$0xf] }
 0x427   :  { %v12105_v51 = vor.u32 %v13989_v54, %v12104_v62  ;;  %v13977_v5 = vld [vmem:[#allocation23 + $0x114] sm:$0xf0] }
 0x428   :  { %6331 = vmatmul.bf16.vlgmr.msrb.gmra.mxu0 %v15453_v24  ;;  %v12242_v24 = vld [vmem:[#allocation23 + $0x290] sm:$0xf0]  ;;  %v5105_v17 = vadd.f32 %v15499_v26, %v5092_v3  ;;  %v12057_v62 = vor.u32 %v13977_v5, %v12056_v57  ;;  %v14054_v3 = vld [vmem:[#allocation23 + $0x384] sm:$0xf] }
 0x429   :  { %7211 = vmatpush.bf16.msrb.mxu1 %v11993_v16  ;;  %7143 = vmatpush.bf16.msra.mxu0 %v12417_v10  ;;  %v12245_v30 = vor.u32 %v14022_v15, %v12242_v24  ;;  %v12352_v16 = vld [vmem:[#allocation23 + $0x360] sm:$0xf]  ;;  %v5644_v10 = vpop.f32.mrf.mxu0  ;;  %v14006_v15 = vld [vmem:[#allocation23 + $0x204] sm:$0xf]  ;;  %v12178_v24 = vld [vmem:[#allocation23 + $0x210] sm:$0xf0] }
 0x42a   :  { %7182 = vmatpush.bf16.msra.mxu3 %v12293_v56  ;;  %7221 = vmatpush.bf16.msrb.mxu2 %v12169_v46  ;;  %v12353_v34 = vor.u32 %v14052_v45, %v12352_v16  ;;  %v15518_v8 = vadd.f32 %v5644_v10, %v15502_v59  ;;  %v12229_v56 = vor.u32 %v14018_v33, %v12226_v36  ;;  %v12210_v46 = vld [vmem:[#allocation23 + $0x250] sm:$0xf0]  ;;  %v11978_v16 = vld [vmem:[#allocation23 + $0x78] sm:$0xf0]  ;;  %v14003_v45 = vld [vmem:[#allocation23 + $0x1ec] sm:$0xf] }
 0x42b   :  { %7138 = vmatmul.bf16.vlgmr.msrb.gmra.mxu3 %v15512_v28  ;;  %7177 = vmatmul.bf16.vlgmr.msra.gmra.mxu2 %v15494_v44  ;;  %v12421_v33 = vor.u32 %v14066_v20, %v12418_v7  ;;  %v5111_v36 = vmax.f32 %v5105_v17, 0.0  ;;  %v14062_v10 = vld [vmem:[#allocation23 + $0x3c4] sm:$0xf]  ;;  %v11981_v43 = vor.u32 %v13955_v47, %v11978_v16  ;;  %v12122_v20 = vld [vmem:[#allocation23 + $0x198] sm:$0xf0] }
 0x42c   :  { %v14100_v7 = vld [vmem:[#allocation25 + $0xec] sm:$0xf0]  ;;  %v14050_v5 = vld [vmem:[#allocation23 + $0x364] sm:$0xf]  ;;  %v12232_v47 = vld [vmem:[#allocation23 + $0x268] sm:$0xf] }
 0x42d   :  { %7212 = vmatpush.bf16.msrb.mxu1 %v11977_v41  ;;  %7144 = vmatpush.bf16.msra.mxu0 %v12401_v52  ;;  %v14014_v41 = vld [vmem:[#allocation23 + $0x244] sm:$0xf]  ;;  %v12320_v52 = vld [vmem:[#allocation23 + $0x320] sm:$0xf]  ;;  %v15531_v49 = vpack.c.bf16 %v5111_v36, %v5111_v36 }
 0x42e   :  { %7183 = vmatpush.bf16.msra.mxu3 %v12277_v13  ;;  %7222 = vmatpush.bf16.msrb.mxu2 %v12153_v58  ;;  %v12213_v59 = vor.u32 %v14014_v41, %v12210_v46  ;;  %v14044_v13 = vld [vmem:[#allocation23 + $0x32c] sm:$0xf0]  ;;  %v15521_v55 = vpop.f32.mrf.mxu3  ;;  %v12194_v58 = vld [vmem:[#allocation23 + $0x230] sm:$0xf0]  ;;  %v6202_v32 = vpop.f32.mrf.mxu2  ;;  %v11962_v41 = vld [vmem:[#allocation23 + $0x58] sm:$0xf0] }
 0x42f   :  { %v13999_v46 = vld [vmem:[#allocation23 + $0x1cc] sm:$0xf]  ;;  %v12528_v36 = vld [vmem:[#allocation25 + $0xc0] sm:$0xf] }
 0x431   :  { %7213 = vmatpush.bf16.msrb.mxu1 %v11961_v39  ;;  %7145 = vmatpush.bf16.msra.mxu0 %v12385_v40  ;;  %v14010_v39 = vld [vmem:[#allocation23 + $0x224] sm:$0xf]  ;;  %v15526_v40 = vadd.f32 %v6202_v32, %v15510_v37  ;;  %v5646_v35 = vpop.f32.mrf.mxu0  ;;  %v11997_v37 = vor.u32 %v13959_v9, %v11994_v12  ;;  %v13995_v32 = vld [vmem:[#allocation23 + $0x1ac] sm:$0xf] }
 0x432   :  { %7184 = vmatpush.bf16.msra.mxu3 %v12261_v27  ;;  %7223 = vmatpush.bf16.msrb.mxu2 %v12137_v2  ;;  %v12321_v27 = vor.u32 %v14044_v13, %v12320_v52  ;;  %v12197_v2 = vor.u32 %v14010_v39, %v12194_v58  ;;  %v12264_v13 = vld [vmem:[#allocation23 + $0x2a8] sm:$0xf]  ;;  %v13947_v39 = vld [vmem:[#allocation23 + $0x2c] sm:$0xf]  ;;  %v11946_v58 = vld [vmem:[#allocation23 + $0x38] sm:$0xf0] }
 0x433   :  { %v12370_v35 = vld [vmem:[#allocation23 + $0x390] sm:$0xf0] }
 0x434   :  { %v12373_v17 = vor.u32 %v14054_v3, %v12370_v35  ;;  %v12306_v3 = vld [vmem:[#allocation23 + $0x310] sm:$0xf0] }
 0x435   :  { %7214 = vmatpush.bf16.msrb.mxu1 %v11945_v14  ;;  %7146 = vmatpush.bf16.msra.mxu0 %v12369_v0  ;;  %v14040_v14 = vld [vmem:[#allocation23 + $0x30c] sm:$0xf0]  ;;  %v12296_v0 = vld [vmem:[#allocation23 + $0x2e8] sm:$0xf] }
 0x436   :  { %7185 = vmatpush.bf16.msra.mxu3 %v12245_v30  ;;  %7224 = vmatpush.bf16.msrb.mxu2 %v12121_v11  ;;  %v12305_v30 = vor.u32 %v14040_v14, %v12304_v21  ;;  %v12181_v11 = vor.u32 %v14006_v15, %v12178_v24  ;;  %v5685_v26 = vpop.f32.mrf.mxu3  ;;  %v12297_v54 = vor.u32 %v14037_v23, %v12296_v0  ;;  %v6204_v50 = vpop.f32.mrf.mxu2  ;;  %v12248_v21 = vld [vmem:[#allocation23 + $0x288] sm:$0xf]  ;;  %v14025_v14 = vld [vmem:[#allocation23 + $0x294] sm:$0xf0]  ;;  %v11930_v15 = vld [vmem:[#allocation23 + $0x18] sm:$0xf0] }
 0x437   :  { %v13991_v24 = vld [vmem:[#allocation23 + $0x18c] sm:$0xf]  ;;  %v12249_v57 = vor.u32 %v14025_v14, %v12248_v21  ;;  %v14096_v26 = vld [vmem:[#allocation25 + $0xcc] sm:$0xf0]  ;;  %v12424_v21 = vld [vmem:[#allocation23 + $0x3e8] sm:$0xf] }
 0x438   :  { %v12125_v23 = vor.u32 %v13991_v24, %v12122_v20  ;;  %v14069_v14 = vld [vmem:[#allocation23 + $0x3f4] sm:$0xf0]  ;;  %v14035_v20 = vld [vmem:[#allocation23 + $0x2ec] sm:$0xf] }
 0x439   :  { %7215 = vmatpush.bf16.msrb.mxu1 %v11929_v1  ;;  %7147 = vmatpush.bf16.msra.mxu0 %v12353_v34  ;;  %v12170_v1 = vld [vmem:[#allocation23 + $0x1f8] sm:$0xf0]  ;;  %v12402_v34 = vld [vmem:[#allocation23 + $0x3d0] sm:$0xf0] }
 0x43a   :  { %7186 = vmatpush.bf16.msra.mxu3 %v12229_v56  ;;  %7225 = vmatpush.bf16.msrb.mxu2 %v12105_v51  ;;  %v12173_v56 = vor.u32 %v14003_v45, %v12170_v1  ;;  %v13951_v51 = vld [vmem:[#allocation23 + $0x4c] sm:$0xf]  ;;  %v12405_v38 = vor.u32 %v14062_v10, %v12402_v34  ;;  %v12106_v1 = vld [vmem:[#allocation23 + $0x178] sm:$0xf0]  ;;  %v14046_v10 = vld [vmem:[#allocation23 + $0x344] sm:$0xf] }
 0x43b   :  { %v13987_v45 = vld [vmem:[#allocation23 + $0x16c] sm:$0xf]  ;;  %v12338_v34 = vld [vmem:[#allocation23 + $0x350] sm:$0xf0] }
 0x43c   :  { %7216 = vmatmul.bf16.vlgmr.msrb.gmra.mxu1 %v15481_v53  ;;  %v12109_v50 = vor.u32 %v13987_v45, %v12106_v1  ;;  %v12408_v1 = vld [vmem:[#allocation23 + $0x3c8] sm:$0xf] }
 0x43d   :  { %7260 = vmatpush.bf16.msra.mxu1 %v12045_v29  ;;  %7148 = vmatpush.bf16.msra.mxu0 %v12337_v63  ;;  %v15529_v29 = vpop.f32.mrf.mxu1  ;;  %v12281_v63 = vor.u32 %v14033_v19, %v12280_v22  ;;  %v12529_v22 = vor.u32 %v14096_v26, %v12528_v36  ;;  %v13983_v19 = vld [vmem:[#allocation23 + $0x14c] sm:$0xf] }
 0x43e   :  { %7187 = vmatpush.bf16.msra.mxu3 %v12213_v59  ;;  %7226 = vmatpush.bf16.msrb.mxu2 %v12089_v18  ;;  %v11965_v59 = vor.u32 %v13951_v51, %v11962_v41  ;;  %v14029_v18 = vld [vmem:[#allocation23 + $0x2b4] sm:$0xf0]  ;;  %v12090_v51 = vld [vmem:[#allocation23 + $0x158] sm:$0xf0]  ;;  %v12341_v41 = vor.u32 %v14046_v10, %v12338_v34  ;;  %v12464_v34 = vld [vmem:[#allocation25 + $0x40] sm:$0xf] }
 0x43f   :  { %v12265_v9 = vor.u32 %v14029_v18, %v12264_v13  ;;  %v12093_v60 = vor.u32 %v13983_v19, %v12090_v51  ;;  %v12282_v10 = vld [vmem:[#allocation23 + $0x2d8] sm:$0xf0]  ;;  %v12392_v51 = vld [vmem:[#allocation23 + $0x3a8] sm:$0xf] }
 0x441   :  { %7261 = vmatpush.bf16.msra.mxu1 %v12029_v48  ;;  %7149 = vmatpush.bf16.msra.mxu0 %v12321_v27  ;;  %v12154_v48 = vld [vmem:[#allocation23 + $0x1d8] sm:$0xf0]  ;;  %v11949_v27 = vor.u32 %v13947_v39, %v11946_v58  ;;  %v13979_v58 = vld [vmem:[#allocation23 + $0x12c] sm:$0xf] }
 0x442   :  { %7188 = vmatpush.bf16.msra.mxu3 %v12197_v2  ;;  %7227 = vmatpush.bf16.msrb.mxu2 %v12073_v31  ;;  %v12157_v52 = vor.u32 %v13999_v46, %v12154_v48  ;;  %v13943_v2 = vld [vmem:[#allocation23 + $0xc] sm:$0xf]  ;;  %v12544_v31 = vld [vmem:[#allocation25 + $0xe0] sm:$0xf]  ;;  %v14092_v48 = vld [vmem:[#allocation25 + $0xac] sm:$0xf0] }
 0x443   :  { %v11933_v0 = vor.u32 %v13943_v2, %v11930_v15  ;;  %v12545_v16 = vor.u32 %v14100_v7, %v12544_v31  ;;  %v12512_v46 = vld [vmem:[#allocation25 + $0xa0] sm:$0xf]  ;;  %v13975_v2 = vld [vmem:[#allocation23 + $0x10c] sm:$0xf]  ;;  %v12058_v15 = vld [vmem:[#allocation23 + $0x118] sm:$0xf0] }
 0x444   :  { %v12513_v39 = vor.u32 %v14092_v48, %v12512_v46  ;;  %v12480_v31 = vld [vmem:[#allocation25 + $0x60] sm:$0xf] }
 0x445   :  { %7262 = vmatpush.bf16.msra.mxu1 %v12013_v61  ;;  %7150 = vmatpush.bf16.msra.mxu0 %v12305_v30  ;;  %v12138_v61 = vld [vmem:[#allocation23 + $0x1b8] sm:$0xf0]  ;;  %v6243_v4 = vpop.f32.mrf.mxu1  ;;  %v14021_v30 = vld [vmem:[#allocation23 + $0x274] sm:$0xf0] }
 0x446   :  { %7189 = vmatpush.bf16.msra.mxu3 %v12181_v11  ;;  %7228 = vmatpush.bf16.msrb.mxu2 %v12057_v62  ;;  %v12141_v12 = vor.u32 %v13995_v32, %v12138_v61  ;;  %v5696_v11 = vpop.f32.mrf.mxu0  ;;  %v12074_v32 = vld [vmem:[#allocation23 + $0x138] sm:$0xf0]  ;;  %v12496_v61 = vld [vmem:[#allocation25 + $0x80] sm:$0xf]  ;;  %v14088_v4 = vld [vmem:[#allocation25 + $0x8c] sm:$0xf0] }
 0x447   :  { %v15537_v62 = vadd.f32 %v5696_v11, %v15521_v55  ;;  %v12497_v24 = vor.u32 %v14088_v4, %v12496_v61  ;;  %v14065_v11 = vld [vmem:[#allocation23 + $0x3d4] sm:$0xf0]  ;;  %v14023_v4 = vld [vmem:[#allocation23 + $0x28c] sm:$0xf] }
 0x448   :  { %7151 = vmatmul.bf16.vlgmr.msra.gmra.mxu0 %v15531_v49  ;;  %v14057_v61 = vld [vmem:[#allocation23 + $0x394] sm:$0xf0] }
 0x449   :  { %7263 = vmatpush.bf16.msra.mxu1 %v11997_v37  ;;  %7195 = vmatpush.bf16.msrb.mxu0 %v12421_v33  ;;  %v12354_v37 = vld [vmem:[#allocation23 + $0x370] sm:$0xf0] }
 0x44a   :  { %7234 = vmatpush.bf16.msrb.mxu3 %v12297_v54  ;;  %7273 = vmatpush.bf16.msra.mxu2 %v12173_v56  ;;  %v12357_v33 = vor.u32 %v14050_v5, %v12354_v37  ;;  %v12233_v54 = vor.u32 %v14021_v30, %v12232_v47  ;;  %v14017_v56 = vld [vmem:[#allocation23 + $0x254] sm:$0xf0]  ;;  %v14098_v5 = vld [vmem:[#allocation25 + $0xe4] sm:$0xf]  ;;  %v12546_v37 = vld [vmem:[#allocation25 + $0xf0] sm:$0xf0] }
 0x44b   :  { %7190 = vmatmul.bf16.vlgmr.msra.gmra.mxu3 %v15512_v28  ;;  %7229 = vmatmul.bf16.vlgmr.msrb.gmra.mxu2 %v15494_v44  ;;  %v12549_v26 = vor.u32 %v14098_v5, %v12546_v37 }
 0x44d   :  { %7264 = vmatpush.bf16.msra.mxu1 %v11981_v43  ;;  %7196 = vmatpush.bf16.msrb.mxu0 %v12405_v38  ;;  %v12216_v43 = vld [vmem:[#allocation23 + $0x248] sm:$0xf]  ;;  %v14042_v38 = vld [vmem:[#allocation23 + $0x324] sm:$0xf] }
 0x44e   :  { %7235 = vmatpush.bf16.msrb.mxu3 %v12281_v63  ;;  %7274 = vmatpush.bf16.msra.mxu2 %v12157_v52  ;;  %v12217_v55 = vor.u32 %v14017_v56, %v12216_v43  ;;  %v12322_v63 = vld [vmem:[#allocation23 + $0x330] sm:$0xf0]  ;;  %v6215_v42 = vpop.f32.mrf.mxu3  ;;  %v14013_v52 = vld [vmem:[#allocation23 + $0x234] sm:$0xf0]  ;;  %v15543_v18 = vpop.f32.mrf.mxu2  ;;  %v14094_v43 = vld [vmem:[#allocation25 + $0xc4] sm:$0xf] }
 0x44f   :  { %v15541_v13 = vadd.f32 %v6215_v42, %v15526_v40  ;;  %v12077_v40 = vor.u32 %v13979_v58, %v12074_v32  ;;  %v12530_v56 = vld [vmem:[#allocation25 + $0xd0] sm:$0xf0]  ;;  %v14076_v42 = vld [vmem:[#allocation25 + $0x2c] sm:$0xf0]  ;;  %v12376_v32 = vld [vmem:[#allocation23 + $0x388] sm:$0xf] }
 0x450   :  { %v12533_v48 = vor.u32 %v14094_v43, %v12530_v56  ;;  %v14011_v56 = vld [vmem:[#allocation23 + $0x22c] sm:$0xf] }
 0x451   :  { %7265 = vmatpush.bf16.msra.mxu1 %v11965_v59  ;;  %7197 = vmatpush.bf16.msrb.mxu0 %v12389_v25  ;;  %v12200_v59 = vld [vmem:[#allocation23 + $0x228] sm:$0xf]  ;;  %v5698_v25 = vpop.f32.mrf.mxu0 }
 0x452   :  { %7236 = vmatpush.bf16.msrb.mxu3 %v12265_v9  ;;  %7275 = vmatpush.bf16.msra.mxu2 %v12141_v12  ;;  %v14038_v9 = vld [vmem:[#allocation23 + $0x304] sm:$0xf]  ;;  %v12201_v35 = vor.u32 %v14013_v52, %v12200_v59  ;;  %v14009_v12 = vld [vmem:[#allocation23 + $0x214] sm:$0xf0]  ;;  %v12514_v59 = vld [vmem:[#allocation25 + $0xb0] sm:$0xf0] }
 0x453   :  { %v12309_v7 = vor.u32 %v14038_v9, %v12306_v3  ;;  %v12250_v9 = vld [vmem:[#allocation23 + $0x298] sm:$0xf0]  ;;  %v12432_v3 = vld [vmem:[#allocation25] sm:$0xf] }
 0x455   :  { %7266 = vmatpush.bf16.msra.mxu1 %v11949_v27  ;;  %7198 = vmatpush.bf16.msrb.mxu0 %v12373_v17  ;;  %v12184_v27 = vld [vmem:[#allocation23 + $0x208] sm:$0xf]  ;;  %v12298_v17 = vld [vmem:[#allocation23 + $0x2f8] sm:$0xf0] }
 0x456   :  { %7237 = vmatpush.bf16.msrb.mxu3 %v12249_v57  ;;  %7276 = vmatpush.bf16.msra.mxu2 %v12125_v23  ;;  %v14084_v57 = vld [vmem:[#allocation25 + $0x6c] sm:$0xf0]  ;;  %v12425_v23 = vor.u32 %v14069_v14, %v12424_v21  ;;  %v6217_v47 = vpop.f32.mrf.mxu3  ;;  %v12301_v45 = vor.u32 %v14035_v20, %v12298_v17  ;;  %v12377_v21 = vor.u32 %v14057_v61, %v12376_v32  ;;  %v14053_v14 = vld [vmem:[#allocation23 + $0x374] sm:$0xf0]  ;;  %v12234_v20 = vld [vmem:[#allocation23 + $0x278] sm:$0xf0] }
 0x457   :  { %v12481_v36 = vor.u32 %v14084_v57, %v12480_v31  ;;  %v14082_v17 = vld [vmem:[#allocation25 + $0x64] sm:$0xf]  ;;  %v12482_v31 = vld [vmem:[#allocation25 + $0x70] sm:$0xf0]  ;;  %v15554_v47 = vld [vmem:[%s15723_s14] sm:$0xf] }
 0x458   :  { %v12552_v32 = vld [vmem:[#allocation25 + $0xe8] sm:$0xf]  ;;  %v14101_v61 = vld [vmem:[#allocation25 + $0xf4] sm:$0xf0] }
 0x459   :  { %7267 = vmatpush.bf16.msra.mxu1 %v11933_v0  ;;  %7199 = vmatpush.bf16.msrb.mxu0 %v12357_v33  ;;  %v12185_v0 = vor.u32 %v14009_v12, %v12184_v27  ;;  %v15545_v30 = vpop.f32.mrf.mxu1  ;;  %v6256_v33 = vpop.f32.mrf.mxu2  ;;  %v14086_v27 = vld [vmem:[#allocation25 + $0x84] sm:$0xf]  ;;  %v12498_v12 = vld [vmem:[#allocation25 + $0x90] sm:$0xf0] }
 0x45a   :  { %7238 = vmatpush.bf16.msrb.mxu3 %v12233_v54  ;;  %7277 = vmatpush.bf16.msra.mxu2 %v12109_v50  ;;  %v14031_v54 = vld [vmem:[#allocation23 + $0x2cc] sm:$0xf]  ;;  %v14080_v50 = vld [vmem:[#allocation25 + $0x4c] sm:$0xf0]  ;;  %v14078_v33 = vld [vmem:[#allocation25 + $0x44] sm:$0xf] }
 0x45b   :  { %v12285_v19 = vor.u32 %v14031_v54, %v12282_v10  ;;  %v12465_v46 = vor.u32 %v14080_v50, %v12464_v34  ;;  %v12328_v54 = vld [vmem:[#allocation23 + $0x328] sm:$0xf]  ;;  %v14045_v10 = vld [vmem:[#allocation23 + $0x334] sm:$0xf0] }
 0x45c   :  { %7268 = vmatmul.bf16.vlgmr.msra.gmra.mxu1 %v15481_v53  ;;  %v12325_v53 = vor.u32 %v14042_v38, %v12322_v63  ;;  %v12266_v38 = vld [vmem:[#allocation23 + $0x2b8] sm:$0xf0]  ;;  %v12448_v63 = vld [vmem:[#allocation25 + $0x20] sm:$0xf] }
 0x45d   :  { %7509 = vmatpush.bf16.msrb.mxu1 %v12545_v16  ;;  %7200 = vmatpush.bf16.msrb.mxu0 %v12341_v41  ;;  %v12061_v16 = vor.u32 %v13975_v2, %v12058_v15  ;;  %v14061_v41 = vld [vmem:[#allocation23 + $0x3b4] sm:$0xf0]  ;;  %v12449_v25 = vor.u32 %v14076_v42, %v12448_v63  ;;  %v12501_v15 = vor.u32 %v14086_v27, %v12498_v12  ;;  %v14007_v42 = vld [vmem:[#allocation23 + $0x20c] sm:$0xf]  ;;  %v12410_v12 = vld [vmem:[#allocation23 + $0x3d8] sm:$0xf0] }
 0x45e   :  { %7239 = vmatpush.bf16.msrb.mxu3 %v12217_v55  ;;  %7278 = vmatpush.bf16.msra.mxu2 %v12093_v60  ;;  %v14027_v55 = vld [vmem:[#allocation23 + $0x2ac] sm:$0xf]  ;;  %v14090_v60 = vld [vmem:[#allocation25 + $0xa4] sm:$0xf]  ;;  %v12393_v52 = vor.u32 %v14061_v41, %v12392_v51  ;;  %v12450_v41 = vld [vmem:[#allocation25 + $0x30] sm:$0xf0] }
 0x45f   :  { %v12269_v58 = vor.u32 %v14027_v55, %v12266_v38  ;;  %v14074_v51 = vld [vmem:[#allocation25 + $0x24] sm:$0xf]  ;;  %v12329_v55 = vor.u32 %v14045_v10, %v12328_v54  ;;  %v12312_v38 = vld [vmem:[#allocation23 + $0x308] sm:$0xf]  ;;  %v14041_v63 = vld [vmem:[#allocation23 + $0x314] sm:$0xf0] }
 0x460   :  { %v14063_v27 = vld [vmem:[#allocation23 + $0x3cc] sm:$0xf] }
 0x461   :  { %7510 = vmatpush.bf16.msrb.mxu1 %v12529_v22  ;;  %7201 = vmatpush.bf16.msrb.mxu0 %v12325_v53  ;;  %v12409_v22 = vor.u32 %v14065_v11, %v12408_v1  ;;  %v12517_v53 = vor.u32 %v14090_v60, %v12514_v59  ;;  %v12218_v1 = vld [vmem:[#allocation23 + $0x258] sm:$0xf0]  ;;  %v12453_v59 = vor.u32 %v14074_v51, %v12450_v41  ;;  %v14047_v10 = vld [vmem:[#allocation23 + $0x34c] sm:$0xf] }
 0x462   :  { %7240 = vmatpush.bf16.msrb.mxu3 %v12201_v35  ;;  %7279 = vmatpush.bf16.msra.mxu2 %v12077_v40  ;;  %v14072_v35 = vld [vmem:[#allocation25 + $0xc] sm:$0xf0]  ;;  %v12360_v40 = vld [vmem:[#allocation23 + $0x368] sm:$0xf]  ;;  %v12186_v60 = vld [vmem:[#allocation23 + $0x218] sm:$0xf0] }
 0x463   :  { %v12433_v2 = vor.u32 %v14072_v35, %v12432_v3  ;;  %v12361_v57 = vor.u32 %v14053_v14, %v12360_v40  ;;  %v12553_v35 = vor.u32 %v14101_v61, %v12552_v32  ;;  %v14097_v40 = vld [vmem:[#allocation25 + $0xd4] sm:$0xf0]  ;;  %v12413_v14 = vor.u32 %v14063_v27, %v12410_v12  ;;  %v14043_v41 = vld [vmem:[#allocation23 + $0x32c] sm:$0xf]  ;;  %v12554_v61 = vld [vmem:[#allocation25 + $0xf8] sm:$0xf0] }
 0x464   :  { %v14099_v32 = vld [vmem:[#allocation25 + $0xec] sm:$0xf]  ;;  %v12672_v12 = vld [vmem:[#allocation26 + $0xe0] sm:$0xf] }
 0x465   :  { %7511 = vmatpush.bf16.msrb.mxu1 %v12513_v39  ;;  %7202 = vmatpush.bf16.msrb.mxu0 %v12309_v7  ;;  %v6295_v39 = vpop.f32.mrf.mxu1  ;;  %v6228_v7 = vpop.f32.mrf.mxu0 }
 0x466   :  { %7241 = vmatpush.bf16.msrb.mxu3 %v12185_v0  ;;  %7280 = vmatpush.bf16.msra.mxu2 %v12061_v16  ;;  %v6229_v5 = vadd.f32 %v6228_v7, %v15518_v8  ;;  %v12344_v0 = vld [vmem:[#allocation23 + $0x348] sm:$0xf]  ;;  %v12485_v16 = vor.u32 %v14082_v17, %v12482_v31  ;;  %v14070_v39 = vld [vmem:[#allocation25 + $0x4] sm:$0xf]  ;;  %v14093_v17 = vld [vmem:[#allocation25 + $0xb4] sm:$0xf0] }
 0x468   :  { %7203 = vmatmul.bf16.vlgmr.msrb.gmra.mxu0 %v15531_v49  ;;  %v6242_v11 = vadd.f32 %v15529_v29, %v6229_v5  ;;  %v14055_v5 = vld [vmem:[#allocation23 + $0x38c] sm:$0xf] }
 0x469   :  { %7512 = vmatpush.bf16.msrb.mxu1 %v12497_v24  ;;  %7247 = vmatpush.bf16.msra.mxu0 %v12425_v23  ;;  %v14019_v24 = vld [vmem:[#allocation23 + $0x26c] sm:$0xf]  ;;  %v14049_v23 = vld [vmem:[#allocation23 + $0x354] sm:$0xf0] }
 0x46a   :  { %7286 = vmatpush.bf16.msra.mxu3 %v12301_v45  ;;  %7522 = vmatpush.bf16.msrb.mxu2 %v12549_v26  ;;  %v12237_v37 = vor.u32 %v14019_v24, %v12234_v20  ;;  %v14015_v45 = vld [vmem:[#allocation23 + $0x24c] sm:$0xf]  ;;  %v12345_v8 = vor.u32 %v14049_v23, %v12344_v0  ;;  %v15559_v34 = vadd.f32 %v15543_v18, %v6242_v11  ;;  %v12394_v24 = vld [vmem:[#allocation23 + $0x3b8] sm:$0xf0]  ;;  %v12520_v20 = vld [vmem:[#allocation25 + $0xa8] sm:$0xf] }
 0x46b   :  { %7242 = vmatmul.bf16.vlgmr.msrb.gmra.mxu3 %v15512_v28  ;;  %7281 = vmatmul.bf16.vlgmr.msra.gmra.mxu2 %v15494_v44  ;;  %v12253_v44 = vor.u32 %v14023_v4, %v12250_v9  ;;  %v12221_v26 = vor.u32 %v14015_v45, %v12218_v1  ;;  %v12504_v0 = vld [vmem:[#allocation25 + $0x88] sm:$0xf]  ;;  %v14089_v23 = vld [vmem:[#allocation25 + $0x94] sm:$0xf0]  ;;  %v14051_v1 = vld [vmem:[#allocation23 + $0x36c] sm:$0xf] }
 0x46c   :  { %v12505_v45 = vor.u32 %v14089_v23, %v12504_v0  ;;  %v12362_v11 = vld [vmem:[#allocation23 + $0x378] sm:$0xf0]  ;;  %v14083_v0 = vld [vmem:[#allocation25 + $0x6c] sm:$0xf] }
 0x46d   :  { %7513 = vmatpush.bf16.msrb.mxu1 %v12481_v36  ;;  %7248 = vmatpush.bf16.msra.mxu0 %v12409_v22  ;;  %v12466_v36 = vld [vmem:[#allocation25 + $0x50] sm:$0xf0]  ;;  %v12202_v22 = vld [vmem:[#allocation23 + $0x238] sm:$0xf0] }
 0x46e   :  { %7287 = vmatpush.bf16.msra.mxu3 %v12285_v19  ;;  %7523 = vmatpush.bf16.msrb.mxu2 %v12533_v48  ;;  %v6267_v50 = vpop.f32.mrf.mxu3  ;;  %v12469_v43 = vor.u32 %v14078_v33, %v12466_v36  ;;  %v6306_v19 = vpop.f32.mrf.mxu2  ;;  %v12205_v18 = vor.u32 %v14011_v56, %v12202_v22  ;;  %v12488_v33 = vld [vmem:[#allocation25 + $0x68] sm:$0xf]  ;;  %v14085_v36 = vld [vmem:[#allocation25 + $0x74] sm:$0xf0]  ;;  %v12490_v23 = vld [vmem:[#allocation25 + $0x78] sm:$0xf0] }
 0x46f   :  { %v15562_v29 = vadd.f32 %v6267_v50, %v15505_v6  ;;  %v6230_v48 = vpop.f32.mrf.mxu0  ;;  %v12426_v6 = vld [vmem:[#allocation23 + $0x3f8] sm:$0xf0]  ;;  %v12489_v54 = vor.u32 %v14085_v36, %v12488_v33  ;;  %v14081_v56 = vld [vmem:[#allocation25 + $0x54] sm:$0xf0]  ;;  %v14079_v36 = vld [vmem:[#allocation25 + $0x4c] sm:$0xf] }
 0x470   :  { %v12346_v50 = vld [vmem:[#allocation23 + $0x358] sm:$0xf0] }
 0x471   :  { %7514 = vmatpush.bf16.msrb.mxu1 %v12465_v46  ;;  %7249 = vmatpush.bf16.msra.mxu0 %v12393_v52  ;;  %v15565_v46 = vadd.f32 %v6306_v19, %v15537_v62  ;;  %v14067_v52 = vld [vmem:[#allocation23 + $0x3ec] sm:$0xf]  ;;  %v12313_v62 = vor.u32 %v14041_v63, %v12312_v38  ;;  %v12349_v19 = vor.u32 %v14047_v10, %v12346_v50  ;;  %v12330_v48 = vld [vmem:[#allocation23 + $0x338] sm:$0xf0]  ;;  %v12456_v38 = vld [vmem:[#allocation25 + $0x28] sm:$0xf] }
 0x472   :  { %7288 = vmatpush.bf16.msra.mxu3 %v12269_v58  ;;  %7524 = vmatpush.bf16.msrb.mxu2 %v12517_v53  ;;  %v12434_v58 = vld [vmem:[#allocation25 + $0x10] sm:$0xf0]  ;;  %v12429_v53 = vor.u32 %v14067_v52, %v12426_v6  ;;  %v14039_v52 = vld [vmem:[#allocation23 + $0x30c] sm:$0xf]  ;;  %v12314_v6 = vld [vmem:[#allocation23 + $0x318] sm:$0xf0] }
 0x473   :  { %v12437_v3 = vor.u32 %v14070_v39, %v12434_v58  ;;  %v12440_v39 = vld [vmem:[#allocation25 + $0x8] sm:$0xf]  ;;  %v14073_v58 = vld [vmem:[#allocation25 + $0x14] sm:$0xf0]  ;;  %v14116_v10 = vld [vmem:[#allocation26 + $0x6c] sm:$0xf0] }
 0x474   :  { %v14075_v50 = vld [vmem:[#allocation25 + $0x2c] sm:$0xf] }
 0x475   :  { %7515 = vmatpush.bf16.msrb.mxu1 %v12449_v25  ;;  %7250 = vmatpush.bf16.msra.mxu0 %v12377_v21  ;;  %v12189_v25 = vor.u32 %v14007_v42, %v12186_v60 }
 0x476   :  { %7289 = vmatpush.bf16.msra.mxu3 %v12253_v44  ;;  %7525 = vmatpush.bf16.msrb.mxu2 %v12501_v15  ;;  %v6269_v4 = vpop.f32.mrf.mxu3  ;;  %v6308_v21 = vpop.f32.mrf.mxu2  ;;  %v12536_v44 = vld [vmem:[#allocation25 + $0xc8] sm:$0xf]  ;;  %v14059_v15 = vld [vmem:[#allocation23 + $0x3ac] sm:$0xf] }
 0x477   :  { %v12397_v31 = vor.u32 %v14059_v15, %v12394_v24  ;;  %v14132_v21 = vld [vmem:[#allocation26 + $0xec] sm:$0xf0] }
 0x478   :  { %v14128_v15 = vld [vmem:[#allocation26 + $0xcc] sm:$0xf0] }
 0x479   :  { %7516 = vmatpush.bf16.msrb.mxu1 %v12433_v2  ;;  %7251 = vmatpush.bf16.msra.mxu0 %v12361_v57  ;;  %v7113_v9 = vpop.f32.mrf.mxu1  ;;  %v12537_v2 = vor.u32 %v14097_v40, %v12536_v44  ;;  %v12521_v57 = vor.u32 %v14093_v17, %v12520_v20  ;;  %v14091_v44 = vld [vmem:[#allocation25 + $0xac] sm:$0xf]  ;;  %v12522_v40 = vld [vmem:[#allocation25 + $0xb8] sm:$0xf0] }
 0x47a   :  { %7290 = vmatpush.bf16.msra.mxu3 %v12237_v37  ;;  %7526 = vmatpush.bf16.msrb.mxu2 %v12485_v16  ;;  %v12378_v37 = vld [vmem:[#allocation23 + $0x398] sm:$0xf0]  ;;  %v12525_v20 = vor.u32 %v14091_v44, %v12522_v40  ;;  %v12768_v44 = vld [vmem:[#allocation26 + $0x1a0] sm:$0xf]  ;;  %v14156_v40 = vld [vmem:[#allocation26 + $0x1ac] sm:$0xf0] }
 0x47b   :  { %v12381_v16 = vor.u32 %v14055_v5, %v12378_v37  ;;  %v12640_v5 = vld [vmem:[#allocation26 + $0xa0] sm:$0xf]  ;;  %v14124_v37 = vld [vmem:[#allocation26 + $0xac] sm:$0xf0] }
 0x47c   :  { %7517 = vmatmul.bf16.vlgmr.msrb.gmra.mxu1 %v15554_v47 }
 0x47d   :  { %7252 = vmatpush.bf16.msra.mxu0 %v12345_v8  ;;  %v12365_v8 = vor.u32 %v14051_v1, %v12362_v11  ;;  %v12624_v1 = vld [vmem:[#allocation26 + $0x80] sm:$0xf]  ;;  %v14120_v11 = vld [vmem:[#allocation26 + $0x8c] sm:$0xf0] }
 0x47e   :  { %7291 = vmatpush.bf16.msra.mxu3 %v12221_v26  ;;  %7527 = vmatpush.bf16.msrb.mxu2 %v12469_v43  ;;  %v12472_v43 = vld [vmem:[#allocation25 + $0x48] sm:$0xf] }
 0x47f   :  { %v12473_v51 = vor.u32 %v14081_v56, %v12472_v43  ;;  %v12458_v43 = vld [vmem:[#allocation25 + $0x38] sm:$0xf0] }
 0x481   :  { %7253 = vmatpush.bf16.msra.mxu0 %v12329_v55  ;;  %v7115_v7 = vpop.f32.mrf.mxu1 }
 0x482   :  { %7292 = vmatpush.bf16.msra.mxu3 %v12205_v18  ;;  %7528 = vmatpush.bf16.msrb.mxu2 %v12453_v59  ;;  %v14077_v18 = vld [vmem:[#allocation25 + $0x34] sm:$0xf0]  ;;  %v12333_v59 = vor.u32 %v14043_v41, %v12330_v48  ;;  %v12506_v7 = vld [vmem:[#allocation25 + $0x98] sm:$0xf0] }
 0x485   :  { %7254 = vmatpush.bf16.msra.mxu0 %v12313_v62  ;;  %v12317_v62 = vor.u32 %v14039_v52, %v12314_v6 }
 0x486   :  { %7293 = vmatpush.bf16.msra.mxu3 %v12189_v25  ;;  %7529 = vmatpush.bf16.msrb.mxu2 %v12437_v3  ;;  %v12441_v25 = vor.u32 %v14073_v58, %v12440_v39  ;;  %v12538_v3 = vld [vmem:[#allocation25 + $0xd8] sm:$0xf0]  ;;  %v12576_v39 = vld [vmem:[#allocation26 + $0x20] sm:$0xf]  ;;  %v14108_v58 = vld [vmem:[#allocation26 + $0x2c] sm:$0xf0] }
 0x488   :  { %7255 = vmatmul.bf16.vlgmr.msra.gmra.mxu0 %v15531_v49 }
 0x489   :  { %7299 = vmatpush.bf16.msrb.mxu0 %v12429_v53  ;;  %7294 = vmatmul.bf16.vlgmr.msra.gmra.mxu3 %v15512_v28  ;;  %v6280_v28 = vpop.f32.mrf.mxu0  ;;  %v12557_v53 = vor.u32 %v14099_v32, %v12554_v61  ;;  %v12784_v32 = vld [vmem:[#allocation26 + $0x1c0] sm:$0xf]  ;;  %v12577_v61 = vor.u32 %v14108_v58, %v12576_v39  ;;  %v12802_v39 = vld [vmem:[#allocation26 + $0x1f0] sm:$0xf0] }
 0x48a   :  { %7535 = vmatpush.bf16.msrb.mxu3 %v12553_v35  ;;  %7530 = vmatmul.bf16.vlgmr.msrb.gmra.mxu2 %v15554_v47  ;;  %v6281_v26 = vadd.f32 %v6280_v28, %v15562_v29  ;;  %v12474_v28 = vld [vmem:[#allocation25 + $0x58] sm:$0xf0] }
 0x48c   :  { %v15572_v22 = vadd.f32 %v15545_v30, %v6281_v26  ;;  %v12457_v30 = vor.u32 %v14077_v18, %v12456_v38  ;;  %v12477_v26 = vor.u32 %v14079_v36, %v12474_v28  ;;  %v12592_v38 = vld [vmem:[#allocation26 + $0x40] sm:$0xf]  ;;  %v14112_v18 = vld [vmem:[#allocation26 + $0x4c] sm:$0xf0] }
 0x48d   :  { %7300 = vmatpush.bf16.msrb.mxu0 %v12413_v14  ;;  %v12673_v14 = vor.u32 %v14132_v21, %v12672_v12  ;;  %v12674_v12 = vld [vmem:[#allocation26 + $0xf0] sm:$0xf0]  ;;  %v12720_v28 = vld [vmem:[#allocation26 + $0x140] sm:$0xf] }
 0x48e   :  { %7536 = vmatpush.bf16.msrb.mxu3 %v12537_v2  ;;  %v6319_v55 = vpop.f32.mrf.mxu3  ;;  %v7126_v63 = vpop.f32.mrf.mxu2  ;;  %v12656_v2 = vld [vmem:[#allocation26 + $0xc0] sm:$0xf] }
 0x48f   :  { %v6320_v29 = vadd.f32 %v6319_v55, %v15565_v46  ;;  %v15575_v42 = vadd.f32 %v7126_v63, %v7113_v9  ;;  %v14095_v9 = vld [vmem:[#allocation25 + $0xcc] sm:$0xf]  ;;  %8365 = vmatpush.bf16.msra.mxu1 %v12673_v14  ;;  %v12657_v24 = vor.u32 %v14128_v15, %v12656_v2  ;;  %v12461_v55 = vor.u32 %v14075_v50, %v12458_v43  ;;  %v12442_v63 = vld [vmem:[#allocation25 + $0x18] sm:$0xf0]  ;;  %v14126_v2 = vld [vmem:[#allocation26 + $0xc4] sm:$0xf] }
 0x490   :  { %v12541_v27 = vor.u32 %v14095_v9, %v12538_v3  ;;  %v12560_v9 = vld [vmem:[#allocation26] sm:$0xf]  ;;  %v14104_v3 = vld [vmem:[#allocation26 + $0xc] sm:$0xf0]  ;;  %v12769_v14 = vor.u32 %v14156_v40, %v12768_v44  ;;  %v12658_v15 = vld [vmem:[#allocation26 + $0xd0] sm:$0xf0] }
 0x491   :  { %7301 = vmatpush.bf16.msrb.mxu0 %v12397_v31  ;;  %v6282_v60 = vpop.f32.mrf.mxu0  ;;  %v14087_v31 = vld [vmem:[#allocation25 + $0x8c] sm:$0xf]  ;;  %v12610_v50 = vld [vmem:[#allocation26 + $0x70] sm:$0xf0]  ;;  %v14102_v44 = vld [vmem:[#allocation26 + $0x4] sm:$0xf] }
 0x492   :  { %7537 = vmatpush.bf16.msrb.mxu3 %v12521_v57  ;;  %v12509_v57 = vor.u32 %v14087_v31, %v12506_v7  ;;  %v12593_v60 = vor.u32 %v14112_v18, %v12592_v38  ;;  %v14110_v18 = vld [vmem:[#allocation26 + $0x44] sm:$0xf]  ;;  %v12562_v40 = vld [vmem:[#allocation26 + $0x10] sm:$0xf0] }
 0x493   :  { %8366 = vmatpush.bf16.msra.mxu1 %v12657_v24  ;;  %v12752_v24 = vld [vmem:[#allocation26 + $0x180] sm:$0xf] }
 0x495   :  { %7302 = vmatpush.bf16.msrb.mxu0 %v12381_v16  ;;  %v12641_v16 = vor.u32 %v14124_v37, %v12640_v5  ;;  %v12642_v5 = vld [vmem:[#allocation26 + $0xb0] sm:$0xf0] }
 0x496   :  { %7538 = vmatpush.bf16.msrb.mxu3 %v12505_v45  ;;  %v6321_v46 = vpop.f32.mrf.mxu3  ;;  %v7128_v35 = vpop.f32.mrf.mxu2  ;;  %v12493_v45 = vor.u32 %v14083_v0, %v12490_v23  ;;  %v12736_v0 = vld [vmem:[#allocation26 + $0x160] sm:$0xf]  ;;  %v14148_v23 = vld [vmem:[#allocation26 + $0x16c] sm:$0xf0] }
 0x497   :  { %8367 = vmatpush.bf16.msra.mxu1 %v12641_v16  ;;  %v12561_v35 = vor.u32 %v14104_v3, %v12560_v9  ;;  %v12737_v16 = vor.u32 %v14148_v23, %v12736_v0  ;;  %v14150_v0 = vld [vmem:[#allocation26 + $0x184] sm:$0xf]  ;;  %v12754_v23 = vld [vmem:[#allocation26 + $0x190] sm:$0xf0] }
 0x499   :  { %7303 = vmatpush.bf16.msrb.mxu0 %v12365_v8  ;;  %v7165_v4 = vpop.f32.mrf.mxu1  ;;  %v12625_v8 = vor.u32 %v14120_v11, %v12624_v1  ;;  %v12626_v1 = vld [vmem:[#allocation26 + $0x90] sm:$0xf0] }
 0x49a   :  { %7539 = vmatpush.bf16.msrb.mxu3 %v12489_v54  ;;  %v12608_v54 = vld [vmem:[#allocation26 + $0x60] sm:$0xf] }
 0x49b   :  { %8368 = vmatpush.bf16.msra.mxu1 %v12625_v8  ;;  %v12609_v56 = vor.u32 %v14116_v10, %v12608_v54  ;;  %v14144_v8 = vld [vmem:[#allocation26 + $0x14c] sm:$0xf0]  ;;  %v14114_v10 = vld [vmem:[#allocation26 + $0x64] sm:$0xf] }
 0x49c   :  { %v12613_v43 = vor.u32 %v14114_v10, %v12610_v50  ;;  %v12848_v10 = vld [vmem:[#allocation26 + $0x240] sm:$0xf]  ;;  %v14176_v50 = vld [vmem:[#allocation26 + $0x24c] sm:$0xf0] }
 0x49d   :  { %7304 = vmatpush.bf16.msrb.mxu0 %v12349_v19 }
 0x49e   :  { %7540 = vmatpush.bf16.msrb.mxu3 %v12473_v51 }
 0x49f   :  { %8369 = vmatpush.bf16.msra.mxu1 %v12609_v56  ;;  %v12704_v56 = vld [vmem:[#allocation26 + $0x120] sm:$0xf] }
 0x4a1   :  { %7305 = vmatpush.bf16.msrb.mxu0 %v12333_v59  ;;  %v7167_v17 = vpop.f32.mrf.mxu1  ;;  %v12800_v59 = vld [vmem:[#allocation26 + $0x1e0] sm:$0xf] }
 0x4a2   :  { %7541 = vmatpush.bf16.msrb.mxu3 %v12457_v30  ;;  %v14164_v30 = vld [vmem:[#allocation26 + $0x1ec] sm:$0xf0] }
 0x4a3   :  { %8370 = vmatpush.bf16.msra.mxu1 %v12593_v60  ;;  %v12801_v52 = vor.u32 %v14164_v30, %v12800_v59  ;;  %v14152_v17 = vld [vmem:[#allocation26 + $0x18c] sm:$0xf0]  ;;  %v12928_v59 = vld [vmem:[#allocation26 + $0x2e0] sm:$0xf] }
 0x4a4   :  { %v12753_v31 = vor.u32 %v14152_v17, %v12752_v24  ;;  %v14136_v60 = vld [vmem:[#allocation26 + $0x10c] sm:$0xf0]  ;;  %v12770_v17 = vld [vmem:[#allocation26 + $0x1b0] sm:$0xf0] }
 0x4a5   :  { %7306 = vmatpush.bf16.msrb.mxu0 %v12317_v62  ;;  %8378 = vmatpush.bf16.msra.mxu2 %v12801_v52  ;;  %v14160_v62 = vld [vmem:[#allocation26 + $0x1cc] sm:$0xf0] }
 0x4a6   :  { %7542 = vmatpush.bf16.msrb.mxu3 %v12441_v25  ;;  %v12785_v46 = vor.u32 %v14160_v62, %v12784_v32  ;;  %v14196_v52 = vld [vmem:[#allocation26 + $0x2ec] sm:$0xf0]  ;;  %v12578_v62 = vld [vmem:[#allocation26 + $0x30] sm:$0xf0] }
 0x4a7   :  { %8371 = vmatpush.bf16.msra.mxu1 %v12577_v61  ;;  %v12929_v58 = vor.u32 %v14196_v52, %v12928_v59  ;;  %v14106_v61 = vld [vmem:[#allocation26 + $0x24] sm:$0xf] }
 0x4a8   :  { %7307 = vmatmul.bf16.vlgmr.msrb.gmra.mxu0 %v15531_v49  ;;  %v6332_v49 = vpop.f32.mrf.mxu0 }
 0x4a9   :  { %7548 = vmatpush.bf16.msra.mxu0 %v12557_v53  ;;  %7543 = vmatmul.bf16.vlgmr.msrb.gmra.mxu3 %v15554_v47  ;;  %v15579_v33 = vadd.f32 %v6332_v49, %v6320_v29  ;;  %v14071_v29 = vld [vmem:[#allocation25 + $0xc] sm:$0xf] }
 0x4aa   :  { %v12445_v6 = vor.u32 %v14071_v29, %v12442_v63  ;;  %8379 = vmatpush.bf16.msra.mxu2 %v12785_v46  ;;  %v12594_v29 = vld [vmem:[#allocation26 + $0x50] sm:$0xf0]  ;;  %8391 = vmatpush.bf16.msra.mxu3 %v12929_v58  ;;  %v14192_v46 = vld [vmem:[#allocation26 + $0x2cc] sm:$0xf0] }
 0x4ab   :  { %8372 = vmatpush.bf16.msra.mxu1 %v12561_v35  ;;  %v12597_v63 = vor.u32 %v14110_v18, %v12594_v29  ;;  %v14158_v35 = vld [vmem:[#allocation26 + $0x1c4] sm:$0xf]  ;;  %v14228_v18 = vld [vmem:[#allocation26 + $0x3ec] sm:$0xf0] }
 0x4ac   :  { %v14224_v58 = vld [vmem:[#allocation26 + $0x3cc] sm:$0xf0] }
 0x4ad   :  { %7549 = vmatpush.bf16.msra.mxu0 %v12541_v27  ;;  %v14130_v27 = vld [vmem:[#allocation26 + $0xe4] sm:$0xf] }
 0x4ae   :  { %v7139_v19 = vpop.f32.mrf.mxu3  ;;  %v7178_v51 = vpop.f32.mrf.mxu2  ;;  %v12677_v21 = vor.u32 %v14130_v27, %v12674_v12  ;;  %8380 = vmatpush.bf16.msra.mxu2 %v12769_v14  ;;  %v12786_v27 = vld [vmem:[#allocation26 + $0x1d0] sm:$0xf0]  ;;  %v12565_v14 = vor.u32 %v14102_v44, %v12562_v40 }
 0x4af   :  { %v15581_v41 = vadd.f32 %v7178_v51, %v7165_v4 }
 0x4b0   :  { %v6334_v48 = vpop.f32.mrf.mxu0  ;;  %8417 = vmatpush.bf16.msrb.mxu1 %v12677_v21  ;;  %v12789_v21 = vor.u32 %v14158_v35, %v12786_v27  ;;  %v12930_v35 = vld [vmem:[#allocation26 + $0x2f0] sm:$0xf0] }
 0x4b1   :  { %7550 = vmatpush.bf16.msra.mxu0 %v12525_v20  ;;  %v12661_v20 = vor.u32 %v14126_v2, %v12658_v15  ;;  %v12896_v2 = vld [vmem:[#allocation26 + $0x2a0] sm:$0xf]  ;;  %v14188_v15 = vld [vmem:[#allocation26 + $0x2ac] sm:$0xf0] }
 0x4b2   :  { %8381 = vmatpush.bf16.msra.mxu2 %v12753_v31  ;;  %v12897_v24 = vor.u32 %v14188_v15, %v12896_v2  ;;  %v14190_v15 = vld [vmem:[#allocation26 + $0x2c4] sm:$0xf] }
 0x4b4   :  { %8418 = vmatpush.bf16.msrb.mxu1 %v12661_v20  ;;  %v14154_v20 = vld [vmem:[#allocation26 + $0x1a4] sm:$0xf] }
 0x4b5   :  { %7551 = vmatpush.bf16.msra.mxu0 %v12509_v57  ;;  %v14122_v57 = vld [vmem:[#allocation26 + $0xa4] sm:$0xf]  ;;  %v12773_v31 = vor.u32 %v14154_v20, %v12770_v17 }
 0x4b6   :  { %v7141_v25 = vpop.f32.mrf.mxu3  ;;  %v7180_v4 = vpop.f32.mrf.mxu2  ;;  %v12645_v37 = vor.u32 %v14122_v57, %v12642_v5  ;;  %8382 = vmatpush.bf16.msra.mxu2 %v12737_v16  ;;  %v14184_v57 = vld [vmem:[#allocation26 + $0x28c] sm:$0xf0]  ;;  %v12757_v16 = vor.u32 %v14150_v0, %v12754_v23  ;;  %v14133_v0 = vld [vmem:[#allocation26 + $0xf4] sm:$0xf0] }
 0x4b7   :  { %v12581_v25 = vor.u32 %v14106_v61, %v12578_v62  ;;  %v12816_v61 = vld [vmem:[#allocation26 + $0x200] sm:$0xf]  ;;  %v14168_v62 = vld [vmem:[#allocation26 + $0x20c] sm:$0xf0] }
 0x4b8   :  { %8419 = vmatpush.bf16.msrb.mxu1 %v12645_v37 }
 0x4b9   :  { %7552 = vmatpush.bf16.msra.mxu0 %v12493_v45  ;;  %v7217_v53 = vpop.f32.mrf.mxu1  ;;  %v14118_v45 = vld [vmem:[#allocation26 + $0x84] sm:$0xf] }
 0x4ba   :  { %v12629_v36 = vor.u32 %v14118_v45, %v12626_v1  ;;  %v14146_v1 = vld [vmem:[#allocation26 + $0x164] sm:$0xf] }
 0x4bc   :  { %8420 = vmatpush.bf16.msrb.mxu1 %v12629_v36 }
 0x4bd   :  { %7553 = vmatpush.bf16.msra.mxu0 %v12477_v26  ;;  %v12721_v26 = vor.u32 %v14144_v8, %v12720_v28 }
 0x4bf   :  { %8383 = vmatpush.bf16.msra.mxu2 %v12721_v26 }
 0x4c0   :  { %8421 = vmatpush.bf16.msrb.mxu1 %v12613_v43  ;;  %v12849_v43 = vor.u32 %v14176_v50, %v12848_v10  ;;  %v14182_v10 = vld [vmem:[#allocation26 + $0x284] sm:$0xf]  ;;  %v12882_v50 = vld [vmem:[#allocation26 + $0x290] sm:$0xf0] }
 0x4c1   :  { %7554 = vmatpush.bf16.msra.mxu0 %v12461_v55  ;;  %v7219_v7 = vpop.f32.mrf.mxu1 }
 0x4c2   :  { %v12880_v7 = vld [vmem:[#allocation26 + $0x280] sm:$0xf] }
 0x4c3   :  { %v12881_v37 = vor.u32 %v14184_v57, %v12880_v7  ;;  %v13008_v7 = vld [vmem:[#allocation26 + $0x380] sm:$0xf]  ;;  %v14216_v57 = vld [vmem:[#allocation26 + $0x38c] sm:$0xf0] }
 0x4c4   :  { %8422 = vmatpush.bf16.msrb.mxu1 %v12597_v63  ;;  %v13009_v23 = vor.u32 %v14216_v57, %v13008_v7  ;;  %v12600_v7 = vld [vmem:[#allocation26 + $0x48] sm:$0xf] }
 0x4c5   :  { %7555 = vmatpush.bf16.msra.mxu0 %v12445_v6  ;;  %v7152_v49 = vpop.f32.mrf.mxu0  ;;  %v14162_v6 = vld [vmem:[#allocation26 + $0x1e4] sm:$0xf] }
 0x4c6   :  { %v12805_v32 = vor.u32 %v14162_v6, %v12802_v39  ;;  %v13040_v39 = vld [vmem:[#allocation26 + $0x3c0] sm:$0xf] }
 0x4c8   :  { %7556 = vmatmul.bf16.vlgmr.msra.gmra.mxu0 %v15554_v47  ;;  %v7140_v47 = vadd.f32 %v7139_v19, %v15575_v42  ;;  %v14140_v42 = vld [vmem:[#allocation26 + $0x12c] sm:$0xf0]  ;;  %8423 = vmatpush.bf16.msrb.mxu1 %v12581_v25  ;;  %v15604_v25 = vld [vmem:[%s15694_s20] sm:$0xf] }
 0x4c9   :  { %v12705_v51 = vor.u32 %v14140_v42, %v12704_v56  ;;  %v14142_v56 = vld [vmem:[#allocation26 + $0x144] sm:$0xf]  ;;  %v12722_v42 = vld [vmem:[#allocation26 + $0x150] sm:$0xf0]  ;;  %v7567_v44 = vperm.slane %v15604_v25, 0 }
 0x4ca   :  { %v7153_v11 = vadd.f32 %v7152_v49, %v7140_v47  ;;  %v12864_v47 = vld [vmem:[#allocation26 + $0x260] sm:$0xf]  ;;  %v14180_v49 = vld [vmem:[#allocation26 + $0x26c] sm:$0xf0] }
 0x4cb   :  { %8384 = vmatpush.bf16.msra.mxu2 %v12705_v51  ;;  %v12865_v45 = vor.u32 %v14180_v49, %v12864_v47  ;;  %v12898_v47 = vld [vmem:[#allocation26 + $0x2b0] sm:$0xf0] }
 0x4cc   :  { %v15586_v54 = vadd.f32 %v7153_v11, %v15541_v13  ;;  %v12688_v13 = vld [vmem:[#allocation26 + $0x100] sm:$0xf]  ;;  %8424 = vmatpush.bf16.msrb.mxu1 %v12565_v14  ;;  %v12738_v11 = vld [vmem:[#allocation26 + $0x170] sm:$0xf0] }
 0x4cd   :  { %v7154_v38 = vpop.f32.mrf.mxu0  ;;  %v12689_v30 = vor.u32 %v14136_v60, %v12688_v13  ;;  %v12741_v28 = vor.u32 %v14146_v1, %v12738_v11  ;;  %v14138_v60 = vld [vmem:[#allocation26 + $0x124] sm:$0xf]  ;;  %v12992_v11 = vld [vmem:[#allocation26 + $0x360] sm:$0xf] }
 0x4ce   :  { %v15588_v19 = vpop.f32.mrf.mxu3  ;;  %v7230_v48 = vpop.f32.mrf.mxu2  ;;  %v13056_v38 = vld [vmem:[#allocation26 + $0x3e0] sm:$0xf] }
 0x4cf   :  { %v15590_v55 = vadd.f32 %v7230_v48, %v7217_v53  ;;  %8385 = vmatpush.bf16.msra.mxu2 %v12689_v30  ;;  %v12912_v53 = vld [vmem:[#allocation26 + $0x2c0] sm:$0xf]  ;;  %v7192_v36 = vadd.f32 %v15588_v19, %v15581_v41  ;;  %v12725_v48 = vor.u32 %v14142_v56, %v12722_v42  ;;  %v13057_v29 = vor.u32 %v14228_v18, %v13056_v38  ;;  %v14172_v19 = vld [vmem:[#allocation26 + $0x22c] sm:$0xf0]  ;;  %v12706_v30 = vld [vmem:[#allocation26 + $0x130] sm:$0xf0] }
 0x4d0   :  { %v12913_v3 = vor.u32 %v14192_v46, %v12912_v53  ;;  %v12832_v41 = vld [vmem:[#allocation26 + $0x220] sm:$0xf]  ;;  %v12817_v53 = vor.u32 %v14168_v62, %v12816_v61  ;;  %v14134_v46 = vld [vmem:[#allocation26 + $0x104] sm:$0xf]  ;;  %v12885_v56 = vor.u32 %v14182_v10, %v12882_v50  ;;  %v14208_v38 = vld [vmem:[#allocation26 + $0x34c] sm:$0xf0] }
 0x4d1   :  { %v12833_v13 = vor.u32 %v14172_v19, %v12832_v41  ;;  %8404 = vmatpush.bf16.msrb.mxu0 %v13057_v29  ;;  %v12648_v18 = vld [vmem:[#allocation26 + $0xa8] sm:$0xf]  ;;  %v14125_v29 = vld [vmem:[#allocation26 + $0xb4] sm:$0xf0]  ;;  %v14178_v19 = vld [vmem:[#allocation26 + $0x264] sm:$0xf] }
 0x4d2   :  { %8392 = vmatpush.bf16.msra.mxu3 %v12913_v3  ;;  %v14194_v3 = vld [vmem:[#allocation26 + $0x2e4] sm:$0xf]  ;;  %v14121_v61 = vld [vmem:[#allocation26 + $0x94] sm:$0xf0]  ;;  %v13026_v50 = vld [vmem:[#allocation26 + $0x3b0] sm:$0xf0] }
 0x4d3   :  { %8430 = vmatpush.bf16.msrb.mxu2 %v12805_v32  ;;  %v13041_v32 = vor.u32 %v14224_v58, %v13040_v39  ;;  %v12933_v27 = vor.u32 %v14194_v3, %v12930_v35  ;;  %v14204_v39 = vld [vmem:[#allocation26 + $0x32c] sm:$0xf0]  ;;  %v12944_v3 = vld [vmem:[#allocation26 + $0x300] sm:$0xf] }
 0x4d4   :  { %v14200_v35 = vld [vmem:[#allocation26 + $0x30c] sm:$0xf0] }
 0x4d5   :  { %8405 = vmatpush.bf16.msrb.mxu0 %v13041_v32  ;;  %v12632_v32 = vld [vmem:[#allocation26 + $0x88] sm:$0xf] }
 0x4d6   :  { %v7193_v4 = vpop.f32.mrf.mxu3  ;;  %v7232_v12 = vpop.f32.mrf.mxu2  ;;  %8393 = vmatpush.bf16.msra.mxu3 %v12897_v24  ;;  %v12914_v24 = vld [vmem:[#allocation26 + $0x2d0] sm:$0xf0] }
 0x4d7   :  { %8431 = vmatpush.bf16.msrb.mxu2 %v12789_v21  ;;  %v12690_v4 = vld [vmem:[#allocation26 + $0x110] sm:$0xf0]  ;;  %v13024_v12 = vld [vmem:[#allocation26 + $0x3a0] sm:$0xf]  ;;  %v14220_v21 = vld [vmem:[#allocation26 + $0x3ac] sm:$0xf0] }
 0x4d8   :  { %v13025_v40 = vor.u32 %v14220_v21, %v13024_v12  ;;  %v12945_v12 = vor.u32 %v14200_v35, %v12944_v3  ;;  %v14226_v21 = vld [vmem:[#allocation26 + $0x3e4] sm:$0xf]  ;;  %v12760_v3 = vld [vmem:[#allocation26 + $0x188] sm:$0xf]  ;;  %v14153_v35 = vld [vmem:[#allocation26 + $0x194] sm:$0xf0] }
 0x4d9   :  { %v7269_v9 = vpop.f32.mrf.mxu1 }
 0x4da   :  { %8394 = vmatpush.bf16.msra.mxu3 %v12881_v37  ;;  %8406 = vmatpush.bf16.msrb.mxu0 %v13025_v40  ;;  %v12680_v37 = vld [vmem:[#allocation26 + $0xe8] sm:$0xf] }
 0x4db   :  { %8432 = vmatpush.bf16.msrb.mxu2 %v12773_v31  ;;  %v12917_v31 = vor.u32 %v14190_v15, %v12914_v24  ;;  %v12681_v1 = vor.u32 %v14133_v0, %v12680_v37  ;;  %v7568_v24 = vperm.slane %v15604_v25, 1  ;;  %v14222_v37 = vld [vmem:[#allocation26 + $0x3c4] sm:$0xf]  ;;  %v13042_v0 = vld [vmem:[#allocation26 + $0x3d0] sm:$0xf0] }
 0x4de   :  { %8395 = vmatpush.bf16.msra.mxu3 %v12865_v45  ;;  %8407 = vmatpush.bf16.msrb.mxu0 %v13009_v23  ;;  %v13045_v23 = vor.u32 %v14222_v37, %v13042_v0  ;;  %v14119_v0 = vld [vmem:[#allocation26 + $0x8c] sm:$0xf] }
 0x4df   :  { %8433 = vmatpush.bf16.msrb.mxu2 %v12757_v16  ;;  %v14186_v16 = vld [vmem:[#allocation26 + $0x2a4] sm:$0xf] }
 0x4e0   :  { %v12901_v45 = vor.u32 %v14186_v16, %v12898_v47  ;;  %v14166_v16 = vld [vmem:[#allocation26 + $0x204] sm:$0xf]  ;;  %v12818_v47 = vld [vmem:[#allocation26 + $0x210] sm:$0xf0] }
 0x4e1   :  { %v7271_v5 = vpop.f32.mrf.mxu1 }
 0x4e2   :  { %8396 = vmatpush.bf16.msra.mxu3 %v12849_v43 }
 0x4e3   :  { %8434 = vmatpush.bf16.msrb.mxu2 %v12741_v28 }
 0x4e5   :  { %v7204_v8 = vpop.f32.mrf.mxu0 }
 0x4e6   :  { %v7205_v26 = vadd.f32 %v7204_v8, %v7192_v36  ;;  %8397 = vmatpush.bf16.msra.mxu3 %v12833_v13  ;;  %v14212_v36 = vld [vmem:[#allocation26 + $0x36c] sm:$0xf0]  ;;  %v14129_v8 = vld [vmem:[#allocation26 + $0xd4] sm:$0xf0]  ;;  %v12866_v13 = vld [vmem:[#allocation26 + $0x270] sm:$0xf0] }
 0x4e7   :  { %8435 = vmatpush.bf16.msrb.mxu2 %v12725_v48  ;;  %v12976_v48 = vld [vmem:[#allocation26 + $0x340] sm:$0xf] }
 0x4e8   :  { %v15595_v51 = vadd.f32 %v7205_v26, %v15559_v34  ;;  %v12709_v34 = vor.u32 %v14138_v60, %v12706_v30  ;;  %v12993_v26 = vor.u32 %v14212_v36, %v12992_v11  ;;  %v12977_v41 = vor.u32 %v14208_v38, %v12976_v48  ;;  %v14161_v48 = vld [vmem:[#allocation26 + $0x1d4] sm:$0xf0] }
 0x4e9   :  { %v12821_v11 = vor.u32 %v14166_v16, %v12818_v47  ;;  %v12728_v47 = vld [vmem:[#allocation26 + $0x148] sm:$0xf] }
 0x4ea   :  { %8398 = vmatpush.bf16.msra.mxu3 %v12817_v53  ;;  %8408 = vmatpush.bf16.msrb.mxu0 %v12993_v26  ;;  %v14174_v53 = vld [vmem:[#allocation26 + $0x244] sm:$0xf]  ;;  %v14109_v26 = vld [vmem:[#allocation26 + $0x34] sm:$0xf0] }
 0x4eb   :  { %8436 = vmatpush.bf16.msrb.mxu2 %v12709_v34  ;;  %v12960_v34 = vld [vmem:[#allocation26 + $0x320] sm:$0xf] }
 0x4ec   :  { %v12961_v62 = vor.u32 %v14204_v39, %v12960_v34  ;;  %v12776_v39 = vld [vmem:[#allocation26 + $0x1a8] sm:$0xf] }
 0x4ed   :  { %v7206_v6 = vpop.f32.mrf.mxu0 }
 0x4ee   :  { %v15597_v63 = vpop.f32.mrf.mxu3  ;;  %v7282_v59 = vpop.f32.mrf.mxu2  ;;  %8443 = vmatpush.bf16.msrb.mxu3 %v12933_v27  ;;  %8409 = vmatpush.bf16.msrb.mxu0 %v12977_v41  ;;  %v12649_v6 = vor.u32 %v14125_v29, %v12648_v18  ;;  %v14117_v27 = vld [vmem:[#allocation26 + $0x74] sm:$0xf0]  ;;  %v12568_v29 = vld [vmem:[#allocation26 + $0x8] sm:$0xf] }
 0x4ef   :  { %v15599_v52 = vadd.f32 %v7282_v59, %v7269_v9  ;;  %v12693_v9 = vor.u32 %v14134_v46, %v12690_v4  ;;  %v7244_v60 = vadd.f32 %v15597_v63, %v15590_v55  ;;  %v12869_v59 = vor.u32 %v14178_v19, %v12866_v13  ;;  %v12850_v46 = vld [vmem:[#allocation26 + $0x250] sm:$0xf0]  ;;  %v12616_v63 = vld [vmem:[#allocation26 + $0x68] sm:$0xf]  ;;  %v14105_v19 = vld [vmem:[#allocation26 + $0x14] sm:$0xf0] }
 0x4f0   :  { %v12633_v55 = vor.u32 %v14121_v61, %v12632_v32  ;;  %v14214_v13 = vld [vmem:[#allocation26 + $0x384] sm:$0xf]  ;;  %v12569_v32 = vor.u32 %v14105_v19, %v12568_v29  ;;  %v12696_v29 = vld [vmem:[#allocation26 + $0x108] sm:$0xf]  ;;  %v14137_v19 = vld [vmem:[#allocation26 + $0x114] sm:$0xf0] }
 0x4f1   :  { %8437 = vmatpush.bf16.msrb.mxu2 %v12693_v9  ;;  %v12853_v9 = vor.u32 %v14174_v53, %v12850_v46  ;;  %v12994_v53 = vld [vmem:[#allocation26 + $0x370] sm:$0xf0] }
 0x4f2   :  { %8444 = vmatpush.bf16.msrb.mxu3 %v12917_v31  ;;  %8410 = vmatpush.bf16.msrb.mxu0 %v12961_v62  ;;  %v12617_v31 = vor.u32 %v14117_v27, %v12616_v63  ;;  %v14210_v62 = vld [vmem:[#allocation26 + $0x364] sm:$0xf] }
 0x4f3   :  { %v12997_v63 = vor.u32 %v14210_v62, %v12994_v53  ;;  %v12920_v53 = vld [vmem:[#allocation26 + $0x2c8] sm:$0xf] }
 0x4f6   :  { %v7245_v14 = vpop.f32.mrf.mxu3  ;;  %v7284_v17 = vpop.f32.mrf.mxu2  ;;  %8445 = vmatpush.bf16.msrb.mxu3 %v12901_v45  ;;  %8411 = vmatpush.bf16.msrb.mxu0 %v12945_v12  ;;  %v12808_v45 = vld [vmem:[#allocation26 + $0x1e8] sm:$0xf]  ;;  %v14206_v12 = vld [vmem:[#allocation26 + $0x344] sm:$0xf] }
 0x4f7   :  { %v14170_v14 = vld [vmem:[#allocation26 + $0x224] sm:$0xf] }
 0x4f9   :  { %v7518_v2 = vpop.f32.mrf.mxu1 }
 0x4fa   :  { %v7561_v20 = vadd.f32 %v7518_v2, %v15586_v54  ;;  %v12664_v54 = vld [vmem:[#allocation26 + $0xc8] sm:$0xf]  ;;  %8446 = vmatpush.bf16.msrb.mxu3 %v12885_v56  ;;  %v12834_v2 = vld [vmem:[#allocation26 + $0x230] sm:$0xf0] }
 0x4fb   :  { %v12665_v42 = vor.u32 %v14129_v8, %v12664_v54  ;;  %v12584_v54 = vld [vmem:[#allocation26 + $0x28] sm:$0xf] }
 0x4fc   :  { %v7575_v5 = vadd.f32 %v7567_v44, %v7561_v20  ;;  %v13058_v44 = vld [vmem:[#allocation26 + $0x3f0] sm:$0xf0]  ;;  %v12585_v18 = vor.u32 %v14109_v26, %v12584_v54  ;;  %v12618_v54 = vld [vmem:[#allocation26 + $0x78] sm:$0xf0]  ;;  %v7569_v26 = vperm.slane %v15604_v25, 2 }
 0x4fd   :  { %v13061_v40 = vor.u32 %v14226_v21, %v13058_v44  ;;  %v12978_v21 = vld [vmem:[#allocation26 + $0x350] sm:$0xf0]  ;;  %v12761_v44 = vor.u32 %v14153_v35, %v12760_v3 }
 0x4fe   :  { %v7579_v49 = vmax.f32 %v7575_v5, 0.0  ;;  %8447 = vmatpush.bf16.msrb.mxu3 %v12869_v59  ;;  %v14113_v5 = vld [vmem:[#allocation26 + $0x54] sm:$0xf0] }
 0x4ff   :  { %8456 = vmatpush.bf16.msra.mxu0 %v13061_v40  ;;  %v12601_v36 = vor.u32 %v14113_v5, %v12600_v7  ;;  %v14123_v40 = vld [vmem:[#allocation26 + $0xac] sm:$0xf]  ;;  %v14202_v7 = vld [vmem:[#allocation26 + $0x324] sm:$0xf] }
 0x500   :  { %v15608_v28 = vpack.c.bf16 %v7579_v49, %v7579_v49 }
 0x501   :  { %v7520_v43 = vpop.f32.mrf.mxu1 }
 0x502   :  { %8373 = vmatmul.bf16.vlgmr.msra.gmra.mxu1 %v15608_v28  ;;  %8448 = vmatpush.bf16.msrb.mxu3 %v12853_v9  ;;  %v14127_v9 = vld [vmem:[#allocation26 + $0xcc] sm:$0xf] }
 0x503   :  { %8469 = vmatpush.bf16.msra.mxu1 %v12681_v1  ;;  %v14165_v1 = vld [vmem:[#allocation26 + $0x1f4] sm:$0xf0]  ;;  %8457 = vmatpush.bf16.msra.mxu0 %v13045_v23  ;;  %v12634_v23 = vld [vmem:[#allocation26 + $0x98] sm:$0xf0] }
 0x504   :  { %v12809_v10 = vor.u32 %v14165_v1, %v12808_v45  ;;  %v12946_v1 = vld [vmem:[#allocation26 + $0x310] sm:$0xf0] }
 0x505   :  { %v7256_v30 = vpop.f32.mrf.mxu0 }
 0x506   :  { %v7257_v58 = vadd.f32 %v7256_v30, %v7244_v60  ;;  %v13010_v60 = vld [vmem:[#allocation26 + $0x390] sm:$0xf0]  ;;  %v14131_v30 = vld [vmem:[#allocation26 + $0xec] sm:$0xf] }
 0x507   :  { %8470 = vmatpush.bf16.msra.mxu1 %v12665_v42  ;;  %v12792_v42 = vld [vmem:[#allocation26 + $0x1c8] sm:$0xf]  ;;  %v13013_v34 = vor.u32 %v14214_v13, %v13010_v60  ;;  %v14197_v60 = vld [vmem:[#allocation26 + $0x2f4] sm:$0xf0] }
 0x508   :  { %v15614_v4 = vadd.f32 %v7257_v58, %v15572_v22  ;;  %v12837_v22 = vor.u32 %v14170_v14, %v12834_v2  ;;  %v12793_v59 = vor.u32 %v14161_v48, %v12792_v42  ;;  %v14157_v58 = vld [vmem:[#allocation26 + $0x1b4] sm:$0xf0]  ;;  %v12650_v14 = vld [vmem:[#allocation26 + $0xb8] sm:$0xf0]  ;;  %v12981_v2 = vor.u32 %v14206_v12, %v12978_v21  ;;  %v12936_v13 = vld [vmem:[#allocation26 + $0x2e8] sm:$0xf] }
 0x509   :  { %v12777_v46 = vor.u32 %v14157_v58, %v12776_v39  ;;  %v12937_v39 = vor.u32 %v14197_v60, %v12936_v13  ;;  %v14107_v58 = vld [vmem:[#allocation26 + $0x2c] sm:$0xf]  ;;  %v12570_v12 = vld [vmem:[#allocation26 + $0x18] sm:$0xf0] }
 0x50a   :  { %8449 = vmatpush.bf16.msrb.mxu3 %v12837_v22  ;;  %v14149_v22 = vld [vmem:[#allocation26 + $0x174] sm:$0xf0] }
 0x50b   :  { %8471 = vmatpush.bf16.msra.mxu1 %v12649_v6  ;;  %v12682_v6 = vld [vmem:[#allocation26 + $0xf8] sm:$0xf0] }
 0x50c   :  { %v15616_v15 = vpop.f32.mrf.mxu3  ;;  %v12685_v61 = vor.u32 %v14131_v30, %v12682_v6  ;;  %v12810_v30 = vld [vmem:[#allocation26 + $0x1f8] sm:$0xf0] }
 0x50d   :  { %v7531_v20 = vpop.f32.mrf.mxu2  ;;  %v7258_v17 = vpop.f32.mrf.mxu0 }
 0x50e   :  { %v7562_v57 = vadd.f32 %v7531_v20, %v15595_v51  ;;  %v14218_v51 = vld [vmem:[#allocation26 + $0x3a4] sm:$0xf]  ;;  %8450 = vmatpush.bf16.msrb.mxu3 %v12821_v11  ;;  %v7296_v20 = vadd.f32 %v15616_v15, %v15599_v52  ;;  %v12637_v52 = vor.u32 %v14119_v0, %v12634_v23  ;;  %v12872_v0 = vld [vmem:[#allocation26 + $0x268] sm:$0xf]  ;;  %v14181_v23 = vld [vmem:[#allocation26 + $0x274] sm:$0xf0] }
 0x50f   :  { %8472 = vmatpush.bf16.msra.mxu1 %v12633_v55  ;;  %v13029_v38 = vor.u32 %v14218_v51, %v13026_v50  ;;  %v12666_v55 = vld [vmem:[#allocation26 + $0xd8] sm:$0xf0]  ;;  %v14198_v15 = vld [vmem:[#allocation26 + $0x304] sm:$0xf]  ;;  %v12712_v51 = vld [vmem:[#allocation26 + $0x128] sm:$0xf] }
 0x510   :  { %v7576_v49 = vadd.f32 %v7568_v24, %v7562_v57  ;;  %v12669_v27 = vor.u32 %v14127_v9, %v12666_v55  ;;  %v12744_v24 = vld [vmem:[#allocation26 + $0x168] sm:$0xf]  ;;  %v12962_v57 = vld [vmem:[#allocation26 + $0x330] sm:$0xf0]  ;;  %v14159_v9 = vld [vmem:[#allocation26 + $0x1cc] sm:$0xf] }
 0x511   :  { %8458 = vmatpush.bf16.msra.mxu0 %v13029_v38  ;;  %v12745_v37 = vor.u32 %v14149_v22, %v12744_v24  ;;  %v12965_v16 = vor.u32 %v14202_v7, %v12962_v57  ;;  %v14111_v38 = vld [vmem:[#allocation26 + $0x4c] sm:$0xf]  ;;  %v12794_v55 = vld [vmem:[#allocation26 + $0x1d8] sm:$0xf0] }
 0x512   :  { %8425 = vmatmul.bf16.vlgmr.msrb.gmra.mxu1 %v15608_v28  ;;  %v7580_v8 = vmax.f32 %v7576_v49, 0.0  ;;  %v14145_v49 = vld [vmem:[#allocation26 + $0x154] sm:$0xf0]  ;;  %v12797_v21 = vor.u32 %v14159_v9, %v12794_v55  ;;  %v14151_v7 = vld [vmem:[#allocation26 + $0x18c] sm:$0xf] }
 0x513   :  { %8473 = vmatpush.bf16.msra.mxu1 %v12617_v31  ;;  %v12653_v31 = vor.u32 %v14123_v40, %v12650_v14  ;;  %v12729_v11 = vor.u32 %v14145_v49, %v12728_v47  ;;  %v14189_v40 = vld [vmem:[#allocation26 + $0x2b4] sm:$0xf0]  ;;  %v14155_v14 = vld [vmem:[#allocation26 + $0x1ac] sm:$0xf]  ;;  %v12762_v57 = vld [vmem:[#allocation26 + $0x198] sm:$0xf0] }
 0x514   :  { %v15621_v43 = vpack.c.bf16 %v7580_v8, %v7580_v8  ;;  %v7297_v56 = vpop.f32.mrf.mxu3  ;;  %v12949_v8 = vor.u32 %v14198_v15, %v12946_v1  ;;  %v12746_v47 = vld [vmem:[#allocation26 + $0x178] sm:$0xf0]  ;;  %v7570_v49 = vperm.slane %v15604_v25, 3  ;;  %v12873_v15 = vor.u32 %v14181_v23, %v12872_v0  ;;  %v12968_v23 = vld [vmem:[#allocation26 + $0x328] sm:$0xf] }
 0x515   :  { %v7533_v41 = vpop.f32.mrf.mxu2  ;;  %8459 = vmatpush.bf16.msra.mxu0 %v13013_v34  ;;  %v12874_v0 = vld [vmem:[#allocation26 + $0x278] sm:$0xf0] }
 0x516   :  { %8386 = vmatmul.bf16.vlgmr.msra.gmra.mxu2 %v15621_v43 }
 0x517   :  { %8474 = vmatpush.bf16.msra.mxu1 %v12601_v36  ;;  %8482 = vmatpush.bf16.msra.mxu2 %v12809_v10  ;;  %v14115_v36 = vld [vmem:[#allocation26 + $0x6c] sm:$0xf]  ;;  %v14141_v10 = vld [vmem:[#allocation26 + $0x134] sm:$0xf0] }
 0x518   :  { %v12621_v42 = vor.u32 %v14115_v36, %v12618_v54  ;;  %v12713_v48 = vor.u32 %v14141_v10, %v12712_v51  ;;  %v12856_v36 = vld [vmem:[#allocation26 + $0x248] sm:$0xf]  ;;  %v14177_v54 = vld [vmem:[#allocation26 + $0x254] sm:$0xf0] }
 0x519   :  { %8460 = vmatpush.bf16.msra.mxu0 %v12997_v63  ;;  %v13064_v10 = vld [vmem:[#allocation26 + $0x3e8] sm:$0xf] }
 0x51b   :  { %8475 = vmatpush.bf16.msra.mxu1 %v12585_v18  ;;  %8483 = vmatpush.bf16.msra.mxu2 %v12793_v59  ;;  %v12602_v18 = vld [vmem:[#allocation26 + $0x58] sm:$0xf0]  ;;  %v14163_v59 = vld [vmem:[#allocation26 + $0x1ec] sm:$0xf] }
 0x51c   :  { %v12605_v34 = vor.u32 %v14111_v38, %v12602_v18  ;;  %v12813_v62 = vor.u32 %v14163_v59, %v12810_v30  ;;  %v14139_v38 = vld [vmem:[#allocation26 + $0x12c] sm:$0xf]  ;;  %v12824_v59 = vld [vmem:[#allocation26 + $0x208] sm:$0xf]  ;;  %v14169_v30 = vld [vmem:[#allocation26 + $0x214] sm:$0xf0] }
 0x51d   :  { %8461 = vmatpush.bf16.msra.mxu0 %v12981_v2  ;;  %v12778_v2 = vld [vmem:[#allocation26 + $0x1b8] sm:$0xf0] }
 0x51f   :  { %8476 = vmatpush.bf16.msra.mxu1 %v12569_v32  ;;  %8484 = vmatpush.bf16.msra.mxu2 %v12777_v46  ;;  %v12586_v32 = vld [vmem:[#allocation26 + $0x38] sm:$0xf0]  ;;  %v14193_v46 = vld [vmem:[#allocation26 + $0x2d4] sm:$0xf0] }
 0x520   :  { %v12589_v3 = vor.u32 %v14107_v58, %v12586_v32  ;;  %v12921_v35 = vor.u32 %v14193_v46, %v12920_v53  ;;  %v12938_v58 = vld [vmem:[#allocation26 + $0x2f8] sm:$0xf0]  ;;  %v13032_v32 = vld [vmem:[#allocation26 + $0x3a8] sm:$0xf]  ;;  %v12825_v53 = vor.u32 %v14169_v30, %v12824_v59 }
 0x521   :  { %8462 = vmatpush.bf16.msra.mxu0 %v12965_v16  ;;  %v14147_v16 = vld [vmem:[#allocation26 + $0x16c] sm:$0xf]  ;;  %v13002_v59 = vld [vmem:[#allocation26 + $0x378] sm:$0xf0] }
 0x522   :  { %8477 = vmatmul.bf16.vlgmr.msra.gmra.mxu1 %v15608_v28 }
 0x523   :  { %8521 = vmatpush.bf16.msrb.mxu1 %v12685_v61  ;;  %8485 = vmatpush.bf16.msra.mxu2 %v12761_v44  ;;  %v12904_v44 = vld [vmem:[#allocation26 + $0x2a8] sm:$0xf] }
 0x524   :  { %v12905_v22 = vor.u32 %v14189_v40, %v12904_v44  ;;  %v14187_v44 = vld [vmem:[#allocation26 + $0x2ac] sm:$0xf]  ;;  %v12906_v40 = vld [vmem:[#allocation26 + $0x2b8] sm:$0xf0] }
 0x525   :  { %v7308_v17 = vpop.f32.mrf.mxu0  ;;  %8463 = vmatpush.bf16.msra.mxu0 %v12949_v8  ;;  %v14143_v8 = vld [vmem:[#allocation26 + $0x14c] sm:$0xf] }
 0x526   :  { %v7309_v5 = vadd.f32 %v7308_v17, %v7296_v20  ;;  %8438 = vmatmul.bf16.vlgmr.msrb.gmra.mxu2 %v15621_v43  ;;  %v12781_v20 = vor.u32 %v14155_v14, %v12778_v2  ;;  %v12888_v17 = vld [vmem:[#allocation26 + $0x288] sm:$0xf]  ;;  %v14213_v2 = vld [vmem:[#allocation26 + $0x374] sm:$0xf0] }
 0x527   :  { %8522 = vmatpush.bf16.msrb.mxu1 %v12669_v27  ;;  %8486 = vmatpush.bf16.msra.mxu2 %v12745_v37  ;;  %v14103_v27 = vld [vmem:[#allocation26 + $0xc] sm:$0xf]  ;;  %v12765_v37 = vor.u32 %v14151_v7, %v12762_v57  ;;  %v13000_v14 = vld [vmem:[#allocation26 + $0x368] sm:$0xf]  ;;  %v14209_v7 = vld [vmem:[#allocation26 + $0x354] sm:$0xf0] }
 0x528   :  { %v15628_v45 = vadd.f32 %v7309_v5, %v15579_v33  ;;  %v12573_v24 = vor.u32 %v14103_v27, %v12570_v12  ;;  %v14217_v27 = vld [vmem:[#allocation26 + $0x394] sm:$0xf0] }
 0x52b   :  { %8523 = vmatpush.bf16.msrb.mxu1 %v12653_v31  ;;  %8487 = vmatpush.bf16.msra.mxu2 %v12729_v11  ;;  %v14185_v31 = vld [vmem:[#allocation26 + $0x294] sm:$0xf0]  ;;  %v12749_v11 = vor.u32 %v14147_v16, %v12746_v47 }
 0x52c   :  { %v7544_v50 = vpop.f32.mrf.mxu3  ;;  %v12889_v5 = vor.u32 %v14185_v31, %v12888_v17  ;;  %v12890_v17 = vld [vmem:[#allocation26 + $0x298] sm:$0xf0]  ;;  %v12984_v31 = vld [vmem:[#allocation26 + $0x348] sm:$0xf]  ;;  %v14205_v16 = vld [vmem:[#allocation26 + $0x334] sm:$0xf0] }
 0x52d   :  { %v7563_v33 = vadd.f32 %v7544_v50, %v15614_v4  ;;  %v7310_v56 = vpop.f32.mrf.mxu0  ;;  %v12697_v4 = vor.u32 %v14137_v19, %v12696_v29  ;;  %v12857_v50 = vor.u32 %v14177_v54, %v12856_v36  ;;  %v13048_v29 = vld [vmem:[#allocation26 + $0x3c8] sm:$0xf]  ;;  %v12969_v47 = vor.u32 %v14205_v16, %v12968_v23  ;;  %v13066_v36 = vld [vmem:[#allocation26 + $0x3f8] sm:$0xf0]  ;;  %v14252_v23 = vld [vmem:[#allocation29 + $0xb0] sm:$0xff] }
 0x52e   :  { %v12840_v56 = vld [vmem:[#allocation26 + $0x228] sm:$0xf] }
 0x52f   :  { %8524 = vmatpush.bf16.msrb.mxu1 %v12637_v52  ;;  %v7577_v41 = vadd.f32 %v7569_v26, %v7563_v33  ;;  %8488 = vmatpush.bf16.msra.mxu2 %v12713_v48  ;;  %v12730_v26 = vld [vmem:[#allocation26 + $0x158] sm:$0xf0] }
 0x530   :  { %v12733_v25 = vor.u32 %v14143_v8, %v12730_v26  ;;  %v14171_v26 = vld [vmem:[#allocation26 + $0x22c] sm:$0xf] }
 0x531   :  { %v7581_v6 = vmax.f32 %v7577_v41, 0.0  ;;  %v14225_v41 = vld [vmem:[#allocation26 + $0x3d4] sm:$0xf0] }
 0x533   :  { %8525 = vmatpush.bf16.msrb.mxu1 %v12621_v42  ;;  %v15633_v61 = vpack.c.bf16 %v7581_v6, %v7581_v6  ;;  %8489 = vmatpush.bf16.msra.mxu2 %v12697_v4  ;;  %v14173_v42 = vld [vmem:[#allocation26 + $0x234] sm:$0xf0]  ;;  %v14135_v6 = vld [vmem:[#allocation26 + $0x10c] sm:$0xf]  ;;  %v12698_v4 = vld [vmem:[#allocation26 + $0x118] sm:$0xf0] }
 0x534   :  { %v7546_v63 = vpop.f32.mrf.mxu3  ;;  %v12841_v13 = vor.u32 %v14173_v42, %v12840_v56  ;;  %v12701_v46 = vor.u32 %v14135_v6, %v12698_v4  ;;  %v12826_v56 = vld [vmem:[#allocation26 + $0x218] sm:$0xf0]  ;;  %v14207_v6 = vld [vmem:[#allocation26 + $0x34c] sm:$0xf] }
 0x535   :  { %8399 = vmatmul.bf16.vlgmr.msra.gmra.mxu3 %v15633_v61  ;;  %v14191_v63 = vld [vmem:[#allocation26 + $0x2cc] sm:$0xf] }
 0x536   :  { %8495 = vmatpush.bf16.msra.mxu3 %v12937_v39  ;;  %8490 = vmatmul.bf16.vlgmr.msra.gmra.mxu2 %v15621_v43  ;;  %v14195_v39 = vld [vmem:[#allocation26 + $0x2ec] sm:$0xf] }
 0x537   :  { %8526 = vmatpush.bf16.msrb.mxu1 %v12605_v34  ;;  %8534 = vmatpush.bf16.msrb.mxu2 %v12813_v62  ;;  %v13049_v34 = vor.u32 %v14225_v41, %v13048_v29  ;;  %v14221_v62 = vld [vmem:[#allocation26 + $0x3b4] sm:$0xf0]  ;;  %v12941_v9 = vor.u32 %v14195_v39, %v12938_v58  ;;  %v14215_v41 = vld [vmem:[#allocation26 + $0x38c] sm:$0xf]  ;;  %v12970_v58 = vld [vmem:[#allocation26 + $0x338] sm:$0xf0] }
 0x538   :  { %v13033_v55 = vor.u32 %v14221_v62, %v13032_v32  ;;  %v14203_v39 = vld [vmem:[#allocation26 + $0x32c] sm:$0xf] }
 0x539   :  { %v12973_v32 = vor.u32 %v14203_v39, %v12970_v58  ;;  %v14199_v62 = vld [vmem:[#allocation26 + $0x30c] sm:$0xf]  ;;  %v14258_v39 = vld [vmem:[#allocation29 + $0xe0] sm:$0xff] }
 0x53a   :  { %8496 = vmatpush.bf16.msra.mxu3 %v12921_v35  ;;  %v13016_v35 = vld [vmem:[#allocation26 + $0x388] sm:$0xf] }
 0x53b   :  { %8527 = vmatpush.bf16.msrb.mxu1 %v12589_v3  ;;  %8535 = vmatpush.bf16.msrb.mxu2 %v12797_v21  ;;  %v12922_v3 = vld [vmem:[#allocation26 + $0x2d8] sm:$0xf0]  ;;  %v13017_v21 = vor.u32 %v14217_v27, %v13016_v35  ;;  %v14235_v27 = vld [vmem:[#allocation29 + $0x28] sm:$0xff] }
 0x53c   :  { %v12925_v12 = vor.u32 %v14191_v63, %v12922_v3  ;;  %v14236_v3 = vld [vmem:[#allocation29 + $0x30] sm:$0xff] }
 0x53e   :  { %8497 = vmatpush.bf16.msra.mxu3 %v12905_v22  ;;  %v13001_v22 = vor.u32 %v14213_v2, %v13000_v14  ;;  %v14245_v14 = vld [vmem:[#allocation29 + $0x78] sm:$0xff] }
 0x53f   :  { %8528 = vmatpush.bf16.msrb.mxu1 %v12573_v24  ;;  %8536 = vmatpush.bf16.msrb.mxu2 %v12781_v20  ;;  %v12909_v24 = vor.u32 %v14187_v44, %v12906_v40  ;;  %v14183_v20 = vld [vmem:[#allocation26 + $0x28c] sm:$0xf]  ;;  %v14233_v40 = vld [vmem:[#allocation29 + $0x18] sm:$0xff] }
 0x540   :  { %v12893_v57 = vor.u32 %v14183_v20, %v12890_v17  ;;  %v14231_v20 = vld [vmem:[#allocation29 + $0x8] sm:$0xff] }
 0x541   :  { %v14243_v17 = vld [vmem:[#allocation29 + $0x68] sm:$0xff] }
 0x542   :  { %8529 = vmatmul.bf16.vlgmr.msrb.gmra.mxu1 %v15608_v28  ;;  %8498 = vmatpush.bf16.msra.mxu3 %v12889_v5  ;;  %v14229_v28 = vld [vmem:[#allocation26 + $0x3f4] sm:$0xf0]  ;;  %v12985_v5 = vor.u32 %v14209_v7, %v12984_v31  ;;  %v14230_v7 = vld [vmem:[#allocation29] sm:$0xff] }
 0x543   :  { %8537 = vmatpush.bf16.msrb.mxu2 %v12765_v37  ;;  %v13065_v48 = vor.u32 %v14229_v28, %v13064_v10  ;;  %v14179_v37 = vld [vmem:[#allocation26 + $0x26c] sm:$0xf] }
 0x544   :  { %v14223_v28 = vld [vmem:[#allocation26 + $0x3cc] sm:$0xf] }
 0x545   :  { %v7557_v52 = vpop.f32.mrf.mxu0  ;;  %8451 = vmatmul.bf16.vlgmr.msrb.gmra.mxu3 %v15633_v61 }
 0x546   :  { %v7564_v1 = vadd.f32 %v7557_v52, %v15628_v45  ;;  %8499 = vmatpush.bf16.msra.mxu3 %v12873_v15  ;;  %v12714_v45 = vld [vmem:[#allocation26 + $0x138] sm:$0xf0]  ;;  %v12952_v15 = vld [vmem:[#allocation26 + $0x308] sm:$0xf] }
 0x547   :  { %8538 = vmatpush.bf16.msrb.mxu2 %v12749_v11  ;;  %v12717_v60 = vor.u32 %v14139_v38, %v12714_v45  ;;  %v12858_v52 = vld [vmem:[#allocation26 + $0x258] sm:$0xf0]  ;;  %v14227_v11 = vld [vmem:[#allocation26 + $0x3ec] sm:$0xf] }
 0x548   :  { %v7578_v51 = vadd.f32 %v7570_v49, %v7564_v1  ;;  %v14175_v49 = vld [vmem:[#allocation26 + $0x24c] sm:$0xf]  ;;  %v14201_v1 = vld [vmem:[#allocation26 + $0x314] sm:$0xf0]  ;;  %v13069_v10 = vor.u32 %v14227_v11, %v13066_v36  ;;  %v13034_v38 = vld [vmem:[#allocation26 + $0x3b8] sm:$0xf0] }
 0x549   :  { %v12861_v54 = vor.u32 %v14175_v49, %v12858_v52  ;;  %v12953_v8 = vor.u32 %v14201_v1, %v12952_v15  ;;  %v14251_v49 = vld [vmem:[#allocation29 + $0xa8] sm:$0xff]  ;;  %v15656_v52 = vld [vmem:[#allocation28] sm:$0xf]  ;;  %v14238_v1 = vld [vmem:[#allocation29 + $0x40] sm:$0xff] }
 0x54a   :  { %v7582_v33 = vmax.f32 %v7578_v51, 0.0  ;;  %8500 = vmatpush.bf16.msra.mxu3 %v12857_v50  ;;  %v12842_v51 = vld [vmem:[#allocation26 + $0x238] sm:$0xf0]  ;;  %v14250_v11 = vld [vmem:[#allocation29 + $0xa0] sm:$0xff] }
 0x54b   :  { %8539 = vmatpush.bf16.msrb.mxu2 %v12733_v25  ;;  %v13050_v50 = vld [vmem:[#allocation26 + $0x3d8] sm:$0xf0]  ;;  %v14167_v25 = vld [vmem:[#allocation26 + $0x20c] sm:$0xf] }
 0x54c   :  { %v15641_v18 = vpack.c.bf16 %v7582_v33, %v7582_v33  ;;  %v12845_v33 = vor.u32 %v14171_v26, %v12842_v51  ;;  %v13053_v42 = vor.u32 %v14223_v28, %v13050_v50  ;;  %v12829_v45 = vor.u32 %v14167_v25, %v12826_v56  ;;  %v14249_v26 = vld [vmem:[#allocation29 + $0x98] sm:$0xff]  ;;  %v14248_v51 = vld [vmem:[#allocation29 + $0x90] sm:$0xff] }
 0x54d   :  { %v7559_v19 = vpop.f32.mrf.mxu0 }
 0x54e   :  { %8412 = vmatmul.bf16.vlgmr.msrb.gmra.mxu0 %v15641_v18  ;;  %8501 = vmatpush.bf16.msra.mxu3 %v12841_v13  ;;  %v13018_v19 = vld [vmem:[#allocation26 + $0x398] sm:$0xf0] }
 0x54f   :  { %8508 = vmatpush.bf16.msrb.mxu0 %v13065_v48  ;;  %8540 = vmatpush.bf16.msrb.mxu2 %v12717_v60  ;;  %v14219_v48 = vld [vmem:[#allocation26 + $0x3ac] sm:$0xf]  ;;  %v13021_v13 = vor.u32 %v14215_v41, %v13018_v19  ;;  %v14261_v41 = vld [vmem:[#allocation29 + $0xf8] sm:$0xff] }
 0x550   :  { %v13037_v29 = vor.u32 %v14219_v48, %v13034_v38  ;;  %v14211_v60 = vld [vmem:[#allocation26 + $0x36c] sm:$0xf] }
 0x551   :  { %v13005_v30 = vor.u32 %v14211_v60, %v13002_v59  ;;  %v14247_v48 = vld [vmem:[#allocation29 + $0x88] sm:$0xff] }
 0x552   :  { %8502 = vmatpush.bf16.msra.mxu3 %v12825_v53  ;;  %v12954_v53 = vld [vmem:[#allocation26 + $0x318] sm:$0xf0] }
 0x553   :  { %8509 = vmatpush.bf16.msrb.mxu0 %v13049_v34  ;;  %8541 = vmatpush.bf16.msrb.mxu2 %v12701_v46  ;;  %v12986_v34 = vld [vmem:[#allocation26 + $0x358] sm:$0xf0] }
 0x554   :  { %v12989_v4 = vor.u32 %v14207_v6, %v12986_v34  ;;  %v14259_v34 = vld [vmem:[#allocation29 + $0xe8] sm:$0xff] }
 0x555   :  { %8503 = vmatmul.bf16.vlgmr.msra.gmra.mxu3 %v15633_v61 }
 0x556   :  { %8547 = vmatpush.bf16.msrb.mxu3 %v12941_v9  ;;  %8542 = vmatmul.bf16.vlgmr.msrb.gmra.mxu2 %v15621_v43  ;;  %v12877_v43 = vor.u32 %v14179_v37, %v12874_v0  ;;  %v12957_v9 = vor.u32 %v14199_v62, %v12954_v53  ;;  %v14253_v37 = vld [vmem:[#allocation29 + $0xb8] sm:$0xff]  ;;  %v14240_v0 = vld [vmem:[#allocation29 + $0x50] sm:$0xff] }
 0x557   :  { %8510 = vmatpush.bf16.msrb.mxu0 %v13033_v55  ;;  %v14237_v55 = vld [vmem:[#allocation29 + $0x38] sm:$0xff]  ;;  %8854 = vmatpush.bf16.msra.mxu2 %v14245_v14 }
 0x558   :  { %8841 = vmatpush.bf16.msra.mxu1 %v14237_v55 }
 0x55a   :  { %8548 = vmatpush.bf16.msrb.mxu3 %v12925_v12 }
 0x55b   :  { %8511 = vmatpush.bf16.msrb.mxu0 %v13017_v21  ;;  %v14234_v21 = vld [vmem:[#allocation29 + $0x20] sm:$0xff] }
 0x55c   :  { %8842 = vmatpush.bf16.msra.mxu1 %v14236_v3  ;;  %v14256_v3 = vld [vmem:[#allocation29 + $0xd0] sm:$0xff] }
 0x55e   :  { %8549 = vmatpush.bf16.msrb.mxu3 %v12909_v24  ;;  %8464 = vmatmul.bf16.vlgmr.msra.gmra.mxu0 %v15641_v18  ;;  %v14244_v24 = vld [vmem:[#allocation29 + $0x70] sm:$0xff] }
 0x55f   :  { %8512 = vmatpush.bf16.msrb.mxu0 %v13001_v22  ;;  %8855 = vmatpush.bf16.msra.mxu2 %v14244_v24  ;;  %v14254_v24 = vld [vmem:[#allocation29 + $0xc0] sm:$0xff] }
 0x560   :  { %8843 = vmatpush.bf16.msra.mxu1 %v14235_v27 }
 0x562   :  { %8550 = vmatpush.bf16.msrb.mxu3 %v12893_v57  ;;  %v14242_v57 = vld [vmem:[#allocation29 + $0x60] sm:$0xff] }
 0x563   :  { %8513 = vmatpush.bf16.msrb.mxu0 %v12985_v5  ;;  %8856 = vmatpush.bf16.msra.mxu2 %v14243_v17  ;;  %v14241_v5 = vld [vmem:[#allocation29 + $0x58] sm:$0xff] }
 0x564   :  { %8844 = vmatpush.bf16.msra.mxu1 %v14234_v21 }
 0x566   :  { %8551 = vmatpush.bf16.msrb.mxu3 %v12877_v43 }
 0x567   :  { %8514 = vmatpush.bf16.msrb.mxu0 %v12969_v47  ;;  %8857 = vmatpush.bf16.msra.mxu2 %v14242_v57  ;;  %v14239_v47 = vld [vmem:[#allocation29 + $0x48] sm:$0xff]  ;;  %v7720_v57 = vperm.slane %v15656_v52, 3 }
 0x568   :  { %8845 = vmatpush.bf16.msra.mxu1 %v14233_v40  ;;  %v14255_v40 = vld [vmem:[#allocation29 + $0xc8] sm:$0xff] }
 0x56a   :  { %8552 = vmatpush.bf16.msrb.mxu3 %v12861_v54  ;;  %v7717_v54 = vperm.slane %v15656_v52, 0 }
 0x56b   :  { %8515 = vmatpush.bf16.msrb.mxu0 %v12953_v8  ;;  %8858 = vmatpush.bf16.msra.mxu2 %v14241_v5 }
 0x56e   :  { %8553 = vmatpush.bf16.msrb.mxu3 %v12845_v33  ;;  %8516 = vmatmul.bf16.vlgmr.msrb.gmra.mxu0 %v15641_v18 }
 0x56f   :  { %8560 = vmatpush.bf16.msra.mxu0 %v13069_v10  ;;  %8859 = vmatpush.bf16.msra.mxu2 %v14240_v0 }
 0x572   :  { %8554 = vmatpush.bf16.msrb.mxu3 %v12829_v45 }
 0x573   :  { %8561 = vmatpush.bf16.msra.mxu0 %v13053_v42  ;;  %8860 = vmatpush.bf16.msra.mxu2 %v14239_v47 }
 0x575   :  { %8555 = vmatmul.bf16.vlgmr.msrb.gmra.mxu3 %v15633_v61 }
 0x576   :  { %8867 = vmatpush.bf16.msra.mxu3 %v14253_v37 }
 0x577   :  { %8562 = vmatpush.bf16.msra.mxu0 %v13037_v29  ;;  %8861 = vmatpush.bf16.msra.mxu2 %v14238_v1  ;;  %v14246_v29 = vld [vmem:[#allocation29 + $0x80] sm:$0xff] }
 0x57a   :  { %8868 = vmatpush.bf16.msra.mxu3 %v14252_v23 }
 0x57b   :  { %8563 = vmatpush.bf16.msra.mxu0 %v13021_v13  ;;  %v7718_v13 = vperm.slane %v15656_v52, 1 }
 0x57e   :  { %8869 = vmatpush.bf16.msra.mxu3 %v14251_v49 }
 0x57f   :  { %8564 = vmatpush.bf16.msra.mxu0 %v13005_v30  ;;  %v15649_v46 = vpop.f32.mrf.mxu1  ;;  %v14260_v30 = vld [vmem:[#allocation29 + $0xf0] sm:$0xff] }
 0x580   :  { %v8375_v10 = vadd.f32 %v15649_v46, %v7717_v54 }
 0x582   :  { %8870 = vmatpush.bf16.msra.mxu3 %v14250_v11 }
 0x583   :  { %8565 = vmatpush.bf16.msra.mxu0 %v12989_v4 }
 0x586   :  { %8871 = vmatpush.bf16.msra.mxu3 %v14249_v26 }
 0x587   :  { %8566 = vmatpush.bf16.msra.mxu0 %v12973_v32  ;;  %v8376_v61 = vpop.f32.mrf.mxu1 }
 0x588   :  { %v14257_v61 = vld [vmem:[#allocation29 + $0xd8] sm:$0xff] }
 0x58a   :  { %8872 = vmatpush.bf16.msra.mxu3 %v14248_v51 }
 0x58b   :  { %8567 = vmatpush.bf16.msra.mxu0 %v12957_v9 }
 0x58e   :  { %8568 = vmatmul.bf16.vlgmr.msra.gmra.mxu0 %v15641_v18  ;;  %v14232_v18 = vld [vmem:[#allocation29 + $0x10] sm:$0xff]  ;;  %8873 = vmatpush.bf16.msra.mxu3 %v14247_v48 }
 0x58f   :  { %v15652_v63 = vpop.f32.mrf.mxu1  ;;  %8846 = vmatpush.bf16.msra.mxu1 %v14232_v18  ;;  %8880 = vmatpush.bf16.msrb.mxu0 %v14261_v41 }
 0x590   :  { %v8427_v6 = vadd.f32 %v15652_v63, %v7718_v13 }
 0x592   :  { %8874 = vmatpush.bf16.msra.mxu3 %v14246_v29 }
 0x593   :  { %8847 = vmatpush.bf16.msra.mxu1 %v14231_v20  ;;  %8881 = vmatpush.bf16.msrb.mxu0 %v14260_v30 }
 0x597   :  { %v8428_v35 = vpop.f32.mrf.mxu1  ;;  %8848 = vmatpush.bf16.msra.mxu1 %v14230_v7  ;;  %8882 = vmatpush.bf16.msrb.mxu0 %v14259_v34 }
 0x598   :  { %v7719_v35 = vperm.slane %v15656_v52, 2  ;;  %v14289_v52 = vld [vmem:[%s15698_s24] ss:$0 sm:$0xff]  ;;  %s14798_s24 = smov [#allocation31]  }
 0x599   :  { %v8387_v12 = vpop.f32.mrf.mxu2  ;;  %s8921_s13 = sshll.u32 %s14798_s24, 4  ;;  %s8922_s13 = int_to_ptr.vmem [resolvable:$true] %s8921_s13 }
 0x59a   :  { %v8388_v50 = vadd.f32 %v8387_v12, %v8375_v10 }
 0x59b   :  { %8883 = vmatpush.bf16.msrb.mxu0 %v14258_v39 }
 0x59f   :  { %v15654_v44 = vpop.f32.mrf.mxu1  ;;  %8884 = vmatpush.bf16.msrb.mxu0 %v14257_v61 }
 0x5a0   :  { %v8479_v21 = vadd.f32 %v15654_v44, %v7719_v35 }
 0x5a1   :  { %v8389_v2 = vpop.f32.mrf.mxu2 }
 0x5a3   :  { %8885 = vmatpush.bf16.msrb.mxu0 %v14256_v3 }
 0x5a7   :  { %v8480_v22 = vpop.f32.mrf.mxu1  ;;  %8886 = vmatpush.bf16.msrb.mxu0 %v14255_v40 }
 0x5a9   :  { %v8439_v31 = vpop.f32.mrf.mxu2 }
 0x5aa   :  { %v8440_v4 = vadd.f32 %v8439_v31, %v8427_v6 }
 0x5ab   :  { %8887 = vmatpush.bf16.msrb.mxu0 %v14254_v24 }
 0x5b1   :  { %v8441_v16 = vpop.f32.mrf.mxu2 }
 0x5b8   :  { %v8400_v43 = vpop.f32.mrf.mxu3 }
 0x5b9   :  { %v8491_v15 = vpop.f32.mrf.mxu2  ;;  %v8401_v25 = vadd.f32 %v8400_v43, %v8388_v50 }
 0x5ba   :  { %v8492_v14 = vadd.f32 %v8491_v15, %v8479_v21 }
 0x5bf   :  { %v15658_v36 = vpop.f32.mrf.mxu1 }
 0x5c0   :  { %v8402_v8 = vpop.f32.mrf.mxu3  ;;  %v8531_v37 = vadd.f32 %v15658_v36, %v7720_v57 }
 0x5c1   :  { %v8493_v28 = vpop.f32.mrf.mxu2 }
 0x5c7   :  { %v8532_v33 = vpop.f32.mrf.mxu1 }
 0x5c8   :  { %v8452_v56 = vpop.f32.mrf.mxu3 }
 0x5c9   :  { %v8453_v58 = vadd.f32 %v8452_v56, %v8440_v4 }
 0x5cb   :  { %v8413_v42 = vpop.f32.mrf.mxu0 }
 0x5cc   :  { %v8414_v38 = vadd.f32 %v8413_v42, %v8401_v25 }
 0x5ce   :  { %v8573_v45 = vmax.f32 %v8414_v38, 0.0 }
 0x5d0   :  { %v8577_v19 = vpack.c.bf16 %v8573_v45, %v8573_v45  ;;  %v8454_v60 = vpop.f32.mrf.mxu3 }
 0x5d2   :  { %8849 = vmatmul.bf16.vlgmr.msra.gmra.mxu1 %v8577_v19 }
 0x5d3   :  { %v8415_v59 = vpop.f32.mrf.mxu0 }
 0x5d8   :  { %v8504_v32 = vpop.f32.mrf.mxu3 }
 0x5d9   :  { %v8543_v53 = vpop.f32.mrf.mxu2  ;;  %v8505_v2 = vadd.f32 %v8504_v32, %v8492_v14 }
 0x5da   :  { %v8544_v0 = vadd.f32 %v8543_v53, %v8531_v37 }
 0x5db   :  { %v8465_v62 = vpop.f32.mrf.mxu0 }
 0x5dc   :  { %v8466_v46 = vadd.f32 %v8465_v62, %v8453_v58 }
 0x5de   :  { %v8574_v9 = vmax.f32 %v8466_v46, 0.0 }
 0x5e0   :  { %v8578_v55 = vpack.c.bf16 %v8574_v9, %v8574_v9  ;;  %v8506_v27 = vpop.f32.mrf.mxu3 }
 0x5e1   :  { %v8545_v12 = vpop.f32.mrf.mxu2 }
 0x5e2   :  { %8862 = vmatmul.bf16.vlgmr.msra.gmra.mxu2 %v8578_v55 }
 0x5e3   :  { %v8467_v63 = vpop.f32.mrf.mxu0 }
 0x5eb   :  { %v8517_v18 = vpop.f32.mrf.mxu0 }
 0x5ec   :  { %v8518_v22 = vadd.f32 %v8517_v18, %v8505_v2 }
 0x5ee   :  { %v8575_v20 = vmax.f32 %v8518_v22, 0.0 }
 0x5f0   :  { %v8579_v17 = vpack.c.bf16 %v8575_v20, %v8575_v20 }
 0x5f2   :  { %8875 = vmatmul.bf16.vlgmr.msra.gmra.mxu3 %v8579_v17 }
 0x5f3   :  { %v8519_v31 = vpop.f32.mrf.mxu0 }
 0x5f8   :  { %v8556_v7 = vpop.f32.mrf.mxu3 }
 0x5f9   :  { %v8557_v44 = vadd.f32 %v8556_v7, %v8544_v0 }
 0x600   :  { %v8558_v5 = vpop.f32.mrf.mxu3 }
 0x60b   :  { %v8569_v23 = vpop.f32.mrf.mxu0 }
 0x60c   :  { %v8570_v16 = vadd.f32 %v8569_v23, %v8557_v44 }
 0x60e   :  { %v8576_v43 = vmax.f32 %v8570_v16, 0.0 }
 0x610   :  { %v8580_v47 = vpack.c.bf16 %v8576_v43, %v8576_v43 }
 0x612   :  { %8888 = vmatmul.bf16.vlgmr.msrb.gmra.mxu0 %v8580_v47 }
 0x613   :  { %v8571_v49 = vpop.f32.mrf.mxu0 }
 0x64f   :  { %v8850_v15 = vpop.f32.mrf.mxu1 }
 0x650   :  { %v8851_v51 = vadd.f32 %v14289_v52, %v8850_v15 }
 0x657   :  { %v8852_v1 = vpop.f32.mrf.mxu1 }
 0x665   :  { %v8863_v11 = vpop.f32.mrf.mxu2 }
 0x666   :  { %v8864_v36 = vadd.f32 %v8863_v11, %v8851_v51 }
 0x66d   :  { %v8865_v54 = vpop.f32.mrf.mxu2 }
 0x675   :  { %v8876_v8 = vpop.f32.mrf.mxu3 }
 0x676   :  { %v8877_v10 = vadd.f32 %v8876_v8, %v8864_v36 }
 0x67d   :  { %v8878_v26 = vpop.f32.mrf.mxu3 }
 0x68f   :  { %v8889_v28 = vpop.f32.mrf.mxu0 }
 0x690   :  { %v8890_v50 = vadd.f32 %v8889_v28, %v8877_v10 }
 0x692   :  { %8893 = vmax.xlane.f32.xlu0 %v8890_v50 }
 0x697   :  { %v8891_v33 = vpop.f32.mrf.mxu0 }
 0x705   :  { %v8894_v25 = vpop.xlane.xlu0 %8893 }
 0x706   :  { %v8895_v56 = vsub.f32 %v8890_v50, %v8894_v25 }
 0x708   :  { %v8896_v42 = vmul.f32 1.442695, %v8895_v56 }
 0x70a   :  { %14290 = vpow2.f32 %v8896_v42 }
 0x710   :  { %v14291_v48 = vpop.eup %14290 }
 0x711   :  { %8898 = vadd.xlane.f32.xlu0 %v14291_v48 }
 0x784   :  { %v8899_v38 = vpop.xlane.xlu0 %8898 }
 0x785   :  { %14292 = vrcp.f32 %v8899_v38  ;;  %v8911_v19 = vand.u32 2147483648, %v8899_v38  ;;  %v8909_v60 = vand.u32 2147483647, %v8899_v38  ;;  %vm8905_vm1 = vweird.f32 %v8899_v38 }
 0x787   :  { %v8912_v30 = vor.u32 1.1754944e-38, %v8911_v19  ;;  %vm8910_vm3 = vcmp.eq.f32.partialorder %v8909_v60, 8.507059e+37 }
 0x78b   :  { %v14293_v45 = vpop.eup %14292 }
 0x78c   :  { %v8901_v29 = vmul.f32 %v14293_v45, %v8899_v38  ;;  %vm8906_vm0 = vweird.f32 %v14293_v45 }
 0x78d   :  { %vm8907_vm2 = vmor %vm8905_vm1, %vm8906_vm0 }
 0x78e   :  { %v8902_v41 = vsub.f32 1.0, %v8901_v29 }
 0x790   :  { %v8903_v13 = vmul.f32 %v14293_v45, %v8902_v41 }
 0x792   :  { %v8904_v59 = vadd.f32 %v14293_v45, %v8903_v13 }
 0x794   :  { %v8908_v6 = vsel %vm8907_vm2, %v14293_v45, %v8904_v59 }
 0x795   :  { %v8913_v34 = vsel %vm8910_vm3, %v8912_v30, %v8908_v6 }
 0x796   :  { %v8914_v4 = vmul.f32 %v14291_v48, %v8913_v34 }
 0x798   :  { %8915 = vst [vmem:[#allocation31] sm:$0xff] %v8914_v4 }
 0x799   :  { %8926 = dma.vmem_to_hbm [thread:$0]  %s8922_s13, 128, %s8924_s27, [#allocation4]  }
 0x79a   :  { %14770 = dma.done.wait [#allocation4], 128  }
 0x79b   :  { %14771 = vsyncadd [#allocation4], 4294967168 }
 0x79c   :  { %8931 = vsyncpa [#allocation3], 1 }
 0x79d   :  { %8932 = vsyncpa [#allocation6], 1 }
 0x79e   :  { %8933 = vsyncpa [#allocation9], 1 }
 0x79f   :  { %8934 = vsyncpa [#allocation12], 1 }
 0x7a0   :  { %8935 = vsyncpa [#allocation15], 1 }
 0x7a1   :  { %8936 = vsyncpa [#allocation18], 1 }
 0x7a2   :  { %8937 = vsyncpa [#allocation21], 1 }
 0x7a3   :  { %8938 = vsyncpa [#allocation24], 1 }
 0x7a4   :  { %8939 = vsyncpa [#allocation27], 1 }
 0x7a5   :  { %8940 = vsyncpa [#allocation30], 1 }
 0x7a6   :  { %8941 = vsyncpa [#allocation4], 1 }

</bundles_post_ra>
